<compile_context>
chip_gen: v6e
topology: v6e:2x2x1
jax: 0.10.0
libtpu: 0.0.40
codegen_flags: <defaults>
</compile_context>

<pallas_src>
import functools

import jax
import jax.numpy as jnp
import numpy as np
from jax.experimental import pallas as pl
from jax.experimental.pallas import tpu as pltpu


def _round_up(x, m):
    return ((x + m - 1) // m) * m


# --------------------------------------------------------------------------
# Fused matmul + bias + activation Pallas kernel (full-K, single step,
# batched over a leading "phase" axis)
# --------------------------------------------------------------------------
def _mm_kernel(a_ref, w_ref, b_ref, o_ref, *, act):
    y = jnp.dot(a_ref[...], w_ref[...], preferred_element_type=jnp.float32)
    y = y + b_ref[...]                       # (1, tn) broadcasts over rows, f32
    if act == "leaky_relu":
        y = jnp.where(y > 0, y, 0.2 * y)
    elif act == "relu":
        y = jnp.maximum(y, 0.0)
    elif act == "sigmoid":
        y = 1.0 / (1.0 + jnp.exp(-y))
    o_ref[...] = y.astype(o_ref.dtype)


def matmul_bias_act(a, w, bias, act="none"):
    """act(a @ w + bias), batched over a leading phase axis.

    a:    (P, M, K)   float (cast to bf16 here), K <= Kp
    w:    (P, Kp, Np) bf16  (pre-reshaped / pre-padded outside jit)
    bias: (P, 1,  Np) f32   (pre-padded)
    returns (P, M, Np) f32
    """
    P, M, K = a.shape
    Pw, Kp, Np_ = w.shape
    assert Pw == P and K <= Kp
    Mp = _round_up(max(M, 8), 8)             # real M rounded to sublane, not 128
    a_p = jnp.pad(a, ((0, 0), (0, Mp - M), (0, Kp - K))).astype(jnp.bfloat16)

    # largest lane tile (<=512) dividing Np; Np is always a multiple of 128
    tn = 512 if Np_ % 512 == 0 else (256 if Np_ % 256 == 0 else 128)
    grid = (P, Np_ // tn)

    out = pl.pallas_call(
        functools.partial(_mm_kernel, act=act),
        out_shape=jax.ShapeDtypeStruct((P, Mp, Np_), jnp.float32),
        grid=grid,
        in_specs=[
            pl.BlockSpec((None, Mp, Kp), lambda p, j: (p, 0, 0)),
            pl.BlockSpec((None, Kp, tn), lambda p, j: (p, 0, j)),
            pl.BlockSpec((None, 1, tn), lambda p, j: (p, 0, j)),
        ],
        out_specs=pl.BlockSpec((None, Mp, tn), lambda p, j: (p, 0, j)),
        compiler_params=pltpu.CompilerParams(
            dimension_semantics=("parallel", "parallel")),
    )(a_p, w, bias)
    return out[:, :M, :]


# --------------------------------------------------------------------------
# Fused [logvar | mean] projection + reparameterization sample kernel
#   ml = hf @ [W_logvar | W_mean] + b ;  z = eps * exp(0.5*logvar) + mean
# --------------------------------------------------------------------------
def _latent_kernel(a_ref, w_ref, b_ref, eps_ref, ml_ref, z_ref, *, hp):
    ml = jnp.dot(a_ref[...], w_ref[...], preferred_element_type=jnp.float32)
    ml = ml + b_ref[...]
    ml_ref[...] = ml
    log_var = ml[:, :hp]
    mean = ml[:, hp:]
    z_ref[...] = eps_ref[...] * jnp.exp(0.5 * log_var) + mean


def latent_sample(hf, w_ml, b_ml, eps):
    B, K = hf.shape
    hidden = eps.shape[1]
    Hp = w_ml.shape[1] // 2
    Mp = _round_up(max(B, 8), 8)
    a_p = jnp.pad(hf, ((0, Mp - B), (0, 0))).astype(jnp.bfloat16)
    e_p = jnp.pad(eps.astype(jnp.float32), ((0, Mp - B), (0, Hp - hidden)))

    ml, z = pl.pallas_call(
        functools.partial(_latent_kernel, hp=Hp),
        out_shape=(jax.ShapeDtypeStruct((Mp, 2 * Hp), jnp.float32),
                   jax.ShapeDtypeStruct((Mp, Hp), jnp.float32)),
        in_specs=[
            pl.BlockSpec((Mp, K), lambda: (0, 0)),
            pl.BlockSpec((K, 2 * Hp), lambda: (0, 0)),
            pl.BlockSpec((1, 2 * Hp), lambda: (0, 0)),
            pl.BlockSpec((Mp, Hp), lambda: (0, 0)),
        ],
        out_specs=(pl.BlockSpec((Mp, 2 * Hp), lambda: (0, 0)),
                   pl.BlockSpec((Mp, Hp), lambda: (0, 0))),
    )(a_p, w_ml, b_ml, e_p)
    log_var = ml[:B, :hidden]
    mean = ml[:B, Hp:Hp + hidden]
    return log_var, mean, z[:B, :hidden]


# --------------------------------------------------------------------------
# JAX glue (NHWC): im2col conv and sub-pixel conv-transpose
# --------------------------------------------------------------------------
def conv2d_nhwc(x, w_p, b_p, kh, kw, stride, pad, cout, act):
    """NHWC conv via im2col + fused Pallas matmul.  x: (B,H,W,C)."""
    B, H, W, C = x.shape
    if pad:
        x = jnp.pad(x, ((0, 0), (pad, pad), (pad, pad), (0, 0)))
    OH = (H + 2 * pad - kh) // stride + 1
    OW = (W + 2 * pad - kw) // stride + 1
    taps = []
    for i in range(kh):
        for j in range(kw):
            taps.append(x[:, i:i + stride * OH:stride, j:j + stride * OW:stride, :])
    col = jnp.stack(taps, axis=3).reshape(B * OH * OW, kh * kw * C)
    # TODO(synk): im2col could be moved inside the Pallas kernel (shifted VMEM
    # reads) to avoid materializing the duplicated col matrix in HBM.
    out = matmul_bias_act(col[None], w_p, b_p, act)                 # (1, M, Np)
    return out[0, :, :cout].reshape(B, OH, OW, cout)                # NHWC, no transpose


def _subpixel_geometry(K, stride, pad):
    """Phase decomposition of a stride-`stride` ConvTranspose2d."""
    pp = K - 1 - pad
    k0s, offs, counts = [], [], []
    for rh in range(stride):
        k0h = (pp - rh) % stride
        offh = (rh + k0h - pp) // stride
        for rw in range(stride):
            k0w = (pp - rw) % stride
            offw = (rw + k0w - pp) // stride
            k0s.append((k0h, k0w))
            offs.append((offh, offw))
            counts.append((len(range(k0h, K, stride)), len(range(k0w, K, stride))))
    assert all(c == counts[0] for c in counts) and counts[0][0] == counts[0][1]
    return counts[0][0], k0s, offs


def conv_transpose2d_nhwc(x, w_all, b_all, K, stride, pad, cout, act):
    """NHWC ConvTranspose2d via sub-pixel decomposition (no zero-insertion).

    All stride^2 output phases are stride-1 convs on the ORIGINAL small input,
    batched into ONE pallas_call (phase = leading grid axis), then
    pixel-shuffled together.
    """
    B, H, W, C = x.shape
    s = stride
    OH = (H - 1) * s - 2 * pad + K
    OW = (W - 1) * s - 2 * pad + K
    assert OH % s == 0 and OW % s == 0
    Qh, Qw = OH // s, OW // s
    T, _, offs = _subpixel_geometry(K, s, pad)

    off_h = [o[0] for o in offs]
    off_w = [o[1] for o in offs]
    padl_h = max(0, -min(off_h))
    padl_w = max(0, -min(off_w))
    padr_h = max(0, max(off_h) + T - 1 + Qh - 1 - (H - 1))
    padr_w = max(0, max(off_w) + T - 1 + Qw - 1 - (W - 1))
    xp = jnp.pad(x, ((0, 0), (padl_h, padr_h), (padl_w, padr_w), (0, 0)))

    cols = []
    for (oh, ow) in offs:
        taps = []
        for jh in range(T):
            for jw in range(T):
                sh = padl_h + oh + jh
                sw = padl_w + ow + jw
                taps.append(xp[:, sh:sh + Qh, sw:sw + Qw, :])
        cols.append(jnp.stack(taps, axis=3).reshape(B * Qh * Qw, T * T * C))
    col_all = jnp.stack(cols, axis=0)                               # (s*s, M, Kt)

    out = matmul_bias_act(col_all, w_all, b_all, act)               # (s*s, M, Np)
    out = out[:, :, :cout].reshape(s, s, B, Qh, Qw, cout)
    out = out.transpose(2, 3, 0, 4, 1, 5).reshape(B, OH, OW, cout)  # pixel shuffle
    return out


# --------------------------------------------------------------------------
# One-time (outside jit) weight reshaping / padding / bf16 cast
# --------------------------------------------------------------------------
def _pad_wb(wmat, bias):
    K, N = wmat.shape
    Kp, Np_ = _round_up(K, 128), _round_up(N, 128)
    w_p = jnp.pad(wmat, ((0, Kp - K), (0, Np_ - N))).astype(jnp.bfloat16)[None]
    b_p = jnp.pad(bias.astype(jnp.float32), (0, Np_ - N)).reshape(1, 1, Np_)
    return w_p, b_p


def _prep_conv(w, b):
    # PyTorch Conv2d weight (Cout,Cin,kh,kw) -> (kh*kw*Cin, Cout) for NHWC im2col
    Cout, Cin, kh, kw = w.shape
    wmat = jnp.transpose(w, (2, 3, 1, 0)).reshape(kh * kw * Cin, Cout)
    return _pad_wb(wmat, b)


def _prep_convT_subpixel(w, b, stride, pad):
    # PyTorch ConvTranspose2d weight (Cin,Cout,K,K) -> per-phase sub-kernels
    Cin, Cout, K, _ = w.shape
    T, k0s, _ = _subpixel_geometry(K, stride, pad)
    wf = jnp.flip(w, axis=(2, 3))                       # spatially flipped
    Kt = T * T * Cin
    Kp, Np_ = _round_up(Kt, 128), _round_up(Cout, 128)
    mats = []
    for (k0h, k0w) in k0s:
        sub = wf[:, :, k0h::stride, k0w::stride]        # (Cin, Cout, T, T)
        m = jnp.transpose(sub, (2, 3, 0, 1)).reshape(Kt, Cout)
        mats.append(jnp.pad(m, ((0, Kp - Kt), (0, Np_ - Cout))))
    w_all = jnp.stack(mats, 0).astype(jnp.bfloat16)     # (s*s, Kp, Np)
    b_p = jnp.pad(b.astype(jnp.float32), (0, Np_ - Cout)).reshape(1, 1, Np_)
    b_all = jnp.tile(b_p, (stride * stride, 1, 1))
    return w_all, b_all


def prepare_params(params, hidden):
    prep = {}
    for name in ("e1", "e2", "e3", "e4"):
        prep[name + "_w"], prep[name + "_b"] = _prep_conv(
            params[name + "_w"], params[name + "_b"])

    # fused [logvar | mean] projection; rows permuted from PyTorch NCHW-flatten
    # order (C,H,W) to our NHWC-flatten order (H,W,C).
    Hp = _round_up(hidden, 128)
    perm = jnp.arange(1024).reshape(256, 2, 2).transpose(1, 2, 0).reshape(-1)
    w_lv = params["logvar_w"].T[perm]
    w_mn = params["mean_w"].T[perm]
    w_ml = jnp.concatenate(
        [jnp.pad(w_lv, ((0, 0), (0, Hp - hidden))),
         jnp.pad(w_mn, ((0, 0), (0, Hp - hidden)))], axis=1)
    b_ml = jnp.concatenate(
        [jnp.pad(params["logvar_b"], (0, Hp - hidden)),
         jnp.pad(params["mean_b"], (0, Hp - hidden))])
    prep["ml_w"] = w_ml.astype(jnp.bfloat16)            # (1024, 2*Hp)
    prep["ml_b"] = b_ml.astype(jnp.float32).reshape(1, 2 * Hp)

    prep["fc_w"], prep["fc_b"] = _pad_wb(params["fc_w"].T, params["fc_b"])

    # first decoder deconv has 1x1 spatial input -> pure matmul producing NHWC
    d1mat = jnp.transpose(params["d1_w"], (0, 2, 3, 1)).reshape(1024, 4 * 4 * 128)
    prep["d1_w"], prep["d1_b"] = _pad_wb(d1mat, jnp.tile(params["d1_b"], 16))

    prep["d2_w"], prep["d2_b"] = _prep_convT_subpixel(params["d2_w"], params["d2_b"], 2, 1)
    prep["d3_w"], prep["d3_b"] = _prep_convT_subpixel(params["d3_w"], params["d3_b"], 2, 2)
    prep["d4_w"], prep["d4_b"] = _prep_convT_subpixel(params["d4_w"], params["d4_b"], 2, 2)
    return prep


# --------------------------------------------------------------------------
# Forward pass (Pallas path)
# --------------------------------------------------------------------------
def cvae_forward(prep, x_nchw, eps):
    x = jnp.transpose(x_nchw, (0, 2, 3, 1))                          # NCHW -> NHWC once
    h = conv2d_nhwc(x, prep["e1_w"], prep["e1_b"], 3, 3, 2, 1, 32, "leaky_relu")
    h = conv2d_nhwc(h, prep["e2_w"], prep["e2_b"], 3, 3, 2, 1, 64, "leaky_relu")
    h = conv2d_nhwc(h, prep["e3_w"], prep["e3_b"], 3, 3, 2, 1, 128, "leaky_relu")
    h = conv2d_nhwc(h, prep["e4_w"], prep["e4_b"], 3, 3, 1, 0, 256, "leaky_relu")
    B = h.shape[0]
    hf = h.reshape(B, -1)                                            # (B,1024), HWC order

    log_var, mean, z = latent_sample(hf, prep["ml_w"], prep["ml_b"], eps)

    xf = matmul_bias_act(z[None], prep["fc_w"], prep["fc_b"], "none")[0]   # (B,1024)
    d = matmul_bias_act(xf[None], prep["d1_w"], prep["d1_b"], "relu")[0]   # (B,2048)
    d = d.reshape(B, 4, 4, 128)                                      # NHWC 4x4
    # TODO(synk): fc/d1..d4 could be fused into one resident-weight pallas_call.
    d = conv_transpose2d_nhwc(d, prep["d2_w"], prep["d2_b"], 4, 2, 1, 64, "relu")
    d = conv_transpose2d_nhwc(d, prep["d3_w"], prep["d3_b"], 6, 2, 2, 32, "relu")
    d = conv_transpose2d_nhwc(d, prep["d4_w"], prep["d4_b"], 6, 2, 2, 3, "sigmoid")
    recon = jnp.transpose(d, (0, 3, 1, 2))                           # NHWC -> NCHW once
    return recon, mean, log_var


# --------------------------------------------------------------------------
# Pure-JAX reference (lax convs) with the same bf16-input / f32-accumulate
# matmul policy, so the Pallas path can be validated with tight-ish tolerance.
# --------------------------------------------------------------------------
def reference_forward(params, x, eps):
    bf = lambda v: v.astype(jnp.bfloat16)

    def conv(v, w, b, stride, pad):
        y = jax.lax.conv_general_dilated(
            bf(v), bf(w), window_strides=(stride, stride),
            padding=[(pad, pad), (pad, pad)],
            dimension_numbers=("NCHW", "OIHW", "NCHW"),
            preferred_element_type=jnp.float32)
        return y + b.reshape(1, -1, 1, 1)

    def convT(v, w, b, stride, pad):
        K = w.shape[2]
        wk = jnp.flip(w, (2, 3)).transpose(1, 0, 2, 3)
        y = jax.lax.conv_general_dilated(
            bf(v), bf(wk), window_strides=(1, 1),
            padding=[(K - 1 - pad, K - 1 - pad)] * 2,
            lhs_dilation=(stride, stride),
            dimension_numbers=("NCHW", "OIHW", "NCHW"),
            preferred_element_type=jnp.float32)
        return y + b.reshape(1, -1, 1, 1)

    def linear(v, w, b):
        return jnp.dot(bf(v), bf(w.T), preferred_element_type=jnp.float32) + b

    lrelu = lambda v: jnp.where(v > 0, v, 0.2 * v)
    h = lrelu(conv(x, params["e1_w"], params["e1_b"], 2, 1))
    h = lrelu(conv(h, params["e2_w"], params["e2_b"], 2, 1))
    h = lrelu(conv(h, params["e3_w"], params["e3_b"], 2, 1))
    h = lrelu(conv(h, params["e4_w"], params["e4_b"], 1, 0))
    hf = h.reshape(h.shape[0], -1)
    log_var = linear(hf, params["logvar_w"], params["logvar_b"])
    mean = linear(hf, params["mean_w"], params["mean_b"])
    z = eps * jnp.exp(0.5 * log_var) + mean
    xf = linear(z, params["fc_w"], params["fc_b"])
    d = xf.reshape(-1, 1024, 1, 1)
    d = jnp.maximum(convT(d, params["d1_w"], params["d1_b"], 2, 0), 0.0)
    d = jnp.maximum(convT(d, params["d2_w"], params["d2_b"], 2, 1), 0.0)
    d = jnp.maximum(convT(d, params["d3_w"], params["d3_b"], 2, 2), 0.0)
    pre = convT(d, params["d4_w"], params["d4_b"], 2, 2)
    return 1.0 / (1.0 + jnp.exp(-pre)), mean, log_var


# --------------------------------------------------------------------------
# Deterministic synthetic parameters (PyTorch-style 1/sqrt(fan_in) scaling,
# with transposed-conv fan adjusted so activations stay O(1))
# --------------------------------------------------------------------------
def init_params(hidden, key):
    ks = jax.random.split(key, 22)
    w = lambda k, shape, fan: (fan ** -0.5) * jax.random.normal(k, shape, jnp.float32)
    b = lambda k, n, fan: (fan ** -0.5) * jax.random.normal(k, (n,), jnp.float32)
    return {
        "e1_w": w(ks[0], (32, 3, 3, 3), 27),        "e1_b": b(ks[1], 32, 27),
        "e2_w": w(ks[2], (64, 32, 3, 3), 288),      "e2_b": b(ks[3], 64, 288),
        "e3_w": w(ks[4], (128, 64, 3, 3), 576),     "e3_b": b(ks[5], 128, 576),
        "e4_w": w(ks[6], (256, 128, 3, 3), 1152),   "e4_b": b(ks[7], 256, 1152),
        "mean_w": w(ks[8], (hidden, 1024), 1024),   "mean_b": b(ks[9], hidden, 1024),
        "logvar_w": w(ks[10], (hidden, 1024), 1024), "logvar_b": b(ks[11], hidden, 1024),
        "fc_w": w(ks[12], (1024, hidden), hidden),  "fc_b": b(ks[13], 1024, hidden),
        "d1_w": w(ks[14], (1024, 128, 4, 4), 1024), "d1_b": b(ks[15], 128, 1024),
        "d2_w": w(ks[16], (128, 64, 4, 4), 512),    "d2_b": b(ks[17], 64, 512),
        "d3_w": w(ks[18], (64, 32, 6, 6), 576),     "d3_b": b(ks[19], 32, 576),
        "d4_w": w(ks[20], (32, 3, 6, 6), 288),      "d4_b": b(ks[21], 3, 288),
    }


if __name__ == "__main__":
    hidden = 32
    batch = 2
    key = jax.random.PRNGKey(0)
    k_params, k_x, k_eps = jax.random.split(key, 3)

    params = init_params(hidden, k_params)
    x = jax.random.normal(k_x, (batch, 3, 32, 32), jnp.float32)      # NCHW like PyTorch
    eps = jax.random.normal(k_eps, (batch, hidden), jnp.float32)     # external randn_like

    prep = prepare_params(params, hidden)                            # one-time, outside jit
    fwd = jax.jit(cvae_forward)
    recon, mean, log_var = fwd(prep, x, eps)
    jax.block_until_ready((recon, mean, log_var))

    # Validate against a pure-JAX reference of the PyTorch module.
    recon_ref, mean_ref, lv_ref = jax.jit(reference_forward)(params, x, eps)
    jax.block_until_ready((recon_ref, mean_ref, lv_ref))

    assert recon.shape == (batch, 3, 32, 32)
    assert mean.shape == (batch, hidden) and log_var.shape == (batch, hidden)
    assert bool(jnp.all(jnp.isfinite(recon)))
    assert bool(jnp.all((recon >= 0.0) & (recon <= 1.0)))
    np.testing.assert_allclose(np.asarray(mean), np.asarray(mean_ref), rtol=5e-2, atol=2e-2)
    np.testing.assert_allclose(np.asarray(log_var), np.asarray(lv_ref), rtol=5e-2, atol=2e-2)
    np.testing.assert_allclose(np.asarray(recon), np.asarray(recon_ref), rtol=5e-2, atol=2e-2)

    print("KERNEL_OK")
</pallas_src>

<mosaic_0001>
module attributes {stable_mosaic.version = 11 : i64} {
  func.func @_mm_kernel(%arg0: i32, %arg1: i32, %arg2: memref<1x512x128xbf16, #tpu.memory_space<vmem>>, %arg3: memref<1x128x128xbf16, #tpu.memory_space<vmem>>, %arg4: memref<1x1x128xf32, #tpu.memory_space<vmem>>, %arg5: memref<1x512x128xf32, #tpu.memory_space<vmem>>) attributes {dimension_semantics = [#tpu.dimension_semantics<parallel>, #tpu.dimension_semantics<parallel>], iteration_bounds = array<i64: 1, 1>, scalar_prefetch = 0 : i64, scratch_operands = 0 : i64, tpu.core_type = #tpu.core_type<tc>, window_params = [{transform_indices = @transform_0, window_bounds = array<i64: 1, 512, 128>}, {transform_indices = @transform_1, window_bounds = array<i64: 1, 128, 128>}, {transform_indices = @transform_2, window_bounds = array<i64: 1, 1, 128>}, {transform_indices = @transform_3, window_bounds = array<i64: 1, 512, 128>}]} {
    %c0 = arith.constant 0 : index
    %c0_0 = arith.constant 0 : index
    %c0_1 = arith.constant 0 : index
    %0 = vector.load %arg2[%c0, %c0_0, %c0_1] : memref<1x512x128xbf16, #tpu.memory_space<vmem>>, vector<1x512x128xbf16>
    %1 = vector.shape_cast %0 : vector<1x512x128xbf16> to vector<512x128xbf16>
    %c0_2 = arith.constant 0 : index
    %c0_3 = arith.constant 0 : index
    %c0_4 = arith.constant 0 : index
    %2 = vector.load %arg3[%c0_2, %c0_3, %c0_4] : memref<1x128x128xbf16, #tpu.memory_space<vmem>>, vector<1x128x128xbf16>
    %3 = vector.shape_cast %2 : vector<1x128x128xbf16> to vector<128x128xbf16>
    %cst = arith.constant dense<0.000000e+00> : vector<512x128xf32>
    %4 = tpu.matmul %1, %3, %cst {dimension_numbers = #tpu.dot_dimension_numbers<[1], [0], [0], [1], [0, 0, 1, 1], [], []>} : vector<512x128xbf16>, vector<128x128xbf16>, vector<512x128xf32> -> vector<512x128xf32>
    %c0_5 = arith.constant 0 : index
    %c0_6 = arith.constant 0 : index
    %c0_7 = arith.constant 0 : index
    %5 = vector.load %arg4[%c0_5, %c0_6, %c0_7] : memref<1x1x128xf32, #tpu.memory_space<vmem>>, vector<1x1x128xf32>
    %6 = vector.shape_cast %5 : vector<1x1x128xf32> to vector<1x128xf32>
    %7 = vector.broadcast %6 : vector<1x128xf32> to vector<512x128xf32>
    %8 = arith.addf %4, %7 : vector<512x128xf32>
    %cst_8 = arith.constant 0.000000e+00 : f32
    %9 = vector.broadcast %cst_8 : f32 to vector<512x128xf32>
    %10 = arith.cmpf ogt, %8, %9 : vector<512x128xf32>
    %cst_9 = arith.constant 2.000000e-01 : f32
    %11 = vector.broadcast %cst_9 : f32 to vector<512x128xf32>
    %12 = arith.mulf %11, %8 : vector<512x128xf32>
    %13 = arith.select %10, %8, %12 : vector<512x128xi1>, vector<512x128xf32>
    %c0_10 = arith.constant 0 : index
    %c0_11 = arith.constant 0 : index
    %c0_12 = arith.constant 0 : index
    %14 = vector.load %arg5[%c0_10, %c0_11, %c0_12] : memref<1x512x128xf32, #tpu.memory_space<vmem>>, vector<1x512x128xf32>
    %15 = vector.shape_cast %14 : vector<1x512x128xf32> to vector<512x128xf32>
    %16 = vector.shape_cast %13 : vector<512x128xf32> to vector<1x512x128xf32>
    tpu.vector_store %arg5[%c0_10, %c0_11, %c0_12], %16 {strides = array<i32>} : memref<1x512x128xf32, #tpu.memory_space<vmem>>, vector<1x512x128xf32>,
    return
  }
  func.func @transform_0(%arg0: i32, %arg1: i32) -> (i32, i32, i32) {
    %c0_i32 = arith.constant 0 : i32
    %c0_i32_0 = arith.constant 0 : i32
    %c0_i32_1 = arith.constant 0 : i32
    return %arg0, %c0_i32, %c0_i32_0 : i32, i32, i32
  }
  func.func @transform_1(%arg0: i32, %arg1: i32) -> (i32, i32, i32) {
    %c0_i32 = arith.constant 0 : i32
    %c0_i32_0 = arith.constant 0 : i32
    return %arg0, %c0_i32, %arg1 : i32, i32, i32
  }
  func.func @transform_2(%arg0: i32, %arg1: i32) -> (i32, i32, i32) {
    %c0_i32 = arith.constant 0 : i32
    %c0_i32_0 = arith.constant 0 : i32
    return %arg0, %c0_i32, %arg1 : i32, i32, i32
  }
  func.func @transform_3(%arg0: i32, %arg1: i32) -> (i32, i32, i32) {
    %c0_i32 = arith.constant 0 : i32
    %c0_i32_0 = arith.constant 0 : i32
    return %arg0, %c0_i32, %arg1 : i32, i32, i32
  }
}

module attributes {stable_mosaic.version = 11 : i64} {
  func.func @_mm_kernel(%arg0: i32, %arg1: i32, %arg2: memref<1x128x384xbf16, #tpu.memory_space<vmem>>, %arg3: memref<1x384x128xbf16, #tpu.memory_space<vmem>>, %arg4: memref<1x1x128xf32, #tpu.memory_space<vmem>>, %arg5: memref<1x128x128xf32, #tpu.memory_space<vmem>>) attributes {dimension_semantics = [#tpu.dimension_semantics<parallel>, #tpu.dimension_semantics<parallel>], iteration_bounds = array<i64: 1, 1>, scalar_prefetch = 0 : i64, scratch_operands = 0 : i64, tpu.core_type = #tpu.core_type<tc>, window_params = [{transform_indices = @transform_0, window_bounds = array<i64: 1, 128, 384>}, {transform_indices = @transform_1, window_bounds = array<i64: 1, 384, 128>}, {transform_indices = @transform_2, window_bounds = array<i64: 1, 1, 128>}, {transform_indices = @transform_3, window_bounds = array<i64: 1, 128, 128>}]} {
    %c0 = arith.constant 0 : index
    %c0_0 = arith.constant 0 : index
    %c0_1 = arith.constant 0 : index
    %0 = vector.load %arg2[%c0, %c0_0, %c0_1] : memref<1x128x384xbf16, #tpu.memory_space<vmem>>, vector<1x128x384xbf16>
    %1 = vector.shape_cast %0 : vector<1x128x384xbf16> to vector<128x384xbf16>
    %c0_2 = arith.constant 0 : index
    %c0_3 = arith.constant 0 : index
    %c0_4 = arith.constant 0 : index
    %2 = vector.load %arg3[%c0_2, %c0_3, %c0_4] : memref<1x384x128xbf16, #tpu.memory_space<vmem>>, vector<1x384x128xbf16>
    %3 = vector.shape_cast %2 : vector<1x384x128xbf16> to vector<384x128xbf16>
    %cst = arith.constant dense<0.000000e+00> : vector<128x128xf32>
    %4 = tpu.matmul %1, %3, %cst {dimension_numbers = #tpu.dot_dimension_numbers<[1], [0], [0], [1], [0, 0, 1, 1], [], []>} : vector<128x384xbf16>, vector<384x128xbf16>, vector<128x128xf32> -> vector<128x128xf32>
    %c0_5 = arith.constant 0 : index
    %c0_6 = arith.constant 0 : index
    %c0_7 = arith.constant 0 : index
    %5 = vector.load %arg4[%c0_5, %c0_6, %c0_7] : memref<1x1x128xf32, #tpu.memory_space<vmem>>, vector<1x1x128xf32>
    %6 = vector.shape_cast %5 : vector<1x1x128xf32> to vector<1x128xf32>
    %7 = vector.broadcast %6 : vector<1x128xf32> to vector<128x128xf32>
    %8 = arith.addf %4, %7 : vector<128x128xf32>
    %cst_8 = arith.constant 0.000000e+00 : f32
    %9 = vector.broadcast %cst_8 : f32 to vector<128x128xf32>
    %10 = arith.cmpf ogt, %8, %9 : vector<128x128xf32>
    %cst_9 = arith.constant 2.000000e-01 : f32
    %11 = vector.broadcast %cst_9 : f32 to vector<128x128xf32>
    %12 = arith.mulf %11, %8 : vector<128x128xf32>
    %13 = arith.select %10, %8, %12 : vector<128x128xi1>, vector<128x128xf32>
    %c0_10 = arith.constant 0 : index
    %c0_11 = arith.constant 0 : index
    %c0_12 = arith.constant 0 : index
    %14 = vector.load %arg5[%c0_10, %c0_11, %c0_12] : memref<1x128x128xf32, #tpu.memory_space<vmem>>, vector<1x128x128xf32>
    %15 = vector.shape_cast %14 : vector<1x128x128xf32> to vector<128x128xf32>
    %16 = vector.shape_cast %13 : vector<128x128xf32> to vector<1x128x128xf32>
    tpu.vector_store %arg5[%c0_10, %c0_11, %c0_12], %16 {strides = array<i32>} : memref<1x128x128xf32, #tpu.memory_space<vmem>>, vector<1x128x128xf32>,
    return
  }
  func.func @transform_0(%arg0: i32, %arg1: i32) -> (i32, i32, i32) {
    %c0_i32 = arith.constant 0 : i32
    %c0_i32_0 = arith.constant 0 : i32
    %c0_i32_1 = arith.constant 0 : i32
    return %arg0, %c0_i32, %c0_i32_0 : i32, i32, i32
  }
  func.func @transform_1(%arg0: i32, %arg1: i32) -> (i32, i32, i32) {
    %c0_i32 = arith.constant 0 : i32
    %c0_i32_0 = arith.constant 0 : i32
    return %arg0, %c0_i32, %arg1 : i32, i32, i32
  }
  func.func @transform_2(%arg0: i32, %arg1: i32) -> (i32, i32, i32) {
    %c0_i32 = arith.constant 0 : i32
    %c0_i32_0 = arith.constant 0 : i32
    return %arg0, %c0_i32, %arg1 : i32, i32, i32
  }
  func.func @transform_3(%arg0: i32, %arg1: i32) -> (i32, i32, i32) {
    %c0_i32 = arith.constant 0 : i32
    %c0_i32_0 = arith.constant 0 : i32
    return %arg0, %c0_i32, %arg1 : i32, i32, i32
  }
}

module attributes {stable_mosaic.version = 11 : i64} {
  func.func @_mm_kernel(%arg0: i32, %arg1: i32, %arg2: memref<1x32x640xbf16, #tpu.memory_space<vmem>>, %arg3: memref<1x640x128xbf16, #tpu.memory_space<vmem>>, %arg4: memref<1x1x128xf32, #tpu.memory_space<vmem>>, %arg5: memref<1x32x128xf32, #tpu.memory_space<vmem>>) attributes {dimension_semantics = [#tpu.dimension_semantics<parallel>, #tpu.dimension_semantics<parallel>], iteration_bounds = array<i64: 1, 1>, scalar_prefetch = 0 : i64, scratch_operands = 0 : i64, tpu.core_type = #tpu.core_type<tc>, window_params = [{transform_indices = @transform_0, window_bounds = array<i64: 1, 32, 640>}, {transform_indices = @transform_1, window_bounds = array<i64: 1, 640, 128>}, {transform_indices = @transform_2, window_bounds = array<i64: 1, 1, 128>}, {transform_indices = @transform_3, window_bounds = array<i64: 1, 32, 128>}]} {
    %c0 = arith.constant 0 : index
    %c0_0 = arith.constant 0 : index
    %c0_1 = arith.constant 0 : index
    %0 = vector.load %arg2[%c0, %c0_0, %c0_1] : memref<1x32x640xbf16, #tpu.memory_space<vmem>>, vector<1x32x640xbf16>
    %1 = vector.shape_cast %0 : vector<1x32x640xbf16> to vector<32x640xbf16>
    %c0_2 = arith.constant 0 : index
    %c0_3 = arith.constant 0 : index
    %c0_4 = arith.constant 0 : index
    %2 = vector.load %arg3[%c0_2, %c0_3, %c0_4] : memref<1x640x128xbf16, #tpu.memory_space<vmem>>, vector<1x640x128xbf16>
    %3 = vector.shape_cast %2 : vector<1x640x128xbf16> to vector<640x128xbf16>
    %cst = arith.constant dense<0.000000e+00> : vector<32x128xf32>
    %4 = tpu.matmul %1, %3, %cst {dimension_numbers = #tpu.dot_dimension_numbers<[1], [0], [0], [1], [0, 0, 1, 1], [], []>} : vector<32x640xbf16>, vector<640x128xbf16>, vector<32x128xf32> -> vector<32x128xf32>
    %c0_5 = arith.constant 0 : index
    %c0_6 = arith.constant 0 : index
    %c0_7 = arith.constant 0 : index
    %5 = vector.load %arg4[%c0_5, %c0_6, %c0_7] : memref<1x1x128xf32, #tpu.memory_space<vmem>>, vector<1x1x128xf32>
    %6 = vector.shape_cast %5 : vector<1x1x128xf32> to vector<1x128xf32>
    %7 = vector.broadcast %6 : vector<1x128xf32> to vector<32x128xf32>
    %8 = arith.addf %4, %7 : vector<32x128xf32>
    %cst_8 = arith.constant 0.000000e+00 : f32
    %9 = vector.broadcast %cst_8 : f32 to vector<32x128xf32>
    %10 = arith.cmpf ogt, %8, %9 : vector<32x128xf32>
    %cst_9 = arith.constant 2.000000e-01 : f32
    %11 = vector.broadcast %cst_9 : f32 to vector<32x128xf32>
    %12 = arith.mulf %11, %8 : vector<32x128xf32>
    %13 = arith.select %10, %8, %12 : vector<32x128xi1>, vector<32x128xf32>
    %c0_10 = arith.constant 0 : index
    %c0_11 = arith.constant 0 : index
    %c0_12 = arith.constant 0 : index
    %14 = vector.load %arg5[%c0_10, %c0_11, %c0_12] : memref<1x32x128xf32, #tpu.memory_space<vmem>>, vector<1x32x128xf32>
    %15 = vector.shape_cast %14 : vector<1x32x128xf32> to vector<32x128xf32>
    %16 = vector.shape_cast %13 : vector<32x128xf32> to vector<1x32x128xf32>
    tpu.vector_store %arg5[%c0_10, %c0_11, %c0_12], %16 {strides = array<i32>} : memref<1x32x128xf32, #tpu.memory_space<vmem>>, vector<1x32x128xf32>,
    return
  }
  func.func @transform_0(%arg0: i32, %arg1: i32) -> (i32, i32, i32) {
    %c0_i32 = arith.constant 0 : i32
    %c0_i32_0 = arith.constant 0 : i32
    %c0_i32_1 = arith.constant 0 : i32
    return %arg0, %c0_i32, %c0_i32_0 : i32, i32, i32
  }
  func.func @transform_1(%arg0: i32, %arg1: i32) -> (i32, i32, i32) {
    %c0_i32 = arith.constant 0 : i32
    %c0_i32_0 = arith.constant 0 : i32
    return %arg0, %c0_i32, %arg1 : i32, i32, i32
  }
  func.func @transform_2(%arg0: i32, %arg1: i32) -> (i32, i32, i32) {
    %c0_i32 = arith.constant 0 : i32
    %c0_i32_0 = arith.constant 0 : i32
    return %arg0, %c0_i32, %arg1 : i32, i32, i32
  }
  func.func @transform_3(%arg0: i32, %arg1: i32) -> (i32, i32, i32) {
    %c0_i32 = arith.constant 0 : i32
    %c0_i32_0 = arith.constant 0 : i32
    return %arg0, %c0_i32, %arg1 : i32, i32, i32
  }
}

module attributes {stable_mosaic.version = 11 : i64} {
  func.func @_mm_kernel(%arg0: i32, %arg1: i32, %arg2: memref<1x8x1152xbf16, #tpu.memory_space<vmem>>, %arg3: memref<1x1152x256xbf16, #tpu.memory_space<vmem>>, %arg4: memref<1x1x256xf32, #tpu.memory_space<vmem>>, %arg5: memref<1x8x256xf32, #tpu.memory_space<vmem>>) attributes {dimension_semantics = [#tpu.dimension_semantics<parallel>, #tpu.dimension_semantics<parallel>], iteration_bounds = array<i64: 1, 1>, scalar_prefetch = 0 : i64, scratch_operands = 0 : i64, tpu.core_type = #tpu.core_type<tc>, window_params = [{transform_indices = @transform_0, window_bounds = array<i64: 1, 8, 1152>}, {transform_indices = @transform_1, window_bounds = array<i64: 1, 1152, 256>}, {transform_indices = @transform_2, window_bounds = array<i64: 1, 1, 256>}, {transform_indices = @transform_3, window_bounds = array<i64: 1, 8, 256>}]} {
    %c0 = arith.constant 0 : index
    %c0_0 = arith.constant 0 : index
    %c0_1 = arith.constant 0 : index
    %0 = vector.load %arg2[%c0, %c0_0, %c0_1] : memref<1x8x1152xbf16, #tpu.memory_space<vmem>>, vector<1x8x1152xbf16>
    %1 = vector.shape_cast %0 : vector<1x8x1152xbf16> to vector<8x1152xbf16>
    %c0_2 = arith.constant 0 : index
    %c0_3 = arith.constant 0 : index
    %c0_4 = arith.constant 0 : index
    %2 = vector.load %arg3[%c0_2, %c0_3, %c0_4] : memref<1x1152x256xbf16, #tpu.memory_space<vmem>>, vector<1x1152x256xbf16>
    %3 = vector.shape_cast %2 : vector<1x1152x256xbf16> to vector<1152x256xbf16>
    %cst = arith.constant dense<0.000000e+00> : vector<8x256xf32>
    %4 = tpu.matmul %1, %3, %cst {dimension_numbers = #tpu.dot_dimension_numbers<[1], [0], [0], [1], [0, 0, 1, 1], [], []>} : vector<8x1152xbf16>, vector<1152x256xbf16>, vector<8x256xf32> -> vector<8x256xf32>
    %c0_5 = arith.constant 0 : index
    %c0_6 = arith.constant 0 : index
    %c0_7 = arith.constant 0 : index
    %5 = vector.load %arg4[%c0_5, %c0_6, %c0_7] : memref<1x1x256xf32, #tpu.memory_space<vmem>>, vector<1x1x256xf32>
    %6 = vector.shape_cast %5 : vector<1x1x256xf32> to vector<1x256xf32>
    %7 = vector.broadcast %6 : vector<1x256xf32> to vector<8x256xf32>
    %8 = arith.addf %4, %7 : vector<8x256xf32>
    %cst_8 = arith.constant 0.000000e+00 : f32
    %9 = vector.broadcast %cst_8 : f32 to vector<8x256xf32>
    %10 = arith.cmpf ogt, %8, %9 : vector<8x256xf32>
    %cst_9 = arith.constant 2.000000e-01 : f32
    %11 = vector.broadcast %cst_9 : f32 to vector<8x256xf32>
    %12 = arith.mulf %11, %8 : vector<8x256xf32>
    %13 = arith.select %10, %8, %12 : vector<8x256xi1>, vector<8x256xf32>
    %c0_10 = arith.constant 0 : index
    %c0_11 = arith.constant 0 : index
    %c0_12 = arith.constant 0 : index
    %14 = vector.load %arg5[%c0_10, %c0_11, %c0_12] : memref<1x8x256xf32, #tpu.memory_space<vmem>>, vector<1x8x256xf32>
    %15 = vector.shape_cast %14 : vector<1x8x256xf32> to vector<8x256xf32>
    %16 = vector.shape_cast %13 : vector<8x256xf32> to vector<1x8x256xf32>
    tpu.vector_store %arg5[%c0_10, %c0_11, %c0_12], %16 {strides = array<i32>} : memref<1x8x256xf32, #tpu.memory_space<vmem>>, vector<1x8x256xf32>,
    return
  }
  func.func @transform_0(%arg0: i32, %arg1: i32) -> (i32, i32, i32) {
    %c0_i32 = arith.constant 0 : i32
    %c0_i32_0 = arith.constant 0 : i32
    %c0_i32_1 = arith.constant 0 : i32
    return %arg0, %c0_i32, %c0_i32_0 : i32, i32, i32
  }
  func.func @transform_1(%arg0: i32, %arg1: i32) -> (i32, i32, i32) {
    %c0_i32 = arith.constant 0 : i32
    %c0_i32_0 = arith.constant 0 : i32
    return %arg0, %c0_i32, %arg1 : i32, i32, i32
  }
  func.func @transform_2(%arg0: i32, %arg1: i32) -> (i32, i32, i32) {
    %c0_i32 = arith.constant 0 : i32
    %c0_i32_0 = arith.constant 0 : i32
    return %arg0, %c0_i32, %arg1 : i32, i32, i32
  }
  func.func @transform_3(%arg0: i32, %arg1: i32) -> (i32, i32, i32) {
    %c0_i32 = arith.constant 0 : i32
    %c0_i32_0 = arith.constant 0 : i32
    return %arg0, %c0_i32, %arg1 : i32, i32, i32
  }
}

module attributes {stable_mosaic.version = 11 : i64} {
  func.func @_latent_kernel(%arg0: memref<8x1024xbf16, #tpu.memory_space<vmem>>, %arg1: memref<1024x256xbf16, #tpu.memory_space<vmem>>, %arg2: memref<1x256xf32, #tpu.memory_space<vmem>>, %arg3: memref<8x128xf32, #tpu.memory_space<vmem>>, %arg4: memref<8x256xf32, #tpu.memory_space<vmem>>, %arg5: memref<8x128xf32, #tpu.memory_space<vmem>>) attributes {dimension_semantics = [], scalar_prefetch = 0 : i64, scratch_operands = 0 : i64, tpu.core_type = #tpu.core_type<tc>} {
    %c0 = arith.constant 0 : index
    %c0_0 = arith.constant 0 : index
    %0 = vector.load %arg0[%c0, %c0_0] : memref<8x1024xbf16, #tpu.memory_space<vmem>>, vector<8x1024xbf16>
    %c0_1 = arith.constant 0 : index
    %c0_2 = arith.constant 0 : index
    %1 = vector.load %arg1[%c0_1, %c0_2] : memref<1024x256xbf16, #tpu.memory_space<vmem>>, vector<1024x256xbf16>
    %cst = arith.constant dense<0.000000e+00> : vector<8x256xf32>
    %2 = tpu.matmul %0, %1, %cst {dimension_numbers = #tpu.dot_dimension_numbers<[1], [0], [0], [1], [0, 0, 1, 1], [], []>} : vector<8x1024xbf16>, vector<1024x256xbf16>, vector<8x256xf32> -> vector<8x256xf32>
    %c0_3 = arith.constant 0 : index
    %c0_4 = arith.constant 0 : index
    %3 = vector.load %arg2[%c0_3, %c0_4] : memref<1x256xf32, #tpu.memory_space<vmem>>, vector<1x256xf32>
    %4 = vector.broadcast %3 : vector<1x256xf32> to vector<8x256xf32>
    %5 = arith.addf %2, %4 : vector<8x256xf32>
    %c0_5 = arith.constant 0 : index
    %c0_6 = arith.constant 0 : index
    %6 = vector.load %arg4[%c0_5, %c0_6] : memref<8x256xf32, #tpu.memory_space<vmem>>, vector<8x256xf32>
    tpu.vector_store %arg4[%c0_5, %c0_6], %5 {strides = array<i32>} : memref<8x256xf32, #tpu.memory_space<vmem>>, vector<8x256xf32>,
    %7 = vector.extract_strided_slice %5 {offsets = [0, 0], sizes = [8, 128], strides = [1, 1]} : vector<8x256xf32> to vector<8x128xf32>
    %8 = vector.extract_strided_slice %5 {offsets = [0, 128], sizes = [8, 128], strides = [1, 1]} : vector<8x256xf32> to vector<8x128xf32>
    %c0_7 = arith.constant 0 : index
    %c0_8 = arith.constant 0 : index
    %9 = vector.load %arg3[%c0_7, %c0_8] : memref<8x128xf32, #tpu.memory_space<vmem>>, vector<8x128xf32>
    %cst_9 = arith.constant 5.000000e-01 : f32
    %10 = vector.broadcast %cst_9 : f32 to vector<8x128xf32>
    %11 = arith.mulf %10, %7 : vector<8x128xf32>
    %12 = math.exp %11 : vector<8x128xf32>
    %13 = arith.mulf %9, %12 : vector<8x128xf32>
    %14 = arith.addf %13, %8 : vector<8x128xf32>
    %c0_10 = arith.constant 0 : index
    %c0_11 = arith.constant 0 : index
    %15 = vector.load %arg5[%c0_10, %c0_11] : memref<8x128xf32, #tpu.memory_space<vmem>>, vector<8x128xf32>
    tpu.vector_store %arg5[%c0_10, %c0_11], %14 {strides = array<i32>} : memref<8x128xf32, #tpu.memory_space<vmem>>, vector<8x128xf32>,
    return
  }
}

module attributes {stable_mosaic.version = 11 : i64} {
  func.func @_mm_kernel(%arg0: i32, %arg1: i32, %arg2: memref<1x8x128xbf16, #tpu.memory_space<vmem>>, %arg3: memref<1x128x512xbf16, #tpu.memory_space<vmem>>, %arg4: memref<1x1x512xf32, #tpu.memory_space<vmem>>, %arg5: memref<1x8x512xf32, #tpu.memory_space<vmem>>) attributes {dimension_semantics = [#tpu.dimension_semantics<parallel>, #tpu.dimension_semantics<parallel>], iteration_bounds = array<i64: 1, 2>, scalar_prefetch = 0 : i64, scratch_operands = 0 : i64, tpu.core_type = #tpu.core_type<tc>, window_params = [{transform_indices = @transform_0, window_bounds = array<i64: 1, 8, 128>}, {transform_indices = @transform_1, window_bounds = array<i64: 1, 128, 512>}, {transform_indices = @transform_2, window_bounds = array<i64: 1, 1, 512>}, {transform_indices = @transform_3, window_bounds = array<i64: 1, 8, 512>}]} {
    %c0 = arith.constant 0 : index
    %c0_0 = arith.constant 0 : index
    %c0_1 = arith.constant 0 : index
    %0 = vector.load %arg2[%c0, %c0_0, %c0_1] : memref<1x8x128xbf16, #tpu.memory_space<vmem>>, vector<1x8x128xbf16>
    %1 = vector.shape_cast %0 : vector<1x8x128xbf16> to vector<8x128xbf16>
    %c0_2 = arith.constant 0 : index
    %c0_3 = arith.constant 0 : index
    %c0_4 = arith.constant 0 : index
    %2 = vector.load %arg3[%c0_2, %c0_3, %c0_4] : memref<1x128x512xbf16, #tpu.memory_space<vmem>>, vector<1x128x512xbf16>
    %3 = vector.shape_cast %2 : vector<1x128x512xbf16> to vector<128x512xbf16>
    %cst = arith.constant dense<0.000000e+00> : vector<8x512xf32>
    %4 = tpu.matmul %1, %3, %cst {dimension_numbers = #tpu.dot_dimension_numbers<[1], [0], [0], [1], [0, 0, 1, 1], [], []>} : vector<8x128xbf16>, vector<128x512xbf16>, vector<8x512xf32> -> vector<8x512xf32>
    %c0_5 = arith.constant 0 : index
    %c0_6 = arith.constant 0 : index
    %c0_7 = arith.constant 0 : index
    %5 = vector.load %arg4[%c0_5, %c0_6, %c0_7] : memref<1x1x512xf32, #tpu.memory_space<vmem>>, vector<1x1x512xf32>
    %6 = vector.shape_cast %5 : vector<1x1x512xf32> to vector<1x512xf32>
    %7 = vector.broadcast %6 : vector<1x512xf32> to vector<8x512xf32>
    %8 = arith.addf %4, %7 : vector<8x512xf32>
    %c0_8 = arith.constant 0 : index
    %c0_9 = arith.constant 0 : index
    %c0_10 = arith.constant 0 : index
    %9 = vector.load %arg5[%c0_8, %c0_9, %c0_10] : memref<1x8x512xf32, #tpu.memory_space<vmem>>, vector<1x8x512xf32>
    %10 = vector.shape_cast %9 : vector<1x8x512xf32> to vector<8x512xf32>
    %11 = vector.shape_cast %8 : vector<8x512xf32> to vector<1x8x512xf32>
    tpu.vector_store %arg5[%c0_8, %c0_9, %c0_10], %11 {strides = array<i32>} : memref<1x8x512xf32, #tpu.memory_space<vmem>>, vector<1x8x512xf32>,
    return
  }
  func.func @transform_0(%arg0: i32, %arg1: i32) -> (i32, i32, i32) {
    %c0_i32 = arith.constant 0 : i32
    %c0_i32_0 = arith.constant 0 : i32
    %c0_i32_1 = arith.constant 0 : i32
    return %arg0, %c0_i32, %c0_i32_0 : i32, i32, i32
  }
  func.func @transform_1(%arg0: i32, %arg1: i32) -> (i32, i32, i32) {
    %c0_i32 = arith.constant 0 : i32
    %c0_i32_0 = arith.constant 0 : i32
    return %arg0, %c0_i32, %arg1 : i32, i32, i32
  }
  func.func @transform_2(%arg0: i32, %arg1: i32) -> (i32, i32, i32) {
    %c0_i32 = arith.constant 0 : i32
    %c0_i32_0 = arith.constant 0 : i32
    return %arg0, %c0_i32, %arg1 : i32, i32, i32
  }
  func.func @transform_3(%arg0: i32, %arg1: i32) -> (i32, i32, i32) {
    %c0_i32 = arith.constant 0 : i32
    %c0_i32_0 = arith.constant 0 : i32
    return %arg0, %c0_i32, %arg1 : i32, i32, i32
  }
}

module attributes {stable_mosaic.version = 11 : i64} {
  func.func @_mm_kernel(%arg0: i32, %arg1: i32, %arg2: memref<1x8x1024xbf16, #tpu.memory_space<vmem>>, %arg3: memref<1x1024x512xbf16, #tpu.memory_space<vmem>>, %arg4: memref<1x1x512xf32, #tpu.memory_space<vmem>>, %arg5: memref<1x8x512xf32, #tpu.memory_space<vmem>>) attributes {dimension_semantics = [#tpu.dimension_semantics<parallel>, #tpu.dimension_semantics<parallel>], iteration_bounds = array<i64: 1, 4>, scalar_prefetch = 0 : i64, scratch_operands = 0 : i64, tpu.core_type = #tpu.core_type<tc>, window_params = [{transform_indices = @transform_0, window_bounds = array<i64: 1, 8, 1024>}, {transform_indices = @transform_1, window_bounds = array<i64: 1, 1024, 512>}, {transform_indices = @transform_2, window_bounds = array<i64: 1, 1, 512>}, {transform_indices = @transform_3, window_bounds = array<i64: 1, 8, 512>}]} {
    %c0 = arith.constant 0 : index
    %c0_0 = arith.constant 0 : index
    %c0_1 = arith.constant 0 : index
    %0 = vector.load %arg2[%c0, %c0_0, %c0_1] : memref<1x8x1024xbf16, #tpu.memory_space<vmem>>, vector<1x8x1024xbf16>
    %1 = vector.shape_cast %0 : vector<1x8x1024xbf16> to vector<8x1024xbf16>
    %c0_2 = arith.constant 0 : index
    %c0_3 = arith.constant 0 : index
    %c0_4 = arith.constant 0 : index
    %2 = vector.load %arg3[%c0_2, %c0_3, %c0_4] : memref<1x1024x512xbf16, #tpu.memory_space<vmem>>, vector<1x1024x512xbf16>
    %3 = vector.shape_cast %2 : vector<1x1024x512xbf16> to vector<1024x512xbf16>
    %cst = arith.constant dense<0.000000e+00> : vector<8x512xf32>
    %4 = tpu.matmul %1, %3, %cst {dimension_numbers = #tpu.dot_dimension_numbers<[1], [0], [0], [1], [0, 0, 1, 1], [], []>} : vector<8x1024xbf16>, vector<1024x512xbf16>, vector<8x512xf32> -> vector<8x512xf32>
    %c0_5 = arith.constant 0 : index
    %c0_6 = arith.constant 0 : index
    %c0_7 = arith.constant 0 : index
    %5 = vector.load %arg4[%c0_5, %c0_6, %c0_7] : memref<1x1x512xf32, #tpu.memory_space<vmem>>, vector<1x1x512xf32>
    %6 = vector.shape_cast %5 : vector<1x1x512xf32> to vector<1x512xf32>
    %7 = vector.broadcast %6 : vector<1x512xf32> to vector<8x512xf32>
    %8 = arith.addf %4, %7 : vector<8x512xf32>
    %cst_8 = arith.constant 0.000000e+00 : f32
    %9 = vector.broadcast %cst_8 : f32 to vector<8x512xf32>
    %10 = arith.maximumf %8, %9 : vector<8x512xf32>
    %c0_9 = arith.constant 0 : index
    %c0_10 = arith.constant 0 : index
    %c0_11 = arith.constant 0 : index
    %11 = vector.load %arg5[%c0_9, %c0_10, %c0_11] : memref<1x8x512xf32, #tpu.memory_space<vmem>>, vector<1x8x512xf32>
    %12 = vector.shape_cast %11 : vector<1x8x512xf32> to vector<8x512xf32>
    %13 = vector.shape_cast %10 : vector<8x512xf32> to vector<1x8x512xf32>
    tpu.vector_store %arg5[%c0_9, %c0_10, %c0_11], %13 {strides = array<i32>} : memref<1x8x512xf32, #tpu.memory_space<vmem>>, vector<1x8x512xf32>,
    return
  }
  func.func @transform_0(%arg0: i32, %arg1: i32) -> (i32, i32, i32) {
    %c0_i32 = arith.constant 0 : i32
    %c0_i32_0 = arith.constant 0 : i32
    %c0_i32_1 = arith.constant 0 : i32
    return %arg0, %c0_i32, %c0_i32_0 : i32, i32, i32
  }
  func.func @transform_1(%arg0: i32, %arg1: i32) -> (i32, i32, i32) {
    %c0_i32 = arith.constant 0 : i32
    %c0_i32_0 = arith.constant 0 : i32
    return %arg0, %c0_i32, %arg1 : i32, i32, i32
  }
  func.func @transform_2(%arg0: i32, %arg1: i32) -> (i32, i32, i32) {
    %c0_i32 = arith.constant 0 : i32
    %c0_i32_0 = arith.constant 0 : i32
    return %arg0, %c0_i32, %arg1 : i32, i32, i32
  }
  func.func @transform_3(%arg0: i32, %arg1: i32) -> (i32, i32, i32) {
    %c0_i32 = arith.constant 0 : i32
    %c0_i32_0 = arith.constant 0 : i32
    return %arg0, %c0_i32, %arg1 : i32, i32, i32
  }
}

module attributes {stable_mosaic.version = 11 : i64} {
  func.func @_mm_kernel(%arg0: i32, %arg1: i32, %arg2: memref<1x32x512xbf16, #tpu.memory_space<vmem>>, %arg3: memref<1x512x128xbf16, #tpu.memory_space<vmem>>, %arg4: memref<1x1x128xf32, #tpu.memory_space<vmem>>, %arg5: memref<1x32x128xf32, #tpu.memory_space<vmem>>) attributes {dimension_semantics = [#tpu.dimension_semantics<parallel>, #tpu.dimension_semantics<parallel>], iteration_bounds = array<i64: 4, 1>, scalar_prefetch = 0 : i64, scratch_operands = 0 : i64, tpu.core_type = #tpu.core_type<tc>, window_params = [{transform_indices = @transform_0, window_bounds = array<i64: 1, 32, 512>}, {transform_indices = @transform_1, window_bounds = array<i64: 1, 512, 128>}, {transform_indices = @transform_2, window_bounds = array<i64: 1, 1, 128>}, {transform_indices = @transform_3, window_bounds = array<i64: 1, 32, 128>}]} {
    %c0 = arith.constant 0 : index
    %c0_0 = arith.constant 0 : index
    %c0_1 = arith.constant 0 : index
    %0 = vector.load %arg2[%c0, %c0_0, %c0_1] : memref<1x32x512xbf16, #tpu.memory_space<vmem>>, vector<1x32x512xbf16>
    %1 = vector.shape_cast %0 : vector<1x32x512xbf16> to vector<32x512xbf16>
    %c0_2 = arith.constant 0 : index
    %c0_3 = arith.constant 0 : index
    %c0_4 = arith.constant 0 : index
    %2 = vector.load %arg3[%c0_2, %c0_3, %c0_4] : memref<1x512x128xbf16, #tpu.memory_space<vmem>>, vector<1x512x128xbf16>
    %3 = vector.shape_cast %2 : vector<1x512x128xbf16> to vector<512x128xbf16>
    %cst = arith.constant dense<0.000000e+00> : vector<32x128xf32>
    %4 = tpu.matmul %1, %3, %cst {dimension_numbers = #tpu.dot_dimension_numbers<[1], [0], [0], [1], [0, 0, 1, 1], [], []>} : vector<32x512xbf16>, vector<512x128xbf16>, vector<32x128xf32> -> vector<32x128xf32>
    %c0_5 = arith.constant 0 : index
    %c0_6 = arith.constant 0 : index
    %c0_7 = arith.constant 0 : index
    %5 = vector.load %arg4[%c0_5, %c0_6, %c0_7] : memref<1x1x128xf32, #tpu.memory_space<vmem>>, vector<1x1x128xf32>
    %6 = vector.shape_cast %5 : vector<1x1x128xf32> to vector<1x128xf32>
    %7 = vector.broadcast %6 : vector<1x128xf32> to vector<32x128xf32>
    %8 = arith.addf %4, %7 : vector<32x128xf32>
    %cst_8 = arith.constant 0.000000e+00 : f32
    %9 = vector.broadcast %cst_8 : f32 to vector<32x128xf32>
    %10 = arith.maximumf %8, %9 : vector<32x128xf32>
    %c0_9 = arith.constant 0 : index
    %c0_10 = arith.constant 0 : index
    %c0_11 = arith.constant 0 : index
    %11 = vector.load %arg5[%c0_9, %c0_10, %c0_11] : memref<1x32x128xf32, #tpu.memory_space<vmem>>, vector<1x32x128xf32>
    %12 = vector.shape_cast %11 : vector<1x32x128xf32> to vector<32x128xf32>
    %13 = vector.shape_cast %10 : vector<32x128xf32> to vector<1x32x128xf32>
    tpu.vector_store %arg5[%c0_9, %c0_10, %c0_11], %13 {strides = array<i32>} : memref<1x32x128xf32, #tpu.memory_space<vmem>>, vector<1x32x128xf32>,
    return
  }
  func.func @transform_0(%arg0: i32, %arg1: i32) -> (i32, i32, i32) {
    %c0_i32 = arith.constant 0 : i32
    %c0_i32_0 = arith.constant 0 : i32
    %c0_i32_1 = arith.constant 0 : i32
    return %arg0, %c0_i32, %c0_i32_0 : i32, i32, i32
  }
  func.func @transform_1(%arg0: i32, %arg1: i32) -> (i32, i32, i32) {
    %c0_i32 = arith.constant 0 : i32
    %c0_i32_0 = arith.constant 0 : i32
    return %arg0, %c0_i32, %arg1 : i32, i32, i32
  }
  func.func @transform_2(%arg0: i32, %arg1: i32) -> (i32, i32, i32) {
    %c0_i32 = arith.constant 0 : i32
    %c0_i32_0 = arith.constant 0 : i32
    return %arg0, %c0_i32, %arg1 : i32, i32, i32
  }
  func.func @transform_3(%arg0: i32, %arg1: i32) -> (i32, i32, i32) {
    %c0_i32 = arith.constant 0 : i32
    %c0_i32_0 = arith.constant 0 : i32
    return %arg0, %c0_i32, %arg1 : i32, i32, i32
  }
}

module attributes {stable_mosaic.version = 11 : i64} {
  func.func @_mm_kernel(%arg0: i32, %arg1: i32, %arg2: memref<1x128x640xbf16, #tpu.memory_space<vmem>>, %arg3: memref<1x640x128xbf16, #tpu.memory_space<vmem>>, %arg4: memref<1x1x128xf32, #tpu.memory_space<vmem>>, %arg5: memref<1x128x128xf32, #tpu.memory_space<vmem>>) attributes {dimension_semantics = [#tpu.dimension_semantics<parallel>, #tpu.dimension_semantics<parallel>], iteration_bounds = array<i64: 4, 1>, scalar_prefetch = 0 : i64, scratch_operands = 0 : i64, tpu.core_type = #tpu.core_type<tc>, window_params = [{transform_indices = @transform_0, window_bounds = array<i64: 1, 128, 640>}, {transform_indices = @transform_1, window_bounds = array<i64: 1, 640, 128>}, {transform_indices = @transform_2, window_bounds = array<i64: 1, 1, 128>}, {transform_indices = @transform_3, window_bounds = array<i64: 1, 128, 128>}]} {
    %c0 = arith.constant 0 : index
    %c0_0 = arith.constant 0 : index
    %c0_1 = arith.constant 0 : index
    %0 = vector.load %arg2[%c0, %c0_0, %c0_1] : memref<1x128x640xbf16, #tpu.memory_space<vmem>>, vector<1x128x640xbf16>
    %1 = vector.shape_cast %0 : vector<1x128x640xbf16> to vector<128x640xbf16>
    %c0_2 = arith.constant 0 : index
    %c0_3 = arith.constant 0 : index
    %c0_4 = arith.constant 0 : index
    %2 = vector.load %arg3[%c0_2, %c0_3, %c0_4] : memref<1x640x128xbf16, #tpu.memory_space<vmem>>, vector<1x640x128xbf16>
    %3 = vector.shape_cast %2 : vector<1x640x128xbf16> to vector<640x128xbf16>
    %cst = arith.constant dense<0.000000e+00> : vector<128x128xf32>
    %4 = tpu.matmul %1, %3, %cst {dimension_numbers = #tpu.dot_dimension_numbers<[1], [0], [0], [1], [0, 0, 1, 1], [], []>} : vector<128x640xbf16>, vector<640x128xbf16>, vector<128x128xf32> -> vector<128x128xf32>
    %c0_5 = arith.constant 0 : index
    %c0_6 = arith.constant 0 : index
    %c0_7 = arith.constant 0 : index
    %5 = vector.load %arg4[%c0_5, %c0_6, %c0_7] : memref<1x1x128xf32, #tpu.memory_space<vmem>>, vector<1x1x128xf32>
    %6 = vector.shape_cast %5 : vector<1x1x128xf32> to vector<1x128xf32>
    %7 = vector.broadcast %6 : vector<1x128xf32> to vector<128x128xf32>
    %8 = arith.addf %4, %7 : vector<128x128xf32>
    %cst_8 = arith.constant 0.000000e+00 : f32
    %9 = vector.broadcast %cst_8 : f32 to vector<128x128xf32>
    %10 = arith.maximumf %8, %9 : vector<128x128xf32>
    %c0_9 = arith.constant 0 : index
    %c0_10 = arith.constant 0 : index
    %c0_11 = arith.constant 0 : index
    %11 = vector.load %arg5[%c0_9, %c0_10, %c0_11] : memref<1x128x128xf32, #tpu.memory_space<vmem>>, vector<1x128x128xf32>
    %12 = vector.shape_cast %11 : vector<1x128x128xf32> to vector<128x128xf32>
    %13 = vector.shape_cast %10 : vector<128x128xf32> to vector<1x128x128xf32>
    tpu.vector_store %arg5[%c0_9, %c0_10, %c0_11], %13 {strides = array<i32>} : memref<1x128x128xf32, #tpu.memory_space<vmem>>, vector<1x128x128xf32>,
    return
  }
  func.func @transform_0(%arg0: i32, %arg1: i32) -> (i32, i32, i32) {
    %c0_i32 = arith.constant 0 : i32
    %c0_i32_0 = arith.constant 0 : i32
    %c0_i32_1 = arith.constant 0 : i32
    return %arg0, %c0_i32, %c0_i32_0 : i32, i32, i32
  }
  func.func @transform_1(%arg0: i32, %arg1: i32) -> (i32, i32, i32) {
    %c0_i32 = arith.constant 0 : i32
    %c0_i32_0 = arith.constant 0 : i32
    return %arg0, %c0_i32, %arg1 : i32, i32, i32
  }
  func.func @transform_2(%arg0: i32, %arg1: i32) -> (i32, i32, i32) {
    %c0_i32 = arith.constant 0 : i32
    %c0_i32_0 = arith.constant 0 : i32
    return %arg0, %c0_i32, %arg1 : i32, i32, i32
  }
  func.func @transform_3(%arg0: i32, %arg1: i32) -> (i32, i32, i32) {
    %c0_i32 = arith.constant 0 : i32
    %c0_i32_0 = arith.constant 0 : i32
    return %arg0, %c0_i32, %arg1 : i32, i32, i32
  }
}

module attributes {stable_mosaic.version = 11 : i64} {
  func.func @_mm_kernel(%arg0: i32, %arg1: i32, %arg2: memref<1x512x384xbf16, #tpu.memory_space<vmem>>, %arg3: memref<1x384x128xbf16, #tpu.memory_space<vmem>>, %arg4: memref<1x1x128xf32, #tpu.memory_space<vmem>>, %arg5: memref<1x512x128xf32, #tpu.memory_space<vmem>>) attributes {dimension_semantics = [#tpu.dimension_semantics<parallel>, #tpu.dimension_semantics<parallel>], iteration_bounds = array<i64: 4, 1>, scalar_prefetch = 0 : i64, scratch_operands = 0 : i64, tpu.core_type = #tpu.core_type<tc>, window_params = [{transform_indices = @transform_0, window_bounds = array<i64: 1, 512, 384>}, {transform_indices = @transform_1, window_bounds = array<i64: 1, 384, 128>}, {transform_indices = @transform_2, window_bounds = array<i64: 1, 1, 128>}, {transform_indices = @transform_3, window_bounds = array<i64: 1, 512, 128>}]} {
    %c0 = arith.constant 0 : index
    %c0_0 = arith.constant 0 : index
    %c0_1 = arith.constant 0 : index
    %0 = vector.load %arg2[%c0, %c0_0, %c0_1] : memref<1x512x384xbf16, #tpu.memory_space<vmem>>, vector<1x512x384xbf16>
    %1 = vector.shape_cast %0 : vector<1x512x384xbf16> to vector<512x384xbf16>
    %c0_2 = arith.constant 0 : index
    %c0_3 = arith.constant 0 : index
    %c0_4 = arith.constant 0 : index
    %2 = vector.load %arg3[%c0_2, %c0_3, %c0_4] : memref<1x384x128xbf16, #tpu.memory_space<vmem>>, vector<1x384x128xbf16>
    %3 = vector.shape_cast %2 : vector<1x384x128xbf16> to vector<384x128xbf16>
    %cst = arith.constant dense<0.000000e+00> : vector<512x128xf32>
    %4 = tpu.matmul %1, %3, %cst {dimension_numbers = #tpu.dot_dimension_numbers<[1], [0], [0], [1], [0, 0, 1, 1], [], []>} : vector<512x384xbf16>, vector<384x128xbf16>, vector<512x128xf32> -> vector<512x128xf32>
    %c0_5 = arith.constant 0 : index
    %c0_6 = arith.constant 0 : index
    %c0_7 = arith.constant 0 : index
    %5 = vector.load %arg4[%c0_5, %c0_6, %c0_7] : memref<1x1x128xf32, #tpu.memory_space<vmem>>, vector<1x1x128xf32>
    %6 = vector.shape_cast %5 : vector<1x1x128xf32> to vector<1x128xf32>
    %7 = vector.broadcast %6 : vector<1x128xf32> to vector<512x128xf32>
    %8 = arith.addf %4, %7 : vector<512x128xf32>
    %cst_8 = arith.constant 0.000000e+00 : f32
    %9 = vector.broadcast %cst_8 : f32 to vector<512x128xf32>
    %10 = arith.subf %9, %8 : vector<512x128xf32>
    %11 = math.exp %10 : vector<512x128xf32>
    %cst_9 = arith.constant 1.000000e+00 : f32
    %12 = vector.broadcast %cst_9 : f32 to vector<512x128xf32>
    %13 = arith.addf %12, %11 : vector<512x128xf32>
    %cst_10 = arith.constant 1.000000e+00 : f32
    %14 = vector.broadcast %cst_10 : f32 to vector<512x128xf32>
    %15 = arith.divf %14, %13 : vector<512x128xf32>
    %c0_11 = arith.constant 0 : index
    %c0_12 = arith.constant 0 : index
    %c0_13 = arith.constant 0 : index
    %16 = vector.load %arg5[%c0_11, %c0_12, %c0_13] : memref<1x512x128xf32, #tpu.memory_space<vmem>>, vector<1x512x128xf32>
    %17 = vector.shape_cast %16 : vector<1x512x128xf32> to vector<512x128xf32>
    %18 = vector.shape_cast %15 : vector<512x128xf32> to vector<1x512x128xf32>
    tpu.vector_store %arg5[%c0_11, %c0_12, %c0_13], %18 {strides = array<i32>} : memref<1x512x128xf32, #tpu.memory_space<vmem>>, vector<1x512x128xf32>,
    return
  }
  func.func @transform_0(%arg0: i32, %arg1: i32) -> (i32, i32, i32) {
    %c0_i32 = arith.constant 0 : i32
    %c0_i32_0 = arith.constant 0 : i32
    %c0_i32_1 = arith.constant 0 : i32
    return %arg0, %c0_i32, %c0_i32_0 : i32, i32, i32
  }
  func.func @transform_1(%arg0: i32, %arg1: i32) -> (i32, i32, i32) {
    %c0_i32 = arith.constant 0 : i32
    %c0_i32_0 = arith.constant 0 : i32
    return %arg0, %c0_i32, %arg1 : i32, i32, i32
  }
  func.func @transform_2(%arg0: i32, %arg1: i32) -> (i32, i32, i32) {
    %c0_i32 = arith.constant 0 : i32
    %c0_i32_0 = arith.constant 0 : i32
    return %arg0, %c0_i32, %arg1 : i32, i32, i32
  }
  func.func @transform_3(%arg0: i32, %arg1: i32) -> (i32, i32, i32) {
    %c0_i32 = arith.constant 0 : i32
    %c0_i32_0 = arith.constant 0 : i32
    return %arg0, %c0_i32, %arg1 : i32, i32, i32
  }
}

</mosaic_0001>

<bundles_post_ra>
// kernel: cvae_forward.10
= control target key start
LH: loop header
LB: loop body
LE: loop exit
PB: predicated region body
PF: predicated region fallthrough
CT: control target
= control target key end

     0   :  { %s1509_s1 = inlined_call_operand.vmem [shape: bf16[1,128,128], index: 1, kind: input, shape index: {}]   ;;  %s1510_s0 = inlined_call_operand.vmem [shape: bf16[1,512,128], index: 0, kind: input, shape index: {}]   ;;  %s1511_s2 = inlined_call_operand.vmem [shape: f32[1,1,128], index: 2, kind: input, shape index: {}]   ;;  %s1512_s3 = inlined_call_operand.vmem [shape: f32[1,512,128], index: 3, kind: output, shape index: {}]  }
   0x1   :  { %v1068_v0 = vld [vmem:[%s1509_s1 + $0x38] sm:$0xff]   ;;  %v1069_v1 = vld [vmem:[%s1509_s1 + $0x30] sm:$0xff]   ;;  %v1070_v2 = vld [vmem:[%s1509_s1 + $0x28] sm:$0xff]  }
   0x2   :  { %972 = vmatprep.subr.bf16.mxu0 %v1068_v0  ;;  %1052 = vmatprep.subr.bf16.mxu1 %v1068_v0  ;;  %v1071_v3 = vld [vmem:[%s1509_s1 + $0x20] sm:$0xff]   ;;  %v1072_v6 = vld [vmem:[%s1509_s1 + $0x18] sm:$0xff]   ;;  %v1073_v7 = vld [vmem:[%s1509_s1 + $0x10] sm:$0xff]  }
   0x3   :  { %973 = vmatpush3.bf16.msra.mxu0 %v1068_v0  ;;  %1060 = vmatpush3.bf16.msra.mxu1 %v1068_v0  ;;  %v1076_v4 = vld [vmem:[%s1510_s0] sm:$0xff]   ;;  %v1074_v8 = vld [vmem:[%s1509_s1 + $0x8] sm:$0xff]   ;;  %v1080_v12 = vld [vmem:[%s1510_s0 + $0x10] sm:$0xff]  }
   0x4   :  { %974 = vmatprep.subr.bf16.mxu0 %v1069_v1  ;;  %1053 = vmatprep.subr.bf16.mxu1 %v1069_v1  ;;  %v1077_v5 = vld [vmem:[%s1510_s0 + $0x80] sm:$0xff]   ;;  %v1078_v10 = vld [vmem:[%s1510_s0 + $0x8] sm:$0xff]   ;;  %v1081_v13 = vld [vmem:[%s1510_s0 + $0x90] sm:$0xff]  }
   0x5   :  { %988 = vmatprep.mubr.bf16.mxu0 %v1076_v4  ;;  %1020 = vmatprep.mubr.bf16.mxu1 %v1077_v5  ;;  %v1075_v9 = vld [vmem:[%s1509_s1] sm:$0xff]   ;;  %v1079_v11 = vld [vmem:[%s1510_s0 + $0x88] sm:$0xff]   ;;  %v1082_v14 = vld [vmem:[%s1510_s0 + $0x18] sm:$0xff]  }
   0x6   :  { %v1083_v15 = vld [vmem:[%s1510_s0 + $0x98] sm:$0xff]   ;;  %v1084_v16 = vld [vmem:[%s1510_s0 + $0x20] sm:$0xff]   ;;  %v1086_v18 = vld [vmem:[%s1510_s0 + $0x28] sm:$0xff]  }
   0x7   :  { %975 = vmatpush3.bf16.msra.mxu0 %v1069_v1  ;;  %1061 = vmatpush3.bf16.msra.mxu1 %v1069_v1  ;;  %v1085_v17 = vld [vmem:[%s1510_s0 + $0xa0] sm:$0xff]   ;;  %v1087_v19 = vld [vmem:[%s1510_s0 + $0xa8] sm:$0xff]   ;;  %v1088_v20 = vld [vmem:[%s1510_s0 + $0x30] sm:$0xff]  }
   0x8   :  { %976 = vmatprep.subr.bf16.mxu0 %v1070_v2  ;;  %1054 = vmatprep.subr.bf16.mxu1 %v1070_v2  ;;  %v1089_v21 = vld [vmem:[%s1510_s0 + $0xb0] sm:$0xff]   ;;  %v1090_v22 = vld [vmem:[%s1510_s0 + $0x38] sm:$0xff]   ;;  %v1092_v24 = vld [vmem:[%s1510_s0 + $0x40] sm:$0xff]  }
   0x9   :  { %v1091_v23 = vld [vmem:[%s1510_s0 + $0xb8] sm:$0xff]   ;;  %v1093_v25 = vld [vmem:[%s1510_s0 + $0xc0] sm:$0xff]   ;;  %v1094_v26 = vld [vmem:[%s1510_s0 + $0x48] sm:$0xff]  }
   0xa   :  { %v1095_v27 = vld [vmem:[%s1510_s0 + $0xc8] sm:$0xff]   ;;  %v1096_v28 = vld [vmem:[%s1510_s0 + $0x50] sm:$0xff]   ;;  %v1098_v30 = vld [vmem:[%s1510_s0 + $0x58] sm:$0xff]  }
   0xb   :  { %977 = vmatpush3.bf16.msra.mxu0 %v1070_v2  ;;  %1062 = vmatpush3.bf16.msra.mxu1 %v1070_v2  ;;  %v1097_v29 = vld [vmem:[%s1510_s0 + $0xd0] sm:$0xff]   ;;  %v1099_v31 = vld [vmem:[%s1510_s0 + $0xd8] sm:$0xff]   ;;  %v1100_v32 = vld [vmem:[%s1510_s0 + $0x60] sm:$0xff]  }
   0xc   :  { %978 = vmatprep.subr.bf16.mxu0 %v1071_v3  ;;  %1055 = vmatprep.subr.bf16.mxu1 %v1071_v3  ;;  %v1101_v33 = vld [vmem:[%s1510_s0 + $0xe0] sm:$0xff]   ;;  %v1102_v34 = vld [vmem:[%s1510_s0 + $0x68] sm:$0xff]   ;;  %v1104_v36 = vld [vmem:[%s1510_s0 + $0x70] sm:$0xff]  }
   0xd   :  { %v1103_v35 = vld [vmem:[%s1510_s0 + $0xe8] sm:$0xff]   ;;  %v1105_v37 = vld [vmem:[%s1510_s0 + $0xf0] sm:$0xff]   ;;  %v1106_v38 = vld [vmem:[%s1510_s0 + $0x78] sm:$0xff]  }
   0xe   :  { %v1107_v39 = vld [vmem:[%s1510_s0 + $0xf8] sm:$0xff]   ;;  %v1251_v40 = vld [vmem:[%s1511_s2] ss:$0 sm:$0xff] }
   0xf   :  { %979 = vmatpush3.bf16.msra.mxu0 %v1071_v3  ;;  %1063 = vmatpush3.bf16.msra.mxu1 %v1071_v3 }
  0x10   :  { %980 = vmatprep.subr.bf16.mxu0 %v1072_v6  ;;  %1056 = vmatprep.subr.bf16.mxu1 %v1072_v6 }
  0x13   :  { %981 = vmatpush3.bf16.msra.mxu0 %v1072_v6  ;;  %1064 = vmatpush3.bf16.msra.mxu1 %v1072_v6 }
  0x14   :  { %982 = vmatprep.subr.bf16.mxu0 %v1073_v7  ;;  %1057 = vmatprep.subr.bf16.mxu1 %v1073_v7 }
  0x17   :  { %983 = vmatpush3.bf16.msra.mxu0 %v1073_v7  ;;  %1065 = vmatpush3.bf16.msra.mxu1 %v1073_v7 }
  0x18   :  { %984 = vmatprep.subr.bf16.mxu0 %v1074_v8  ;;  %1058 = vmatprep.subr.bf16.mxu1 %v1074_v8 }
  0x1b   :  { %985 = vmatpush3.bf16.msra.mxu0 %v1074_v8  ;;  %1066 = vmatpush3.bf16.msra.mxu1 %v1074_v8 }
  0x1c   :  { %986 = vmatprep.subr.bf16.mxu0 %v1075_v9  ;;  %1059 = vmatprep.subr.bf16.mxu1 %v1075_v9 }
  0x1f   :  { %987 = vmatpush3.bf16.msra.mxu0 %v1075_v9  ;;  %1067 = vmatpush3.bf16.msra.mxu1 %v1075_v9 }
  0x22   :  { %989 = vmatmul.mubr.bf16.vlgmr.msra.gmra.mxu0 %v1078_v10  ;;  %1021 = vmatmul.mubr.bf16.vlgmr.msra.gmra.mxu1 %v1079_v11 }
  0x23   :  { %992 = vmatprep.mubr.bf16.mxu0 %v1080_v12  ;;  %1024 = vmatprep.mubr.bf16.mxu1 %v1081_v13 }
  0x2a   :  { %993 = vmatmul.mubr.bf16.gmra.mxu0 %v1082_v14  ;;  %1025 = vmatmul.mubr.bf16.gmra.mxu1 %v1083_v15 }
  0x2b   :  { %996 = vmatprep.mubr.bf16.mxu0 %v1084_v16  ;;  %1028 = vmatprep.mubr.bf16.mxu1 %v1085_v17 }
  0x32   :  { %997 = vmatmul.mubr.bf16.gmra.mxu0 %v1086_v18  ;;  %1029 = vmatmul.mubr.bf16.gmra.mxu1 %v1087_v19 }
  0x33   :  { %1000 = vmatprep.mubr.bf16.mxu0 %v1088_v20  ;;  %1032 = vmatprep.mubr.bf16.mxu1 %v1089_v21 }
  0x3a   :  { %1001 = vmatmul.mubr.bf16.gmra.mxu0 %v1090_v22  ;;  %1033 = vmatmul.mubr.bf16.gmra.mxu1 %v1091_v23 }
  0x3b   :  { %1004 = vmatprep.mubr.bf16.mxu0 %v1092_v24  ;;  %1036 = vmatprep.mubr.bf16.mxu1 %v1093_v25 }
  0x42   :  { %1005 = vmatmul.mubr.bf16.gmra.mxu0 %v1094_v26  ;;  %1037 = vmatmul.mubr.bf16.gmra.mxu1 %v1095_v27 }
  0x43   :  { %1008 = vmatprep.mubr.bf16.mxu0 %v1096_v28  ;;  %1040 = vmatprep.mubr.bf16.mxu1 %v1097_v29 }
  0x4a   :  { %1009 = vmatmul.mubr.bf16.gmra.mxu0 %v1098_v30  ;;  %1041 = vmatmul.mubr.bf16.gmra.mxu1 %v1099_v31 }
  0x4b   :  { %1012 = vmatprep.mubr.bf16.mxu0 %v1100_v32  ;;  %1044 = vmatprep.mubr.bf16.mxu1 %v1101_v33 }
  0x52   :  { %1013 = vmatmul.mubr.bf16.gmra.mxu0 %v1102_v34  ;;  %1045 = vmatmul.mubr.bf16.gmra.mxu1 %v1103_v35 }
  0x53   :  { %1016 = vmatprep.mubr.bf16.mxu0 %v1104_v36  ;;  %1048 = vmatprep.mubr.bf16.mxu1 %v1105_v37 }
  0x5a   :  { %1017 = vmatmul.mubr.bf16.gmra.mxu0 %v1106_v38  ;;  %1049 = vmatmul.mubr.bf16.gmra.mxu1 %v1107_v39 }
  0xe2   :  { %v990_v41 = vpop.f32.mrf.mxu0  ;;  %v1022_v42 = vpop.f32.mrf.mxu1 }
  0xe3   :  { %v385_v43 = vadd.f32 %v990_v41, %v1251_v40  ;;  %v513_v44 = vadd.f32 %v1022_v42, %v1251_v40 }
  0xe4   :  { %v376_v45 = vpop.f32.mrf.mxu0  ;;  %v504_v46 = vpop.f32.mrf.mxu1 }
  0xe5   :  { %vm633_vm0 = vcmp.gt.f32.partialorder %v385_v43, 0.0  ;;  %v697_v47 = vmul.f32 0.2, %v385_v43  ;;  %vm665_vm1 = vcmp.gt.f32.partialorder %v513_v44, 0.0  ;;  %v729_v48 = vmul.f32 0.2, %v513_v44 }
  0xe6   :  { %v377_v49 = vadd.f32 %v1251_v40, %v376_v45  ;;  %v505_v50 = vadd.f32 %v1251_v40, %v504_v46  ;;  %v991_v51 = vpop.f32.mrf.mxu0  ;;  %v1023_v52 = vpop.f32.mrf.mxu1 }
  0xe7   :  { %v761_v53 = vsel %vm633_vm0, %v385_v43, %v697_v47  ;;  %v793_v54 = vsel %vm665_vm1, %v513_v44, %v729_v48  ;;  %v388_v55 = vadd.f32 %v991_v51, %v1251_v40  ;;  %v516_v56 = vadd.f32 %v1023_v52, %v1251_v40 }
  0xe8   :  { %825 = vst [vmem:[%s1512_s3 + $0x10] sm:$0xff] %v761_v53  ;;  %857 = vst [vmem:[%s1512_s3 + $0x110] sm:$0xff] %v793_v54  ;;  %vm631_vm2 = vcmp.gt.f32.partialorder %v377_v49, 0.0  ;;  %v695_v57 = vmul.f32 0.2, %v377_v49  ;;  %vm663_vm3 = vcmp.gt.f32.partialorder %v505_v50, 0.0  ;;  %v379_v59 = vpop.f32.mrf.mxu0  ;;  %v507_v60 = vpop.f32.mrf.mxu1 }
  0xe9   :  { %v727_v58 = vmul.f32 0.2, %v505_v50  ;;  %vm634_vm4 = vcmp.gt.f32.partialorder %v388_v55, 0.0  ;;  %v698_v61 = vmul.f32 0.2, %v388_v55  ;;  %vm666_vm5 = vcmp.gt.f32.partialorder %v516_v56, 0.0 }
  0xea   :  { %v730_v62 = vmul.f32 0.2, %v516_v56  ;;  %v759_v63 = vsel %vm631_vm2, %v377_v49, %v695_v57  ;;  %v380_v1 = vadd.f32 %v1251_v40, %v379_v59  ;;  %v508_v2 = vadd.f32 %v1251_v40, %v507_v60  ;;  %v994_v3 = vpop.f32.mrf.mxu0  ;;  %v1026_v4 = vpop.f32.mrf.mxu1 }
  0xeb   :  { %v791_v0 = vsel %vm663_vm3, %v505_v50, %v727_v58  ;;  %823 = vst [vmem:[%s1512_s3] sm:$0xff] %v759_v63  ;;  %v762_v5 = vsel %vm634_vm4, %v388_v55, %v698_v61  ;;  %v401_v7 = vadd.f32 %v994_v3, %v1251_v40  ;;  %v529_v8 = vadd.f32 %v1026_v4, %v1251_v40 }
  0xec   :  { %855 = vst [vmem:[%s1512_s3 + $0x100] sm:$0xff] %v791_v0  ;;  %v794_v6 = vsel %vm666_vm5, %v516_v56, %v730_v62  ;;  %826 = vst [vmem:[%s1512_s3 + $0x18] sm:$0xff] %v762_v5  ;;  %vm632_vm6 = vcmp.gt.f32.partialorder %v380_v1, 0.0  ;;  %v696_v9 = vmul.f32 0.2, %v380_v1  ;;  %vm664_vm7 = vcmp.gt.f32.partialorder %v508_v2, 0.0  ;;  %v392_v11 = vpop.f32.mrf.mxu0  ;;  %v520_v12 = vpop.f32.mrf.mxu1 }
  0xed   :  { %858 = vst [vmem:[%s1512_s3 + $0x118] sm:$0xff] %v794_v6  ;;  %v728_v10 = vmul.f32 0.2, %v508_v2  ;;  %vm637_vm8 = vcmp.gt.f32.partialorder %v401_v7, 0.0  ;;  %v701_v13 = vmul.f32 0.2, %v401_v7  ;;  %v393_v17 = vadd.f32 %v1251_v40, %v392_v11 }
  0xee   :  { %vm669_vm9 = vcmp.gt.f32.partialorder %v529_v8, 0.0  ;;  %v733_v14 = vmul.f32 0.2, %v529_v8  ;;  %v760_v15 = vsel %vm632_vm6, %v380_v1, %v696_v9  ;;  %v521_v18 = vadd.f32 %v1251_v40, %v520_v12  ;;  %v995_v19 = vpop.f32.mrf.mxu0  ;;  %v1027_v20 = vpop.f32.mrf.mxu1 }
  0xef   :  { %v792_v16 = vsel %vm664_vm7, %v508_v2, %v728_v10  ;;  %824 = vst [vmem:[%s1512_s3 + $0x8] sm:$0xff] %v760_v15  ;;  %v765_v21 = vsel %vm637_vm8, %v401_v7, %v701_v13  ;;  %v404_v23 = vadd.f32 %v995_v19, %v1251_v40  ;;  %v532_v24 = vadd.f32 %v1027_v20, %v1251_v40 }
  0xf0   :  { %856 = vst [vmem:[%s1512_s3 + $0x108] sm:$0xff] %v792_v16  ;;  %v797_v22 = vsel %vm669_vm9, %v529_v8, %v733_v14  ;;  %829 = vst [vmem:[%s1512_s3 + $0x30] sm:$0xff] %v765_v21  ;;  %vm635_vm10 = vcmp.gt.f32.partialorder %v393_v17, 0.0  ;;  %v699_v25 = vmul.f32 0.2, %v393_v17  ;;  %vm667_vm11 = vcmp.gt.f32.partialorder %v521_v18, 0.0  ;;  %v395_v27 = vpop.f32.mrf.mxu0  ;;  %v523_v28 = vpop.f32.mrf.mxu1 }
  0xf1   :  { %861 = vst [vmem:[%s1512_s3 + $0x130] sm:$0xff] %v797_v22  ;;  %v731_v26 = vmul.f32 0.2, %v521_v18  ;;  %vm638_vm12 = vcmp.gt.f32.partialorder %v404_v23, 0.0  ;;  %v702_v29 = vmul.f32 0.2, %v404_v23  ;;  %v396_v33 = vadd.f32 %v1251_v40, %v395_v27 }
  0xf2   :  { %vm670_vm13 = vcmp.gt.f32.partialorder %v532_v24, 0.0  ;;  %v734_v30 = vmul.f32 0.2, %v532_v24  ;;  %v763_v31 = vsel %vm635_vm10, %v393_v17, %v699_v25  ;;  %v524_v34 = vadd.f32 %v1251_v40, %v523_v28  ;;  %v998_v35 = vpop.f32.mrf.mxu0  ;;  %v1030_v36 = vpop.f32.mrf.mxu1 }
  0xf3   :  { %v795_v32 = vsel %vm667_vm11, %v521_v18, %v731_v26  ;;  %827 = vst [vmem:[%s1512_s3 + $0x20] sm:$0xff] %v763_v31  ;;  %v766_v37 = vsel %vm638_vm12, %v404_v23, %v702_v29  ;;  %v417_v39 = vadd.f32 %v998_v35, %v1251_v40  ;;  %v545_v41 = vadd.f32 %v1030_v36, %v1251_v40 }
  0xf4   :  { %859 = vst [vmem:[%s1512_s3 + $0x120] sm:$0xff] %v795_v32  ;;  %v798_v38 = vsel %vm670_vm13, %v532_v24, %v734_v30  ;;  %830 = vst [vmem:[%s1512_s3 + $0x38] sm:$0xff] %v766_v37  ;;  %vm636_vm14 = vcmp.gt.f32.partialorder %v396_v33, 0.0  ;;  %v700_v42 = vmul.f32 0.2, %v396_v33  ;;  %vm668_vm15 = vcmp.gt.f32.partialorder %v524_v34, 0.0  ;;  %v408_v44 = vpop.f32.mrf.mxu0  ;;  %v536_v45 = vpop.f32.mrf.mxu1 }
  0xf5   :  { %862 = vst [vmem:[%s1512_s3 + $0x138] sm:$0xff] %v798_v38  ;;  %v732_v43 = vmul.f32 0.2, %v524_v34  ;;  %vm641_vm0 = vcmp.gt.f32.partialorder %v417_v39, 0.0  ;;  %v705_v46 = vmul.f32 0.2, %v417_v39  ;;  %v409_v50 = vadd.f32 %v1251_v40, %v408_v44 }
  0xf6   :  { %vm673_vm1 = vcmp.gt.f32.partialorder %v545_v41, 0.0  ;;  %v737_v47 = vmul.f32 0.2, %v545_v41  ;;  %v764_v48 = vsel %vm636_vm14, %v396_v33, %v700_v42  ;;  %v537_v51 = vadd.f32 %v1251_v40, %v536_v45  ;;  %v999_v52 = vpop.f32.mrf.mxu0  ;;  %v1031_v53 = vpop.f32.mrf.mxu1 }
  0xf7   :  { %v796_v49 = vsel %vm668_vm15, %v524_v34, %v732_v43  ;;  %828 = vst [vmem:[%s1512_s3 + $0x28] sm:$0xff] %v764_v48  ;;  %v769_v54 = vsel %vm641_vm0, %v417_v39, %v705_v46  ;;  %v420_v56 = vadd.f32 %v999_v52, %v1251_v40  ;;  %v548_v57 = vadd.f32 %v1031_v53, %v1251_v40 }
  0xf8   :  { %860 = vst [vmem:[%s1512_s3 + $0x128] sm:$0xff] %v796_v49  ;;  %v801_v55 = vsel %vm673_vm1, %v545_v41, %v737_v47  ;;  %833 = vst [vmem:[%s1512_s3 + $0x50] sm:$0xff] %v769_v54  ;;  %vm639_vm2 = vcmp.gt.f32.partialorder %v409_v50, 0.0  ;;  %v703_v58 = vmul.f32 0.2, %v409_v50  ;;  %vm671_vm3 = vcmp.gt.f32.partialorder %v537_v51, 0.0  ;;  %v411_v60 = vpop.f32.mrf.mxu0  ;;  %v539_v61 = vpop.f32.mrf.mxu1 }
  0xf9   :  { %865 = vst [vmem:[%s1512_s3 + $0x150] sm:$0xff] %v801_v55  ;;  %v735_v59 = vmul.f32 0.2, %v537_v51  ;;  %vm642_vm4 = vcmp.gt.f32.partialorder %v420_v56, 0.0  ;;  %v706_v62 = vmul.f32 0.2, %v420_v56  ;;  %v412_v2 = vadd.f32 %v1251_v40, %v411_v60 }
  0xfa   :  { %vm674_vm5 = vcmp.gt.f32.partialorder %v548_v57, 0.0  ;;  %v738_v63 = vmul.f32 0.2, %v548_v57  ;;  %v767_v0 = vsel %vm639_vm2, %v409_v50, %v703_v58  ;;  %v540_v3 = vadd.f32 %v1251_v40, %v539_v61  ;;  %v1002_v4 = vpop.f32.mrf.mxu0  ;;  %v1034_v5 = vpop.f32.mrf.mxu1 }
  0xfb   :  { %v799_v1 = vsel %vm671_vm3, %v537_v51, %v735_v59  ;;  %831 = vst [vmem:[%s1512_s3 + $0x40] sm:$0xff] %v767_v0  ;;  %v770_v6 = vsel %vm642_vm4, %v420_v56, %v706_v62  ;;  %v433_v8 = vadd.f32 %v1002_v4, %v1251_v40  ;;  %v561_v9 = vadd.f32 %v1034_v5, %v1251_v40 }
  0xfc   :  { %863 = vst [vmem:[%s1512_s3 + $0x140] sm:$0xff] %v799_v1  ;;  %v802_v7 = vsel %vm674_vm5, %v548_v57, %v738_v63  ;;  %834 = vst [vmem:[%s1512_s3 + $0x58] sm:$0xff] %v770_v6  ;;  %vm640_vm6 = vcmp.gt.f32.partialorder %v412_v2, 0.0  ;;  %v704_v10 = vmul.f32 0.2, %v412_v2  ;;  %vm672_vm7 = vcmp.gt.f32.partialorder %v540_v3, 0.0  ;;  %v424_v12 = vpop.f32.mrf.mxu0  ;;  %v552_v13 = vpop.f32.mrf.mxu1 }
  0xfd   :  { %866 = vst [vmem:[%s1512_s3 + $0x158] sm:$0xff] %v802_v7  ;;  %v736_v11 = vmul.f32 0.2, %v540_v3  ;;  %vm645_vm8 = vcmp.gt.f32.partialorder %v433_v8, 0.0  ;;  %v709_v14 = vmul.f32 0.2, %v433_v8  ;;  %v425_v18 = vadd.f32 %v1251_v40, %v424_v12 }
  0xfe   :  { %vm677_vm9 = vcmp.gt.f32.partialorder %v561_v9, 0.0  ;;  %v741_v15 = vmul.f32 0.2, %v561_v9  ;;  %v768_v16 = vsel %vm640_vm6, %v412_v2, %v704_v10  ;;  %v553_v19 = vadd.f32 %v1251_v40, %v552_v13  ;;  %v1003_v20 = vpop.f32.mrf.mxu0  ;;  %v1035_v21 = vpop.f32.mrf.mxu1 }
  0xff   :  { %v800_v17 = vsel %vm672_vm7, %v540_v3, %v736_v11  ;;  %832 = vst [vmem:[%s1512_s3 + $0x48] sm:$0xff] %v768_v16  ;;  %v773_v22 = vsel %vm645_vm8, %v433_v8, %v709_v14  ;;  %v436_v24 = vadd.f32 %v1003_v20, %v1251_v40  ;;  %v564_v25 = vadd.f32 %v1035_v21, %v1251_v40 }
 0x100   :  { %864 = vst [vmem:[%s1512_s3 + $0x148] sm:$0xff] %v800_v17  ;;  %v805_v23 = vsel %vm677_vm9, %v561_v9, %v741_v15  ;;  %837 = vst [vmem:[%s1512_s3 + $0x70] sm:$0xff] %v773_v22  ;;  %vm643_vm10 = vcmp.gt.f32.partialorder %v425_v18, 0.0  ;;  %v707_v26 = vmul.f32 0.2, %v425_v18  ;;  %vm675_vm11 = vcmp.gt.f32.partialorder %v553_v19, 0.0  ;;  %v427_v28 = vpop.f32.mrf.mxu0  ;;  %v555_v29 = vpop.f32.mrf.mxu1 }
 0x101   :  { %869 = vst [vmem:[%s1512_s3 + $0x170] sm:$0xff] %v805_v23  ;;  %v739_v27 = vmul.f32 0.2, %v553_v19  ;;  %vm646_vm12 = vcmp.gt.f32.partialorder %v436_v24, 0.0  ;;  %v710_v30 = vmul.f32 0.2, %v436_v24  ;;  %v428_v34 = vadd.f32 %v1251_v40, %v427_v28 }
 0x102   :  { %vm678_vm13 = vcmp.gt.f32.partialorder %v564_v25, 0.0  ;;  %v742_v31 = vmul.f32 0.2, %v564_v25  ;;  %v771_v32 = vsel %vm643_vm10, %v425_v18, %v707_v26  ;;  %v556_v35 = vadd.f32 %v1251_v40, %v555_v29  ;;  %v1006_v36 = vpop.f32.mrf.mxu0  ;;  %v1038_v37 = vpop.f32.mrf.mxu1 }
 0x103   :  { %v803_v33 = vsel %vm675_vm11, %v553_v19, %v739_v27  ;;  %835 = vst [vmem:[%s1512_s3 + $0x60] sm:$0xff] %v771_v32  ;;  %v774_v38 = vsel %vm646_vm12, %v436_v24, %v710_v30  ;;  %v449_v41 = vadd.f32 %v1006_v36, %v1251_v40  ;;  %v577_v42 = vadd.f32 %v1038_v37, %v1251_v40 }
 0x104   :  { %867 = vst [vmem:[%s1512_s3 + $0x160] sm:$0xff] %v803_v33  ;;  %v806_v39 = vsel %vm678_vm13, %v564_v25, %v742_v31  ;;  %838 = vst [vmem:[%s1512_s3 + $0x78] sm:$0xff] %v774_v38  ;;  %vm644_vm14 = vcmp.gt.f32.partialorder %v428_v34, 0.0  ;;  %v708_v43 = vmul.f32 0.2, %v428_v34  ;;  %vm676_vm15 = vcmp.gt.f32.partialorder %v556_v35, 0.0  ;;  %v440_v45 = vpop.f32.mrf.mxu0  ;;  %v568_v46 = vpop.f32.mrf.mxu1 }
 0x105   :  { %870 = vst [vmem:[%s1512_s3 + $0x178] sm:$0xff] %v806_v39  ;;  %v740_v44 = vmul.f32 0.2, %v556_v35  ;;  %vm649_vm0 = vcmp.gt.f32.partialorder %v449_v41, 0.0  ;;  %v713_v47 = vmul.f32 0.2, %v449_v41  ;;  %v441_v51 = vadd.f32 %v1251_v40, %v440_v45 }
 0x106   :  { %vm681_vm1 = vcmp.gt.f32.partialorder %v577_v42, 0.0  ;;  %v745_v48 = vmul.f32 0.2, %v577_v42  ;;  %v772_v49 = vsel %vm644_vm14, %v428_v34, %v708_v43  ;;  %v569_v52 = vadd.f32 %v1251_v40, %v568_v46  ;;  %v1007_v53 = vpop.f32.mrf.mxu0  ;;  %v1039_v54 = vpop.f32.mrf.mxu1 }
 0x107   :  { %v804_v50 = vsel %vm676_vm15, %v556_v35, %v740_v44  ;;  %836 = vst [vmem:[%s1512_s3 + $0x68] sm:$0xff] %v772_v49  ;;  %v777_v55 = vsel %vm649_vm0, %v449_v41, %v713_v47  ;;  %v452_v57 = vadd.f32 %v1007_v53, %v1251_v40  ;;  %v580_v58 = vadd.f32 %v1039_v54, %v1251_v40 }
 0x108   :  { %868 = vst [vmem:[%s1512_s3 + $0x168] sm:$0xff] %v804_v50  ;;  %v809_v56 = vsel %vm681_vm1, %v577_v42, %v745_v48  ;;  %841 = vst [vmem:[%s1512_s3 + $0x90] sm:$0xff] %v777_v55  ;;  %vm647_vm2 = vcmp.gt.f32.partialorder %v441_v51, 0.0  ;;  %v711_v59 = vmul.f32 0.2, %v441_v51  ;;  %vm679_vm3 = vcmp.gt.f32.partialorder %v569_v52, 0.0  ;;  %v443_v61 = vpop.f32.mrf.mxu0  ;;  %v571_v62 = vpop.f32.mrf.mxu1 }
 0x109   :  { %873 = vst [vmem:[%s1512_s3 + $0x190] sm:$0xff] %v809_v56  ;;  %v743_v60 = vmul.f32 0.2, %v569_v52  ;;  %vm650_vm4 = vcmp.gt.f32.partialorder %v452_v57, 0.0  ;;  %v714_v63 = vmul.f32 0.2, %v452_v57  ;;  %v444_v3 = vadd.f32 %v1251_v40, %v443_v61 }
 0x10a   :  { %vm682_vm5 = vcmp.gt.f32.partialorder %v580_v58, 0.0  ;;  %v746_v0 = vmul.f32 0.2, %v580_v58  ;;  %v775_v1 = vsel %vm647_vm2, %v441_v51, %v711_v59  ;;  %v572_v4 = vadd.f32 %v1251_v40, %v571_v62  ;;  %v1010_v5 = vpop.f32.mrf.mxu0  ;;  %v1042_v6 = vpop.f32.mrf.mxu1 }
 0x10b   :  { %v807_v2 = vsel %vm679_vm3, %v569_v52, %v743_v60  ;;  %839 = vst [vmem:[%s1512_s3 + $0x80] sm:$0xff] %v775_v1  ;;  %v778_v7 = vsel %vm650_vm4, %v452_v57, %v714_v63  ;;  %v465_v9 = vadd.f32 %v1010_v5, %v1251_v40  ;;  %v593_v10 = vadd.f32 %v1042_v6, %v1251_v40 }
 0x10c   :  { %871 = vst [vmem:[%s1512_s3 + $0x180] sm:$0xff] %v807_v2  ;;  %v810_v8 = vsel %vm682_vm5, %v580_v58, %v746_v0  ;;  %842 = vst [vmem:[%s1512_s3 + $0x98] sm:$0xff] %v778_v7  ;;  %vm648_vm6 = vcmp.gt.f32.partialorder %v444_v3, 0.0  ;;  %v712_v11 = vmul.f32 0.2, %v444_v3  ;;  %vm680_vm7 = vcmp.gt.f32.partialorder %v572_v4, 0.0  ;;  %v456_v13 = vpop.f32.mrf.mxu0  ;;  %v584_v14 = vpop.f32.mrf.mxu1 }
 0x10d   :  { %874 = vst [vmem:[%s1512_s3 + $0x198] sm:$0xff] %v810_v8  ;;  %v744_v12 = vmul.f32 0.2, %v572_v4  ;;  %vm653_vm8 = vcmp.gt.f32.partialorder %v465_v9, 0.0  ;;  %v717_v15 = vmul.f32 0.2, %v465_v9  ;;  %v457_v19 = vadd.f32 %v1251_v40, %v456_v13 }
 0x10e   :  { %vm685_vm9 = vcmp.gt.f32.partialorder %v593_v10, 0.0  ;;  %v749_v16 = vmul.f32 0.2, %v593_v10  ;;  %v776_v17 = vsel %vm648_vm6, %v444_v3, %v712_v11  ;;  %v585_v20 = vadd.f32 %v1251_v40, %v584_v14  ;;  %v1011_v21 = vpop.f32.mrf.mxu0  ;;  %v1043_v22 = vpop.f32.mrf.mxu1 }
 0x10f   :  { %v808_v18 = vsel %vm680_vm7, %v572_v4, %v744_v12  ;;  %840 = vst [vmem:[%s1512_s3 + $0x88] sm:$0xff] %v776_v17  ;;  %v781_v23 = vsel %vm653_vm8, %v465_v9, %v717_v15  ;;  %v468_v25 = vadd.f32 %v1011_v21, %v1251_v40  ;;  %v596_v26 = vadd.f32 %v1043_v22, %v1251_v40 }
 0x110   :  { %872 = vst [vmem:[%s1512_s3 + $0x188] sm:$0xff] %v808_v18  ;;  %v813_v24 = vsel %vm685_vm9, %v593_v10, %v749_v16  ;;  %845 = vst [vmem:[%s1512_s3 + $0xb0] sm:$0xff] %v781_v23  ;;  %vm651_vm10 = vcmp.gt.f32.partialorder %v457_v19, 0.0  ;;  %v715_v27 = vmul.f32 0.2, %v457_v19  ;;  %vm683_vm11 = vcmp.gt.f32.partialorder %v585_v20, 0.0  ;;  %v459_v29 = vpop.f32.mrf.mxu0  ;;  %v587_v30 = vpop.f32.mrf.mxu1 }
 0x111   :  { %877 = vst [vmem:[%s1512_s3 + $0x1b0] sm:$0xff] %v813_v24  ;;  %v747_v28 = vmul.f32 0.2, %v585_v20  ;;  %vm654_vm12 = vcmp.gt.f32.partialorder %v468_v25, 0.0  ;;  %v718_v31 = vmul.f32 0.2, %v468_v25  ;;  %v460_v35 = vadd.f32 %v1251_v40, %v459_v29 }
 0x112   :  { %vm686_vm13 = vcmp.gt.f32.partialorder %v596_v26, 0.0  ;;  %v750_v32 = vmul.f32 0.2, %v596_v26  ;;  %v779_v33 = vsel %vm651_vm10, %v457_v19, %v715_v27  ;;  %v588_v36 = vadd.f32 %v1251_v40, %v587_v30  ;;  %v1014_v37 = vpop.f32.mrf.mxu0  ;;  %v1046_v38 = vpop.f32.mrf.mxu1 }
 0x113   :  { %v811_v34 = vsel %vm683_vm11, %v585_v20, %v747_v28  ;;  %843 = vst [vmem:[%s1512_s3 + $0xa0] sm:$0xff] %v779_v33  ;;  %v782_v39 = vsel %vm654_vm12, %v468_v25, %v718_v31  ;;  %v481_v42 = vadd.f32 %v1014_v37, %v1251_v40  ;;  %v609_v43 = vadd.f32 %v1046_v38, %v1251_v40 }
 0x114   :  { %875 = vst [vmem:[%s1512_s3 + $0x1a0] sm:$0xff] %v811_v34  ;;  %v814_v41 = vsel %vm686_vm13, %v596_v26, %v750_v32  ;;  %846 = vst [vmem:[%s1512_s3 + $0xb8] sm:$0xff] %v782_v39  ;;  %vm652_vm14 = vcmp.gt.f32.partialorder %v460_v35, 0.0  ;;  %v716_v44 = vmul.f32 0.2, %v460_v35  ;;  %vm684_vm15 = vcmp.gt.f32.partialorder %v588_v36, 0.0  ;;  %v472_v46 = vpop.f32.mrf.mxu0  ;;  %v600_v47 = vpop.f32.mrf.mxu1 }
 0x115   :  { %878 = vst [vmem:[%s1512_s3 + $0x1b8] sm:$0xff] %v814_v41  ;;  %v748_v45 = vmul.f32 0.2, %v588_v36  ;;  %vm657_vm0 = vcmp.gt.f32.partialorder %v481_v42, 0.0  ;;  %v721_v48 = vmul.f32 0.2, %v481_v42  ;;  %v473_v52 = vadd.f32 %v1251_v40, %v472_v46 }
 0x116   :  { %vm689_vm1 = vcmp.gt.f32.partialorder %v609_v43, 0.0  ;;  %v753_v49 = vmul.f32 0.2, %v609_v43  ;;  %v780_v50 = vsel %vm652_vm14, %v460_v35, %v716_v44  ;;  %v601_v53 = vadd.f32 %v1251_v40, %v600_v47  ;;  %v1015_v54 = vpop.f32.mrf.mxu0  ;;  %v1047_v55 = vpop.f32.mrf.mxu1 }
 0x117   :  { %v812_v51 = vsel %vm684_vm15, %v588_v36, %v748_v45  ;;  %844 = vst [vmem:[%s1512_s3 + $0xa8] sm:$0xff] %v780_v50  ;;  %v785_v56 = vsel %vm657_vm0, %v481_v42, %v721_v48  ;;  %v484_v58 = vadd.f32 %v1015_v54, %v1251_v40  ;;  %v612_v59 = vadd.f32 %v1047_v55, %v1251_v40 }
 0x118   :  { %876 = vst [vmem:[%s1512_s3 + $0x1a8] sm:$0xff] %v812_v51  ;;  %v817_v57 = vsel %vm689_vm1, %v609_v43, %v753_v49  ;;  %849 = vst [vmem:[%s1512_s3 + $0xd0] sm:$0xff] %v785_v56  ;;  %vm655_vm2 = vcmp.gt.f32.partialorder %v473_v52, 0.0  ;;  %v719_v60 = vmul.f32 0.2, %v473_v52  ;;  %vm687_vm3 = vcmp.gt.f32.partialorder %v601_v53, 0.0  ;;  %v475_v62 = vpop.f32.mrf.mxu0  ;;  %v603_v63 = vpop.f32.mrf.mxu1 }
 0x119   :  { %881 = vst [vmem:[%s1512_s3 + $0x1d0] sm:$0xff] %v817_v57  ;;  %v751_v61 = vmul.f32 0.2, %v601_v53  ;;  %vm658_vm4 = vcmp.gt.f32.partialorder %v484_v58, 0.0  ;;  %v722_v0 = vmul.f32 0.2, %v484_v58  ;;  %v476_v4 = vadd.f32 %v1251_v40, %v475_v62 }
 0x11a   :  { %vm690_vm5 = vcmp.gt.f32.partialorder %v612_v59, 0.0  ;;  %v754_v1 = vmul.f32 0.2, %v612_v59  ;;  %v783_v2 = vsel %vm655_vm2, %v473_v52, %v719_v60  ;;  %v604_v5 = vadd.f32 %v1251_v40, %v603_v63  ;;  %v1018_v6 = vpop.f32.mrf.mxu0  ;;  %v1050_v7 = vpop.f32.mrf.mxu1 }
 0x11b   :  { %v815_v3 = vsel %vm687_vm3, %v601_v53, %v751_v61  ;;  %847 = vst [vmem:[%s1512_s3 + $0xc0] sm:$0xff] %v783_v2  ;;  %v786_v8 = vsel %vm658_vm4, %v484_v58, %v722_v0  ;;  %v497_v10 = vadd.f32 %v1018_v6, %v1251_v40  ;;  %v625_v11 = vadd.f32 %v1050_v7, %v1251_v40 }
 0x11c   :  { %879 = vst [vmem:[%s1512_s3 + $0x1c0] sm:$0xff] %v815_v3  ;;  %v818_v9 = vsel %vm690_vm5, %v612_v59, %v754_v1  ;;  %850 = vst [vmem:[%s1512_s3 + $0xd8] sm:$0xff] %v786_v8  ;;  %vm656_vm6 = vcmp.gt.f32.partialorder %v476_v4, 0.0  ;;  %v720_v12 = vmul.f32 0.2, %v476_v4  ;;  %vm688_vm7 = vcmp.gt.f32.partialorder %v604_v5, 0.0  ;;  %v488_v14 = vpop.f32.mrf.mxu0  ;;  %v616_v15 = vpop.f32.mrf.mxu1 }
 0x11d   :  { %882 = vst [vmem:[%s1512_s3 + $0x1d8] sm:$0xff] %v818_v9  ;;  %v752_v13 = vmul.f32 0.2, %v604_v5  ;;  %vm661_vm8 = vcmp.gt.f32.partialorder %v497_v10, 0.0  ;;  %v725_v16 = vmul.f32 0.2, %v497_v10  ;;  %v489_v20 = vadd.f32 %v1251_v40, %v488_v14 }
 0x11e   :  { %vm693_vm9 = vcmp.gt.f32.partialorder %v625_v11, 0.0  ;;  %v757_v17 = vmul.f32 0.2, %v625_v11  ;;  %v784_v18 = vsel %vm656_vm6, %v476_v4, %v720_v12  ;;  %v617_v21 = vadd.f32 %v1251_v40, %v616_v15  ;;  %v1019_v22 = vpop.f32.mrf.mxu0  ;;  %v1051_v23 = vpop.f32.mrf.mxu1 }
 0x11f   :  { %v816_v19 = vsel %vm688_vm7, %v604_v5, %v752_v13  ;;  %848 = vst [vmem:[%s1512_s3 + $0xc8] sm:$0xff] %v784_v18  ;;  %v789_v24 = vsel %vm661_vm8, %v497_v10, %v725_v16  ;;  %v500_v26 = vadd.f32 %v1019_v22, %v1251_v40  ;;  %v628_v27 = vadd.f32 %v1051_v23, %v1251_v40 }
 0x120   :  { %880 = vst [vmem:[%s1512_s3 + $0x1c8] sm:$0xff] %v816_v19  ;;  %v821_v25 = vsel %vm693_vm9, %v625_v11, %v757_v17  ;;  %853 = vst [vmem:[%s1512_s3 + $0xf0] sm:$0xff] %v789_v24  ;;  %vm659_vm10 = vcmp.gt.f32.partialorder %v489_v20, 0.0  ;;  %v723_v28 = vmul.f32 0.2, %v489_v20  ;;  %vm691_vm11 = vcmp.gt.f32.partialorder %v617_v21, 0.0  ;;  %v491_v30 = vpop.f32.mrf.mxu0  ;;  %v619_v31 = vpop.f32.mrf.mxu1 }
 0x121   :  { %885 = vst [vmem:[%s1512_s3 + $0x1f0] sm:$0xff] %v821_v25  ;;  %v755_v29 = vmul.f32 0.2, %v617_v21  ;;  %vm662_vm12 = vcmp.gt.f32.partialorder %v500_v26, 0.0  ;;  %v726_v32 = vmul.f32 0.2, %v500_v26  ;;  %v492_v36 = vadd.f32 %v1251_v40, %v491_v30 }
 0x122   :  { %vm694_vm13 = vcmp.gt.f32.partialorder %v628_v27, 0.0  ;;  %v758_v33 = vmul.f32 0.2, %v628_v27  ;;  %v787_v34 = vsel %vm659_vm10, %v489_v20, %v723_v28  ;;  %v620_v37 = vadd.f32 %v1251_v40, %v619_v31 }
 0x123   :  { %v819_v35 = vsel %vm691_vm11, %v617_v21, %v755_v29  ;;  %851 = vst [vmem:[%s1512_s3 + $0xe0] sm:$0xff] %v787_v34  ;;  %v790_v38 = vsel %vm662_vm12, %v500_v26, %v726_v32  ;;  %vm660_vm14 = vcmp.gt.f32.partialorder %v492_v36, 0.0  ;;  %v724_v40 = vmul.f32 0.2, %v492_v36 }
 0x124   :  { %883 = vst [vmem:[%s1512_s3 + $0x1e0] sm:$0xff] %v819_v35  ;;  %v822_v39 = vsel %vm694_vm13, %v628_v27, %v758_v33  ;;  %854 = vst [vmem:[%s1512_s3 + $0xf8] sm:$0xff] %v790_v38  ;;  %vm692_vm15 = vcmp.gt.f32.partialorder %v620_v37, 0.0  ;;  %v756_v41 = vmul.f32 0.2, %v620_v37 }
 0x125   :  { %886 = vst [vmem:[%s1512_s3 + $0x1f8] sm:$0xff] %v822_v39  ;;  %v788_v42 = vsel %vm660_vm14, %v492_v36, %v724_v40 }
 0x126   :  { %v820_v43 = vsel %vm692_vm15, %v620_v37, %v756_v41  ;;  %852 = vst [vmem:[%s1512_s3 + $0xe8] sm:$0xff] %v788_v42 }
 0x127   :  { %884 = vst [vmem:[%s1512_s3 + $0x1e8] sm:$0xff] %v820_v43 }

// kernel: cvae_forward.11
= control target key start
LH: loop header
LB: loop body
LE: loop exit
PB: predicated region body
PF: predicated region fallthrough
CT: control target
= control target key end

     0   :  { %s1086_s1 = inlined_call_operand.vmem [shape: bf16[1,384,128], index: 1, kind: input, shape index: {}]   ;;  %s1087_s0 = inlined_call_operand.vmem [shape: bf16[1,128,384], index: 0, kind: input, shape index: {}]   ;;  %s1088_s2 = inlined_call_operand.vmem [shape: f32[1,1,128], index: 2, kind: input, shape index: {}]   ;;  %s1089_s3 = inlined_call_operand.vmem [shape: f32[1,128,128], index: 3, kind: output, shape index: {}]  }
   0x1   :  { %v797_v0 = vld [vmem:[%s1086_s1 + $0x78] sm:$0xff]   ;;  %v799_v2 = vld [vmem:[%s1086_s1 + $0x70] sm:$0xff]   ;;  %v802_v5 = vld [vmem:[%s1086_s1 + $0x68] sm:$0xff]  }
   0x2   :  { %v798_v1 = vld [vmem:[%s1086_s1 + $0x38] sm:$0xff]   ;;  %685 = vmatprep.subr.bf16.mxu0 %v797_v0  ;;  %v801_v4 = vld [vmem:[%s1086_s1 + $0x30] sm:$0xff]   ;;  %v804_v7 = vld [vmem:[%s1086_s1 + $0x28] sm:$0xff]  }
   0x3   :  { %686 = vmatpush3.bf16.msra.mxu0 %v798_v1  ;;  %v800_v3 = vld [vmem:[%s1086_s1 + $0xb8] sm:$0xff]   ;;  %v803_v6 = vld [vmem:[%s1086_s1 + $0xb0] sm:$0xff]   ;;  %v805_v8 = vld [vmem:[%s1086_s1 + $0x60] sm:$0xff]  }
   0x4   :  { %687 = vmatprep.subr.bf16.mxu0 %v799_v2  ;;  %765 = vmatprep.subr.bf16.mxu1 %v800_v3  ;;  %v806_v9 = vld [vmem:[%s1086_s1 + $0xa8] sm:$0xff]   ;;  %v807_v10 = vld [vmem:[%s1086_s1 + $0x20] sm:$0xff]   ;;  %v808_v11 = vld [vmem:[%s1086_s1 + $0x58] sm:$0xff]  }
   0x5   :  { %766 = vmatpush3.bf16.msra.mxu1 %v800_v3  ;;  %v809_v12 = vld [vmem:[%s1086_s1 + $0xa0] sm:$0xff]   ;;  %v810_v13 = vld [vmem:[%s1086_s1 + $0x18] sm:$0xff]   ;;  %v811_v15 = vld [vmem:[%s1086_s1 + $0x50] sm:$0xff]  }
   0x6   :  { %767 = vmatprep.subr.bf16.mxu1 %v803_v6  ;;  %v812_v14 = vld [vmem:[%s1086_s1 + $0x98] sm:$0xff]   ;;  %v813_v16 = vld [vmem:[%s1086_s1 + $0x10] sm:$0xff]   ;;  %v814_v18 = vld [vmem:[%s1086_s1 + $0x48] sm:$0xff]  }
   0x7   :  { %688 = vmatpush3.bf16.msra.mxu0 %v801_v4  ;;  %v815_v17 = vld [vmem:[%s1086_s1 + $0x90] sm:$0xff]   ;;  %v816_v19 = vld [vmem:[%s1086_s1 + $0x8] sm:$0xff]   ;;  %v817_v20 = vld [vmem:[%s1086_s1 + $0x40] sm:$0xff]  }
   0x8   :  { %689 = vmatprep.subr.bf16.mxu0 %v802_v5  ;;  %v818_v21 = vld [vmem:[%s1086_s1 + $0x88] sm:$0xff]   ;;  %v822_v22 = vld [vmem:[%s1087_s0 + $0x4] ss:$12 sps:$4 sm:$0xff]   ;;  %v829_v31 = vld [vmem:[%s1087_s0 + $0x34] ss:$12 sps:$4 sm:$0xff]  }
   0x9   :  { %768 = vmatpush3.bf16.msra.mxu1 %v803_v6  ;;  %v819_v23 = vld [vmem:[%s1086_s1] sm:$0xff]   ;;  %406 = vmatprep.mubr.bf16.mxu0 %v822_v22  ;;  %v824_v24 = vld [vmem:[%s1087_s0 + $0x8] ss:$12 sps:$4 sm:$0xff]   ;;  %v833_v32 = vld [vmem:[%s1087_s0 + $0x50] ss:$12 sps:$4 sm:$0xff]  }
   0xa   :  { %769 = vmatprep.subr.bf16.mxu1 %v806_v9  ;;  %v823_v25 = vld [vmem:[%s1086_s1 + $0x80] sm:$0xff]   ;;  %781 = vmatprep.mubr.bf16.mxu1 %v824_v24  ;;  %v826_v27 = vld [vmem:[%s1087_s0 + $0x1c] ss:$12 sps:$4 sm:$0xff]   ;;  %v834_v35 = vld [vmem:[%s1087_s0 + $0x4c] ss:$12 sps:$4 sm:$0xff]  }
   0xb   :  { %690 = vmatpush3.bf16.msra.mxu0 %v804_v7  ;;  %v820_v26 = vld [vmem:[%s1087_s0] ss:$12 sps:$4 sm:$0xff]   ;;  %v832_v29 = vld [vmem:[%s1087_s0 + $0x38] ss:$12 sps:$4 sm:$0xff]   ;;  %v840_v33 = vld [vmem:[%s1087_s0 + $0x68] ss:$12 sps:$4 sm:$0xff]  }
   0xc   :  { %691 = vmatprep.subr.bf16.mxu0 %v805_v8  ;;  %v825_v28 = vld [vmem:[%s1087_s0 + $0x20] ss:$12 sps:$4 sm:$0xff]   ;;  %v828_v30 = vld [vmem:[%s1087_s0 + $0x18] ss:$12 sps:$4 sm:$0xff]   ;;  %v831_v34 = vld [vmem:[%s1087_s0 + $0x30] ss:$12 sps:$4 sm:$0xff]  }
   0xd   :  { %770 = vmatpush3.bf16.msra.mxu1 %v806_v9  ;;  %v841_v36 = vld [vmem:[%s1087_s0 + $0x80] ss:$12 sps:$4 sm:$0xff]   ;;  %v848_v37 = vld [vmem:[%s1087_s0 + $0x98] ss:$12 sps:$4 sm:$0xff]   ;;  %v836_v38 = vld [vmem:[%s1087_s0 + $0x48] ss:$12 sps:$4 sm:$0xff]  }
   0xe   :  { %771 = vmatprep.subr.bf16.mxu1 %v809_v12  ;;  %v837_v39 = vld [vmem:[%s1087_s0 + $0x64] ss:$12 sps:$4 sm:$0xff]   ;;  %v839_v41 = vld [vmem:[%s1087_s0 + $0x60] ss:$12 sps:$4 sm:$0xff]   ;;  %v842_v42 = vld [vmem:[%s1087_s0 + $0x7c] ss:$12 sps:$4 sm:$0xff]  }
   0xf   :  { %692 = vmatpush3.bf16.msra.mxu0 %v807_v10  ;;  %v849_v40 = vld [vmem:[%s1087_s0 + $0xb0] ss:$12 sps:$4 sm:$0xff]   ;;  %v844_v43 = vld [vmem:[%s1087_s0 + $0x78] ss:$12 sps:$4 sm:$0xff]   ;;  %v845_v44 = vld [vmem:[%s1087_s0 + $0x94] ss:$12 sps:$4 sm:$0xff]  }
  0x10   :  { %693 = vmatprep.subr.bf16.mxu0 %v808_v11  ;;  %v847_v45 = vld [vmem:[%s1087_s0 + $0x90] ss:$12 sps:$4 sm:$0xff]   ;;  %v850_v46 = vld [vmem:[%s1087_s0 + $0xac] ss:$12 sps:$4 sm:$0xff]   ;;  %v852_v47 = vld [vmem:[%s1087_s0 + $0xa8] ss:$12 sps:$4 sm:$0xff]  }
  0x11   :  { %772 = vmatpush3.bf16.msra.mxu1 %v809_v12  ;;  %v1020_v50 = vld [vmem:[%s1088_s2] ss:$0 sm:$0xff] }
  0x12   :  { %773 = vmatprep.subr.bf16.mxu1 %v812_v14 }
  0x13   :  { %694 = vmatpush3.bf16.msra.mxu0 %v810_v13 }
  0x14   :  { %695 = vmatprep.subr.bf16.mxu0 %v811_v15 }
  0x15   :  { %774 = vmatpush3.bf16.msra.mxu1 %v812_v14 }
  0x16   :  { %775 = vmatprep.subr.bf16.mxu1 %v815_v17 }
  0x17   :  { %696 = vmatpush3.bf16.msra.mxu0 %v813_v16 }
  0x18   :  { %697 = vmatprep.subr.bf16.mxu0 %v814_v18 }
  0x19   :  { %776 = vmatpush3.bf16.msra.mxu1 %v815_v17 }
  0x1a   :  { %777 = vmatprep.subr.bf16.mxu1 %v818_v21 }
  0x1b   :  { %698 = vmatpush3.bf16.msra.mxu0 %v816_v19 }
  0x1c   :  { %699 = vmatprep.subr.bf16.mxu0 %v817_v20 }
  0x1d   :  { %778 = vmatpush3.bf16.msra.mxu1 %v818_v21 }
  0x1e   :  { %779 = vmatprep.subr.bf16.mxu1 %v823_v25 }
  0x1f   :  { %700 = vmatpush3.bf16.msra.mxu0 %v819_v23 }
  0x21   :  { %780 = vmatpush3.bf16.msra.mxu1 %v823_v25 }
  0x22   :  { %407 = vmatmul.mubr.bf16.vlgmr.msra.gmra.mxu0 %v820_v26 }
  0x23   :  { %414 = vmatprep.mubr.bf16.mxu0 %v826_v27 }
  0x24   :  { %782 = vmatmul.mubr.bf16.vlgmr.msra.gmra.mxu1 %v825_v28 }
  0x25   :  { %785 = vmatprep.mubr.bf16.mxu1 %v832_v29 }
  0x2a   :  { %415 = vmatmul.mubr.bf16.gmra.mxu0 %v828_v30 }
  0x2b   :  { %422 = vmatprep.mubr.bf16.mxu0 %v829_v31 }
  0x2c   :  { %786 = vmatmul.mubr.bf16.gmra.mxu1 %v833_v32 }
  0x2d   :  { %789 = vmatprep.mubr.bf16.mxu1 %v840_v33 }
  0x32   :  { %423 = vmatmul.mubr.bf16.gmra.mxu0 %v831_v34 }
  0x33   :  { %430 = vmatprep.mubr.bf16.mxu0 %v834_v35 }
  0x34   :  { %790 = vmatmul.mubr.bf16.gmra.mxu1 %v841_v36 }
  0x35   :  { %793 = vmatprep.mubr.bf16.mxu1 %v848_v37 }
  0x3a   :  { %431 = vmatmul.mubr.bf16.gmra.mxu0 %v836_v38 }
  0x3b   :  { %438 = vmatprep.mubr.bf16.mxu0 %v837_v39 }
  0x3c   :  { %794 = vmatmul.mubr.bf16.gmra.mxu1 %v849_v40 }
  0x42   :  { %439 = vmatmul.mubr.bf16.gmra.mxu0 %v839_v41 }
  0x43   :  { %446 = vmatprep.mubr.bf16.mxu0 %v842_v42 }
  0x4a   :  { %447 = vmatmul.mubr.bf16.gmra.mxu0 %v844_v43 }
  0x4b   :  { %454 = vmatprep.mubr.bf16.mxu0 %v845_v44 }
  0x52   :  { %455 = vmatmul.mubr.bf16.gmra.mxu0 %v847_v45 }
  0x53   :  { %462 = vmatprep.mubr.bf16.mxu0 %v850_v46 }
  0x5a   :  { %463 = vmatmul.mubr.bf16.gmra.mxu0 %v852_v47 }
  0xe2   :  { %v701_v48 = vpop.f32.mrf.mxu0 }
  0xe4   :  { %v702_v49 = vpop.f32.mrf.mxu0  ;;  %v783_v52 = vpop.f32.mrf.mxu1 }
  0xe5   :  { %v703_v51 = vadd.f32 %v702_v49, %v701_v48 }
  0xe6   :  { %v704_v53 = vpop.f32.mrf.mxu0  ;;  %v505_v55 = vpop.f32.mrf.mxu1 }
  0xe7   :  { %v409_v54 = vadd.f32 %v703_v51, %v1020_v50 }
  0xe8   :  { %v705_v56 = vpop.f32.mrf.mxu0  ;;  %v784_v59 = vpop.f32.mrf.mxu1 }
  0xe9   :  { %v706_v57 = vadd.f32 %v705_v56, %v704_v53  ;;  %v506_v58 = vadd.f32 %v505_v55, %v409_v54 }
  0xea   :  { %v707_v60 = vpop.f32.mrf.mxu0  ;;  %v508_v63 = vpop.f32.mrf.mxu1 }
  0xeb   :  { %vm568_vm0 = vcmp.gt.f32.partialorder %v506_v58, 0.0  ;;  %v584_v61 = vmul.f32 0.2, %v506_v58  ;;  %v412_v62 = vadd.f32 %v706_v57, %v1020_v50 }
  0xec   :  { %v708_v0 = vpop.f32.mrf.mxu0  ;;  %v787_v5 = vpop.f32.mrf.mxu1 }
  0xed   :  { %v600_v1 = vsel %vm568_vm0, %v506_v58, %v584_v61  ;;  %v709_v2 = vadd.f32 %v708_v0, %v707_v60  ;;  %v509_v3 = vadd.f32 %v508_v63, %v412_v62 }
  0xee   :  { %616 = vst [vmem:[%s1089_s3] sm:$0xff] %v600_v1  ;;  %v710_v4 = vpop.f32.mrf.mxu0  ;;  %v521_v13 = vpop.f32.mrf.mxu1 }
  0xef   :  { %v417_v6 = vadd.f32 %v709_v2, %v1020_v50  ;;  %vm569_vm1 = vcmp.gt.f32.partialorder %v509_v3, 0.0  ;;  %v585_v7 = vmul.f32 0.2, %v509_v3 }
  0xf0   :  { %v711_v8 = vpop.f32.mrf.mxu0  ;;  %v788_v21 = vpop.f32.mrf.mxu1 }
  0xf1   :  { %v514_v9 = vadd.f32 %v783_v52, %v417_v6  ;;  %v601_v10 = vsel %vm569_vm1, %v509_v3, %v585_v7  ;;  %v712_v11 = vadd.f32 %v711_v8, %v710_v4 }
  0xf2   :  { %617 = vst [vmem:[%s1089_s3 + $0x8] sm:$0xff] %v601_v10  ;;  %v713_v12 = vpop.f32.mrf.mxu0  ;;  %v524_v29 = vpop.f32.mrf.mxu1 }
  0xf3   :  { %vm570_vm2 = vcmp.gt.f32.partialorder %v514_v9, 0.0  ;;  %v586_v14 = vmul.f32 0.2, %v514_v9  ;;  %v420_v15 = vadd.f32 %v712_v11, %v1020_v50 }
  0xf4   :  { %v714_v16 = vpop.f32.mrf.mxu0  ;;  %v791_v37 = vpop.f32.mrf.mxu1 }
  0xf5   :  { %v602_v17 = vsel %vm570_vm2, %v514_v9, %v586_v14  ;;  %v517_v18 = vadd.f32 %v784_v59, %v420_v15  ;;  %v715_v19 = vadd.f32 %v714_v16, %v713_v12 }
  0xf6   :  { %618 = vst [vmem:[%s1089_s3 + $0x10] sm:$0xff] %v602_v17  ;;  %v716_v20 = vpop.f32.mrf.mxu0  ;;  %v537_v45 = vpop.f32.mrf.mxu1 }
  0xf7   :  { %vm571_vm3 = vcmp.gt.f32.partialorder %v517_v18, 0.0  ;;  %v587_v22 = vmul.f32 0.2, %v517_v18  ;;  %v425_v23 = vadd.f32 %v715_v19, %v1020_v50 }
  0xf8   :  { %v717_v24 = vpop.f32.mrf.mxu0  ;;  %v792_v54 = vpop.f32.mrf.mxu1 }
  0xf9   :  { %v603_v25 = vsel %vm571_vm3, %v517_v18, %v587_v22  ;;  %v718_v26 = vadd.f32 %v717_v24, %v716_v20  ;;  %v522_v27 = vadd.f32 %v521_v13, %v425_v23 }
  0xfa   :  { %619 = vst [vmem:[%s1089_s3 + $0x18] sm:$0xff] %v603_v25  ;;  %v719_v28 = vpop.f32.mrf.mxu0  ;;  %v540_v62 = vpop.f32.mrf.mxu1 }
  0xfb   :  { %vm572_vm4 = vcmp.gt.f32.partialorder %v522_v27, 0.0  ;;  %v588_v30 = vmul.f32 0.2, %v522_v27  ;;  %v428_v31 = vadd.f32 %v718_v26, %v1020_v50 }
  0xfc   :  { %v720_v32 = vpop.f32.mrf.mxu0  ;;  %v795_v6 = vpop.f32.mrf.mxu1 }
  0xfd   :  { %v604_v33 = vsel %vm572_vm4, %v522_v27, %v588_v30  ;;  %v721_v34 = vadd.f32 %v720_v32, %v719_v28  ;;  %v525_v35 = vadd.f32 %v524_v29, %v428_v31 }
  0xfe   :  { %620 = vst [vmem:[%s1089_s3 + $0x20] sm:$0xff] %v604_v33  ;;  %v722_v36 = vpop.f32.mrf.mxu0  ;;  %v553_v14 = vpop.f32.mrf.mxu1 }
  0xff   :  { %v433_v38 = vadd.f32 %v721_v34, %v1020_v50  ;;  %vm573_vm5 = vcmp.gt.f32.partialorder %v525_v35, 0.0  ;;  %v589_v39 = vmul.f32 0.2, %v525_v35 }
 0x100   :  { %v723_v40 = vpop.f32.mrf.mxu0  ;;  %v796_v22 = vpop.f32.mrf.mxu1 }
 0x101   :  { %v530_v41 = vadd.f32 %v787_v5, %v433_v38  ;;  %v605_v42 = vsel %vm573_vm5, %v525_v35, %v589_v39  ;;  %v724_v43 = vadd.f32 %v723_v40, %v722_v36 }
 0x102   :  { %621 = vst [vmem:[%s1089_s3 + $0x28] sm:$0xff] %v605_v42  ;;  %v725_v44 = vpop.f32.mrf.mxu0  ;;  %v556_v30 = vpop.f32.mrf.mxu1 }
 0x103   :  { %vm574_vm6 = vcmp.gt.f32.partialorder %v530_v41, 0.0  ;;  %v590_v46 = vmul.f32 0.2, %v530_v41  ;;  %v436_v47 = vadd.f32 %v724_v43, %v1020_v50 }
 0x104   :  { %v726_v48 = vpop.f32.mrf.mxu0 }
 0x105   :  { %v606_v49 = vsel %vm574_vm6, %v530_v41, %v590_v46  ;;  %v533_v51 = vadd.f32 %v788_v21, %v436_v47  ;;  %v727_v52 = vadd.f32 %v726_v48, %v725_v44 }
 0x106   :  { %622 = vst [vmem:[%s1089_s3 + $0x30] sm:$0xff] %v606_v49  ;;  %v728_v53 = vpop.f32.mrf.mxu0 }
 0x107   :  { %vm575_vm7 = vcmp.gt.f32.partialorder %v533_v51, 0.0  ;;  %v591_v55 = vmul.f32 0.2, %v533_v51  ;;  %v441_v56 = vadd.f32 %v727_v52, %v1020_v50 }
 0x108   :  { %v729_v57 = vpop.f32.mrf.mxu0 }
 0x109   :  { %v607_v58 = vsel %vm575_vm7, %v533_v51, %v591_v55  ;;  %v730_v59 = vadd.f32 %v729_v57, %v728_v53  ;;  %v538_v60 = vadd.f32 %v537_v45, %v441_v56 }
 0x10a   :  { %623 = vst [vmem:[%s1089_s3 + $0x38] sm:$0xff] %v607_v58  ;;  %v731_v61 = vpop.f32.mrf.mxu0 }
 0x10b   :  { %vm576_vm8 = vcmp.gt.f32.partialorder %v538_v60, 0.0  ;;  %v592_v63 = vmul.f32 0.2, %v538_v60  ;;  %v444_v0 = vadd.f32 %v730_v59, %v1020_v50 }
 0x10c   :  { %v732_v1 = vpop.f32.mrf.mxu0 }
 0x10d   :  { %v608_v2 = vsel %vm576_vm8, %v538_v60, %v592_v63  ;;  %v733_v3 = vadd.f32 %v732_v1, %v731_v61  ;;  %v541_v4 = vadd.f32 %v540_v62, %v444_v0 }
 0x10e   :  { %624 = vst [vmem:[%s1089_s3 + $0x40] sm:$0xff] %v608_v2  ;;  %v734_v5 = vpop.f32.mrf.mxu0 }
 0x10f   :  { %v449_v7 = vadd.f32 %v733_v3, %v1020_v50  ;;  %vm577_vm9 = vcmp.gt.f32.partialorder %v541_v4, 0.0  ;;  %v593_v8 = vmul.f32 0.2, %v541_v4 }
 0x110   :  { %v735_v9 = vpop.f32.mrf.mxu0 }
 0x111   :  { %v546_v10 = vadd.f32 %v791_v37, %v449_v7  ;;  %v609_v11 = vsel %vm577_vm9, %v541_v4, %v593_v8  ;;  %v736_v12 = vadd.f32 %v735_v9, %v734_v5 }
 0x112   :  { %625 = vst [vmem:[%s1089_s3 + $0x48] sm:$0xff] %v609_v11  ;;  %v737_v13 = vpop.f32.mrf.mxu0 }
 0x113   :  { %vm578_vm10 = vcmp.gt.f32.partialorder %v546_v10, 0.0  ;;  %v594_v15 = vmul.f32 0.2, %v546_v10  ;;  %v452_v16 = vadd.f32 %v736_v12, %v1020_v50 }
 0x114   :  { %v738_v17 = vpop.f32.mrf.mxu0 }
 0x115   :  { %v610_v18 = vsel %vm578_vm10, %v546_v10, %v594_v15  ;;  %v549_v19 = vadd.f32 %v792_v54, %v452_v16  ;;  %v739_v20 = vadd.f32 %v738_v17, %v737_v13 }
 0x116   :  { %626 = vst [vmem:[%s1089_s3 + $0x50] sm:$0xff] %v610_v18  ;;  %v740_v21 = vpop.f32.mrf.mxu0 }
 0x117   :  { %vm579_vm11 = vcmp.gt.f32.partialorder %v549_v19, 0.0  ;;  %v595_v23 = vmul.f32 0.2, %v549_v19  ;;  %v457_v24 = vadd.f32 %v739_v20, %v1020_v50 }
 0x118   :  { %v741_v25 = vpop.f32.mrf.mxu0 }
 0x119   :  { %v611_v26 = vsel %vm579_vm11, %v549_v19, %v595_v23  ;;  %v742_v27 = vadd.f32 %v741_v25, %v740_v21  ;;  %v554_v28 = vadd.f32 %v553_v14, %v457_v24 }
 0x11a   :  { %627 = vst [vmem:[%s1089_s3 + $0x58] sm:$0xff] %v611_v26  ;;  %v743_v29 = vpop.f32.mrf.mxu0 }
 0x11b   :  { %vm580_vm12 = vcmp.gt.f32.partialorder %v554_v28, 0.0  ;;  %v596_v31 = vmul.f32 0.2, %v554_v28  ;;  %v460_v32 = vadd.f32 %v742_v27, %v1020_v50 }
 0x11c   :  { %v744_v33 = vpop.f32.mrf.mxu0 }
 0x11d   :  { %v612_v34 = vsel %vm580_vm12, %v554_v28, %v596_v31  ;;  %v745_v35 = vadd.f32 %v744_v33, %v743_v29  ;;  %v557_v36 = vadd.f32 %v556_v30, %v460_v32 }
 0x11e   :  { %628 = vst [vmem:[%s1089_s3 + $0x60] sm:$0xff] %v612_v34  ;;  %v746_v37 = vpop.f32.mrf.mxu0 }
 0x11f   :  { %v465_v38 = vadd.f32 %v745_v35, %v1020_v50  ;;  %vm581_vm13 = vcmp.gt.f32.partialorder %v557_v36, 0.0  ;;  %v597_v39 = vmul.f32 0.2, %v557_v36 }
 0x120   :  { %v747_v40 = vpop.f32.mrf.mxu0 }
 0x121   :  { %v562_v41 = vadd.f32 %v795_v6, %v465_v38  ;;  %v613_v42 = vsel %vm581_vm13, %v557_v36, %v597_v39  ;;  %v748_v43 = vadd.f32 %v747_v40, %v746_v37 }
 0x122   :  { %629 = vst [vmem:[%s1089_s3 + $0x68] sm:$0xff] %v613_v42 }
 0x123   :  { %vm582_vm14 = vcmp.gt.f32.partialorder %v562_v41, 0.0  ;;  %v598_v44 = vmul.f32 0.2, %v562_v41  ;;  %v468_v45 = vadd.f32 %v748_v43, %v1020_v50 }
 0x125   :  { %v614_v46 = vsel %vm582_vm14, %v562_v41, %v598_v44  ;;  %v565_v47 = vadd.f32 %v796_v22, %v468_v45 }
 0x126   :  { %630 = vst [vmem:[%s1089_s3 + $0x70] sm:$0xff] %v614_v46 }
 0x127   :  { %vm583_vm15 = vcmp.gt.f32.partialorder %v565_v47, 0.0  ;;  %v599_v48 = vmul.f32 0.2, %v565_v47 }
 0x129   :  { %v615_v49 = vsel %vm583_vm15, %v565_v47, %v599_v48 }
 0x12a   :  { %631 = vst [vmem:[%s1089_s3 + $0x78] sm:$0xff] %v615_v49 }

// kernel: squeeze.0
= control target key start
LH: loop header
LB: loop body
LE: loop exit
PB: predicated region body
PF: predicated region fallthrough
CT: control target
= control target key end

     0   :  { %v135_v6 = vmov 0.0   ;;  %s173_s0 = inlined_call_operand.vmem [shape: bf16[1,8,256], index: 0, kind: input, shape index: {}]   ;;  %s174_s1 = inlined_call_operand.vmem [shape: bf16[2,1024], index: 1, kind: output, shape index: {}]  }
   0x1   :  { %v131_v0 = vld [vmem:[%s173_s0] sm:$0xff]  }
   0x2   :  { %v132_v1 = vunpack.c.l.bf16 %v131_v0  ;;  %v133_v2 = vunpack.c.h.bf16 %v131_v0 }
   0x4   :  { %35 = vst [vmem:[#allocation0] ss:$16 sm:$0x3] %v132_v1   ;;  %36 = vst [vmem:[#allocation0] ss:$16 sm:$0xc] %v132_v1  }
   0x5   :  { %38 = vst [vmem:[#allocation0 - $0x3f] ss:$16 sm:$0x30] %v132_v1   ;;  %40 = vst [vmem:[#allocation0 - $0x3f] ss:$16 sm:$0xc0] %v132_v1  }
   0x6   :  { %44 = vst [vmem:[#allocation0 + $0x8] ss:$16 sm:$0x3] %v133_v2   ;;  %46 = vst [vmem:[#allocation0 + $0x8] ss:$16 sm:$0xc] %v133_v2  }
   0x7   :  { %48 = vst [vmem:[#allocation0 - $0x37] ss:$16 sm:$0x30] %v133_v2   ;;  %50 = vst [vmem:[#allocation0 - $0x37] ss:$16 sm:$0xc0] %v133_v2  }
   0xc   :  { %v56_v3 = vld [vmem:[#allocation0] sm:$0x3]  ;;  %v69_v5 = vld [vmem:[#allocation0 + $0x10] sm:$0x3] }
   0xd   :  { %v57_v7 = vpack.c.bf16 %v135_v6, %v56_v3  ;;  %v70_v9 = vpack.c.bf16 %v135_v6, %v69_v5  ;;  %v85_v11 = vld [vmem:[#allocation0 + $0x20] sm:$0x3]  ;;  %v101_v16 = vld [vmem:[#allocation0 + $0x30] sm:$0x3] }
   0xe   :  { %v62_v4 = vld [vmem:[#allocation0 + $0x8] sm:$0x3]  ;;  %v77_v10 = vld [vmem:[#allocation0 + $0x18] sm:$0x3]  ;;  %v86_v14 = vpack.c.bf16 %v135_v6, %v85_v11  ;;  %v102_v18 = vpack.c.bf16 %v135_v6, %v101_v16 }
   0xf   :  { %v63_v8 = vpack.c.bf16 %v135_v6, %v62_v4  ;;  %v93_v12 = vld [vmem:[#allocation0 + $0x28] sm:$0x3]  ;;  %v78_v13 = vpack.c.bf16 %v135_v6, %v77_v10  ;;  %v109_v17 = vld [vmem:[#allocation0 + $0x38] sm:$0x3]  ;;  %60 = vst [vmem:[%s174_s1] sm:$0x1] %v57_v7 }
  0x10   :  { %v94_v15 = vpack.c.bf16 %v135_v6, %v93_v12  ;;  %124 = vst [vmem:[%s174_s1 + $0x2] sm:$0x1] %v70_v9  ;;  %v110_v19 = vpack.c.bf16 %v135_v6, %v109_v17  ;;  %126 = vst [vmem:[%s174_s1 + $0x4] sm:$0x1] %v86_v14 }
  0x11   :  { %123 = vst [vmem:[%s174_s1 + $0x1] sm:$0x1] %v63_v8  ;;  %125 = vst [vmem:[%s174_s1 + $0x3] sm:$0x1] %v78_v13 }
  0x12   :  { %127 = vst [vmem:[%s174_s1 + $0x5] sm:$0x1] %v94_v15  ;;  %128 = vst [vmem:[%s174_s1 + $0x6] sm:$0x1] %v102_v18 }
  0x13   :  { %129 = vst [vmem:[%s174_s1 + $0x7] sm:$0x1] %v110_v19 }

// kernel: cvae_forward.12
= control target key start
LH: loop header
LB: loop body
LE: loop exit
PB: predicated region body
PF: predicated region fallthrough
CT: control target
= control target key end

     0   :  { %s949_s1 = inlined_call_operand.vmem [shape: bf16[1,640,128], index: 1, kind: input, shape index: {}]   ;;  %s950_s0 = inlined_call_operand.vmem [shape: bf16[1,32,640], index: 0, kind: input, shape index: {}]   ;;  %s951_s2 = inlined_call_operand.vmem [shape: f32[1,1,128], index: 2, kind: input, shape index: {}]   ;;  %s952_s3 = inlined_call_operand.vmem [shape: f32[1,32,128], index: 3, kind: output, shape index: {}]  }
   0x1   :  { %v710_v0 = vld [vmem:[%s949_s1 + $0x78] sm:$0xff]   ;;  %v714_v4 = vld [vmem:[%s949_s1 + $0x70] sm:$0xff]   ;;  %v718_v8 = vld [vmem:[%s949_s1 + $0x68] sm:$0xff]  }
   0x2   :  { %v711_v1 = vld [vmem:[%s949_s1 + $0x38] sm:$0xff]   ;;  %624 = vmatprep.subr.bf16.mxu0 %v710_v0  ;;  %v715_v5 = vld [vmem:[%s949_s1 + $0x30] sm:$0xff]   ;;  %v719_v9 = vld [vmem:[%s949_s1 + $0x28] sm:$0xff]  }
   0x3   :  { %v712_v2 = vld [vmem:[%s949_s1 + $0xf8] sm:$0xff]   ;;  %625 = vmatpush3.bf16.msra.mxu0 %v711_v1  ;;  %v716_v6 = vld [vmem:[%s949_s1 + $0xf0] sm:$0xff]   ;;  %v720_v10 = vld [vmem:[%s949_s1 + $0xe8] sm:$0xff]  }
   0x4   :  { %v713_v3 = vld [vmem:[%s949_s1 + $0xb8] sm:$0xff]   ;;  %652 = vmatprep.subr.bf16.mxu1 %v712_v2  ;;  %626 = vmatprep.subr.bf16.mxu0 %v714_v4  ;;  %v717_v7 = vld [vmem:[%s949_s1 + $0xb0] sm:$0xff]   ;;  %v721_v11 = vld [vmem:[%s949_s1 + $0xa8] sm:$0xff]  }
   0x5   :  { %653 = vmatpush3.bf16.msra.mxu1 %v713_v3  ;;  %v722_v12 = vld [vmem:[%s949_s1 + $0x60] sm:$0xff]   ;;  %v726_v16 = vld [vmem:[%s949_s1 + $0x58] sm:$0xff]   ;;  %v730_v20 = vld [vmem:[%s949_s1 + $0x50] sm:$0xff]  }
   0x6   :  { %654 = vmatprep.subr.bf16.mxu1 %v716_v6  ;;  %v723_v13 = vld [vmem:[%s949_s1 + $0x20] sm:$0xff]   ;;  %v727_v17 = vld [vmem:[%s949_s1 + $0x18] sm:$0xff]   ;;  %v731_v21 = vld [vmem:[%s949_s1 + $0x10] sm:$0xff]  }
   0x7   :  { %627 = vmatpush3.bf16.msra.mxu0 %v715_v5  ;;  %v724_v14 = vld [vmem:[%s949_s1 + $0xe0] sm:$0xff]   ;;  %v728_v18 = vld [vmem:[%s949_s1 + $0xd8] sm:$0xff]   ;;  %v732_v22 = vld [vmem:[%s949_s1 + $0xd0] sm:$0xff]  }
   0x8   :  { %628 = vmatprep.subr.bf16.mxu0 %v718_v8  ;;  %v725_v15 = vld [vmem:[%s949_s1 + $0xa0] sm:$0xff]   ;;  %v729_v19 = vld [vmem:[%s949_s1 + $0x98] sm:$0xff]   ;;  %v733_v23 = vld [vmem:[%s949_s1 + $0x90] sm:$0xff]  }
   0x9   :  { %655 = vmatpush3.bf16.msra.mxu1 %v717_v7  ;;  %v734_v24 = vld [vmem:[%s949_s1 + $0x48] sm:$0xff]   ;;  %v738_v28 = vld [vmem:[%s949_s1 + $0x40] sm:$0xff]   ;;  %v745_v34 = vld [vmem:[%s949_s1 + $0x138] sm:$0xff]  }
   0xa   :  { %656 = vmatprep.subr.bf16.mxu1 %v720_v10  ;;  %v735_v25 = vld [vmem:[%s949_s1 + $0x8] sm:$0xff]   ;;  %v739_v29 = vld [vmem:[%s949_s1] sm:$0xff]   ;;  %v749_v37 = vld [vmem:[%s949_s1 + $0x130] sm:$0xff]  }
   0xb   :  { %629 = vmatpush3.bf16.msra.mxu0 %v719_v9  ;;  %v736_v26 = vld [vmem:[%s949_s1 + $0xc8] sm:$0xff]   ;;  %v740_v30 = vld [vmem:[%s949_s1 + $0xc0] sm:$0xff]   ;;  %v752_v44 = vld [vmem:[%s949_s1 + $0x118] sm:$0xff]  }
   0xc   :  { %630 = vmatprep.subr.bf16.mxu0 %v722_v12  ;;  %v737_v27 = vld [vmem:[%s949_s1 + $0x88] sm:$0xff]   ;;  %v741_v31 = vld [vmem:[%s950_s0] ss:$20 sps:$4 sm:$0xff]   ;;  %v743_v32 = vld [vmem:[%s950_s0 + $0x4] ss:$20 sps:$4 sm:$0xff]  }
   0xd   :  { %657 = vmatpush3.bf16.msra.mxu1 %v721_v11  ;;  %v744_v33 = vld [vmem:[%s949_s1 + $0x80] sm:$0xff]   ;;  %438 = vmatprep.mubr.bf16.mxu0 %v743_v32  ;;  %v746_v35 = vld [vmem:[%s950_s0 + $0x8] ss:$20 sps:$4 sm:$0xff]   ;;  %v759_v46 = vld [vmem:[%s949_s1 + $0x110] sm:$0xff]  }
   0xe   :  { %658 = vmatprep.subr.bf16.mxu1 %v724_v14  ;;  %v748_v36 = vld [vmem:[%s950_s0 + $0xc] ss:$20 sps:$4 sm:$0xff]   ;;  %v755_v41 = vld [vmem:[%s950_s0 + $0x28] ss:$20 sps:$4 sm:$0xff]   ;;  %v758_v43 = vld [vmem:[%s950_s0 + $0x30] ss:$20 sps:$4 sm:$0xff]  }
   0xf   :  { %631 = vmatpush3.bf16.msra.mxu0 %v723_v13  ;;  %487 = vmatprep.mubr.bf16.mxu1 %v748_v36  ;;  %v750_v38 = vld [vmem:[%s949_s1 + $0x128] sm:$0xff]   ;;  %v751_v39 = vld [vmem:[%s949_s1 + $0x120] sm:$0xff]  }
  0x10   :  { %632 = vmatprep.subr.bf16.mxu0 %v726_v16  ;;  %v753_v40 = vld [vmem:[%s950_s0 + $0x2c] ss:$20 sps:$4 sm:$0xff]   ;;  %v756_v42 = vld [vmem:[%s950_s0 + $0x34] ss:$20 sps:$4 sm:$0xff]   ;;  %v762_v45 = vld [vmem:[%s950_s0 + $0x10] ss:$20 sps:$4 sm:$0xff]  }
  0x11   :  { %659 = vmatpush3.bf16.msra.mxu1 %v725_v15  ;;  %v760_v47 = vld [vmem:[%s949_s1 + $0x108] sm:$0xff]   ;;  %v761_v48 = vld [vmem:[%s949_s1 + $0x100] sm:$0xff]  }
  0x12   :  { %660 = vmatprep.subr.bf16.mxu1 %v728_v18  ;;  %v763_v49 = vld [vmem:[%s950_s0 + $0x38] ss:$20 sps:$4 sm:$0xff]   ;;  %v573_v3 = vld [vmem:[%s951_s2] ss:$0 sm:$0xff] }
  0x13   :  { %633 = vmatpush3.bf16.msra.mxu0 %v727_v17 }
  0x14   :  { %634 = vmatprep.subr.bf16.mxu0 %v730_v20 }
  0x15   :  { %661 = vmatpush3.bf16.msra.mxu1 %v729_v19 }
  0x16   :  { %662 = vmatprep.subr.bf16.mxu1 %v732_v22 }
  0x17   :  { %635 = vmatpush3.bf16.msra.mxu0 %v731_v21 }
  0x18   :  { %636 = vmatprep.subr.bf16.mxu0 %v734_v24 }
  0x19   :  { %663 = vmatpush3.bf16.msra.mxu1 %v733_v23 }
  0x1a   :  { %664 = vmatprep.subr.bf16.mxu1 %v736_v26 }
  0x1b   :  { %637 = vmatpush3.bf16.msra.mxu0 %v735_v25 }
  0x1c   :  { %638 = vmatprep.subr.bf16.mxu0 %v738_v28 }
  0x1d   :  { %665 = vmatpush3.bf16.msra.mxu1 %v737_v27 }
  0x1e   :  { %666 = vmatprep.subr.bf16.mxu1 %v740_v30 }
  0x1f   :  { %639 = vmatpush3.bf16.msra.mxu0 %v739_v29 }
  0x20   :  { %690 = vmatprep.subr.bf16.mxu0 %v745_v34 }
  0x21   :  { %667 = vmatpush3.bf16.msra.mxu1 %v744_v33 }
  0x22   :  { %439 = vmatmul.mubr.bf16.vlgmr.msra.gmra.mxu0 %v741_v31 }
  0x23   :  { %691 = vmatpush3.bf16.msra.mxu0 %v745_v34  ;;  %446 = vmatprep.mubr.bf16.mxu0 %v753_v40 }
  0x24   :  { %488 = vmatmul.mubr.bf16.vlgmr.msra.gmra.mxu1 %v746_v35  ;;  %692 = vmatprep.subr.bf16.mxu0 %v749_v37 }
  0x25   :  { %495 = vmatprep.mubr.bf16.mxu1 %v756_v42 }
  0x27   :  { %693 = vmatpush3.bf16.msra.mxu0 %v749_v37 }
  0x28   :  { %694 = vmatprep.subr.bf16.mxu0 %v750_v38 }
  0x2a   :  { %447 = vmatmul.mubr.bf16.gmra.mxu0 %v755_v41 }
  0x2b   :  { %695 = vmatpush3.bf16.msra.mxu0 %v750_v38  ;;  %706 = vmatprep.mubr.bf16.mxu0 %v762_v45 }
  0x2c   :  { %696 = vmatprep.subr.bf16.mxu0 %v751_v39  ;;  %496 = vmatmul.mubr.bf16.gmra.mxu1 %v758_v43 }
  0x2f   :  { %697 = vmatpush3.bf16.msra.mxu0 %v751_v39 }
  0x30   :  { %698 = vmatprep.subr.bf16.mxu0 %v752_v44 }
  0x33   :  { %699 = vmatpush3.bf16.msra.mxu0 %v752_v44 }
  0x34   :  { %700 = vmatprep.subr.bf16.mxu0 %v759_v46 }
  0x37   :  { %701 = vmatpush3.bf16.msra.mxu0 %v759_v46 }
  0x38   :  { %702 = vmatprep.subr.bf16.mxu0 %v760_v47 }
  0x3b   :  { %703 = vmatpush3.bf16.msra.mxu0 %v760_v47 }
  0x3c   :  { %704 = vmatprep.subr.bf16.mxu0 %v761_v48 }
  0x3f   :  { %705 = vmatpush3.bf16.msra.mxu0 %v761_v48 }
  0x42   :  { %707 = vmatmul.mubr.bf16.vlgmr.msra.gmra.mxu0 %v763_v49 }
  0xe2   :  { %v640_v50 = vpop.f32.mrf.mxu0 }
  0xe4   :  { %v641_v51 = vpop.f32.mrf.mxu0  ;;  %v668_v52 = vpop.f32.mrf.mxu1 }
  0xe5   :  { %v642_v2 = vadd.f32 %v641_v51, %v640_v50 }
  0xe6   :  { %v643_v53 = vpop.f32.mrf.mxu0  ;;  %v669_v54 = vpop.f32.mrf.mxu1 }
  0xe7   :  { %v441_v9 = vadd.f32 %v642_v2, %v573_v3  ;;  %v670_v10 = vadd.f32 %v669_v54, %v668_v52 }
  0xe8   :  { %v644_v55 = vpop.f32.mrf.mxu0  ;;  %v671_v56 = vpop.f32.mrf.mxu1 }
  0xe9   :  { %v645_v7 = vadd.f32 %v644_v55, %v643_v53  ;;  %v490_v18 = vadd.f32 %v670_v10, %v441_v9 }
  0xea   :  { %v646_v57 = vpop.f32.mrf.mxu0  ;;  %v672_v58 = vpop.f32.mrf.mxu1 }
  0xeb   :  { %v444_v14 = vadd.f32 %v645_v7, %v573_v3  ;;  %v673_v15 = vadd.f32 %v672_v58, %v671_v56 }
  0xec   :  { %v647_v59 = vpop.f32.mrf.mxu0  ;;  %v674_v60 = vpop.f32.mrf.mxu1 }
  0xed   :  { %v648_v63 = vadd.f32 %v647_v59, %v646_v57  ;;  %v493_v24 = vadd.f32 %v673_v15, %v444_v14 }
  0xee   :  { %v649_v61 = vpop.f32.mrf.mxu0  ;;  %v675_v62 = vpop.f32.mrf.mxu1 }
  0xef   :  { %v449_v4 = vadd.f32 %v648_v63, %v573_v3  ;;  %v676_v5 = vadd.f32 %v675_v62, %v674_v60 }
  0xf0   :  { %v650_v0 = vpop.f32.mrf.mxu0  ;;  %v677_v1 = vpop.f32.mrf.mxu1 }
  0xf1   :  { %v651_v6 = vadd.f32 %v650_v0, %v649_v61  ;;  %v498_v13 = vadd.f32 %v676_v5, %v449_v4 }
  0xf2   :  { %v678_v8 = vpop.f32.mrf.mxu1 }
  0xf3   :  { %v452_v11 = vadd.f32 %v651_v6, %v573_v3  ;;  %v679_v12 = vadd.f32 %v678_v8, %v677_v1 }
  0xf5   :  { %v501_v22 = vadd.f32 %v679_v12, %v452_v11 }
 0x102   :  { %v708_v16 = vpop.f32.mrf.mxu0 }
 0x103   :  { %v547_v17 = vadd.f32 %v708_v16, %v498_v13 }
 0x104   :  { %v538_v19 = vpop.f32.mrf.mxu0 }
 0x105   :  { %vm555_vm0 = vcmp.gt.f32.partialorder %v547_v17, 0.0  ;;  %v559_v20 = vmul.f32 0.2, %v547_v17  ;;  %v539_v21 = vadd.f32 %v538_v19, %v490_v18 }
 0x106   :  { %v709_v23 = vpop.f32.mrf.mxu0 }
 0x107   :  { %v563_v25 = vsel %vm555_vm0, %v547_v17, %v559_v20  ;;  %vm553_vm1 = vcmp.gt.f32.partialorder %v539_v21, 0.0  ;;  %v557_v26 = vmul.f32 0.2, %v539_v21  ;;  %v550_v27 = vadd.f32 %v709_v23, %v501_v22 }
 0x108   :  { %567 = vst [vmem:[%s952_s3 + $0x10] sm:$0xff] %v563_v25  ;;  %v541_v28 = vpop.f32.mrf.mxu0 }
 0x109   :  { %v561_v29 = vsel %vm553_vm1, %v539_v21, %v557_v26  ;;  %vm556_vm2 = vcmp.gt.f32.partialorder %v550_v27, 0.0  ;;  %v560_v30 = vmul.f32 0.2, %v550_v27  ;;  %v542_v31 = vadd.f32 %v541_v28, %v493_v24 }
 0x10a   :  { %565 = vst [vmem:[%s952_s3] sm:$0xff] %v561_v29 }
 0x10b   :  { %v564_v32 = vsel %vm556_vm2, %v550_v27, %v560_v30  ;;  %vm554_vm3 = vcmp.gt.f32.partialorder %v542_v31, 0.0  ;;  %v558_v33 = vmul.f32 0.2, %v542_v31 }
 0x10c   :  { %568 = vst [vmem:[%s952_s3 + $0x18] sm:$0xff] %v564_v32 }
 0x10d   :  { %v562_v34 = vsel %vm554_vm3, %v542_v31, %v558_v33 }
 0x10e   :  { %566 = vst [vmem:[%s952_s3 + $0x8] sm:$0xff] %v562_v34 }

// kernel: cvae_forward.15
= control target key start
LH: loop header
LB: loop body
LE: loop exit
PB: predicated region body
PF: predicated region fallthrough
CT: control target
= control target key end

     0   :  { %s951_s12 = smov 0   ;;  %s953_s13 = smov 0   ;;  %s1124_s0 = inlined_call_operand.vmem [shape: bf16[1,8,128], index: 0, kind: input, shape index: {}]   ;;  %s1125_s1 = inlined_call_operand.vmem [shape: bf16[1,128,1024], index: 1, kind: input, shape index: {}]   ;;  %s1126_s2 = inlined_call_operand.vmem [shape: f32[1,1,1024], index: 2, kind: input, shape index: {}]   ;;  %s1127_s3 = inlined_call_operand.vmem [shape: f32[1,8,1024], index: 3, kind: output, shape index: {}]  }
   0x1   :  { %s955_s14 = smov 0   ;;  %s957_s15 = smov 0  }
   0x2   :  { %s959_s16 = smov 0  }
   0x3 LB: > { %s22_s17 = sadd.s32 1, %s924_s15  ;;  %p67_p1 = scmp.ne.s32.totalorder %s916_s13, %s912_s12  ;;  %s928_s16 = sphi %s959_s16, %s13_s16   ;;  %s924_s15 = sphi %s957_s15, %s1131_s15   ;;  %s920_s14 = sphi %s955_s14, %s1130_s14   ;;  %s916_s13 = sphi %s953_s13, %s1129_s13   ;;  %s912_s12 = sphi %s951_s12, %s1128_s12  }
   0x4   : > { %p23_p0 = scmp.ge.s32.totalorder %s22_s17, 2  ;;  %p68_p2 = scmp.eq.s32.totalorder %s928_s16, 0 }
   0x5   : > { %s60_s19 = sadd.s32 1, %s916_s13  ;;  %p757_p5 = scmp.ge.s32.totalorder %s928_s16, 2 }
   0x6   : > { %s1133_s17 = smov (%p23_p0, %s22_s17), 0  ;;  %p69_p3 = por %p68_p2, %p67_p1 }
   0x7   : > { %s56_s18 = ssub.s32 %s924_s15, %s1133_s17  ;;  %156 = sbr.rel (%p757_p5) target bundleno = 32 (0x20), region = 20 }
   0x8   : > { %p58_p4 = scmp.eq.s32.totalorder %s56_s18, 0 }
   0xa   : > { %s986_s20 = scalar_select %p58_p4, %s916_s13, %s60_s19  }
   0xc   : > { %159 = sbr.rel (!%p69_p3) target bundleno = 32 (0x20), region = 24  ;;  %s161_s21 = sand.u32 (%p69_p3), 1, %s916_s13  }
   0xd   : > { %s800_s22 = sshll.u32 (%p69_p3), %s924_s15, 4  ;;  %s758_s23 = sshll.u32 (%p69_p3), %s161_s21, 8 }
   0xe   : > { %s994_s26 = scalar_lea.vmem (%p69_p3), %s1125_s1, %s800_s22  ;;  %s999_s27 = scalar_lea.vmem (%p69_p3), [#allocation2], %s758_s23 }
   0xf   : > { %v181_v0 = vld [vmem:[%s994_s26] sm:$0xff] (%p69_p3)  ;;  %v183_v1 = vld [vmem:[%s994_s26 + $0x8] sm:$0xff] (%p69_p3) }
  0x10   : > { %v185_v2 = vld [vmem:[%s994_s26 + $0x20] sm:$0xff] (%p69_p3)  ;;  %182 = vst [vmem:[%s999_s27] sm:$0xff] (%p69_p3), %v181_v0  ;;  %184 = vst [vmem:[%s999_s27 + $0x8] sm:$0xff] (%p69_p3), %v183_v1  ;;  %v187_v3 = vld [vmem:[%s994_s26 + $0x28] sm:$0xff] (%p69_p3) }
  0x11   : > { %186 = vst [vmem:[%s999_s27 + $0x10] sm:$0xff] %v185_v2  ;;  %v189_v4 = vld [vmem:[%s994_s26 + $0x40] sm:$0xff]  ;;  %v191_v5 = vld [vmem:[%s994_s26 + $0x48] sm:$0xff]  ;;  %188 = vst [vmem:[%s999_s27 + $0x18] sm:$0xff] %v187_v3 }
  0x12   : > { %190 = vst [vmem:[%s999_s27 + $0x20] sm:$0xff] %v189_v4  ;;  %192 = vst [vmem:[%s999_s27 + $0x28] sm:$0xff] %v191_v5  ;;  %v193_v6 = vld [vmem:[%s994_s26 + $0x60] sm:$0xff]  ;;  %v195_v7 = vld [vmem:[%s994_s26 + $0x68] sm:$0xff] }
  0x13   : > { %v197_v8 = vld [vmem:[%s994_s26 + $0x80] sm:$0xff]  ;;  %194 = vst [vmem:[%s999_s27 + $0x30] sm:$0xff] %v193_v6  ;;  %196 = vst [vmem:[%s999_s27 + $0x38] sm:$0xff] %v195_v7  ;;  %v199_v9 = vld [vmem:[%s994_s26 + $0x88] sm:$0xff] }
  0x14   : > { %198 = vst [vmem:[%s999_s27 + $0x40] sm:$0xff] %v197_v8  ;;  %v201_v10 = vld [vmem:[%s994_s26 + $0xa0] sm:$0xff]  ;;  %v203_v11 = vld [vmem:[%s994_s26 + $0xa8] sm:$0xff]  ;;  %200 = vst [vmem:[%s999_s27 + $0x48] sm:$0xff] %v199_v9 }
  0x15   : > { %202 = vst [vmem:[%s999_s27 + $0x50] sm:$0xff] %v201_v10  ;;  %204 = vst [vmem:[%s999_s27 + $0x58] sm:$0xff] %v203_v11  ;;  %v205_v12 = vld [vmem:[%s994_s26 + $0xc0] sm:$0xff]  ;;  %v207_v13 = vld [vmem:[%s994_s26 + $0xc8] sm:$0xff] }
  0x16   : > { %v209_v14 = vld [vmem:[%s994_s26 + $0xe0] sm:$0xff]  ;;  %206 = vst [vmem:[%s999_s27 + $0x60] sm:$0xff] %v205_v12  ;;  %208 = vst [vmem:[%s999_s27 + $0x68] sm:$0xff] %v207_v13  ;;  %v211_v15 = vld [vmem:[%s994_s26 + $0xe8] sm:$0xff] }
  0x17   : > { %210 = vst [vmem:[%s999_s27 + $0x70] sm:$0xff] %v209_v14  ;;  %v213_v16 = vld [vmem:[%s994_s26 + $0x100] sm:$0xff]  ;;  %v215_v17 = vld [vmem:[%s994_s26 + $0x108] sm:$0xff]  ;;  %212 = vst [vmem:[%s999_s27 + $0x78] sm:$0xff] %v211_v15 }
  0x18   : > { %214 = vst [vmem:[%s999_s27 + $0x80] sm:$0xff] %v213_v16  ;;  %216 = vst [vmem:[%s999_s27 + $0x88] sm:$0xff] %v215_v17  ;;  %v217_v18 = vld [vmem:[%s994_s26 + $0x120] sm:$0xff]  ;;  %v219_v19 = vld [vmem:[%s994_s26 + $0x128] sm:$0xff] }
  0x19   : > { %v221_v20 = vld [vmem:[%s994_s26 + $0x140] sm:$0xff]  ;;  %218 = vst [vmem:[%s999_s27 + $0x90] sm:$0xff] %v217_v18  ;;  %220 = vst [vmem:[%s999_s27 + $0x98] sm:$0xff] %v219_v19  ;;  %v223_v21 = vld [vmem:[%s994_s26 + $0x148] sm:$0xff] }
  0x1a   : > { %222 = vst [vmem:[%s999_s27 + $0xa0] sm:$0xff] %v221_v20  ;;  %v225_v22 = vld [vmem:[%s994_s26 + $0x160] sm:$0xff]  ;;  %v227_v23 = vld [vmem:[%s994_s26 + $0x168] sm:$0xff]  ;;  %224 = vst [vmem:[%s999_s27 + $0xa8] sm:$0xff] %v223_v21 }
  0x1b   : > { %226 = vst [vmem:[%s999_s27 + $0xb0] sm:$0xff] %v225_v22  ;;  %228 = vst [vmem:[%s999_s27 + $0xb8] sm:$0xff] %v227_v23  ;;  %v229_v24 = vld [vmem:[%s994_s26 + $0x180] sm:$0xff]  ;;  %v231_v25 = vld [vmem:[%s994_s26 + $0x188] sm:$0xff] }
  0x1c   : > { %v233_v26 = vld [vmem:[%s994_s26 + $0x1a0] sm:$0xff]  ;;  %230 = vst [vmem:[%s999_s27 + $0xc0] sm:$0xff] %v229_v24  ;;  %232 = vst [vmem:[%s999_s27 + $0xc8] sm:$0xff] %v231_v25  ;;  %v235_v27 = vld [vmem:[%s994_s26 + $0x1a8] sm:$0xff] }
  0x1d   : > { %234 = vst [vmem:[%s999_s27 + $0xd0] sm:$0xff] %v233_v26  ;;  %v237_v28 = vld [vmem:[%s994_s26 + $0x1c0] sm:$0xff]  ;;  %v239_v29 = vld [vmem:[%s994_s26 + $0x1c8] sm:$0xff]  ;;  %236 = vst [vmem:[%s999_s27 + $0xd8] sm:$0xff] %v235_v27 }
  0x1e   : > { %238 = vst [vmem:[%s999_s27 + $0xe0] sm:$0xff] %v237_v28  ;;  %240 = vst [vmem:[%s999_s27 + $0xe8] sm:$0xff] %v239_v29  ;;  %v241_v30 = vld [vmem:[%s994_s26 + $0x1e0] sm:$0xff]  ;;  %v243_v31 = vld [vmem:[%s994_s26 + $0x1e8] sm:$0xff] }
  0x1f   : > { %242 = vst [vmem:[%s999_s27 + $0xf0] sm:$0xff] %v241_v30  ;;  %244 = vst [vmem:[%s999_s27 + $0xf8] sm:$0xff] %v243_v31 }
  0x20 PF: > { %p761_p6 = scmp.ge.s32.totalorder %s928_s16, 1  ;;  %p261_p7 = scmp.lt.s32.totalorder %s928_s16, 3 }
  0x22   : > { %p262_p8 = pnand %p761_p6, %p261_p7 }
  0x23   : > { %s268_s28 = sand.u32 (!%p262_p8), 1, %s912_s12   ;;  %s763_s6 = sshll.u32 (!%p262_p8), %s920_s14, 2 }
  0x24   : > { %265 = sbr.rel (%p262_p8) target bundleno = 274 (0x112), region = 51  ;;  %s762_s29 = sshll.u32 (!%p262_p8), %s268_s28, 8 }
  0x25   : > { %s1065_s30 = scalar_lea.vmem (!%p262_p8), [#allocation2], %s762_s29  ;;  %p315_p9 = scmp.lt.s32.totalorder (!%p262_p8), %s763_s6, 7 }
  0x29   : > { %v930_v32 = vmov 0   ;;  %v842_v33 = vld [vmem:[%s1065_s30 + $0xe4] ss:$16 sps:$4 sm:$0xff]   ;;  %v844_v34 = vld [vmem:[%s1065_s30 + $0xec] ss:$16 sps:$4 sm:$0xff]   ;;  %v367_v2 = vlaneseq  ;;  %s1135_s6 = smov (!%p315_p9, %s763_s6), 7 }
  0x2a   : > { %579 = vmatprep.mubr.bf16.mxu0 %v930_v32  ;;  %620 = vmatprep.mubr.bf16.mxu1 %v930_v32  ;;  %v846_v35 = vld [vmem:[%s1065_s30 + $0xe0] ss:$16 sps:$4 sm:$0xff]   ;;  %v847_v36 = vld [vmem:[%s1065_s30 + $0xe8] ss:$16 sps:$4 sm:$0xff]   ;;  %v848_v37 = vld [vmem:[%s1065_s30 + $0xc4] ss:$16 sps:$4 sm:$0xff]   ;;  %s319_s9 = scalar_lea.vmem %s1126_s2, %s1135_s6 }
  0x2b   : > { %547 = vmatprep.subr.bf16.mxu0 %v842_v33  ;;  %588 = vmatprep.subr.bf16.mxu1 %v844_v34  ;;  %v850_v38 = vld [vmem:[%s1065_s30 + $0xcc] ss:$16 sps:$4 sm:$0xff]   ;;  %v852_v39 = vld [vmem:[%s1065_s30 + $0xc0] ss:$16 sps:$4 sm:$0xff]   ;;  %v853_v40 = vld [vmem:[%s1065_s30 + $0xc8] ss:$16 sps:$4 sm:$0xff]  }
  0x2c   : > { %548 = vmatpush1.bf16.msra.mxu0 %v846_v35  ;;  %589 = vmatpush1.bf16.msra.mxu1 %v847_v36  ;;  %v854_v41 = vld [vmem:[%s1065_s30 + $0xa4] ss:$16 sps:$4 sm:$0xff]   ;;  %v856_v42 = vld [vmem:[%s1065_s30 + $0xac] ss:$16 sps:$4 sm:$0xff]   ;;  %v858_v43 = vld [vmem:[%s1065_s30 + $0xa0] ss:$16 sps:$4 sm:$0xff]  }
  0x2d   : > { %549 = vmatprep.subr.bf16.mxu0 %v848_v37  ;;  %590 = vmatprep.subr.bf16.mxu1 %v850_v38  ;;  %v859_v44 = vld [vmem:[%s1065_s30 + $0xa8] ss:$16 sps:$4 sm:$0xff]   ;;  %v860_v45 = vld [vmem:[%s1065_s30 + $0x84] ss:$16 sps:$4 sm:$0xff]   ;;  %v862_v46 = vld [vmem:[%s1065_s30 + $0x8c] ss:$16 sps:$4 sm:$0xff]  }
  0x2e   : > { %v864_v47 = vld [vmem:[%s1065_s30 + $0x80] ss:$16 sps:$4 sm:$0xff]   ;;  %v865_v48 = vld [vmem:[%s1065_s30 + $0x88] ss:$16 sps:$4 sm:$0xff]   ;;  %v866_v49 = vld [vmem:[%s1065_s30 + $0x64] ss:$16 sps:$4 sm:$0xff]  }
  0x2f   : > { %v868_v50 = vld [vmem:[%s1065_s30 + $0x6c] ss:$16 sps:$4 sm:$0xff]   ;;  %v870_v51 = vld [vmem:[%s1065_s30 + $0x60] ss:$16 sps:$4 sm:$0xff]   ;;  %v871_v52 = vld [vmem:[%s1065_s30 + $0x68] ss:$16 sps:$4 sm:$0xff]  }
  0x30   : > { %550 = vmatpush1.bf16.msra.mxu0 %v852_v39  ;;  %591 = vmatpush1.bf16.msra.mxu1 %v853_v40  ;;  %v872_v53 = vld [vmem:[%s1065_s30 + $0x44] ss:$16 sps:$4 sm:$0xff]   ;;  %v874_v54 = vld [vmem:[%s1065_s30 + $0x4c] ss:$16 sps:$4 sm:$0xff]   ;;  %v876_v55 = vld [vmem:[%s1065_s30 + $0x40] ss:$16 sps:$4 sm:$0xff]  }
  0x31   : > { %551 = vmatprep.subr.bf16.mxu0 %v854_v41  ;;  %592 = vmatprep.subr.bf16.mxu1 %v856_v42  ;;  %v877_v56 = vld [vmem:[%s1065_s30 + $0x48] ss:$16 sps:$4 sm:$0xff]   ;;  %v878_v57 = vld [vmem:[%s1065_s30 + $0x24] ss:$16 sps:$4 sm:$0xff]   ;;  %v880_v58 = vld [vmem:[%s1065_s30 + $0x2c] ss:$16 sps:$4 sm:$0xff]  }
  0x32   : > { %v882_v59 = vld [vmem:[%s1065_s30 + $0x20] ss:$16 sps:$4 sm:$0xff]   ;;  %v883_v60 = vld [vmem:[%s1065_s30 + $0x28] ss:$16 sps:$4 sm:$0xff]   ;;  %v884_v61 = vld [vmem:[%s1065_s30 + $0x4] ss:$16 sps:$4 sm:$0xff]  }
  0x33   : > { %v886_v62 = vld [vmem:[%s1065_s30 + $0xc] ss:$16 sps:$4 sm:$0xff]   ;;  %v888_v63 = vld [vmem:[%s1065_s30] ss:$16 sps:$4 sm:$0xff]   ;;  %v889_v0 = vld [vmem:[%s1065_s30 + $0x8] ss:$16 sps:$4 sm:$0xff]  }
  0x34   : > { %552 = vmatpush1.bf16.msra.mxu0 %v858_v43  ;;  %593 = vmatpush1.bf16.msra.mxu1 %v859_v44  ;;  %v332_v1 = vld [vmem:[%s1124_s0] sm:$0xf]  ;;  %v368_v3 = vshrl.u32 %v367_v2, 7  ;;  %s765_s10 = sshll.u32 %s1135_s6, 3 }
  0x35   : > { %553 = vmatprep.subr.bf16.mxu0 %v860_v45  ;;  %594 = vmatprep.subr.bf16.mxu1 %v862_v46  ;;  %v365_v5 = vld [vmem:[%s319_s9] sm:$0xf]  ;;  %s329_s14 = scalar_lea.vmem %s1127_s3, %s765_s10 }
  0x36   : > { %v369_v4 = vsub.s32 0, %v368_v3  ;;  %v373_v6 = vsub.s32 1, %v368_v3  ;;  %v377_v7 = vsub.s32 2, %v368_v3  ;;  %v381_v9 = vsub.s32 3, %v368_v3 }
  0x38   : > { %554 = vmatpush1.bf16.msra.mxu0 %v864_v47  ;;  %595 = vmatpush1.bf16.msra.mxu1 %v865_v48  ;;  %v370_v8 = vrot.slane %v365_v5, %v369_v4  ;;  %v374_v10 = vrot.slane %v365_v5, %v373_v6  ;;  %v378_v12 = vrot.slane %v365_v5, %v377_v7 }
  0x39   : > { %555 = vmatprep.subr.bf16.mxu0 %v866_v49  ;;  %596 = vmatprep.subr.bf16.mxu1 %v868_v50  ;;  %v382_v15 = vrot.slane %v365_v5, %v381_v9 }
  0x3c   : > { %556 = vmatpush1.bf16.msra.mxu0 %v870_v51  ;;  %597 = vmatpush1.bf16.msra.mxu1 %v871_v52 }
  0x3d   : > { %557 = vmatprep.subr.bf16.mxu0 %v872_v53  ;;  %598 = vmatprep.subr.bf16.mxu1 %v874_v54 }
  0x40   : > { %558 = vmatpush1.bf16.msra.mxu0 %v876_v55  ;;  %599 = vmatpush1.bf16.msra.mxu1 %v877_v56 }
  0x41   : > { %559 = vmatprep.subr.bf16.mxu0 %v878_v57  ;;  %600 = vmatprep.subr.bf16.mxu1 %v880_v58 }
  0x44   : > { %560 = vmatpush1.bf16.msra.mxu0 %v882_v59  ;;  %601 = vmatpush1.bf16.msra.mxu1 %v883_v60 }
  0x45   : > { %561 = vmatprep.subr.bf16.mxu0 %v884_v61  ;;  %602 = vmatprep.subr.bf16.mxu1 %v886_v62 }
  0x48   : > { %562 = vmatpush1.bf16.msra.mxu0 %v888_v63  ;;  %603 = vmatpush1.bf16.msra.mxu1 %v889_v0 }
  0x4b   : > { %580 = vmatmul.mubr.bf16.vlgmr.msra.gmra.mxu0 %v332_v1  ;;  %621 = vmatmul.mubr.bf16.vlgmr.msra.gmra.mxu1 %v332_v1 }
 0x10b   : > { %v581_v11 = vpop.f32.mrf.mxu0  ;;  %v622_v13 = vpop.f32.mrf.mxu1 }
 0x10c   : > { %v582_v14 = vadd.f32 %v581_v11, %v370_v8  ;;  %v623_v19 = vadd.f32 %v622_v13, %v378_v12 }
 0x10d   : > { %v583_v16 = vpop.f32.mrf.mxu0  ;;  %v624_v17 = vpop.f32.mrf.mxu1 }
 0x10e   : > { %629 = vst [vmem:[%s329_s14] sm:$0xff] %v582_v14  ;;  %v584_v18 = vadd.f32 %v583_v16, %v374_v10  ;;  %v625_v22 = vadd.f32 %v624_v17, %v382_v15  ;;  %631 = vst [vmem:[%s329_s14 + $0x10] sm:$0xff] %v623_v19 }
 0x10f   : > { %v585_v20 = vpop.f32.mrf.mxu0  ;;  %v626_v21 = vpop.f32.mrf.mxu1 }
 0x110   : > { %630 = vst [vmem:[%s329_s14 + $0x8] sm:$0xff] %v584_v18  ;;  %632 = vst [vmem:[%s329_s14 + $0x18] sm:$0xff] %v625_v22 }
 0x111   : > { %v586_v23 = vpop.f32.mrf.mxu0  ;;  %v627_v24 = vpop.f32.mrf.mxu1 }
 0x112 PF: > { %s13_s16 = sadd.s32 1, %s928_s16   ;;  %s1128_s12 = smov %s916_s13 }
 0x113   : > { %p10_p10 = scmp.ge.s32.totalorder %s13_s16, 4   ;;  %s1129_s13 = smov %s986_s20 }
 0x114   : > { %s1130_s14 = smov %s924_s15  ;;  %s1131_s15 = smov %s1133_s17 }
 0x115   :  { %12 = sbr.rel (!%p10_p10) target bundleno = 3 (0x3), region = 96 }

// kernel: cvae_forward.13
= control target key start
LH: loop header
LB: loop body
LE: loop exit
PB: predicated region body
PF: predicated region fallthrough
CT: control target
= control target key end

     0   :  { %s2013_s1 = inlined_call_operand.vmem [shape: bf16[1,1152,256], index: 1, kind: input, shape index: {}]   ;;  %s2014_s0 = inlined_call_operand.vmem [shape: bf16[1,8,1152], index: 0, kind: input, shape index: {}]   ;;  %s2015_s2 = inlined_call_operand.vmem [shape: f32[1,1,256], index: 2, kind: input, shape index: {}]   ;;  %s2016_s3 = inlined_call_operand.vmem [shape: f32[1,8,256], index: 3, kind: output, shape index: {}]  }
   0x1   :  { %v1299_v0 = vld [vmem:[%s2013_s1 + $0x74] ss:$8 sps:$4 sm:$0xff]   ;;  %v1301_v1 = vld [vmem:[%s2013_s1 + $0x70] ss:$8 sps:$4 sm:$0xff]   ;;  %v1305_v4 = vld [vmem:[%s2013_s1 + $0x64] ss:$8 sps:$4 sm:$0xff]  }
   0x2   :  { %928 = vmatprep.subr.bf16.mxu0 %v1299_v0  ;;  %v1302_v2 = vld [vmem:[%s2013_s1 + $0x174] ss:$8 sps:$4 sm:$0xff]   ;;  %v1304_v3 = vld [vmem:[%s2013_s1 + $0x170] ss:$8 sps:$4 sm:$0xff]   ;;  %v1307_v5 = vld [vmem:[%s2013_s1 + $0x60] ss:$8 sps:$4 sm:$0xff]  }
   0x3   :  { %929 = vmatpush1.bf16.msra.mxu0 %v1301_v1  ;;  %969 = vmatprep.subr.bf16.mxu1 %v1302_v2  ;;  %v1308_v6 = vld [vmem:[%s2013_s1 + $0x164] ss:$8 sps:$4 sm:$0xff]   ;;  %v1310_v7 = vld [vmem:[%s2013_s1 + $0x160] ss:$8 sps:$4 sm:$0xff]   ;;  %v1311_v8 = vld [vmem:[%s2013_s1 + $0x54] ss:$8 sps:$4 sm:$0xff]  }
   0x4   :  { %970 = vmatpush1.bf16.msra.mxu1 %v1304_v3  ;;  %930 = vmatprep.subr.bf16.mxu0 %v1305_v4  ;;  %v1313_v9 = vld [vmem:[%s2013_s1 + $0x50] ss:$8 sps:$4 sm:$0xff]   ;;  %v1314_v10 = vld [vmem:[%s2013_s1 + $0x154] ss:$8 sps:$4 sm:$0xff]   ;;  %v1317_v11 = vld [vmem:[%s2013_s1 + $0x44] ss:$8 sps:$4 sm:$0xff]  }
   0x5   :  { %971 = vmatprep.subr.bf16.mxu1 %v1308_v6  ;;  %v1316_v12 = vld [vmem:[%s2013_s1 + $0x150] ss:$8 sps:$4 sm:$0xff]   ;;  %v1320_v13 = vld [vmem:[%s2013_s1 + $0x144] ss:$8 sps:$4 sm:$0xff]   ;;  %v1319_v14 = vld [vmem:[%s2013_s1 + $0x40] ss:$8 sps:$4 sm:$0xff]  }
   0x6   :  { %v1323_v15 = vld [vmem:[%s2013_s1 + $0x34] ss:$8 sps:$4 sm:$0xff]   ;;  %v1322_v16 = vld [vmem:[%s2013_s1 + $0x140] ss:$8 sps:$4 sm:$0xff]   ;;  %v1325_v18 = vld [vmem:[%s2013_s1 + $0x30] ss:$8 sps:$4 sm:$0xff]  }
   0x7   :  { %931 = vmatpush1.bf16.msra.mxu0 %v1307_v5  ;;  %v1326_v17 = vld [vmem:[%s2013_s1 + $0x134] ss:$8 sps:$4 sm:$0xff]   ;;  %v1329_v19 = vld [vmem:[%s2013_s1 + $0x24] ss:$8 sps:$4 sm:$0xff]   ;;  %v1328_v20 = vld [vmem:[%s2013_s1 + $0x130] ss:$8 sps:$4 sm:$0xff]  }
   0x8   :  { %932 = vmatprep.subr.bf16.mxu0 %v1311_v8  ;;  %972 = vmatpush1.bf16.msra.mxu1 %v1310_v7  ;;  %v1332_v21 = vld [vmem:[%s2013_s1 + $0x124] ss:$8 sps:$4 sm:$0xff]   ;;  %v1331_v22 = vld [vmem:[%s2013_s1 + $0x20] ss:$8 sps:$4 sm:$0xff]   ;;  %v1335_v23 = vld [vmem:[%s2013_s1 + $0x14] ss:$8 sps:$4 sm:$0xff]  }
   0x9   :  { %973 = vmatprep.subr.bf16.mxu1 %v1314_v10  ;;  %v1334_v24 = vld [vmem:[%s2013_s1 + $0x120] ss:$8 sps:$4 sm:$0xff]   ;;  %v1338_v25 = vld [vmem:[%s2013_s1 + $0x114] ss:$8 sps:$4 sm:$0xff]   ;;  %v1337_v26 = vld [vmem:[%s2013_s1 + $0x10] ss:$8 sps:$4 sm:$0xff]  }
   0xa   :  { %v1341_v27 = vld [vmem:[%s2013_s1 + $0x4] ss:$8 sps:$4 sm:$0xff]   ;;  %v1340_v28 = vld [vmem:[%s2013_s1 + $0x110] ss:$8 sps:$4 sm:$0xff]   ;;  %v1343_v30 = vld [vmem:[%s2013_s1] ss:$8 sps:$4 sm:$0xff]  }
   0xb   :  { %933 = vmatpush1.bf16.msra.mxu0 %v1313_v9  ;;  %v1344_v29 = vld [vmem:[%s2013_s1 + $0x104] ss:$8 sps:$4 sm:$0xff]   ;;  %v1347_v31 = vld [vmem:[%s2013_s1 + $0xf4] ss:$8 sps:$4 sm:$0xff]   ;;  %v1346_v32 = vld [vmem:[%s2013_s1 + $0x100] ss:$8 sps:$4 sm:$0xff]  }
   0xc   :  { %934 = vmatprep.subr.bf16.mxu0 %v1317_v11  ;;  %974 = vmatpush1.bf16.msra.mxu1 %v1316_v12  ;;  %v1350_v33 = vld [vmem:[%s2013_s1 + $0x1f4] ss:$8 sps:$4 sm:$0xff]   ;;  %v1349_v34 = vld [vmem:[%s2013_s1 + $0xf0] ss:$8 sps:$4 sm:$0xff]   ;;  %v1353_v35 = vld [vmem:[%s2013_s1 + $0xe4] ss:$8 sps:$4 sm:$0xff]  }
   0xd   :  { %975 = vmatprep.subr.bf16.mxu1 %v1320_v13  ;;  %v1352_v36 = vld [vmem:[%s2013_s1 + $0x1f0] ss:$8 sps:$4 sm:$0xff]   ;;  %v1356_v37 = vld [vmem:[%s2013_s1 + $0x1e4] ss:$8 sps:$4 sm:$0xff]   ;;  %v1355_v38 = vld [vmem:[%s2013_s1 + $0xe0] ss:$8 sps:$4 sm:$0xff]  }
   0xe   :  { %v1359_v39 = vld [vmem:[%s2013_s1 + $0xd4] ss:$8 sps:$4 sm:$0xff]   ;;  %v1358_v40 = vld [vmem:[%s2013_s1 + $0x1e0] ss:$8 sps:$4 sm:$0xff]   ;;  %v1361_v42 = vld [vmem:[%s2013_s1 + $0xd0] ss:$8 sps:$4 sm:$0xff]  }
   0xf   :  { %935 = vmatpush1.bf16.msra.mxu0 %v1319_v14  ;;  %v1362_v41 = vld [vmem:[%s2013_s1 + $0x1d4] ss:$8 sps:$4 sm:$0xff]   ;;  %v1365_v43 = vld [vmem:[%s2013_s1 + $0xc4] ss:$8 sps:$4 sm:$0xff]   ;;  %v1364_v44 = vld [vmem:[%s2013_s1 + $0x1d0] ss:$8 sps:$4 sm:$0xff]  }
  0x10   :  { %936 = vmatprep.subr.bf16.mxu0 %v1323_v15  ;;  %976 = vmatpush1.bf16.msra.mxu1 %v1322_v16  ;;  %v1368_v45 = vld [vmem:[%s2013_s1 + $0x1c4] ss:$8 sps:$4 sm:$0xff]   ;;  %v1367_v47 = vld [vmem:[%s2013_s1 + $0xc0] ss:$8 sps:$4 sm:$0xff]   ;;  %v1371_v49 = vld [vmem:[%s2013_s1 + $0xb4] ss:$8 sps:$4 sm:$0xff]  }
  0x11   :  { %977 = vmatprep.subr.bf16.mxu1 %v1326_v17  ;;  %v15_v46 = vld [vmem:[%s2014_s0] sm:$0xff]  ;;  %v16_v50 = vld [vmem:[%s2014_s0 + $0x8] sm:$0xff]  ;;  %v1374_v53 = vld [vmem:[%s2013_s1 + $0x1b4] ss:$8 sps:$4 sm:$0xff]  }
  0x12   :  { %v1146_v48 = vcombine.high %v15_v46, %v15_v46  ;;  %v1370_v51 = vld [vmem:[%s2013_s1 + $0x1c0] ss:$8 sps:$4 sm:$0xff]   ;;  %v1148_v52 = vcombine.high %v16_v50, %v16_v50  ;;  %v1373_v54 = vld [vmem:[%s2013_s1 + $0xb0] ss:$8 sps:$4 sm:$0xff]   ;;  %v1377_v55 = vld [vmem:[%s2013_s1 + $0xa4] ss:$8 sps:$4 sm:$0xff]   ;;  %v1145_v5 = vcombine.low %v15_v46, %v15_v46  ;;  %v1147_v8 = vcombine.low %v16_v50, %v16_v50 }
  0x13   :  { %937 = vmatpush1.bf16.msra.mxu0 %v1325_v18  ;;  %v1376_v56 = vld [vmem:[%s2013_s1 + $0x1b0] ss:$8 sps:$4 sm:$0xff]   ;;  %v1380_v57 = vld [vmem:[%s2013_s1 + $0x1a4] ss:$8 sps:$4 sm:$0xff]   ;;  %v1379_v58 = vld [vmem:[%s2013_s1 + $0xa0] ss:$8 sps:$4 sm:$0xff]  }
  0x14   :  { %938 = vmatprep.subr.bf16.mxu0 %v1329_v19  ;;  %978 = vmatpush1.bf16.msra.mxu1 %v1328_v20  ;;  %v1383_v59 = vld [vmem:[%s2013_s1 + $0x94] ss:$8 sps:$4 sm:$0xff]   ;;  %v1382_v60 = vld [vmem:[%s2013_s1 + $0x1a0] ss:$8 sps:$4 sm:$0xff]   ;;  %v1385_v62 = vld [vmem:[%s2013_s1 + $0x90] ss:$8 sps:$4 sm:$0xff]  }
  0x15   :  { %979 = vmatprep.subr.bf16.mxu1 %v1332_v21  ;;  %960 = vmatprep.mubr.bf16.mxu0 %v1146_v48  ;;  %v1386_v61 = vld [vmem:[%s2013_s1 + $0x194] ss:$8 sps:$4 sm:$0xff]   ;;  %v1389_v63 = vld [vmem:[%s2013_s1 + $0x84] ss:$8 sps:$4 sm:$0xff]   ;;  %v1388_v0 = vld [vmem:[%s2013_s1 + $0x190] ss:$8 sps:$4 sm:$0xff]  }
  0x16   :  { %1001 = vmatprep.mubr.bf16.mxu1 %v1148_v52  ;;  %v1392_v1 = vld [vmem:[%s2013_s1 + $0x184] ss:$8 sps:$4 sm:$0xff]   ;;  %v1391_v2 = vld [vmem:[%s2013_s1 + $0x80] ss:$8 sps:$4 sm:$0xff]   ;;  %v1399_v3 = vld [vmem:[%s2013_s1 + $0x274] ss:$8 sps:$4 sm:$0xff]  }
  0x17   :  { %939 = vmatpush1.bf16.msra.mxu0 %v1331_v22  ;;  %v1396_v4 = vld [vmem:[%s2013_s1 + $0x180] ss:$8 sps:$4 sm:$0xff]   ;;  %v1404_v6 = vld [vmem:[%s2013_s1 + $0x374] ss:$8 sps:$4 sm:$0xff]   ;;  %v1397_v7 = vld [vmem:[%s2013_s1 + $0x270] ss:$8 sps:$4 sm:$0xff]  }
  0x18   :  { %940 = vmatprep.subr.bf16.mxu0 %v1335_v23  ;;  %980 = vmatpush1.bf16.msra.mxu1 %v1334_v24  ;;  %v1407_v9 = vld [vmem:[%s2013_s1 + $0x264] ss:$8 sps:$4 sm:$0xff]   ;;  %v1402_v10 = vld [vmem:[%s2013_s1 + $0x370] ss:$8 sps:$4 sm:$0xff]   ;;  %v1405_v12 = vld [vmem:[%s2013_s1 + $0x260] ss:$8 sps:$4 sm:$0xff]  }
  0x19   :  { %981 = vmatprep.subr.bf16.mxu1 %v1338_v25  ;;  %v1410_v11 = vld [vmem:[%s2013_s1 + $0x364] ss:$8 sps:$4 sm:$0xff]   ;;  %v1413_v13 = vld [vmem:[%s2013_s1 + $0x254] ss:$8 sps:$4 sm:$0xff]   ;;  %v1408_v14 = vld [vmem:[%s2013_s1 + $0x360] ss:$8 sps:$4 sm:$0xff]  }
  0x1a   :  { %v1416_v15 = vld [vmem:[%s2013_s1 + $0x354] ss:$8 sps:$4 sm:$0xff]   ;;  %v1411_v16 = vld [vmem:[%s2013_s1 + $0x250] ss:$8 sps:$4 sm:$0xff]   ;;  %v1419_v17 = vld [vmem:[%s2013_s1 + $0x244] ss:$8 sps:$4 sm:$0xff]  }
  0x1b   :  { %941 = vmatpush1.bf16.msra.mxu0 %v1337_v26  ;;  %v1414_v18 = vld [vmem:[%s2013_s1 + $0x350] ss:$8 sps:$4 sm:$0xff]   ;;  %v1422_v19 = vld [vmem:[%s2013_s1 + $0x344] ss:$8 sps:$4 sm:$0xff]   ;;  %v1417_v20 = vld [vmem:[%s2013_s1 + $0x240] ss:$8 sps:$4 sm:$0xff]  }
  0x1c   :  { %942 = vmatprep.subr.bf16.mxu0 %v1341_v27  ;;  %982 = vmatpush1.bf16.msra.mxu1 %v1340_v28  ;;  %v1425_v21 = vld [vmem:[%s2013_s1 + $0x234] ss:$8 sps:$4 sm:$0xff]   ;;  %v1420_v22 = vld [vmem:[%s2013_s1 + $0x340] ss:$8 sps:$4 sm:$0xff]   ;;  %v1423_v24 = vld [vmem:[%s2013_s1 + $0x230] ss:$8 sps:$4 sm:$0xff]  }
  0x1d   :  { %983 = vmatprep.subr.bf16.mxu1 %v1344_v29  ;;  %v1428_v23 = vld [vmem:[%s2013_s1 + $0x334] ss:$8 sps:$4 sm:$0xff]   ;;  %v1431_v25 = vld [vmem:[%s2013_s1 + $0x224] ss:$8 sps:$4 sm:$0xff]   ;;  %v1426_v26 = vld [vmem:[%s2013_s1 + $0x330] ss:$8 sps:$4 sm:$0xff]  }
  0x1e   :  { %v1434_v27 = vld [vmem:[%s2013_s1 + $0x324] ss:$8 sps:$4 sm:$0xff]   ;;  %v1429_v28 = vld [vmem:[%s2013_s1 + $0x220] ss:$8 sps:$4 sm:$0xff]   ;;  %v1437_v29 = vld [vmem:[%s2013_s1 + $0x214] ss:$8 sps:$4 sm:$0xff]  }
  0x1f   :  { %943 = vmatpush1.bf16.msra.mxu0 %v1343_v30  ;;  %v1432_v30 = vld [vmem:[%s2013_s1 + $0x320] ss:$8 sps:$4 sm:$0xff]   ;;  %v1450_v46 = vld [vmem:[%s2013_s1 + $0x3f0] ss:$8 sps:$4 sm:$0xff]  }
  0x20   :  { %944 = vmatprep.subr.bf16.mxu0 %v1347_v31  ;;  %984 = vmatpush1.bf16.msra.mxu1 %v1346_v32  ;;  %v1440_v31 = vld [vmem:[%s2013_s1 + $0x314] ss:$8 sps:$4 sm:$0xff]   ;;  %v1453_v48 = vld [vmem:[%s2013_s1 + $0x2e0] ss:$8 sps:$4 sm:$0xff]   ;;  %v1459_v52 = vld [vmem:[%s2013_s1 + $0x2d0] ss:$8 sps:$4 sm:$0xff]  }
  0x21   :  { %985 = vmatprep.subr.bf16.mxu1 %v1350_v33  ;;  %v1824_v32 = vld [vmem:[%s2014_s0 + $0x10] sm:$0xff]  ;;  %v1456_v50 = vld [vmem:[%s2013_s1 + $0x3e0] ss:$8 sps:$4 sm:$0xff]  }
  0x22   :  { %v1435_v33 = vld [vmem:[%s2013_s1 + $0x210] ss:$8 sps:$4 sm:$0xff]  }
  0x23   :  { %945 = vmatpush2.bf16.msra.mxu0 %v1349_v34  ;;  %v1150_v34 = vcombine.high %v1824_v32, %v1824_v32 }
  0x24   :  { %946 = vmatprep.subr.bf16.mxu0 %v1353_v35  ;;  %986 = vmatpush2.bf16.msra.mxu1 %v1352_v36  ;;  %v1834_v35 = vld [vmem:[%s2014_s0 + $0x18] sm:$0xff]  ;;  %v1443_v36 = vld [vmem:[%s2013_s1 + $0x204] ss:$8 sps:$4 sm:$0xff]  }
  0x25   :  { %987 = vmatprep.subr.bf16.mxu1 %v1356_v37  ;;  %v1152_v37 = vcombine.high %v1834_v35, %v1834_v35 }
  0x27   :  { %947 = vmatpush2.bf16.msra.mxu0 %v1355_v38  ;;  %v1438_v38 = vld [vmem:[%s2013_s1 + $0x310] ss:$8 sps:$4 sm:$0xff]  }
  0x28   :  { %948 = vmatprep.subr.bf16.mxu0 %v1359_v39  ;;  %988 = vmatpush2.bf16.msra.mxu1 %v1358_v40  ;;  %v1446_v39 = vld [vmem:[%s2013_s1 + $0x304] ss:$8 sps:$4 sm:$0xff]   ;;  %v1441_v40 = vld [vmem:[%s2013_s1 + $0x200] ss:$8 sps:$4 sm:$0xff]  }
  0x29   :  { %989 = vmatprep.subr.bf16.mxu1 %v1362_v41  ;;  %v1449_v41 = vld [vmem:[%s2013_s1 + $0x2f4] ss:$8 sps:$4 sm:$0xff]  }
  0x2b   :  { %949 = vmatpush2.bf16.msra.mxu0 %v1361_v42  ;;  %v1444_v42 = vld [vmem:[%s2013_s1 + $0x300] ss:$8 sps:$4 sm:$0xff]  }
  0x2c   :  { %950 = vmatprep.subr.bf16.mxu0 %v1365_v43  ;;  %990 = vmatpush2.bf16.msra.mxu1 %v1364_v44  ;;  %v1452_v43 = vld [vmem:[%s2013_s1 + $0x3f4] ss:$8 sps:$4 sm:$0xff]   ;;  %v1447_v44 = vld [vmem:[%s2013_s1 + $0x2f0] ss:$8 sps:$4 sm:$0xff]  }
  0x2d   :  { %991 = vmatprep.subr.bf16.mxu1 %v1368_v45  ;;  %v1455_v45 = vld [vmem:[%s2013_s1 + $0x2e4] ss:$8 sps:$4 sm:$0xff]  }
  0x2f   :  { %951 = vmatpush2.bf16.msra.mxu0 %v1367_v47  ;;  %v1458_v47 = vld [vmem:[%s2013_s1 + $0x3e4] ss:$8 sps:$4 sm:$0xff]  }
  0x30   :  { %952 = vmatprep.subr.bf16.mxu0 %v1371_v49  ;;  %992 = vmatpush2.bf16.msra.mxu1 %v1370_v51  ;;  %v1461_v49 = vld [vmem:[%s2013_s1 + $0x2d4] ss:$8 sps:$4 sm:$0xff]  }
  0x31   :  { %993 = vmatprep.subr.bf16.mxu1 %v1374_v53  ;;  %v1464_v51 = vld [vmem:[%s2013_s1 + $0x3d4] ss:$8 sps:$4 sm:$0xff]   ;;  %v1467_v53 = vld [vmem:[%s2013_s1 + $0x2c4] ss:$8 sps:$4 sm:$0xff]  }
  0x33   :  { %953 = vmatpush2.bf16.msra.mxu0 %v1373_v54  ;;  %v1462_v54 = vld [vmem:[%s2013_s1 + $0x3d0] ss:$8 sps:$4 sm:$0xff]  }
  0x34   :  { %954 = vmatprep.subr.bf16.mxu0 %v1377_v55  ;;  %994 = vmatpush2.bf16.msra.mxu1 %v1376_v56  ;;  %v1470_v55 = vld [vmem:[%s2013_s1 + $0x3c4] ss:$8 sps:$4 sm:$0xff]   ;;  %v1465_v56 = vld [vmem:[%s2013_s1 + $0x2c0] ss:$8 sps:$4 sm:$0xff]  }
  0x35   :  { %995 = vmatprep.subr.bf16.mxu1 %v1380_v57  ;;  %v1473_v57 = vld [vmem:[%s2013_s1 + $0x2b4] ss:$8 sps:$4 sm:$0xff]  }
  0x37   :  { %955 = vmatpush2.bf16.msra.mxu0 %v1379_v58  ;;  %v1468_v58 = vld [vmem:[%s2013_s1 + $0x3c0] ss:$8 sps:$4 sm:$0xff]  }
  0x38   :  { %956 = vmatprep.subr.bf16.mxu0 %v1383_v59  ;;  %996 = vmatpush2.bf16.msra.mxu1 %v1382_v60  ;;  %v1476_v59 = vld [vmem:[%s2013_s1 + $0x3b4] ss:$8 sps:$4 sm:$0xff]   ;;  %v1471_v60 = vld [vmem:[%s2013_s1 + $0x2b0] ss:$8 sps:$4 sm:$0xff]  }
  0x39   :  { %997 = vmatprep.subr.bf16.mxu1 %v1386_v61  ;;  %v1479_v61 = vld [vmem:[%s2013_s1 + $0x2a4] ss:$8 sps:$4 sm:$0xff]  }
  0x3b   :  { %957 = vmatpush2.bf16.msra.mxu0 %v1385_v62  ;;  %v1474_v62 = vld [vmem:[%s2013_s1 + $0x3b0] ss:$8 sps:$4 sm:$0xff]  }
  0x3c   :  { %958 = vmatprep.subr.bf16.mxu0 %v1389_v63  ;;  %998 = vmatpush2.bf16.msra.mxu1 %v1388_v0  ;;  %v1482_v63 = vld [vmem:[%s2013_s1 + $0x3a4] ss:$8 sps:$4 sm:$0xff]   ;;  %v1477_v0 = vld [vmem:[%s2013_s1 + $0x2a0] ss:$8 sps:$4 sm:$0xff]  }
  0x3d   :  { %999 = vmatprep.subr.bf16.mxu1 %v1392_v1  ;;  %v1485_v1 = vld [vmem:[%s2013_s1 + $0x294] ss:$8 sps:$4 sm:$0xff]  }
  0x3f   :  { %959 = vmatpush2.bf16.msra.mxu0 %v1391_v2  ;;  %v1480_v2 = vld [vmem:[%s2013_s1 + $0x3a0] ss:$8 sps:$4 sm:$0xff]  }
  0x40   :  { %1010 = vmatprep.subr.bf16.mxu0 %v1399_v3  ;;  %1000 = vmatpush2.bf16.msra.mxu1 %v1396_v4  ;;  %v1488_v3 = vld [vmem:[%s2013_s1 + $0x394] ss:$8 sps:$4 sm:$0xff]   ;;  %v1483_v4 = vld [vmem:[%s2013_s1 + $0x290] ss:$8 sps:$4 sm:$0xff]  }
  0x41   :  { %1051 = vmatprep.subr.bf16.mxu1 %v1404_v6  ;;  %v1486_v6 = vld [vmem:[%s2013_s1 + $0x390] ss:$8 sps:$4 sm:$0xff]  }
  0x42   :  { %961 = vmatmul.mubr.bf16.vlgmr.msra.gmra.mxu0 %v1145_v5  ;;  %v1491_v5 = vld [vmem:[%s2013_s1 + $0x284] ss:$8 sps:$4 sm:$0xff]  }
  0x43   :  { %1011 = vmatpush1.bf16.msra.mxu0 %v1397_v7  ;;  %1002 = vmatmul.mubr.bf16.vlgmr.msra.gmra.mxu1 %v1147_v8  ;;  %v1494_v7 = vld [vmem:[%s2013_s1 + $0x384] ss:$8 sps:$4 sm:$0xff]   ;;  %v1489_v8 = vld [vmem:[%s2013_s1 + $0x280] ss:$8 sps:$4 sm:$0xff]  }
  0x44   :  { %1012 = vmatprep.subr.bf16.mxu0 %v1407_v9  ;;  %1052 = vmatpush1.bf16.msra.mxu1 %v1402_v10  ;;  %v1499_v9 = vld [vmem:[%s2013_s1 + $0x474] ss:$8 sps:$4 sm:$0xff]   ;;  %v1492_v10 = vld [vmem:[%s2013_s1 + $0x380] ss:$8 sps:$4 sm:$0xff]  }
  0x45   :  { %1053 = vmatprep.subr.bf16.mxu1 %v1410_v11  ;;  %1042 = vmatprep.mubr.bf16.mxu0 %v1150_v34  ;;  %v1149_v11 = vcombine.low %v1824_v32, %v1824_v32 }
  0x46   :  { %1083 = vmatprep.mubr.bf16.mxu1 %v1152_v37 }
  0x47   :  { %1013 = vmatpush1.bf16.msra.mxu0 %v1405_v12  ;;  %v1497_v12 = vld [vmem:[%s2013_s1 + $0x470] ss:$8 sps:$4 sm:$0xff]  }
  0x48   :  { %1014 = vmatprep.subr.bf16.mxu0 %v1413_v13  ;;  %1054 = vmatpush1.bf16.msra.mxu1 %v1408_v14  ;;  %v1151_v13 = vcombine.low %v1834_v35, %v1834_v35  ;;  %v1504_v14 = vld [vmem:[%s2013_s1 + $0x464] ss:$8 sps:$4 sm:$0xff]  }
  0x49   :  { %1055 = vmatprep.subr.bf16.mxu1 %v1416_v15  ;;  %v1502_v15 = vld [vmem:[%s2013_s1 + $0x460] ss:$8 sps:$4 sm:$0xff]  }
  0x4b   :  { %1015 = vmatpush1.bf16.msra.mxu0 %v1411_v16  ;;  %v1524_v16 = vmov 0  }
  0x4c   :  { %1016 = vmatprep.subr.bf16.mxu0 %v1419_v17  ;;  %1056 = vmatpush1.bf16.msra.mxu1 %v1414_v18  ;;  %v1507_v17 = vld [vmem:[%s2013_s1 + $0x454] ss:$8 sps:$4 sm:$0xff]   ;;  %v1505_v18 = vld [vmem:[%s2013_s1 + $0x450] ss:$8 sps:$4 sm:$0xff]  }
  0x4d   :  { %1057 = vmatprep.subr.bf16.mxu1 %v1422_v19  ;;  %v1510_v19 = vld [vmem:[%s2013_s1 + $0x444] ss:$8 sps:$4 sm:$0xff]  }
  0x4f   :  { %1017 = vmatpush1.bf16.msra.mxu0 %v1417_v20  ;;  %v1508_v20 = vld [vmem:[%s2013_s1 + $0x440] ss:$8 sps:$4 sm:$0xff]  }
  0x50   :  { %1018 = vmatprep.subr.bf16.mxu0 %v1425_v21  ;;  %1058 = vmatpush1.bf16.msra.mxu1 %v1420_v22  ;;  %v1513_v21 = vld [vmem:[%s2013_s1 + $0x434] ss:$8 sps:$4 sm:$0xff]   ;;  %v1511_v22 = vld [vmem:[%s2013_s1 + $0x430] ss:$8 sps:$4 sm:$0xff]  }
  0x51   :  { %1059 = vmatprep.subr.bf16.mxu1 %v1428_v23  ;;  %v1516_v23 = vld [vmem:[%s2013_s1 + $0x424] ss:$8 sps:$4 sm:$0xff]  }
  0x53   :  { %1019 = vmatpush1.bf16.msra.mxu0 %v1423_v24  ;;  %v1514_v24 = vld [vmem:[%s2013_s1 + $0x420] ss:$8 sps:$4 sm:$0xff]  }
  0x54   :  { %1020 = vmatprep.subr.bf16.mxu0 %v1431_v25  ;;  %1060 = vmatpush1.bf16.msra.mxu1 %v1426_v26  ;;  %v1519_v25 = vld [vmem:[%s2013_s1 + $0x414] ss:$8 sps:$4 sm:$0xff]   ;;  %v1517_v26 = vld [vmem:[%s2013_s1 + $0x410] ss:$8 sps:$4 sm:$0xff]  }
  0x55   :  { %1061 = vmatprep.subr.bf16.mxu1 %v1434_v27  ;;  %v1522_v27 = vld [vmem:[%s2013_s1 + $0x404] ss:$8 sps:$4 sm:$0xff]  }
  0x57   :  { %1021 = vmatpush1.bf16.msra.mxu0 %v1429_v28  ;;  %v1520_v28 = vld [vmem:[%s2013_s1 + $0x400] ss:$8 sps:$4 sm:$0xff]  }
  0x58   :  { %1022 = vmatprep.subr.bf16.mxu0 %v1437_v29  ;;  %1062 = vmatpush1.bf16.msra.mxu1 %v1432_v30  ;;  %v1523_v29 = vld [vmem:[%s2014_s0 + $0x20] ss:$0 sps:$4 sm:$0xff]   ;;  %v166_v30 = vlaneseq }
  0x59   :  { %1063 = vmatprep.subr.bf16.mxu1 %v1440_v31 }
  0x5a   :  { %v167_v31 = vshrl.u32 %v166_v30, 7 }
  0x5b   :  { %1023 = vmatpush1.bf16.msra.mxu0 %v1435_v33  ;;  %v164_v33 = vld [vmem:[%s2015_s2] sm:$0x3] }
  0x5c   :  { %1024 = vmatprep.subr.bf16.mxu0 %v1443_v36  ;;  %1064 = vmatpush1.bf16.msra.mxu1 %v1438_v38  ;;  %v168_v32 = vsub.s32 0, %v167_v31  ;;  %v172_v34 = vsub.s32 1, %v167_v31 }
  0x5d   :  { %1065 = vmatprep.subr.bf16.mxu1 %v1446_v39 }
  0x5e   :  { %v169_v35 = vrot.slane %v164_v33, %v168_v32  ;;  %v173_v36 = vrot.slane %v164_v33, %v172_v34 }
  0x5f   :  { %1025 = vmatpush1.bf16.msra.mxu0 %v1441_v40 }
  0x60   :  { %1026 = vmatprep.subr.bf16.mxu0 %v1449_v41  ;;  %1066 = vmatpush1.bf16.msra.mxu1 %v1444_v42 }
  0x61   :  { %1067 = vmatprep.subr.bf16.mxu1 %v1452_v43 }
  0x63   :  { %1027 = vmatpush2.bf16.msra.mxu0 %v1447_v44 }
  0x64   :  { %1028 = vmatprep.subr.bf16.mxu0 %v1455_v45  ;;  %1068 = vmatpush2.bf16.msra.mxu1 %v1450_v46 }
  0x65   :  { %1069 = vmatprep.subr.bf16.mxu1 %v1458_v47 }
  0x67   :  { %1029 = vmatpush2.bf16.msra.mxu0 %v1453_v48 }
  0x68   :  { %1030 = vmatprep.subr.bf16.mxu0 %v1461_v49  ;;  %1070 = vmatpush2.bf16.msra.mxu1 %v1456_v50 }
  0x69   :  { %1071 = vmatprep.subr.bf16.mxu1 %v1464_v51 }
  0x6b   :  { %1031 = vmatpush2.bf16.msra.mxu0 %v1459_v52 }
  0x6c   :  { %1032 = vmatprep.subr.bf16.mxu0 %v1467_v53  ;;  %1072 = vmatpush2.bf16.msra.mxu1 %v1462_v54 }
  0x6d   :  { %1073 = vmatprep.subr.bf16.mxu1 %v1470_v55 }
  0x6f   :  { %1033 = vmatpush2.bf16.msra.mxu0 %v1465_v56 }
  0x70   :  { %1034 = vmatprep.subr.bf16.mxu0 %v1473_v57  ;;  %1074 = vmatpush2.bf16.msra.mxu1 %v1468_v58 }
  0x71   :  { %1075 = vmatprep.subr.bf16.mxu1 %v1476_v59 }
  0x73   :  { %1035 = vmatpush2.bf16.msra.mxu0 %v1471_v60 }
  0x74   :  { %1036 = vmatprep.subr.bf16.mxu0 %v1479_v61  ;;  %1076 = vmatpush2.bf16.msra.mxu1 %v1474_v62 }
  0x75   :  { %1077 = vmatprep.subr.bf16.mxu1 %v1482_v63 }
  0x77   :  { %1037 = vmatpush2.bf16.msra.mxu0 %v1477_v0 }
  0x78   :  { %1038 = vmatprep.subr.bf16.mxu0 %v1485_v1  ;;  %1078 = vmatpush2.bf16.msra.mxu1 %v1480_v2 }
  0x79   :  { %1079 = vmatprep.subr.bf16.mxu1 %v1488_v3 }
  0x7b   :  { %1039 = vmatpush2.bf16.msra.mxu0 %v1483_v4 }
  0x7c   :  { %1040 = vmatprep.subr.bf16.mxu0 %v1491_v5  ;;  %1080 = vmatpush2.bf16.msra.mxu1 %v1486_v6 }
  0x7d   :  { %1081 = vmatprep.subr.bf16.mxu1 %v1494_v7 }
  0x7f   :  { %1041 = vmatpush2.bf16.msra.mxu0 %v1489_v8 }
  0x80   :  { %1092 = vmatprep.subr.bf16.mxu0 %v1499_v9  ;;  %1082 = vmatpush2.bf16.msra.mxu1 %v1492_v10 }
  0x82   :  { %1043 = vmatmul.mubr.bf16.vlgmr.msra.gmra.mxu0 %v1149_v11 }
  0x83   :  { %1093 = vmatpush1.bf16.msra.mxu0 %v1497_v12  ;;  %1124 = vmatprep.mubr.bf16.mxu0 %v1524_v16 }
  0x84   :  { %1084 = vmatmul.mubr.bf16.vlgmr.msra.gmra.mxu1 %v1151_v13  ;;  %1094 = vmatprep.subr.bf16.mxu0 %v1504_v14 }
  0x87   :  { %1095 = vmatpush1.bf16.msra.mxu0 %v1502_v15 }
  0x88   :  { %1096 = vmatprep.subr.bf16.mxu0 %v1507_v17 }
  0x8b   :  { %1097 = vmatpush1.bf16.msra.mxu0 %v1505_v18 }
  0x8c   :  { %1098 = vmatprep.subr.bf16.mxu0 %v1510_v19 }
  0x8f   :  { %1099 = vmatpush1.bf16.msra.mxu0 %v1508_v20 }
  0x90   :  { %1100 = vmatprep.subr.bf16.mxu0 %v1513_v21 }
  0x93   :  { %1101 = vmatpush1.bf16.msra.mxu0 %v1511_v22 }
  0x94   :  { %1102 = vmatprep.subr.bf16.mxu0 %v1516_v23 }
  0x97   :  { %1103 = vmatpush1.bf16.msra.mxu0 %v1514_v24 }
  0x98   :  { %1104 = vmatprep.subr.bf16.mxu0 %v1519_v25 }
  0x9b   :  { %1105 = vmatpush1.bf16.msra.mxu0 %v1517_v26 }
  0x9c   :  { %1106 = vmatprep.subr.bf16.mxu0 %v1522_v27 }
  0x9f   :  { %1107 = vmatpush1.bf16.msra.mxu0 %v1520_v28 }
  0xa2   :  { %1125 = vmatmul.mubr.bf16.vlgmr.msra.gmra.mxu0 %v1523_v29 }
 0x102   :  { %v962_v37 = vpop.f32.mrf.mxu0 }
 0x103   :  { %v963_v38 = vadd.f32 %v962_v37, %v169_v35  ;;  %v1003_v40 = vpop.f32.mrf.mxu1 }
 0x104   :  { %v964_v39 = vpop.f32.mrf.mxu0 }
 0x105   :  { %v965_v41 = vadd.f32 %v964_v39, %v173_v36  ;;  %v1004_v42 = vadd.f32 %v1003_v40, %v963_v38  ;;  %v1005_v44 = vpop.f32.mrf.mxu1 }
 0x106   :  { %v966_v43 = vpop.f32.mrf.mxu0 }
 0x107   :  { %v1006_v45 = vadd.f32 %v1005_v44, %v965_v41  ;;  %v1007_v47 = vpop.f32.mrf.mxu1 }
 0x108   :  { %v967_v46 = vpop.f32.mrf.mxu0 }
 0x109   :  { %v1008_v48 = vpop.f32.mrf.mxu1 }
 0x142   :  { %v1044_v49 = vpop.f32.mrf.mxu0 }
 0x143   :  { %v1045_v57 = vadd.f32 %v1044_v49, %v1004_v42 }
 0x144   :  { %v1046_v50 = vpop.f32.mrf.mxu0  ;;  %v1085_v51 = vpop.f32.mrf.mxu1 }
 0x145   :  { %v1047_v58 = vadd.f32 %v1046_v50, %v1006_v45  ;;  %v1086_v59 = vadd.f32 %v1085_v51, %v1045_v57 }
 0x146   :  { %v1048_v52 = vpop.f32.mrf.mxu0  ;;  %v1087_v53 = vpop.f32.mrf.mxu1 }
 0x147   :  { %v1088_v61 = vadd.f32 %v1087_v53, %v1047_v58 }
 0x148   :  { %v1049_v54 = vpop.f32.mrf.mxu0  ;;  %v1089_v55 = vpop.f32.mrf.mxu1 }
 0x14a   :  { %v1090_v56 = vpop.f32.mrf.mxu1 }
 0x162   :  { %v1126_v60 = vpop.f32.mrf.mxu0 }
 0x163   :  { %v1127_v62 = vadd.f32 %v1126_v60, %v1086_v59 }
 0x164   :  { %v1128_v63 = vpop.f32.mrf.mxu0 }
 0x165   :  { %vm1133_vm0 = vcmp.gt.f32.partialorder %v1127_v62, 0.0  ;;  %v1135_v0 = vmul.f32 0.2, %v1127_v62  ;;  %v1129_v1 = vadd.f32 %v1128_v63, %v1088_v61 }
 0x166   :  { %v1130_v2 = vpop.f32.mrf.mxu0 }
 0x167   :  { %v1137_v3 = vsel %vm1133_vm0, %v1127_v62, %v1135_v0  ;;  %vm1134_vm1 = vcmp.gt.f32.partialorder %v1129_v1, 0.0  ;;  %v1136_v4 = vmul.f32 0.2, %v1129_v1 }
 0x168   :  { %1139 = vst [vmem:[%s2016_s3] sm:$0xff] %v1137_v3  ;;  %v1131_v5 = vpop.f32.mrf.mxu0 }
 0x169   :  { %v1138_v6 = vsel %vm1134_vm1, %v1129_v1, %v1136_v4 }
 0x16a   :  { %1140 = vst [vmem:[%s2016_s3 + $0x8] sm:$0xff] %v1138_v6 }

// kernel: squeeze.9
= control target key start
LH: loop header
LB: loop body
LE: loop exit
PB: predicated region body
PF: predicated region fallthrough
CT: control target
= control target key end

     0   :  { %v460_v51 = vmov 0.0   ;;  %s543_s0 = inlined_call_operand.vmem [shape: bf16[1,2,2048], index: 0, kind: input, shape index: {}]   ;;  %s544_s1 = inlined_call_operand.vmem [shape: bf16[2,4,4,128], index: 1, kind: output, shape index: {}]  }
   0x1   :  { %v437_v0 = vld [vmem:[%s543_s0 + $0xf] sm:$0x1]  ;;  %v438_v1 = vld [vmem:[%s543_s0 + $0xe] sm:$0x1]  ;;  %v439_v2 = vld [vmem:[%s543_s0 + $0xd] sm:$0x1] }
   0x2   :  { %v18_v3 = vunpack.c.l.bf16 %v437_v0  ;;  %v34_v4 = vunpack.c.l.bf16 %v438_v1  ;;  %v50_v5 = vunpack.c.l.bf16 %v439_v2  ;;  %v440_v6 = vld [vmem:[%s543_s0 + $0xc] sm:$0x1]  ;;  %v441_v7 = vld [vmem:[%s543_s0 + $0xb] sm:$0x1]  ;;  %v442_v8 = vld [vmem:[%s543_s0 + $0xa] sm:$0x1] }
   0x3   :  { %v66_v9 = vunpack.c.l.bf16 %v440_v6  ;;  %v82_v10 = vunpack.c.l.bf16 %v441_v7  ;;  %v98_v11 = vunpack.c.l.bf16 %v442_v8  ;;  %v443_v12 = vld [vmem:[%s543_s0 + $0x9] sm:$0x1]  ;;  %v444_v13 = vld [vmem:[%s543_s0 + $0x8] sm:$0x1]  ;;  %v445_v14 = vld [vmem:[%s543_s0 + $0x7] sm:$0x1] }
   0x4   :  { %21 = vst [vmem:[#allocation1 + $0x48] sm:$0x3] %v18_v3  ;;  %37 = vst [vmem:[#allocation1 + $0x78] sm:$0x3] %v34_v4  ;;  %v114_v15 = vunpack.c.l.bf16 %v443_v12  ;;  %v130_v16 = vunpack.c.l.bf16 %v444_v13  ;;  %v146_v17 = vunpack.c.l.bf16 %v445_v14  ;;  %v446_v18 = vld [vmem:[%s543_s0 + $0x6] sm:$0x1] }
   0x5   :  { %53 = vst [vmem:[#allocation1 + $0x20] sm:$0x3] %v50_v5  ;;  %v447_v19 = vld [vmem:[%s543_s0 + $0x5] sm:$0x1]  ;;  %v448_v20 = vld [vmem:[%s543_s0 + $0x4] sm:$0x1]  ;;  %v162_v21 = vunpack.c.l.bf16 %v446_v18 }
   0x6   :  { %69 = vst [vmem:[#allocation1 + $0x60] sm:$0x3] %v66_v9  ;;  %85 = vst [vmem:[#allocation1 + $0x28] sm:$0x3] %v82_v10  ;;  %v178_v22 = vunpack.c.l.bf16 %v447_v19  ;;  %v194_v23 = vunpack.c.l.bf16 %v448_v20  ;;  %v449_v24 = vld [vmem:[%s543_s0 + $0x3] sm:$0x1] }
   0x7   :  { %101 = vst [vmem:[#allocation1 + $0x10] sm:$0x3] %v98_v11  ;;  %v450_v25 = vld [vmem:[%s543_s0 + $0x2] sm:$0x1]  ;;  %v451_v26 = vld [vmem:[%s543_s0 + $0x1] sm:$0x1]  ;;  %v210_v27 = vunpack.c.l.bf16 %v449_v24 }
   0x8   :  { %117 = vst [vmem:[#allocation1 + $0x70] sm:$0x3] %v114_v15  ;;  %133 = vst [vmem:[#allocation1 + $0x30] sm:$0x3] %v130_v16  ;;  %v226_v28 = vunpack.c.l.bf16 %v450_v25  ;;  %v241_v29 = vunpack.c.l.bf16 %v451_v26  ;;  %v254_v30 = vld [vmem:[%s543_s0] sm:$0x1] }
   0x9   :  { %149 = vst [vmem:[#allocation1 + $0x38] sm:$0x3] %v146_v17  ;;  %165 = vst [vmem:[#allocation1 + $0x58] sm:$0x3] %v162_v21  ;;  %v255_v31 = vunpack.c.l.bf16 %v254_v30 }
   0xa   :  { %181 = vst [vmem:[#allocation1 + $0x68] sm:$0x3] %v178_v22  ;;  %197 = vst [vmem:[#allocation1 + $0x40] sm:$0x3] %v194_v23 }
   0xb   :  { %213 = vst [vmem:[#allocation1 + $0x18] sm:$0x3] %v210_v27  ;;  %229 = vst [vmem:[#allocation1 + $0x8] sm:$0x3] %v226_v28  ;;  %v341_v33 = vld [vmem:[#allocation1 + $0x78] sm:$0x3]  }
   0xc   :  { %244 = vst [vmem:[#allocation1] sm:$0x3] %v241_v29  ;;  %257 = vst [vmem:[#allocation1 + $0x50] sm:$0x3] %v255_v31  ;;  %v335_v32 = vld [vmem:[#allocation1 + $0x20] sm:$0x3]  }
   0xd   :  { %v347_v34 = vld [vmem:[#allocation1 + $0x48] sm:$0x3]   ;;  %v329_v37 = vld [vmem:[#allocation1 + $0x60] sm:$0x3]   ;;  %337 = vst [vmem:[#allocation0 + $0x19] sm:$0x1] %v335_v32  }
   0xe   :  { %v317_v35 = vld [vmem:[#allocation1 + $0x10] sm:$0x3]   ;;  %v323_v36 = vld [vmem:[#allocation1 + $0x28] sm:$0x3]   ;;  %339 = vst [vmem:[#allocation0 + $0x38] sm:$0x2] %v335_v32  }
   0xf   :  { %343 = vst [vmem:[#allocation0 + $0x1a] sm:$0x1] %v341_v33   ;;  %345 = vst [vmem:[#allocation0 + $0x39] sm:$0x2] %v341_v33   ;;  %v305_v39 = vld [vmem:[#allocation1 + $0x30] sm:$0x3]  }
  0x10   :  { %349 = vst [vmem:[#allocation0 + $0x1b] sm:$0x1] %v347_v34   ;;  %351 = vst [vmem:[#allocation0 + $0x3a] sm:$0x2] %v347_v34   ;;  %v299_v38 = vld [vmem:[#allocation1 + $0x38] sm:$0x3]  }
  0x11   :  { %v311_v40 = vld [vmem:[#allocation1 + $0x70] sm:$0x3]   ;;  %319 = vst [vmem:[#allocation0 + $0x12] sm:$0x1] %v317_v35   ;;  %321 = vst [vmem:[#allocation0 + $0x31] sm:$0x2] %v317_v35  }
  0x12   :  { %325 = vst [vmem:[#allocation0 + $0x13] sm:$0x1] %v323_v36   ;;  %327 = vst [vmem:[#allocation0 + $0x32] sm:$0x2] %v323_v36   ;;  %v281_v41 = vld [vmem:[#allocation1 + $0x40] sm:$0x3]  }
  0x13   :  { %331 = vst [vmem:[#allocation0 + $0x18] sm:$0x1] %v329_v37   ;;  %333 = vst [vmem:[#allocation0 + $0x37] sm:$0x2] %v329_v37   ;;  %v287_v42 = vld [vmem:[#allocation1 + $0x68] sm:$0x3]  }
  0x14   :  { %v293_v43 = vld [vmem:[#allocation1 + $0x58] sm:$0x3]   ;;  %301 = vst [vmem:[#allocation0 + $0xb] sm:$0x1] %v299_v38   ;;  %303 = vst [vmem:[#allocation0 + $0x2a] sm:$0x2] %v299_v38  }
  0x15   :  { %307 = vst [vmem:[#allocation0 + $0x10] sm:$0x1] %v305_v39   ;;  %309 = vst [vmem:[#allocation0 + $0x2f] sm:$0x2] %v305_v39   ;;  %v263_v44 = vld [vmem:[#allocation1] sm:$0x3]  }
  0x16   :  { %313 = vst [vmem:[#allocation0 + $0x11] sm:$0x1] %v311_v40   ;;  %315 = vst [vmem:[#allocation0 + $0x30] sm:$0x2] %v311_v40   ;;  %v269_v45 = vld [vmem:[#allocation1 + $0x8] sm:$0x3]  }
  0x17   :  { %v275_v46 = vld [vmem:[#allocation1 + $0x18] sm:$0x3]   ;;  %283 = vst [vmem:[#allocation0 + $0x8] sm:$0x1] %v281_v41   ;;  %285 = vst [vmem:[#allocation0 + $0x27] sm:$0x2] %v281_v41  }
  0x18   :  { %289 = vst [vmem:[#allocation0 + $0x9] sm:$0x1] %v287_v42   ;;  %291 = vst [vmem:[#allocation0 + $0x28] sm:$0x2] %v287_v42   ;;  %v258_v47 = vld [vmem:[#allocation1 + $0x50] sm:$0x3]  }
  0x19   :  { %295 = vst [vmem:[#allocation0 + $0xa] sm:$0x1] %v293_v43   ;;  %297 = vst [vmem:[#allocation0 + $0x29] sm:$0x2] %v293_v43  }
  0x1a   :  { %265 = vst [vmem:[#allocation0 + $0x1] sm:$0x1] %v263_v44   ;;  %267 = vst [vmem:[#allocation0 + $0x20] sm:$0x2] %v263_v44   ;;  %v378_v48 = vld [vmem:[#allocation0 + $0x18] sm:$0xf] }
  0x1b   :  { %271 = vst [vmem:[#allocation0 + $0x2] sm:$0x1] %v269_v45   ;;  %273 = vst [vmem:[#allocation0 + $0x21] sm:$0x2] %v269_v45   ;;  %v410_v49 = vld [vmem:[#allocation0 + $0x38] sm:$0xf]  ;;  %v379_v52 = vpack.c.bf16 %v460_v51, %v378_v48 }
  0x1c   :  { %277 = vst [vmem:[#allocation0 + $0x3] sm:$0x1] %v275_v46   ;;  %279 = vst [vmem:[#allocation0 + $0x22] sm:$0x2] %v275_v46   ;;  %v411_v54 = vpack.c.bf16 %v460_v51, %v410_v49 }
  0x1d   :  { %259 = vst [vmem:[#allocation0] sm:$0x1] %v258_v47   ;;  %261 = vst [vmem:[#allocation0 + $0x1f] sm:$0x2] %v258_v47   ;;  %v370_v50 = vld [vmem:[#allocation0 + $0x10] sm:$0xf] }
  0x1e   :  { %v402_v53 = vld [vmem:[#allocation0 + $0x30] sm:$0xf]  ;;  %v371_v56 = vpack.c.bf16 %v460_v51, %v370_v50  ;;  %454 = vst [vmem:[%s544_s1 + $0x6] sm:$0x3] %v379_v52  ;;  %458 = vst [vmem:[%s544_s1 + $0xe] sm:$0x3] %v411_v54 }
  0x1f   :  { %v403_v58 = vpack.c.bf16 %v460_v51, %v402_v53 }
  0x20   :  { %v363_v55 = vld [vmem:[#allocation0 + $0x8] sm:$0xf]  ;;  %453 = vst [vmem:[%s544_s1 + $0x4] sm:$0x3] %v371_v56 }
  0x21   :  { %v394_v57 = vld [vmem:[#allocation0 + $0x28] sm:$0xf]  ;;  %v364_v59 = vpack.c.bf16 %v460_v51, %v363_v55  ;;  %457 = vst [vmem:[%s544_s1 + $0xc] sm:$0x3] %v403_v58 }
  0x22   :  { %v395_v60 = vpack.c.bf16 %v460_v51, %v394_v57 }
  0x23   :  { %452 = vst [vmem:[%s544_s1 + $0x2] sm:$0x3] %v364_v59 }
  0x24   :  { %v357_v61 = vld [vmem:[#allocation0] sm:$0xf]  ;;  %456 = vst [vmem:[%s544_s1 + $0xa] sm:$0x3] %v395_v60 }
  0x25   :  { %v386_v62 = vld [vmem:[#allocation0 + $0x20] sm:$0xf]  ;;  %v358_v63 = vpack.c.bf16 %v460_v51, %v357_v61 }
  0x26   :  { %v387_v0 = vpack.c.bf16 %v460_v51, %v386_v62 }
  0x27   :  { %361 = vst [vmem:[%s544_s1] sm:$0x3] %v358_v63 }
  0x28   :  { %455 = vst [vmem:[%s544_s1 + $0x8] sm:$0x3] %v387_v0 }

// kernel: cvae_forward.14
= control target key start
LH: loop header
LB: loop body
LE: loop exit
PB: predicated region body
PF: predicated region fallthrough
CT: control target
= control target key end

     0   :  { %s1803_s1 = inlined_call_operand.vmem [shape: bf16[1024,256], index: 1, kind: input, shape index: {}]   ;;  %s1804_s0 = inlined_call_operand.vmem [shape: bf16[8,1024], index: 0, kind: input, shape index: {}]   ;;  %s1805_s2 = inlined_call_operand.vmem [shape: f32[1,256], index: 2, kind: input, shape index: {}]   ;;  %s1806_s4 = inlined_call_operand.vmem [shape: f32[8,256], index: 4, kind: output, shape index: {0}]   ;;  %s1807_s3 = inlined_call_operand.vmem [shape: f32[8,128], index: 3, kind: input, shape index: {}]   ;;  %s1808_s5 = inlined_call_operand.vmem [shape: f32[8,128], index: 5, kind: output, shape index: {1}]  }
   0x1   :  { %v1148_v0 = vld [vmem:[%s1803_s1 + $0x74] ss:$8 sps:$4 sm:$0xff]   ;;  %v1152_v2 = vld [vmem:[%s1803_s1 + $0x70] ss:$8 sps:$4 sm:$0xff]   ;;  %v1154_v4 = vld [vmem:[%s1803_s1 + $0x64] ss:$8 sps:$4 sm:$0xff]  }
   0x2   :  { %v1150_v1 = vld [vmem:[%s1803_s1 + $0x174] ss:$8 sps:$4 sm:$0xff]   ;;  %831 = vmatprep.subr.bf16.mxu0 %v1148_v0  ;;  %v1153_v3 = vld [vmem:[%s1803_s1 + $0x170] ss:$8 sps:$4 sm:$0xff]   ;;  %v1156_v5 = vld [vmem:[%s1803_s1 + $0x164] ss:$8 sps:$4 sm:$0xff]  }
   0x3   :  { %872 = vmatprep.subr.bf16.mxu1 %v1150_v1  ;;  %832 = vmatpush1.bf16.msra.mxu0 %v1152_v2  ;;  %v1158_v6 = vld [vmem:[%s1803_s1 + $0x60] ss:$8 sps:$4 sm:$0xff]   ;;  %v1160_v8 = vld [vmem:[%s1803_s1 + $0x54] ss:$8 sps:$4 sm:$0xff]   ;;  %v1164_v10 = vld [vmem:[%s1803_s1 + $0x50] ss:$8 sps:$4 sm:$0xff]  }
   0x4   :  { %873 = vmatpush1.bf16.msra.mxu1 %v1153_v3  ;;  %833 = vmatprep.subr.bf16.mxu0 %v1154_v4  ;;  %v1159_v7 = vld [vmem:[%s1803_s1 + $0x160] ss:$8 sps:$4 sm:$0xff]   ;;  %v1162_v9 = vld [vmem:[%s1803_s1 + $0x154] ss:$8 sps:$4 sm:$0xff]   ;;  %v1165_v11 = vld [vmem:[%s1803_s1 + $0x150] ss:$8 sps:$4 sm:$0xff]  }
   0x5   :  { %874 = vmatprep.subr.bf16.mxu1 %v1156_v5  ;;  %v1166_v12 = vld [vmem:[%s1803_s1 + $0x44] ss:$8 sps:$4 sm:$0xff]   ;;  %v1170_v14 = vld [vmem:[%s1803_s1 + $0x40] ss:$8 sps:$4 sm:$0xff]   ;;  %v1172_v16 = vld [vmem:[%s1803_s1 + $0x34] ss:$8 sps:$4 sm:$0xff]  }
   0x6   :  { %v1168_v13 = vld [vmem:[%s1803_s1 + $0x144] ss:$8 sps:$4 sm:$0xff]   ;;  %v1171_v15 = vld [vmem:[%s1803_s1 + $0x140] ss:$8 sps:$4 sm:$0xff]   ;;  %v1174_v17 = vld [vmem:[%s1803_s1 + $0x134] ss:$8 sps:$4 sm:$0xff]  }
   0x7   :  { %834 = vmatpush1.bf16.msra.mxu0 %v1158_v6  ;;  %v1176_v18 = vld [vmem:[%s1803_s1 + $0x30] ss:$8 sps:$4 sm:$0xff]   ;;  %v1178_v20 = vld [vmem:[%s1803_s1 + $0x24] ss:$8 sps:$4 sm:$0xff]   ;;  %v1182_v22 = vld [vmem:[%s1803_s1 + $0x20] ss:$8 sps:$4 sm:$0xff]  }
   0x8   :  { %875 = vmatpush1.bf16.msra.mxu1 %v1159_v7  ;;  %835 = vmatprep.subr.bf16.mxu0 %v1160_v8  ;;  %v1177_v19 = vld [vmem:[%s1803_s1 + $0x130] ss:$8 sps:$4 sm:$0xff]   ;;  %v1180_v21 = vld [vmem:[%s1803_s1 + $0x124] ss:$8 sps:$4 sm:$0xff]   ;;  %v1183_v23 = vld [vmem:[%s1803_s1 + $0x120] ss:$8 sps:$4 sm:$0xff]  }
   0x9   :  { %876 = vmatprep.subr.bf16.mxu1 %v1162_v9  ;;  %v1184_v24 = vld [vmem:[%s1803_s1 + $0x14] ss:$8 sps:$4 sm:$0xff]   ;;  %v1188_v26 = vld [vmem:[%s1803_s1 + $0x10] ss:$8 sps:$4 sm:$0xff]   ;;  %v1190_v28 = vld [vmem:[%s1803_s1 + $0x4] ss:$8 sps:$4 sm:$0xff]  }
   0xa   :  { %v1186_v25 = vld [vmem:[%s1803_s1 + $0x114] ss:$8 sps:$4 sm:$0xff]   ;;  %v1189_v27 = vld [vmem:[%s1803_s1 + $0x110] ss:$8 sps:$4 sm:$0xff]   ;;  %v1192_v29 = vld [vmem:[%s1803_s1 + $0x104] ss:$8 sps:$4 sm:$0xff]  }
   0xb   :  { %836 = vmatpush1.bf16.msra.mxu0 %v1164_v10  ;;  %v1194_v30 = vld [vmem:[%s1803_s1] ss:$8 sps:$4 sm:$0xff]   ;;  %v1196_v32 = vld [vmem:[%s1803_s1 + $0xf4] ss:$8 sps:$4 sm:$0xff]   ;;  %v1200_v34 = vld [vmem:[%s1803_s1 + $0xf0] ss:$8 sps:$4 sm:$0xff]  }
   0xc   :  { %877 = vmatpush1.bf16.msra.mxu1 %v1165_v11  ;;  %837 = vmatprep.subr.bf16.mxu0 %v1166_v12  ;;  %v1195_v31 = vld [vmem:[%s1803_s1 + $0x100] ss:$8 sps:$4 sm:$0xff]   ;;  %v1198_v33 = vld [vmem:[%s1803_s1 + $0x1f4] ss:$8 sps:$4 sm:$0xff]   ;;  %v1201_v35 = vld [vmem:[%s1803_s1 + $0x1f0] ss:$8 sps:$4 sm:$0xff]  }
   0xd   :  { %878 = vmatprep.subr.bf16.mxu1 %v1168_v13  ;;  %v1202_v36 = vld [vmem:[%s1803_s1 + $0xe4] ss:$8 sps:$4 sm:$0xff]   ;;  %v1206_v38 = vld [vmem:[%s1803_s1 + $0xe0] ss:$8 sps:$4 sm:$0xff]   ;;  %v1208_v40 = vld [vmem:[%s1803_s1 + $0xd4] ss:$8 sps:$4 sm:$0xff]  }
   0xe   :  { %v1204_v37 = vld [vmem:[%s1803_s1 + $0x1e4] ss:$8 sps:$4 sm:$0xff]   ;;  %v1207_v39 = vld [vmem:[%s1803_s1 + $0x1e0] ss:$8 sps:$4 sm:$0xff]   ;;  %v1210_v41 = vld [vmem:[%s1803_s1 + $0x1d4] ss:$8 sps:$4 sm:$0xff]  }
   0xf   :  { %838 = vmatpush1.bf16.msra.mxu0 %v1170_v14  ;;  %v1212_v42 = vld [vmem:[%s1803_s1 + $0xd0] ss:$8 sps:$4 sm:$0xff]   ;;  %v1214_v44 = vld [vmem:[%s1803_s1 + $0xc4] ss:$8 sps:$4 sm:$0xff]   ;;  %v1218_v49 = vld [vmem:[%s1803_s1 + $0xc0] ss:$8 sps:$4 sm:$0xff]  }
  0x10   :  { %879 = vmatpush1.bf16.msra.mxu1 %v1171_v15  ;;  %839 = vmatprep.subr.bf16.mxu0 %v1172_v16  ;;  %v1213_v43 = vld [vmem:[%s1803_s1 + $0x1d0] ss:$8 sps:$4 sm:$0xff]   ;;  %v1216_v45 = vld [vmem:[%s1803_s1 + $0x1c4] ss:$8 sps:$4 sm:$0xff]   ;;  %v1219_v50 = vld [vmem:[%s1803_s1 + $0x1c0] ss:$8 sps:$4 sm:$0xff]  }
  0x11   :  { %880 = vmatprep.subr.bf16.mxu1 %v1174_v17  ;;  %v19_v46 = vld [vmem:[%s1804_s0] sm:$0xff]  ;;  %v20_v48 = vld [vmem:[%s1804_s0 + $0x8] sm:$0xff]  ;;  %v1220_v52 = vld [vmem:[%s1803_s1 + $0xb4] ss:$8 sps:$4 sm:$0xff]  }
  0x12   :  { %v1013_v47 = vcombine.high %v19_v46, %v19_v46  ;;  %v1015_v51 = vcombine.high %v20_v48, %v20_v48  ;;  %v1222_v53 = vld [vmem:[%s1803_s1 + $0x1b4] ss:$8 sps:$4 sm:$0xff]   ;;  %v1224_v54 = vld [vmem:[%s1803_s1 + $0xb0] ss:$8 sps:$4 sm:$0xff]   ;;  %v1226_v56 = vld [vmem:[%s1803_s1 + $0xa4] ss:$8 sps:$4 sm:$0xff]   ;;  %v1012_v6 = vcombine.low %v19_v46, %v19_v46  ;;  %v1014_v7 = vcombine.low %v20_v48, %v20_v48 }
  0x13   :  { %840 = vmatpush1.bf16.msra.mxu0 %v1176_v18  ;;  %v1225_v55 = vld [vmem:[%s1803_s1 + $0x1b0] ss:$8 sps:$4 sm:$0xff]   ;;  %v1228_v57 = vld [vmem:[%s1803_s1 + $0x1a4] ss:$8 sps:$4 sm:$0xff]   ;;  %v1230_v58 = vld [vmem:[%s1803_s1 + $0xa0] ss:$8 sps:$4 sm:$0xff]  }
  0x14   :  { %881 = vmatpush1.bf16.msra.mxu1 %v1177_v19  ;;  %841 = vmatprep.subr.bf16.mxu0 %v1178_v20  ;;  %v1231_v59 = vld [vmem:[%s1803_s1 + $0x1a0] ss:$8 sps:$4 sm:$0xff]   ;;  %v1232_v60 = vld [vmem:[%s1803_s1 + $0x94] ss:$8 sps:$4 sm:$0xff]   ;;  %v1236_v62 = vld [vmem:[%s1803_s1 + $0x90] ss:$8 sps:$4 sm:$0xff]  }
  0x15   :  { %882 = vmatprep.subr.bf16.mxu1 %v1180_v21  ;;  %863 = vmatprep.mubr.bf16.mxu0 %v1013_v47  ;;  %v1234_v61 = vld [vmem:[%s1803_s1 + $0x194] ss:$8 sps:$4 sm:$0xff]   ;;  %v1237_v63 = vld [vmem:[%s1803_s1 + $0x190] ss:$8 sps:$4 sm:$0xff]   ;;  %v1238_v0 = vld [vmem:[%s1803_s1 + $0x84] ss:$8 sps:$4 sm:$0xff]  }
  0x16   :  { %904 = vmatprep.mubr.bf16.mxu1 %v1015_v51  ;;  %v1240_v1 = vld [vmem:[%s1803_s1 + $0x184] ss:$8 sps:$4 sm:$0xff]   ;;  %v1242_v2 = vld [vmem:[%s1803_s1 + $0x80] ss:$8 sps:$4 sm:$0xff]   ;;  %v1250_v4 = vld [vmem:[%s1803_s1 + $0x274] ss:$8 sps:$4 sm:$0xff]  }
  0x17   :  { %842 = vmatpush1.bf16.msra.mxu0 %v1182_v22  ;;  %v1243_v3 = vld [vmem:[%s1803_s1 + $0x180] ss:$8 sps:$4 sm:$0xff]   ;;  %v1253_v5 = vld [vmem:[%s1803_s1 + $0x374] ss:$8 sps:$4 sm:$0xff]   ;;  %v1248_v8 = vld [vmem:[%s1803_s1 + $0x270] ss:$8 sps:$4 sm:$0xff]  }
  0x18   :  { %883 = vmatpush1.bf16.msra.mxu1 %v1183_v23  ;;  %843 = vmatprep.subr.bf16.mxu0 %v1184_v24  ;;  %v1251_v9 = vld [vmem:[%s1803_s1 + $0x370] ss:$8 sps:$4 sm:$0xff]   ;;  %v1256_v10 = vld [vmem:[%s1803_s1 + $0x264] ss:$8 sps:$4 sm:$0xff]   ;;  %v1254_v12 = vld [vmem:[%s1803_s1 + $0x260] ss:$8 sps:$4 sm:$0xff]  }
  0x19   :  { %884 = vmatprep.subr.bf16.mxu1 %v1186_v25  ;;  %v1259_v11 = vld [vmem:[%s1803_s1 + $0x364] ss:$8 sps:$4 sm:$0xff]   ;;  %v1257_v13 = vld [vmem:[%s1803_s1 + $0x360] ss:$8 sps:$4 sm:$0xff]   ;;  %v1262_v14 = vld [vmem:[%s1803_s1 + $0x254] ss:$8 sps:$4 sm:$0xff]  }
  0x1a   :  { %v1265_v15 = vld [vmem:[%s1803_s1 + $0x354] ss:$8 sps:$4 sm:$0xff]   ;;  %v1260_v16 = vld [vmem:[%s1803_s1 + $0x250] ss:$8 sps:$4 sm:$0xff]   ;;  %v1268_v18 = vld [vmem:[%s1803_s1 + $0x244] ss:$8 sps:$4 sm:$0xff]  }
  0x1b   :  { %844 = vmatpush1.bf16.msra.mxu0 %v1188_v26  ;;  %v1263_v17 = vld [vmem:[%s1803_s1 + $0x350] ss:$8 sps:$4 sm:$0xff]   ;;  %v1271_v19 = vld [vmem:[%s1803_s1 + $0x344] ss:$8 sps:$4 sm:$0xff]   ;;  %v1266_v20 = vld [vmem:[%s1803_s1 + $0x240] ss:$8 sps:$4 sm:$0xff]  }
  0x1c   :  { %885 = vmatpush1.bf16.msra.mxu1 %v1189_v27  ;;  %845 = vmatprep.subr.bf16.mxu0 %v1190_v28  ;;  %v1269_v21 = vld [vmem:[%s1803_s1 + $0x340] ss:$8 sps:$4 sm:$0xff]   ;;  %v1274_v22 = vld [vmem:[%s1803_s1 + $0x234] ss:$8 sps:$4 sm:$0xff]   ;;  %v1272_v24 = vld [vmem:[%s1803_s1 + $0x230] ss:$8 sps:$4 sm:$0xff]  }
  0x1d   :  { %886 = vmatprep.subr.bf16.mxu1 %v1192_v29  ;;  %v1277_v23 = vld [vmem:[%s1803_s1 + $0x334] ss:$8 sps:$4 sm:$0xff]   ;;  %v1275_v25 = vld [vmem:[%s1803_s1 + $0x330] ss:$8 sps:$4 sm:$0xff]   ;;  %v1280_v26 = vld [vmem:[%s1803_s1 + $0x224] ss:$8 sps:$4 sm:$0xff]  }
  0x1e   :  { %v1283_v27 = vld [vmem:[%s1803_s1 + $0x324] ss:$8 sps:$4 sm:$0xff]   ;;  %v1278_v28 = vld [vmem:[%s1803_s1 + $0x220] ss:$8 sps:$4 sm:$0xff]   ;;  %v1313_v51 = vld [vmem:[%s1803_s1 + $0x3d4] ss:$8 sps:$4 sm:$0xff]  }
  0x1f   :  { %846 = vmatpush1.bf16.msra.mxu0 %v1194_v30  ;;  %v1281_v29 = vld [vmem:[%s1803_s1 + $0x320] ss:$8 sps:$4 sm:$0xff]   ;;  %v1286_v30 = vld [vmem:[%s1803_s1 + $0x214] ss:$8 sps:$4 sm:$0xff]   ;;  %v1304_v46 = vld [vmem:[%s1803_s1 + $0x2e4] ss:$8 sps:$4 sm:$0xff]  }
  0x20   :  { %887 = vmatpush1.bf16.msra.mxu1 %v1195_v31  ;;  %847 = vmatprep.subr.bf16.mxu0 %v1196_v32  ;;  %v1289_v31 = vld [vmem:[%s1803_s1 + $0x314] ss:$8 sps:$4 sm:$0xff]   ;;  %v1307_v47 = vld [vmem:[%s1803_s1 + $0x3e4] ss:$8 sps:$4 sm:$0xff]   ;;  %v1302_v48 = vld [vmem:[%s1803_s1 + $0x2e0] ss:$8 sps:$4 sm:$0xff]  }
  0x21   :  { %888 = vmatprep.subr.bf16.mxu1 %v1198_v33  ;;  %v1659_v32 = vld [vmem:[%s1804_s0 + $0x10] sm:$0xff]  ;;  %v1664_v33 = vld [vmem:[%s1804_s0 + $0x18] sm:$0xff] }
  0x23   :  { %848 = vmatpush2.bf16.msra.mxu0 %v1200_v34  ;;  %v1017_v34 = vcombine.high %v1659_v32, %v1659_v32 }
  0x24   :  { %889 = vmatpush2.bf16.msra.mxu1 %v1201_v35  ;;  %849 = vmatprep.subr.bf16.mxu0 %v1202_v36  ;;  %v1019_v35 = vcombine.high %v1664_v33, %v1664_v33  ;;  %v1284_v36 = vld [vmem:[%s1803_s1 + $0x210] ss:$8 sps:$4 sm:$0xff]  }
  0x25   :  { %890 = vmatprep.subr.bf16.mxu1 %v1204_v37  ;;  %v1287_v37 = vld [vmem:[%s1803_s1 + $0x310] ss:$8 sps:$4 sm:$0xff]  }
  0x27   :  { %850 = vmatpush2.bf16.msra.mxu0 %v1206_v38  ;;  %v1292_v38 = vld [vmem:[%s1803_s1 + $0x204] ss:$8 sps:$4 sm:$0xff]  }
  0x28   :  { %891 = vmatpush2.bf16.msra.mxu1 %v1207_v39  ;;  %851 = vmatprep.subr.bf16.mxu0 %v1208_v40  ;;  %v1295_v39 = vld [vmem:[%s1803_s1 + $0x304] ss:$8 sps:$4 sm:$0xff]   ;;  %v1290_v40 = vld [vmem:[%s1803_s1 + $0x200] ss:$8 sps:$4 sm:$0xff]  }
  0x29   :  { %892 = vmatprep.subr.bf16.mxu1 %v1210_v41  ;;  %v1293_v41 = vld [vmem:[%s1803_s1 + $0x300] ss:$8 sps:$4 sm:$0xff]  }
  0x2b   :  { %852 = vmatpush2.bf16.msra.mxu0 %v1212_v42  ;;  %v1298_v42 = vld [vmem:[%s1803_s1 + $0x2f4] ss:$8 sps:$4 sm:$0xff]  }
  0x2c   :  { %893 = vmatpush2.bf16.msra.mxu1 %v1213_v43  ;;  %853 = vmatprep.subr.bf16.mxu0 %v1214_v44  ;;  %v1301_v43 = vld [vmem:[%s1803_s1 + $0x3f4] ss:$8 sps:$4 sm:$0xff]   ;;  %v1296_v44 = vld [vmem:[%s1803_s1 + $0x2f0] ss:$8 sps:$4 sm:$0xff]  }
  0x2d   :  { %894 = vmatprep.subr.bf16.mxu1 %v1216_v45  ;;  %v1299_v45 = vld [vmem:[%s1803_s1 + $0x3f0] ss:$8 sps:$4 sm:$0xff]  }
  0x2f   :  { %854 = vmatpush2.bf16.msra.mxu0 %v1218_v49  ;;  %v1305_v49 = vld [vmem:[%s1803_s1 + $0x3e0] ss:$8 sps:$4 sm:$0xff]  }
  0x30   :  { %895 = vmatpush2.bf16.msra.mxu1 %v1219_v50  ;;  %855 = vmatprep.subr.bf16.mxu0 %v1220_v52  ;;  %v1310_v50 = vld [vmem:[%s1803_s1 + $0x2d4] ss:$8 sps:$4 sm:$0xff]   ;;  %v1308_v52 = vld [vmem:[%s1803_s1 + $0x2d0] ss:$8 sps:$4 sm:$0xff]  }
  0x31   :  { %896 = vmatprep.subr.bf16.mxu1 %v1222_v53  ;;  %v1311_v53 = vld [vmem:[%s1803_s1 + $0x3d0] ss:$8 sps:$4 sm:$0xff]  }
  0x33   :  { %856 = vmatpush2.bf16.msra.mxu0 %v1224_v54  ;;  %v1316_v54 = vld [vmem:[%s1803_s1 + $0x2c4] ss:$8 sps:$4 sm:$0xff]  }
  0x34   :  { %897 = vmatpush2.bf16.msra.mxu1 %v1225_v55  ;;  %857 = vmatprep.subr.bf16.mxu0 %v1226_v56  ;;  %v1319_v55 = vld [vmem:[%s1803_s1 + $0x3c4] ss:$8 sps:$4 sm:$0xff]   ;;  %v1314_v56 = vld [vmem:[%s1803_s1 + $0x2c0] ss:$8 sps:$4 sm:$0xff]  }
  0x35   :  { %898 = vmatprep.subr.bf16.mxu1 %v1228_v57  ;;  %v1317_v57 = vld [vmem:[%s1803_s1 + $0x3c0] ss:$8 sps:$4 sm:$0xff]  }
  0x37   :  { %858 = vmatpush2.bf16.msra.mxu0 %v1230_v58  ;;  %v1322_v58 = vld [vmem:[%s1803_s1 + $0x2b4] ss:$8 sps:$4 sm:$0xff]  }
  0x38   :  { %899 = vmatpush2.bf16.msra.mxu1 %v1231_v59  ;;  %859 = vmatprep.subr.bf16.mxu0 %v1232_v60  ;;  %v1325_v59 = vld [vmem:[%s1803_s1 + $0x3b4] ss:$8 sps:$4 sm:$0xff]   ;;  %v1320_v60 = vld [vmem:[%s1803_s1 + $0x2b0] ss:$8 sps:$4 sm:$0xff]  }
  0x39   :  { %900 = vmatprep.subr.bf16.mxu1 %v1234_v61  ;;  %v1323_v61 = vld [vmem:[%s1803_s1 + $0x3b0] ss:$8 sps:$4 sm:$0xff]  }
  0x3b   :  { %860 = vmatpush2.bf16.msra.mxu0 %v1236_v62  ;;  %v1328_v62 = vld [vmem:[%s1803_s1 + $0x2a4] ss:$8 sps:$4 sm:$0xff]  }
  0x3c   :  { %901 = vmatpush2.bf16.msra.mxu1 %v1237_v63  ;;  %861 = vmatprep.subr.bf16.mxu0 %v1238_v0  ;;  %v1331_v63 = vld [vmem:[%s1803_s1 + $0x3a4] ss:$8 sps:$4 sm:$0xff]   ;;  %v1326_v0 = vld [vmem:[%s1803_s1 + $0x2a0] ss:$8 sps:$4 sm:$0xff]  }
  0x3d   :  { %902 = vmatprep.subr.bf16.mxu1 %v1240_v1  ;;  %v1329_v1 = vld [vmem:[%s1803_s1 + $0x3a0] ss:$8 sps:$4 sm:$0xff]  }
  0x3f   :  { %862 = vmatpush2.bf16.msra.mxu0 %v1242_v2  ;;  %v1334_v2 = vld [vmem:[%s1803_s1 + $0x294] ss:$8 sps:$4 sm:$0xff]  }
  0x40   :  { %903 = vmatpush2.bf16.msra.mxu1 %v1243_v3  ;;  %913 = vmatprep.subr.bf16.mxu0 %v1250_v4  ;;  %v1337_v3 = vld [vmem:[%s1803_s1 + $0x394] ss:$8 sps:$4 sm:$0xff]   ;;  %v1332_v4 = vld [vmem:[%s1803_s1 + $0x290] ss:$8 sps:$4 sm:$0xff]  }
  0x41   :  { %954 = vmatprep.subr.bf16.mxu1 %v1253_v5  ;;  %v1335_v5 = vld [vmem:[%s1803_s1 + $0x390] ss:$8 sps:$4 sm:$0xff]  }
  0x42   :  { %864 = vmatmul.mubr.bf16.vlgmr.msra.gmra.mxu0 %v1012_v6  ;;  %v1340_v6 = vld [vmem:[%s1803_s1 + $0x284] ss:$8 sps:$4 sm:$0xff]  }
  0x43   :  { %905 = vmatmul.mubr.bf16.vlgmr.msra.gmra.mxu1 %v1014_v7  ;;  %914 = vmatpush1.bf16.msra.mxu0 %v1248_v8  ;;  %v1343_v7 = vld [vmem:[%s1803_s1 + $0x384] ss:$8 sps:$4 sm:$0xff]   ;;  %v1338_v8 = vld [vmem:[%s1803_s1 + $0x280] ss:$8 sps:$4 sm:$0xff]  }
  0x44   :  { %955 = vmatpush1.bf16.msra.mxu1 %v1251_v9  ;;  %915 = vmatprep.subr.bf16.mxu0 %v1256_v10  ;;  %v1341_v9 = vld [vmem:[%s1803_s1 + $0x380] ss:$8 sps:$4 sm:$0xff]   ;;  %v1016_v10 = vcombine.low %v1659_v32, %v1659_v32 }
  0x45   :  { %956 = vmatprep.subr.bf16.mxu1 %v1259_v11  ;;  %945 = vmatprep.mubr.bf16.mxu0 %v1017_v34  ;;  %v1018_v11 = vcombine.low %v1664_v33, %v1664_v33 }
  0x46   :  { %986 = vmatprep.mubr.bf16.mxu1 %v1019_v35 }
  0x47   :  { %916 = vmatpush1.bf16.msra.mxu0 %v1254_v12 }
  0x48   :  { %957 = vmatpush1.bf16.msra.mxu1 %v1257_v13  ;;  %917 = vmatprep.subr.bf16.mxu0 %v1262_v14 }
  0x49   :  { %958 = vmatprep.subr.bf16.mxu1 %v1265_v15 }
  0x4b   :  { %918 = vmatpush1.bf16.msra.mxu0 %v1260_v16 }
  0x4c   :  { %959 = vmatpush1.bf16.msra.mxu1 %v1263_v17  ;;  %919 = vmatprep.subr.bf16.mxu0 %v1268_v18 }
  0x4d   :  { %960 = vmatprep.subr.bf16.mxu1 %v1271_v19 }
  0x4f   :  { %920 = vmatpush1.bf16.msra.mxu0 %v1266_v20  ;;  %v153_v20 = vlaneseq }
  0x50   :  { %961 = vmatpush1.bf16.msra.mxu1 %v1269_v21  ;;  %921 = vmatprep.subr.bf16.mxu0 %v1274_v22 }
  0x51   :  { %962 = vmatprep.subr.bf16.mxu1 %v1277_v23  ;;  %v154_v21 = vshrl.u32 %v153_v20, 7  ;;  %v151_v23 = vld [vmem:[%s1805_s2] sm:$0x3] }
  0x53   :  { %922 = vmatpush1.bf16.msra.mxu0 %v1272_v24  ;;  %v155_v22 = vsub.s32 0, %v154_v21  ;;  %v159_v24 = vsub.s32 1, %v154_v21 }
  0x54   :  { %963 = vmatpush1.bf16.msra.mxu1 %v1275_v25  ;;  %923 = vmatprep.subr.bf16.mxu0 %v1280_v26 }
  0x55   :  { %964 = vmatprep.subr.bf16.mxu1 %v1283_v27  ;;  %v156_v25 = vrot.slane %v151_v23, %v155_v22  ;;  %v160_v26 = vrot.slane %v151_v23, %v159_v24 }
  0x57   :  { %924 = vmatpush1.bf16.msra.mxu0 %v1278_v28 }
  0x58   :  { %965 = vmatpush1.bf16.msra.mxu1 %v1281_v29  ;;  %925 = vmatprep.subr.bf16.mxu0 %v1286_v30 }
  0x59   :  { %966 = vmatprep.subr.bf16.mxu1 %v1289_v31 }
  0x5b   :  { %926 = vmatpush1.bf16.msra.mxu0 %v1284_v36 }
  0x5c   :  { %967 = vmatpush1.bf16.msra.mxu1 %v1287_v37  ;;  %927 = vmatprep.subr.bf16.mxu0 %v1292_v38 }
  0x5d   :  { %968 = vmatprep.subr.bf16.mxu1 %v1295_v39 }
  0x5f   :  { %928 = vmatpush1.bf16.msra.mxu0 %v1290_v40 }
  0x60   :  { %969 = vmatpush1.bf16.msra.mxu1 %v1293_v41  ;;  %929 = vmatprep.subr.bf16.mxu0 %v1298_v42 }
  0x61   :  { %970 = vmatprep.subr.bf16.mxu1 %v1301_v43 }
  0x63   :  { %930 = vmatpush2.bf16.msra.mxu0 %v1296_v44 }
  0x64   :  { %971 = vmatpush2.bf16.msra.mxu1 %v1299_v45  ;;  %931 = vmatprep.subr.bf16.mxu0 %v1304_v46  ;;  %v997_v45 = vld [vmem:[%s1807_s3] sm:$0xff] }
  0x65   :  { %972 = vmatprep.subr.bf16.mxu1 %v1307_v47 }
  0x67   :  { %932 = vmatpush2.bf16.msra.mxu0 %v1302_v48 }
  0x68   :  { %973 = vmatpush2.bf16.msra.mxu1 %v1305_v49  ;;  %933 = vmatprep.subr.bf16.mxu0 %v1310_v50 }
  0x69   :  { %974 = vmatprep.subr.bf16.mxu1 %v1313_v51 }
  0x6b   :  { %934 = vmatpush2.bf16.msra.mxu0 %v1308_v52 }
  0x6c   :  { %975 = vmatpush2.bf16.msra.mxu1 %v1311_v53  ;;  %935 = vmatprep.subr.bf16.mxu0 %v1316_v54 }
  0x6d   :  { %976 = vmatprep.subr.bf16.mxu1 %v1319_v55 }
  0x6f   :  { %936 = vmatpush2.bf16.msra.mxu0 %v1314_v56 }
  0x70   :  { %977 = vmatpush2.bf16.msra.mxu1 %v1317_v57  ;;  %937 = vmatprep.subr.bf16.mxu0 %v1322_v58 }
  0x71   :  { %978 = vmatprep.subr.bf16.mxu1 %v1325_v59 }
  0x73   :  { %938 = vmatpush2.bf16.msra.mxu0 %v1320_v60 }
  0x74   :  { %979 = vmatpush2.bf16.msra.mxu1 %v1323_v61  ;;  %939 = vmatprep.subr.bf16.mxu0 %v1328_v62 }
  0x75   :  { %980 = vmatprep.subr.bf16.mxu1 %v1331_v63 }
  0x77   :  { %940 = vmatpush2.bf16.msra.mxu0 %v1326_v0 }
  0x78   :  { %981 = vmatpush2.bf16.msra.mxu1 %v1329_v1  ;;  %941 = vmatprep.subr.bf16.mxu0 %v1334_v2 }
  0x79   :  { %982 = vmatprep.subr.bf16.mxu1 %v1337_v3 }
  0x7b   :  { %942 = vmatpush2.bf16.msra.mxu0 %v1332_v4 }
  0x7c   :  { %983 = vmatpush2.bf16.msra.mxu1 %v1335_v5  ;;  %943 = vmatprep.subr.bf16.mxu0 %v1340_v6 }
  0x7d   :  { %984 = vmatprep.subr.bf16.mxu1 %v1343_v7 }
  0x7f   :  { %944 = vmatpush2.bf16.msra.mxu0 %v1338_v8 }
  0x80   :  { %985 = vmatpush2.bf16.msra.mxu1 %v1341_v9 }
  0x82   :  { %946 = vmatmul.mubr.bf16.vlgmr.msra.gmra.mxu0 %v1016_v10 }
  0x83   :  { %987 = vmatmul.mubr.bf16.vlgmr.msra.gmra.mxu1 %v1018_v11 }
 0x102   :  { %v865_v12 = vpop.f32.mrf.mxu0 }
 0x103   :  { %v906_v13 = vpop.f32.mrf.mxu1  ;;  %v866_v27 = vadd.f32 %v865_v12, %v156_v25 }
 0x104   :  { %v867_v14 = vpop.f32.mrf.mxu0 }
 0x105   :  { %v908_v15 = vpop.f32.mrf.mxu1  ;;  %v868_v28 = vadd.f32 %v867_v14, %v160_v26  ;;  %v907_v29 = vadd.f32 %v906_v13, %v866_v27 }
 0x106   :  { %v869_v16 = vpop.f32.mrf.mxu0 }
 0x107   :  { %v910_v17 = vpop.f32.mrf.mxu1  ;;  %v909_v32 = vadd.f32 %v908_v15, %v868_v28 }
 0x108   :  { %v870_v18 = vpop.f32.mrf.mxu0 }
 0x109   :  { %v911_v19 = vpop.f32.mrf.mxu1 }
 0x142   :  { %v947_v30 = vpop.f32.mrf.mxu0 }
 0x143   :  { %v988_v31 = vpop.f32.mrf.mxu1  ;;  %v948_v33 = vadd.f32 %v947_v30, %v907_v29 }
 0x144   :  { %v949_v34 = vpop.f32.mrf.mxu0 }
 0x145   :  { %v990_v35 = vpop.f32.mrf.mxu1  ;;  %v989_v36 = vadd.f32 %v988_v31, %v948_v33  ;;  %v950_v37 = vadd.f32 %v949_v34, %v909_v32 }
 0x146   :  { %v951_v38 = vpop.f32.mrf.mxu0 }
 0x147   :  { %v992_v39 = vpop.f32.mrf.mxu1  ;;  %995 = vst [vmem:[%s1806_s4] sm:$0xff] %v989_v36  ;;  %v998_v40 = vmul.f32 0.5, %v989_v36  ;;  %v991_v41 = vadd.f32 %v990_v35, %v950_v37 }
 0x148   :  { %v952_v42 = vpop.f32.mrf.mxu0 }
 0x149   :  { %v993_v43 = vpop.f32.mrf.mxu1  ;;  %v999_v44 = vmul.f32 1.442695, %v998_v40  ;;  %996 = vst [vmem:[%s1806_s4 + $0x8] sm:$0xff] %v991_v41 }
 0x14b   :  { %1348 = vpow2.f32 %v999_v44 }
 0x158   :  { %v1349_v46 = vpop.eup %1348 }
 0x159   :  { %v1001_v47 = vmul.f32 %v1349_v46, %v997_v45 }
 0x15b   :  { %v1002_v48 = vadd.f32 %v1001_v47, %v991_v41 }
 0x15d   :  { %1003 = vst [vmem:[%s1808_s5] sm:$0xff] %v1002_v48 }

// kernel: cvae_forward.16
= control target key start
LH: loop header
LB: loop body
LE: loop exit
PB: predicated region body
PF: predicated region fallthrough
CT: control target
= control target key end

     0   :  { %s3600_s12 = smov 0   ;;  %s3602_s13 = smov 0   ;;  %s4516_s0 = inlined_call_operand.vmem [shape: bf16[1,8,1024], index: 0, kind: input, shape index: {}]   ;;  %s4517_s1 = inlined_call_operand.vmem [shape: bf16[1,1024,2048], index: 1, kind: input, shape index: {}]   ;;  %s4518_s2 = inlined_call_operand.vmem [shape: f32[1,1,2048], index: 2, kind: input, shape index: {}]   ;;  %s4519_s3 = inlined_call_operand.vmem [shape: f32[1,8,2048], index: 3, kind: output, shape index: {}]  }
   0x1   :  { %s3604_s14 = smov 0   ;;  %s3606_s15 = smov 0  }
   0x2   :  { %s3608_s16 = smov 0  }
   0x3 LB: > { %s22_s17 = sadd.s32 1, %s3574_s15  ;;  %p67_p1 = scmp.ne.s32.totalorder %s3566_s13, %s3562_s12  ;;  %s3578_s16 = sphi %s3608_s16, %s13_s16   ;;  %s3574_s15 = sphi %s3606_s15, %s4523_s15   ;;  %s3570_s14 = sphi %s3604_s14, %s4522_s14   ;;  %s3566_s13 = sphi %s3602_s13, %s4521_s13   ;;  %s3562_s12 = sphi %s3600_s12, %s4520_s12  }
   0x4   : > { %p23_p0 = scmp.ge.s32.totalorder %s22_s17, 4  ;;  %p68_p2 = scmp.eq.s32.totalorder %s3578_s16, 0 }
   0x5   : > { %s60_s19 = sadd.s32 1, %s3566_s13  ;;  %p2832_p5 = scmp.ge.s32.totalorder %s3578_s16, 4 }
   0x6   : > { %s4525_s17 = smov (%p23_p0, %s22_s17), 0  ;;  %p69_p3 = por %p68_p2, %p67_p1 }
   0x7   : > { %s56_s18 = ssub.s32 %s3574_s15, %s4525_s17  ;;  %157 = sbr.rel (%p2832_p5) target bundleno = 144 (0x90), region = 20 }
   0x8   : > { %p58_p4 = scmp.eq.s32.totalorder %s56_s18, 0 }
   0xa   : > { %s3635_s20 = scalar_select %p58_p4, %s3566_s13, %s60_s19  }
   0xc   : > { %160 = sbr.rel (!%p69_p3) target bundleno = 144 (0x90), region = 24  ;;  %s162_s21 = sand.u32 (%p69_p3), 1, %s3566_s13  }
   0xd   : > { %s3107_s22 = sshll.u32 (%p69_p3), %s3574_s15, 4  ;;  %s2833_s23 = sshll.u32 (%p69_p3), %s162_s21, 11 }
   0xe   : > { %s3643_s26 = scalar_lea.vmem (%p69_p3), %s4517_s1, %s3107_s22  ;;  %s3648_s27 = scalar_lea.vmem (%p69_p3), [#allocation2], %s2833_s23 }
   0xf   : > { %v182_v0 = vld [vmem:[%s3643_s26] sm:$0xff] (%p69_p3)  ;;  %v184_v1 = vld [vmem:[%s3643_s26 + $0x8] sm:$0xff] (%p69_p3) }
  0x10   : > { %v186_v2 = vld [vmem:[%s3643_s26 + $0x40] sm:$0xff] (%p69_p3)  ;;  %183 = vst [vmem:[%s3648_s27] sm:$0xff] (%p69_p3), %v182_v0  ;;  %185 = vst [vmem:[%s3648_s27 + $0x8] sm:$0xff] (%p69_p3), %v184_v1  ;;  %v188_v3 = vld [vmem:[%s3643_s26 + $0x48] sm:$0xff] (%p69_p3) }
  0x11   : > { %187 = vst [vmem:[%s3648_s27 + $0x10] sm:$0xff] %v186_v2  ;;  %v190_v4 = vld [vmem:[%s3643_s26 + $0x80] sm:$0xff]  ;;  %v192_v5 = vld [vmem:[%s3643_s26 + $0x88] sm:$0xff]  ;;  %189 = vst [vmem:[%s3648_s27 + $0x18] sm:$0xff] %v188_v3 }
  0x12   : > { %191 = vst [vmem:[%s3648_s27 + $0x20] sm:$0xff] %v190_v4  ;;  %193 = vst [vmem:[%s3648_s27 + $0x28] sm:$0xff] %v192_v5  ;;  %v194_v6 = vld [vmem:[%s3643_s26 + $0xc0] sm:$0xff]  ;;  %v196_v7 = vld [vmem:[%s3643_s26 + $0xc8] sm:$0xff] }
  0x13   : > { %v198_v8 = vld [vmem:[%s3643_s26 + $0x100] sm:$0xff]  ;;  %195 = vst [vmem:[%s3648_s27 + $0x30] sm:$0xff] %v194_v6  ;;  %197 = vst [vmem:[%s3648_s27 + $0x38] sm:$0xff] %v196_v7  ;;  %v200_v9 = vld [vmem:[%s3643_s26 + $0x108] sm:$0xff] }
  0x14   : > { %199 = vst [vmem:[%s3648_s27 + $0x40] sm:$0xff] %v198_v8  ;;  %v202_v10 = vld [vmem:[%s3643_s26 + $0x140] sm:$0xff]  ;;  %v204_v11 = vld [vmem:[%s3643_s26 + $0x148] sm:$0xff]  ;;  %201 = vst [vmem:[%s3648_s27 + $0x48] sm:$0xff] %v200_v9 }
  0x15   : > { %203 = vst [vmem:[%s3648_s27 + $0x50] sm:$0xff] %v202_v10  ;;  %205 = vst [vmem:[%s3648_s27 + $0x58] sm:$0xff] %v204_v11  ;;  %v206_v12 = vld [vmem:[%s3643_s26 + $0x180] sm:$0xff]  ;;  %v208_v13 = vld [vmem:[%s3643_s26 + $0x188] sm:$0xff] }
  0x16   : > { %v210_v14 = vld [vmem:[%s3643_s26 + $0x1c0] sm:$0xff]  ;;  %207 = vst [vmem:[%s3648_s27 + $0x60] sm:$0xff] %v206_v12  ;;  %209 = vst [vmem:[%s3648_s27 + $0x68] sm:$0xff] %v208_v13  ;;  %v212_v15 = vld [vmem:[%s3643_s26 + $0x1c8] sm:$0xff] }
  0x17   : > { %211 = vst [vmem:[%s3648_s27 + $0x70] sm:$0xff] %v210_v14  ;;  %v214_v16 = vld [vmem:[%s3643_s26 + $0x200] sm:$0xff]  ;;  %v216_v17 = vld [vmem:[%s3643_s26 + $0x208] sm:$0xff]  ;;  %213 = vst [vmem:[%s3648_s27 + $0x78] sm:$0xff] %v212_v15 }
  0x18   : > { %215 = vst [vmem:[%s3648_s27 + $0x80] sm:$0xff] %v214_v16  ;;  %217 = vst [vmem:[%s3648_s27 + $0x88] sm:$0xff] %v216_v17  ;;  %v218_v18 = vld [vmem:[%s3643_s26 + $0x240] sm:$0xff]  ;;  %v220_v19 = vld [vmem:[%s3643_s26 + $0x248] sm:$0xff] }
  0x19   : > { %v222_v20 = vld [vmem:[%s3643_s26 + $0x280] sm:$0xff]  ;;  %219 = vst [vmem:[%s3648_s27 + $0x90] sm:$0xff] %v218_v18  ;;  %221 = vst [vmem:[%s3648_s27 + $0x98] sm:$0xff] %v220_v19  ;;  %v224_v21 = vld [vmem:[%s3643_s26 + $0x288] sm:$0xff] }
  0x1a   : > { %223 = vst [vmem:[%s3648_s27 + $0xa0] sm:$0xff] %v222_v20  ;;  %v226_v22 = vld [vmem:[%s3643_s26 + $0x2c0] sm:$0xff]  ;;  %v228_v23 = vld [vmem:[%s3643_s26 + $0x2c8] sm:$0xff]  ;;  %225 = vst [vmem:[%s3648_s27 + $0xa8] sm:$0xff] %v224_v21 }
  0x1b   : > { %227 = vst [vmem:[%s3648_s27 + $0xb0] sm:$0xff] %v226_v22  ;;  %229 = vst [vmem:[%s3648_s27 + $0xb8] sm:$0xff] %v228_v23  ;;  %v230_v24 = vld [vmem:[%s3643_s26 + $0x300] sm:$0xff]  ;;  %v232_v25 = vld [vmem:[%s3643_s26 + $0x308] sm:$0xff] }
  0x1c   : > { %v234_v26 = vld [vmem:[%s3643_s26 + $0x340] sm:$0xff]  ;;  %231 = vst [vmem:[%s3648_s27 + $0xc0] sm:$0xff] %v230_v24  ;;  %233 = vst [vmem:[%s3648_s27 + $0xc8] sm:$0xff] %v232_v25  ;;  %v236_v27 = vld [vmem:[%s3643_s26 + $0x348] sm:$0xff] }
  0x1d   : > { %235 = vst [vmem:[%s3648_s27 + $0xd0] sm:$0xff] %v234_v26  ;;  %v238_v28 = vld [vmem:[%s3643_s26 + $0x380] sm:$0xff]  ;;  %v240_v29 = vld [vmem:[%s3643_s26 + $0x388] sm:$0xff]  ;;  %237 = vst [vmem:[%s3648_s27 + $0xd8] sm:$0xff] %v236_v27 }
  0x1e   : > { %239 = vst [vmem:[%s3648_s27 + $0xe0] sm:$0xff] %v238_v28  ;;  %241 = vst [vmem:[%s3648_s27 + $0xe8] sm:$0xff] %v240_v29  ;;  %v242_v30 = vld [vmem:[%s3643_s26 + $0x3c0] sm:$0xff]  ;;  %v244_v31 = vld [vmem:[%s3643_s26 + $0x3c8] sm:$0xff] }
  0x1f   : > { %v246_v32 = vld [vmem:[%s3643_s26 + $0x400] sm:$0xff]  ;;  %243 = vst [vmem:[%s3648_s27 + $0xf0] sm:$0xff] %v242_v30  ;;  %245 = vst [vmem:[%s3648_s27 + $0xf8] sm:$0xff] %v244_v31  ;;  %v248_v33 = vld [vmem:[%s3643_s26 + $0x408] sm:$0xff] }
  0x20   : > { %247 = vst [vmem:[%s3648_s27 + $0x100] sm:$0xff] %v246_v32  ;;  %v250_v34 = vld [vmem:[%s3643_s26 + $0x440] sm:$0xff]  ;;  %v252_v35 = vld [vmem:[%s3643_s26 + $0x448] sm:$0xff]  ;;  %249 = vst [vmem:[%s3648_s27 + $0x108] sm:$0xff] %v248_v33 }
  0x21   : > { %251 = vst [vmem:[%s3648_s27 + $0x110] sm:$0xff] %v250_v34  ;;  %253 = vst [vmem:[%s3648_s27 + $0x118] sm:$0xff] %v252_v35  ;;  %v254_v36 = vld [vmem:[%s3643_s26 + $0x480] sm:$0xff]  ;;  %v256_v37 = vld [vmem:[%s3643_s26 + $0x488] sm:$0xff] }
  0x22   : > { %v258_v38 = vld [vmem:[%s3643_s26 + $0x4c0] sm:$0xff]  ;;  %255 = vst [vmem:[%s3648_s27 + $0x120] sm:$0xff] %v254_v36  ;;  %257 = vst [vmem:[%s3648_s27 + $0x128] sm:$0xff] %v256_v37  ;;  %v260_v39 = vld [vmem:[%s3643_s26 + $0x4c8] sm:$0xff] }
  0x23   : > { %259 = vst [vmem:[%s3648_s27 + $0x130] sm:$0xff] %v258_v38  ;;  %v262_v40 = vld [vmem:[%s3643_s26 + $0x500] sm:$0xff]  ;;  %v264_v41 = vld [vmem:[%s3643_s26 + $0x508] sm:$0xff]  ;;  %261 = vst [vmem:[%s3648_s27 + $0x138] sm:$0xff] %v260_v39 }
  0x24   : > { %263 = vst [vmem:[%s3648_s27 + $0x140] sm:$0xff] %v262_v40  ;;  %265 = vst [vmem:[%s3648_s27 + $0x148] sm:$0xff] %v264_v41  ;;  %v266_v42 = vld [vmem:[%s3643_s26 + $0x540] sm:$0xff]  ;;  %v268_v43 = vld [vmem:[%s3643_s26 + $0x548] sm:$0xff] }
  0x25   : > { %v270_v44 = vld [vmem:[%s3643_s26 + $0x580] sm:$0xff]  ;;  %267 = vst [vmem:[%s3648_s27 + $0x150] sm:$0xff] %v266_v42  ;;  %269 = vst [vmem:[%s3648_s27 + $0x158] sm:$0xff] %v268_v43  ;;  %v272_v45 = vld [vmem:[%s3643_s26 + $0x588] sm:$0xff] }
  0x26   : > { %271 = vst [vmem:[%s3648_s27 + $0x160] sm:$0xff] %v270_v44  ;;  %v274_v46 = vld [vmem:[%s3643_s26 + $0x5c0] sm:$0xff]  ;;  %v276_v47 = vld [vmem:[%s3643_s26 + $0x5c8] sm:$0xff]  ;;  %273 = vst [vmem:[%s3648_s27 + $0x168] sm:$0xff] %v272_v45 }
  0x27   : > { %275 = vst [vmem:[%s3648_s27 + $0x170] sm:$0xff] %v274_v46  ;;  %277 = vst [vmem:[%s3648_s27 + $0x178] sm:$0xff] %v276_v47  ;;  %v278_v48 = vld [vmem:[%s3643_s26 + $0x600] sm:$0xff]  ;;  %v280_v49 = vld [vmem:[%s3643_s26 + $0x608] sm:$0xff] }
  0x28   : > { %v282_v50 = vld [vmem:[%s3643_s26 + $0x640] sm:$0xff]  ;;  %279 = vst [vmem:[%s3648_s27 + $0x180] sm:$0xff] %v278_v48  ;;  %281 = vst [vmem:[%s3648_s27 + $0x188] sm:$0xff] %v280_v49  ;;  %v284_v51 = vld [vmem:[%s3643_s26 + $0x648] sm:$0xff] }
  0x29   : > { %283 = vst [vmem:[%s3648_s27 + $0x190] sm:$0xff] %v282_v50  ;;  %v286_v52 = vld [vmem:[%s3643_s26 + $0x680] sm:$0xff]  ;;  %v288_v53 = vld [vmem:[%s3643_s26 + $0x688] sm:$0xff]  ;;  %285 = vst [vmem:[%s3648_s27 + $0x198] sm:$0xff] %v284_v51 }
  0x2a   : > { %287 = vst [vmem:[%s3648_s27 + $0x1a0] sm:$0xff] %v286_v52  ;;  %289 = vst [vmem:[%s3648_s27 + $0x1a8] sm:$0xff] %v288_v53  ;;  %v290_v54 = vld [vmem:[%s3643_s26 + $0x6c0] sm:$0xff]  ;;  %v292_v55 = vld [vmem:[%s3643_s26 + $0x6c8] sm:$0xff] }
  0x2b   : > { %v294_v56 = vld [vmem:[%s3643_s26 + $0x700] sm:$0xff]  ;;  %291 = vst [vmem:[%s3648_s27 + $0x1b0] sm:$0xff] %v290_v54  ;;  %293 = vst [vmem:[%s3648_s27 + $0x1b8] sm:$0xff] %v292_v55  ;;  %v296_v57 = vld [vmem:[%s3643_s26 + $0x708] sm:$0xff] }
  0x2c   : > { %295 = vst [vmem:[%s3648_s27 + $0x1c0] sm:$0xff] %v294_v56  ;;  %v298_v58 = vld [vmem:[%s3643_s26 + $0x740] sm:$0xff]  ;;  %v300_v59 = vld [vmem:[%s3643_s26 + $0x748] sm:$0xff]  ;;  %297 = vst [vmem:[%s3648_s27 + $0x1c8] sm:$0xff] %v296_v57 }
  0x2d   : > { %299 = vst [vmem:[%s3648_s27 + $0x1d0] sm:$0xff] %v298_v58  ;;  %301 = vst [vmem:[%s3648_s27 + $0x1d8] sm:$0xff] %v300_v59  ;;  %v302_v60 = vld [vmem:[%s3643_s26 + $0x780] sm:$0xff]  ;;  %v304_v61 = vld [vmem:[%s3643_s26 + $0x788] sm:$0xff] }
  0x2e   : > { %v306_v62 = vld [vmem:[%s3643_s26 + $0x7c0] sm:$0xff]  ;;  %303 = vst [vmem:[%s3648_s27 + $0x1e0] sm:$0xff] %v302_v60  ;;  %305 = vst [vmem:[%s3648_s27 + $0x1e8] sm:$0xff] %v304_v61  ;;  %v308_v63 = vld [vmem:[%s3643_s26 + $0x7c8] sm:$0xff] }
  0x2f   : > { %307 = vst [vmem:[%s3648_s27 + $0x1f0] sm:$0xff] %v306_v62  ;;  %v310_v0 = vld [vmem:[%s3643_s26 + $0x800] sm:$0xff]  ;;  %v312_v1 = vld [vmem:[%s3643_s26 + $0x808] sm:$0xff]  ;;  %309 = vst [vmem:[%s3648_s27 + $0x1f8] sm:$0xff] %v308_v63 }
  0x30   : > { %311 = vst [vmem:[%s3648_s27 + $0x200] sm:$0xff] %v310_v0  ;;  %313 = vst [vmem:[%s3648_s27 + $0x208] sm:$0xff] %v312_v1  ;;  %v314_v2 = vld [vmem:[%s3643_s26 + $0x840] sm:$0xff]  ;;  %v316_v3 = vld [vmem:[%s3643_s26 + $0x848] sm:$0xff] }
  0x31   : > { %v318_v4 = vld [vmem:[%s3643_s26 + $0x880] sm:$0xff]  ;;  %315 = vst [vmem:[%s3648_s27 + $0x210] sm:$0xff] %v314_v2  ;;  %317 = vst [vmem:[%s3648_s27 + $0x218] sm:$0xff] %v316_v3  ;;  %v320_v5 = vld [vmem:[%s3643_s26 + $0x888] sm:$0xff] }
  0x32   : > { %319 = vst [vmem:[%s3648_s27 + $0x220] sm:$0xff] %v318_v4  ;;  %v322_v6 = vld [vmem:[%s3643_s26 + $0x8c0] sm:$0xff]  ;;  %v324_v7 = vld [vmem:[%s3643_s26 + $0x8c8] sm:$0xff]  ;;  %321 = vst [vmem:[%s3648_s27 + $0x228] sm:$0xff] %v320_v5 }
  0x33   : > { %323 = vst [vmem:[%s3648_s27 + $0x230] sm:$0xff] %v322_v6  ;;  %325 = vst [vmem:[%s3648_s27 + $0x238] sm:$0xff] %v324_v7  ;;  %v326_v8 = vld [vmem:[%s3643_s26 + $0x900] sm:$0xff]  ;;  %v328_v9 = vld [vmem:[%s3643_s26 + $0x908] sm:$0xff] }
  0x34   : > { %v330_v10 = vld [vmem:[%s3643_s26 + $0x940] sm:$0xff]  ;;  %327 = vst [vmem:[%s3648_s27 + $0x240] sm:$0xff] %v326_v8  ;;  %329 = vst [vmem:[%s3648_s27 + $0x248] sm:$0xff] %v328_v9  ;;  %v332_v11 = vld [vmem:[%s3643_s26 + $0x948] sm:$0xff] }
  0x35   : > { %331 = vst [vmem:[%s3648_s27 + $0x250] sm:$0xff] %v330_v10  ;;  %v334_v12 = vld [vmem:[%s3643_s26 + $0x980] sm:$0xff]  ;;  %v336_v13 = vld [vmem:[%s3643_s26 + $0x988] sm:$0xff]  ;;  %333 = vst [vmem:[%s3648_s27 + $0x258] sm:$0xff] %v332_v11 }
  0x36   : > { %335 = vst [vmem:[%s3648_s27 + $0x260] sm:$0xff] %v334_v12  ;;  %337 = vst [vmem:[%s3648_s27 + $0x268] sm:$0xff] %v336_v13  ;;  %v338_v14 = vld [vmem:[%s3643_s26 + $0x9c0] sm:$0xff]  ;;  %v340_v15 = vld [vmem:[%s3643_s26 + $0x9c8] sm:$0xff] }
  0x37   : > { %v342_v16 = vld [vmem:[%s3643_s26 + $0xa00] sm:$0xff]  ;;  %339 = vst [vmem:[%s3648_s27 + $0x270] sm:$0xff] %v338_v14  ;;  %341 = vst [vmem:[%s3648_s27 + $0x278] sm:$0xff] %v340_v15  ;;  %v344_v17 = vld [vmem:[%s3643_s26 + $0xa08] sm:$0xff] }
  0x38   : > { %343 = vst [vmem:[%s3648_s27 + $0x280] sm:$0xff] %v342_v16  ;;  %v346_v18 = vld [vmem:[%s3643_s26 + $0xa40] sm:$0xff]  ;;  %v348_v19 = vld [vmem:[%s3643_s26 + $0xa48] sm:$0xff]  ;;  %345 = vst [vmem:[%s3648_s27 + $0x288] sm:$0xff] %v344_v17 }
  0x39   : > { %347 = vst [vmem:[%s3648_s27 + $0x290] sm:$0xff] %v346_v18  ;;  %349 = vst [vmem:[%s3648_s27 + $0x298] sm:$0xff] %v348_v19  ;;  %v350_v20 = vld [vmem:[%s3643_s26 + $0xa80] sm:$0xff]  ;;  %v352_v21 = vld [vmem:[%s3643_s26 + $0xa88] sm:$0xff] }
  0x3a   : > { %v354_v22 = vld [vmem:[%s3643_s26 + $0xac0] sm:$0xff]  ;;  %351 = vst [vmem:[%s3648_s27 + $0x2a0] sm:$0xff] %v350_v20  ;;  %353 = vst [vmem:[%s3648_s27 + $0x2a8] sm:$0xff] %v352_v21  ;;  %v356_v23 = vld [vmem:[%s3643_s26 + $0xac8] sm:$0xff] }
  0x3b   : > { %355 = vst [vmem:[%s3648_s27 + $0x2b0] sm:$0xff] %v354_v22  ;;  %v358_v24 = vld [vmem:[%s3643_s26 + $0xb00] sm:$0xff]  ;;  %v360_v25 = vld [vmem:[%s3643_s26 + $0xb08] sm:$0xff]  ;;  %357 = vst [vmem:[%s3648_s27 + $0x2b8] sm:$0xff] %v356_v23 }
  0x3c   : > { %359 = vst [vmem:[%s3648_s27 + $0x2c0] sm:$0xff] %v358_v24  ;;  %361 = vst [vmem:[%s3648_s27 + $0x2c8] sm:$0xff] %v360_v25  ;;  %v362_v26 = vld [vmem:[%s3643_s26 + $0xb40] sm:$0xff]  ;;  %v364_v27 = vld [vmem:[%s3643_s26 + $0xb48] sm:$0xff] }
  0x3d   : > { %v366_v28 = vld [vmem:[%s3643_s26 + $0xb80] sm:$0xff]  ;;  %363 = vst [vmem:[%s3648_s27 + $0x2d0] sm:$0xff] %v362_v26  ;;  %365 = vst [vmem:[%s3648_s27 + $0x2d8] sm:$0xff] %v364_v27  ;;  %v368_v29 = vld [vmem:[%s3643_s26 + $0xb88] sm:$0xff] }
  0x3e   : > { %367 = vst [vmem:[%s3648_s27 + $0x2e0] sm:$0xff] %v366_v28  ;;  %v370_v30 = vld [vmem:[%s3643_s26 + $0xbc0] sm:$0xff]  ;;  %v372_v31 = vld [vmem:[%s3643_s26 + $0xbc8] sm:$0xff]  ;;  %369 = vst [vmem:[%s3648_s27 + $0x2e8] sm:$0xff] %v368_v29 }
  0x3f   : > { %371 = vst [vmem:[%s3648_s27 + $0x2f0] sm:$0xff] %v370_v30  ;;  %373 = vst [vmem:[%s3648_s27 + $0x2f8] sm:$0xff] %v372_v31  ;;  %v374_v32 = vld [vmem:[%s3643_s26 + $0xc00] sm:$0xff]  ;;  %v376_v33 = vld [vmem:[%s3643_s26 + $0xc08] sm:$0xff] }
  0x40   : > { %v378_v34 = vld [vmem:[%s3643_s26 + $0xc40] sm:$0xff]  ;;  %375 = vst [vmem:[%s3648_s27 + $0x300] sm:$0xff] %v374_v32  ;;  %377 = vst [vmem:[%s3648_s27 + $0x308] sm:$0xff] %v376_v33  ;;  %v380_v35 = vld [vmem:[%s3643_s26 + $0xc48] sm:$0xff] }
  0x41   : > { %379 = vst [vmem:[%s3648_s27 + $0x310] sm:$0xff] %v378_v34  ;;  %v382_v36 = vld [vmem:[%s3643_s26 + $0xc80] sm:$0xff]  ;;  %v384_v37 = vld [vmem:[%s3643_s26 + $0xc88] sm:$0xff]  ;;  %381 = vst [vmem:[%s3648_s27 + $0x318] sm:$0xff] %v380_v35 }
  0x42   : > { %383 = vst [vmem:[%s3648_s27 + $0x320] sm:$0xff] %v382_v36  ;;  %385 = vst [vmem:[%s3648_s27 + $0x328] sm:$0xff] %v384_v37  ;;  %v386_v38 = vld [vmem:[%s3643_s26 + $0xcc0] sm:$0xff]  ;;  %v388_v39 = vld [vmem:[%s3643_s26 + $0xcc8] sm:$0xff] }
  0x43   : > { %v390_v40 = vld [vmem:[%s3643_s26 + $0xd00] sm:$0xff]  ;;  %387 = vst [vmem:[%s3648_s27 + $0x330] sm:$0xff] %v386_v38  ;;  %389 = vst [vmem:[%s3648_s27 + $0x338] sm:$0xff] %v388_v39  ;;  %v392_v41 = vld [vmem:[%s3643_s26 + $0xd08] sm:$0xff] }
  0x44   : > { %391 = vst [vmem:[%s3648_s27 + $0x340] sm:$0xff] %v390_v40  ;;  %v394_v42 = vld [vmem:[%s3643_s26 + $0xd40] sm:$0xff]  ;;  %v396_v43 = vld [vmem:[%s3643_s26 + $0xd48] sm:$0xff]  ;;  %393 = vst [vmem:[%s3648_s27 + $0x348] sm:$0xff] %v392_v41 }
  0x45   : > { %395 = vst [vmem:[%s3648_s27 + $0x350] sm:$0xff] %v394_v42  ;;  %397 = vst [vmem:[%s3648_s27 + $0x358] sm:$0xff] %v396_v43  ;;  %v398_v44 = vld [vmem:[%s3643_s26 + $0xd80] sm:$0xff]  ;;  %v400_v45 = vld [vmem:[%s3643_s26 + $0xd88] sm:$0xff] }
  0x46   : > { %v402_v46 = vld [vmem:[%s3643_s26 + $0xdc0] sm:$0xff]  ;;  %399 = vst [vmem:[%s3648_s27 + $0x360] sm:$0xff] %v398_v44  ;;  %401 = vst [vmem:[%s3648_s27 + $0x368] sm:$0xff] %v400_v45  ;;  %v404_v47 = vld [vmem:[%s3643_s26 + $0xdc8] sm:$0xff] }
  0x47   : > { %403 = vst [vmem:[%s3648_s27 + $0x370] sm:$0xff] %v402_v46  ;;  %v406_v48 = vld [vmem:[%s3643_s26 + $0xe00] sm:$0xff]  ;;  %v408_v49 = vld [vmem:[%s3643_s26 + $0xe08] sm:$0xff]  ;;  %405 = vst [vmem:[%s3648_s27 + $0x378] sm:$0xff] %v404_v47 }
  0x48   : > { %407 = vst [vmem:[%s3648_s27 + $0x380] sm:$0xff] %v406_v48  ;;  %409 = vst [vmem:[%s3648_s27 + $0x388] sm:$0xff] %v408_v49  ;;  %v410_v50 = vld [vmem:[%s3643_s26 + $0xe40] sm:$0xff]  ;;  %v412_v51 = vld [vmem:[%s3643_s26 + $0xe48] sm:$0xff] }
  0x49   : > { %v414_v52 = vld [vmem:[%s3643_s26 + $0xe80] sm:$0xff]  ;;  %411 = vst [vmem:[%s3648_s27 + $0x390] sm:$0xff] %v410_v50  ;;  %413 = vst [vmem:[%s3648_s27 + $0x398] sm:$0xff] %v412_v51  ;;  %v416_v53 = vld [vmem:[%s3643_s26 + $0xe88] sm:$0xff] }
  0x4a   : > { %415 = vst [vmem:[%s3648_s27 + $0x3a0] sm:$0xff] %v414_v52  ;;  %v418_v54 = vld [vmem:[%s3643_s26 + $0xec0] sm:$0xff]  ;;  %v420_v55 = vld [vmem:[%s3643_s26 + $0xec8] sm:$0xff]  ;;  %417 = vst [vmem:[%s3648_s27 + $0x3a8] sm:$0xff] %v416_v53 }
  0x4b   : > { %419 = vst [vmem:[%s3648_s27 + $0x3b0] sm:$0xff] %v418_v54  ;;  %421 = vst [vmem:[%s3648_s27 + $0x3b8] sm:$0xff] %v420_v55  ;;  %v422_v56 = vld [vmem:[%s3643_s26 + $0xf00] sm:$0xff]  ;;  %v424_v57 = vld [vmem:[%s3643_s26 + $0xf08] sm:$0xff] }
  0x4c   : > { %v426_v58 = vld [vmem:[%s3643_s26 + $0xf40] sm:$0xff]  ;;  %423 = vst [vmem:[%s3648_s27 + $0x3c0] sm:$0xff] %v422_v56  ;;  %425 = vst [vmem:[%s3648_s27 + $0x3c8] sm:$0xff] %v424_v57  ;;  %v428_v59 = vld [vmem:[%s3643_s26 + $0xf48] sm:$0xff] }
  0x4d   : > { %427 = vst [vmem:[%s3648_s27 + $0x3d0] sm:$0xff] %v426_v58  ;;  %v430_v60 = vld [vmem:[%s3643_s26 + $0xf80] sm:$0xff]  ;;  %v432_v61 = vld [vmem:[%s3643_s26 + $0xf88] sm:$0xff]  ;;  %429 = vst [vmem:[%s3648_s27 + $0x3d8] sm:$0xff] %v428_v59 }
  0x4e   : > { %431 = vst [vmem:[%s3648_s27 + $0x3e0] sm:$0xff] %v430_v60  ;;  %433 = vst [vmem:[%s3648_s27 + $0x3e8] sm:$0xff] %v432_v61  ;;  %v434_v62 = vld [vmem:[%s3643_s26 + $0xfc0] sm:$0xff]  ;;  %v436_v63 = vld [vmem:[%s3643_s26 + $0xfc8] sm:$0xff] }
  0x4f   : > { %v438_v0 = vld [vmem:[%s3643_s26 + $0x1000] sm:$0xff]  ;;  %435 = vst [vmem:[%s3648_s27 + $0x3f0] sm:$0xff] %v434_v62  ;;  %437 = vst [vmem:[%s3648_s27 + $0x3f8] sm:$0xff] %v436_v63  ;;  %v440_v1 = vld [vmem:[%s3643_s26 + $0x1008] sm:$0xff] }
  0x50   : > { %439 = vst [vmem:[%s3648_s27 + $0x400] sm:$0xff] %v438_v0  ;;  %v442_v2 = vld [vmem:[%s3643_s26 + $0x1040] sm:$0xff]  ;;  %v444_v3 = vld [vmem:[%s3643_s26 + $0x1048] sm:$0xff]  ;;  %441 = vst [vmem:[%s3648_s27 + $0x408] sm:$0xff] %v440_v1 }
  0x51   : > { %443 = vst [vmem:[%s3648_s27 + $0x410] sm:$0xff] %v442_v2  ;;  %445 = vst [vmem:[%s3648_s27 + $0x418] sm:$0xff] %v444_v3  ;;  %v446_v4 = vld [vmem:[%s3643_s26 + $0x1080] sm:$0xff]  ;;  %v448_v5 = vld [vmem:[%s3643_s26 + $0x1088] sm:$0xff] }
  0x52   : > { %v450_v6 = vld [vmem:[%s3643_s26 + $0x10c0] sm:$0xff]  ;;  %447 = vst [vmem:[%s3648_s27 + $0x420] sm:$0xff] %v446_v4  ;;  %449 = vst [vmem:[%s3648_s27 + $0x428] sm:$0xff] %v448_v5  ;;  %v452_v7 = vld [vmem:[%s3643_s26 + $0x10c8] sm:$0xff] }
  0x53   : > { %451 = vst [vmem:[%s3648_s27 + $0x430] sm:$0xff] %v450_v6  ;;  %v454_v8 = vld [vmem:[%s3643_s26 + $0x1100] sm:$0xff]  ;;  %v456_v9 = vld [vmem:[%s3643_s26 + $0x1108] sm:$0xff]  ;;  %453 = vst [vmem:[%s3648_s27 + $0x438] sm:$0xff] %v452_v7 }
  0x54   : > { %455 = vst [vmem:[%s3648_s27 + $0x440] sm:$0xff] %v454_v8  ;;  %457 = vst [vmem:[%s3648_s27 + $0x448] sm:$0xff] %v456_v9  ;;  %v458_v10 = vld [vmem:[%s3643_s26 + $0x1140] sm:$0xff]  ;;  %v460_v11 = vld [vmem:[%s3643_s26 + $0x1148] sm:$0xff] }
  0x55   : > { %v462_v12 = vld [vmem:[%s3643_s26 + $0x1180] sm:$0xff]  ;;  %459 = vst [vmem:[%s3648_s27 + $0x450] sm:$0xff] %v458_v10  ;;  %461 = vst [vmem:[%s3648_s27 + $0x458] sm:$0xff] %v460_v11  ;;  %v464_v13 = vld [vmem:[%s3643_s26 + $0x1188] sm:$0xff] }
  0x56   : > { %463 = vst [vmem:[%s3648_s27 + $0x460] sm:$0xff] %v462_v12  ;;  %v466_v14 = vld [vmem:[%s3643_s26 + $0x11c0] sm:$0xff]  ;;  %v468_v15 = vld [vmem:[%s3643_s26 + $0x11c8] sm:$0xff]  ;;  %465 = vst [vmem:[%s3648_s27 + $0x468] sm:$0xff] %v464_v13 }
  0x57   : > { %467 = vst [vmem:[%s3648_s27 + $0x470] sm:$0xff] %v466_v14  ;;  %469 = vst [vmem:[%s3648_s27 + $0x478] sm:$0xff] %v468_v15  ;;  %v470_v16 = vld [vmem:[%s3643_s26 + $0x1200] sm:$0xff]  ;;  %v472_v17 = vld [vmem:[%s3643_s26 + $0x1208] sm:$0xff] }
  0x58   : > { %v474_v18 = vld [vmem:[%s3643_s26 + $0x1240] sm:$0xff]  ;;  %471 = vst [vmem:[%s3648_s27 + $0x480] sm:$0xff] %v470_v16  ;;  %473 = vst [vmem:[%s3648_s27 + $0x488] sm:$0xff] %v472_v17  ;;  %v476_v19 = vld [vmem:[%s3643_s26 + $0x1248] sm:$0xff] }
  0x59   : > { %475 = vst [vmem:[%s3648_s27 + $0x490] sm:$0xff] %v474_v18  ;;  %v478_v20 = vld [vmem:[%s3643_s26 + $0x1280] sm:$0xff]  ;;  %v480_v21 = vld [vmem:[%s3643_s26 + $0x1288] sm:$0xff]  ;;  %477 = vst [vmem:[%s3648_s27 + $0x498] sm:$0xff] %v476_v19 }
  0x5a   : > { %479 = vst [vmem:[%s3648_s27 + $0x4a0] sm:$0xff] %v478_v20  ;;  %481 = vst [vmem:[%s3648_s27 + $0x4a8] sm:$0xff] %v480_v21  ;;  %v482_v22 = vld [vmem:[%s3643_s26 + $0x12c0] sm:$0xff]  ;;  %v484_v23 = vld [vmem:[%s3643_s26 + $0x12c8] sm:$0xff] }
  0x5b   : > { %v486_v24 = vld [vmem:[%s3643_s26 + $0x1300] sm:$0xff]  ;;  %483 = vst [vmem:[%s3648_s27 + $0x4b0] sm:$0xff] %v482_v22  ;;  %485 = vst [vmem:[%s3648_s27 + $0x4b8] sm:$0xff] %v484_v23  ;;  %v488_v25 = vld [vmem:[%s3643_s26 + $0x1308] sm:$0xff] }
  0x5c   : > { %487 = vst [vmem:[%s3648_s27 + $0x4c0] sm:$0xff] %v486_v24  ;;  %v490_v26 = vld [vmem:[%s3643_s26 + $0x1340] sm:$0xff]  ;;  %v492_v27 = vld [vmem:[%s3643_s26 + $0x1348] sm:$0xff]  ;;  %489 = vst [vmem:[%s3648_s27 + $0x4c8] sm:$0xff] %v488_v25 }
  0x5d   : > { %491 = vst [vmem:[%s3648_s27 + $0x4d0] sm:$0xff] %v490_v26  ;;  %493 = vst [vmem:[%s3648_s27 + $0x4d8] sm:$0xff] %v492_v27  ;;  %v494_v28 = vld [vmem:[%s3643_s26 + $0x1380] sm:$0xff]  ;;  %v496_v29 = vld [vmem:[%s3643_s26 + $0x1388] sm:$0xff] }
  0x5e   : > { %v498_v30 = vld [vmem:[%s3643_s26 + $0x13c0] sm:$0xff]  ;;  %495 = vst [vmem:[%s3648_s27 + $0x4e0] sm:$0xff] %v494_v28  ;;  %497 = vst [vmem:[%s3648_s27 + $0x4e8] sm:$0xff] %v496_v29  ;;  %v500_v31 = vld [vmem:[%s3643_s26 + $0x13c8] sm:$0xff] }
  0x5f   : > { %499 = vst [vmem:[%s3648_s27 + $0x4f0] sm:$0xff] %v498_v30  ;;  %v502_v32 = vld [vmem:[%s3643_s26 + $0x1400] sm:$0xff]  ;;  %v504_v33 = vld [vmem:[%s3643_s26 + $0x1408] sm:$0xff]  ;;  %501 = vst [vmem:[%s3648_s27 + $0x4f8] sm:$0xff] %v500_v31 }
  0x60   : > { %503 = vst [vmem:[%s3648_s27 + $0x500] sm:$0xff] %v502_v32  ;;  %505 = vst [vmem:[%s3648_s27 + $0x508] sm:$0xff] %v504_v33  ;;  %v506_v34 = vld [vmem:[%s3643_s26 + $0x1440] sm:$0xff]  ;;  %v508_v35 = vld [vmem:[%s3643_s26 + $0x1448] sm:$0xff] }
  0x61   : > { %v510_v36 = vld [vmem:[%s3643_s26 + $0x1480] sm:$0xff]  ;;  %507 = vst [vmem:[%s3648_s27 + $0x510] sm:$0xff] %v506_v34  ;;  %509 = vst [vmem:[%s3648_s27 + $0x518] sm:$0xff] %v508_v35  ;;  %v512_v37 = vld [vmem:[%s3643_s26 + $0x1488] sm:$0xff] }
  0x62   : > { %511 = vst [vmem:[%s3648_s27 + $0x520] sm:$0xff] %v510_v36  ;;  %v514_v38 = vld [vmem:[%s3643_s26 + $0x14c0] sm:$0xff]  ;;  %v516_v39 = vld [vmem:[%s3643_s26 + $0x14c8] sm:$0xff]  ;;  %513 = vst [vmem:[%s3648_s27 + $0x528] sm:$0xff] %v512_v37 }
  0x63   : > { %515 = vst [vmem:[%s3648_s27 + $0x530] sm:$0xff] %v514_v38  ;;  %517 = vst [vmem:[%s3648_s27 + $0x538] sm:$0xff] %v516_v39  ;;  %v518_v40 = vld [vmem:[%s3643_s26 + $0x1500] sm:$0xff]  ;;  %v520_v41 = vld [vmem:[%s3643_s26 + $0x1508] sm:$0xff] }
  0x64   : > { %v522_v42 = vld [vmem:[%s3643_s26 + $0x1540] sm:$0xff]  ;;  %519 = vst [vmem:[%s3648_s27 + $0x540] sm:$0xff] %v518_v40  ;;  %521 = vst [vmem:[%s3648_s27 + $0x548] sm:$0xff] %v520_v41  ;;  %v524_v43 = vld [vmem:[%s3643_s26 + $0x1548] sm:$0xff] }
  0x65   : > { %523 = vst [vmem:[%s3648_s27 + $0x550] sm:$0xff] %v522_v42  ;;  %v526_v44 = vld [vmem:[%s3643_s26 + $0x1580] sm:$0xff]  ;;  %v528_v45 = vld [vmem:[%s3643_s26 + $0x1588] sm:$0xff]  ;;  %525 = vst [vmem:[%s3648_s27 + $0x558] sm:$0xff] %v524_v43 }
  0x66   : > { %527 = vst [vmem:[%s3648_s27 + $0x560] sm:$0xff] %v526_v44  ;;  %529 = vst [vmem:[%s3648_s27 + $0x568] sm:$0xff] %v528_v45  ;;  %v530_v46 = vld [vmem:[%s3643_s26 + $0x15c0] sm:$0xff]  ;;  %v532_v47 = vld [vmem:[%s3643_s26 + $0x15c8] sm:$0xff] }
  0x67   : > { %v534_v48 = vld [vmem:[%s3643_s26 + $0x1600] sm:$0xff]  ;;  %531 = vst [vmem:[%s3648_s27 + $0x570] sm:$0xff] %v530_v46  ;;  %533 = vst [vmem:[%s3648_s27 + $0x578] sm:$0xff] %v532_v47  ;;  %v536_v49 = vld [vmem:[%s3643_s26 + $0x1608] sm:$0xff] }
  0x68   : > { %535 = vst [vmem:[%s3648_s27 + $0x580] sm:$0xff] %v534_v48  ;;  %v538_v50 = vld [vmem:[%s3643_s26 + $0x1640] sm:$0xff]  ;;  %v540_v51 = vld [vmem:[%s3643_s26 + $0x1648] sm:$0xff]  ;;  %537 = vst [vmem:[%s3648_s27 + $0x588] sm:$0xff] %v536_v49 }
  0x69   : > { %539 = vst [vmem:[%s3648_s27 + $0x590] sm:$0xff] %v538_v50  ;;  %541 = vst [vmem:[%s3648_s27 + $0x598] sm:$0xff] %v540_v51  ;;  %v542_v52 = vld [vmem:[%s3643_s26 + $0x1680] sm:$0xff]  ;;  %v544_v53 = vld [vmem:[%s3643_s26 + $0x1688] sm:$0xff] }
  0x6a   : > { %v546_v54 = vld [vmem:[%s3643_s26 + $0x16c0] sm:$0xff]  ;;  %543 = vst [vmem:[%s3648_s27 + $0x5a0] sm:$0xff] %v542_v52  ;;  %545 = vst [vmem:[%s3648_s27 + $0x5a8] sm:$0xff] %v544_v53  ;;  %v548_v55 = vld [vmem:[%s3643_s26 + $0x16c8] sm:$0xff] }
  0x6b   : > { %547 = vst [vmem:[%s3648_s27 + $0x5b0] sm:$0xff] %v546_v54  ;;  %v550_v56 = vld [vmem:[%s3643_s26 + $0x1700] sm:$0xff]  ;;  %v552_v57 = vld [vmem:[%s3643_s26 + $0x1708] sm:$0xff]  ;;  %549 = vst [vmem:[%s3648_s27 + $0x5b8] sm:$0xff] %v548_v55 }
  0x6c   : > { %551 = vst [vmem:[%s3648_s27 + $0x5c0] sm:$0xff] %v550_v56  ;;  %553 = vst [vmem:[%s3648_s27 + $0x5c8] sm:$0xff] %v552_v57  ;;  %v554_v58 = vld [vmem:[%s3643_s26 + $0x1740] sm:$0xff]  ;;  %v556_v59 = vld [vmem:[%s3643_s26 + $0x1748] sm:$0xff] }
  0x6d   : > { %v558_v60 = vld [vmem:[%s3643_s26 + $0x1780] sm:$0xff]  ;;  %555 = vst [vmem:[%s3648_s27 + $0x5d0] sm:$0xff] %v554_v58  ;;  %557 = vst [vmem:[%s3648_s27 + $0x5d8] sm:$0xff] %v556_v59  ;;  %v560_v61 = vld [vmem:[%s3643_s26 + $0x1788] sm:$0xff] }
  0x6e   : > { %559 = vst [vmem:[%s3648_s27 + $0x5e0] sm:$0xff] %v558_v60  ;;  %v562_v62 = vld [vmem:[%s3643_s26 + $0x17c0] sm:$0xff]  ;;  %v564_v63 = vld [vmem:[%s3643_s26 + $0x17c8] sm:$0xff]  ;;  %561 = vst [vmem:[%s3648_s27 + $0x5e8] sm:$0xff] %v560_v61 }
  0x6f   : > { %563 = vst [vmem:[%s3648_s27 + $0x5f0] sm:$0xff] %v562_v62  ;;  %565 = vst [vmem:[%s3648_s27 + $0x5f8] sm:$0xff] %v564_v63  ;;  %v566_v0 = vld [vmem:[%s3643_s26 + $0x1800] sm:$0xff]  ;;  %v568_v1 = vld [vmem:[%s3643_s26 + $0x1808] sm:$0xff] }
  0x70   : > { %v570_v2 = vld [vmem:[%s3643_s26 + $0x1840] sm:$0xff]  ;;  %567 = vst [vmem:[%s3648_s27 + $0x600] sm:$0xff] %v566_v0  ;;  %569 = vst [vmem:[%s3648_s27 + $0x608] sm:$0xff] %v568_v1  ;;  %v572_v3 = vld [vmem:[%s3643_s26 + $0x1848] sm:$0xff] }
  0x71   : > { %571 = vst [vmem:[%s3648_s27 + $0x610] sm:$0xff] %v570_v2  ;;  %v574_v4 = vld [vmem:[%s3643_s26 + $0x1880] sm:$0xff]  ;;  %v576_v5 = vld [vmem:[%s3643_s26 + $0x1888] sm:$0xff]  ;;  %573 = vst [vmem:[%s3648_s27 + $0x618] sm:$0xff] %v572_v3 }
  0x72   : > { %575 = vst [vmem:[%s3648_s27 + $0x620] sm:$0xff] %v574_v4  ;;  %577 = vst [vmem:[%s3648_s27 + $0x628] sm:$0xff] %v576_v5  ;;  %v578_v6 = vld [vmem:[%s3643_s26 + $0x18c0] sm:$0xff]  ;;  %v580_v7 = vld [vmem:[%s3643_s26 + $0x18c8] sm:$0xff] }
  0x73   : > { %v582_v8 = vld [vmem:[%s3643_s26 + $0x1900] sm:$0xff]  ;;  %579 = vst [vmem:[%s3648_s27 + $0x630] sm:$0xff] %v578_v6  ;;  %581 = vst [vmem:[%s3648_s27 + $0x638] sm:$0xff] %v580_v7  ;;  %v584_v9 = vld [vmem:[%s3643_s26 + $0x1908] sm:$0xff] }
  0x74   : > { %583 = vst [vmem:[%s3648_s27 + $0x640] sm:$0xff] %v582_v8  ;;  %v586_v10 = vld [vmem:[%s3643_s26 + $0x1940] sm:$0xff]  ;;  %v588_v11 = vld [vmem:[%s3643_s26 + $0x1948] sm:$0xff]  ;;  %585 = vst [vmem:[%s3648_s27 + $0x648] sm:$0xff] %v584_v9 }
  0x75   : > { %587 = vst [vmem:[%s3648_s27 + $0x650] sm:$0xff] %v586_v10  ;;  %589 = vst [vmem:[%s3648_s27 + $0x658] sm:$0xff] %v588_v11  ;;  %v590_v12 = vld [vmem:[%s3643_s26 + $0x1980] sm:$0xff]  ;;  %v592_v13 = vld [vmem:[%s3643_s26 + $0x1988] sm:$0xff] }
  0x76   : > { %v594_v14 = vld [vmem:[%s3643_s26 + $0x19c0] sm:$0xff]  ;;  %591 = vst [vmem:[%s3648_s27 + $0x660] sm:$0xff] %v590_v12  ;;  %593 = vst [vmem:[%s3648_s27 + $0x668] sm:$0xff] %v592_v13  ;;  %v596_v15 = vld [vmem:[%s3643_s26 + $0x19c8] sm:$0xff] }
  0x77   : > { %595 = vst [vmem:[%s3648_s27 + $0x670] sm:$0xff] %v594_v14  ;;  %v598_v16 = vld [vmem:[%s3643_s26 + $0x1a00] sm:$0xff]  ;;  %v600_v17 = vld [vmem:[%s3643_s26 + $0x1a08] sm:$0xff]  ;;  %597 = vst [vmem:[%s3648_s27 + $0x678] sm:$0xff] %v596_v15 }
  0x78   : > { %599 = vst [vmem:[%s3648_s27 + $0x680] sm:$0xff] %v598_v16  ;;  %601 = vst [vmem:[%s3648_s27 + $0x688] sm:$0xff] %v600_v17  ;;  %v602_v18 = vld [vmem:[%s3643_s26 + $0x1a40] sm:$0xff]  ;;  %v604_v19 = vld [vmem:[%s3643_s26 + $0x1a48] sm:$0xff] }
  0x79   : > { %v606_v20 = vld [vmem:[%s3643_s26 + $0x1a80] sm:$0xff]  ;;  %603 = vst [vmem:[%s3648_s27 + $0x690] sm:$0xff] %v602_v18  ;;  %605 = vst [vmem:[%s3648_s27 + $0x698] sm:$0xff] %v604_v19  ;;  %v608_v21 = vld [vmem:[%s3643_s26 + $0x1a88] sm:$0xff] }
  0x7a   : > { %607 = vst [vmem:[%s3648_s27 + $0x6a0] sm:$0xff] %v606_v20  ;;  %v610_v22 = vld [vmem:[%s3643_s26 + $0x1ac0] sm:$0xff]  ;;  %v612_v23 = vld [vmem:[%s3643_s26 + $0x1ac8] sm:$0xff]  ;;  %609 = vst [vmem:[%s3648_s27 + $0x6a8] sm:$0xff] %v608_v21 }
  0x7b   : > { %611 = vst [vmem:[%s3648_s27 + $0x6b0] sm:$0xff] %v610_v22  ;;  %613 = vst [vmem:[%s3648_s27 + $0x6b8] sm:$0xff] %v612_v23  ;;  %v614_v24 = vld [vmem:[%s3643_s26 + $0x1b00] sm:$0xff]  ;;  %v616_v25 = vld [vmem:[%s3643_s26 + $0x1b08] sm:$0xff] }
  0x7c   : > { %v618_v26 = vld [vmem:[%s3643_s26 + $0x1b40] sm:$0xff]  ;;  %615 = vst [vmem:[%s3648_s27 + $0x6c0] sm:$0xff] %v614_v24  ;;  %617 = vst [vmem:[%s3648_s27 + $0x6c8] sm:$0xff] %v616_v25  ;;  %v620_v27 = vld [vmem:[%s3643_s26 + $0x1b48] sm:$0xff] }
  0x7d   : > { %619 = vst [vmem:[%s3648_s27 + $0x6d0] sm:$0xff] %v618_v26  ;;  %v622_v28 = vld [vmem:[%s3643_s26 + $0x1b80] sm:$0xff]  ;;  %v624_v29 = vld [vmem:[%s3643_s26 + $0x1b88] sm:$0xff]  ;;  %621 = vst [vmem:[%s3648_s27 + $0x6d8] sm:$0xff] %v620_v27 }
  0x7e   : > { %623 = vst [vmem:[%s3648_s27 + $0x6e0] sm:$0xff] %v622_v28  ;;  %625 = vst [vmem:[%s3648_s27 + $0x6e8] sm:$0xff] %v624_v29  ;;  %v626_v30 = vld [vmem:[%s3643_s26 + $0x1bc0] sm:$0xff]  ;;  %v628_v31 = vld [vmem:[%s3643_s26 + $0x1bc8] sm:$0xff] }
  0x7f   : > { %v630_v32 = vld [vmem:[%s3643_s26 + $0x1c00] sm:$0xff]  ;;  %627 = vst [vmem:[%s3648_s27 + $0x6f0] sm:$0xff] %v626_v30  ;;  %629 = vst [vmem:[%s3648_s27 + $0x6f8] sm:$0xff] %v628_v31  ;;  %v632_v33 = vld [vmem:[%s3643_s26 + $0x1c08] sm:$0xff] }
  0x80   : > { %631 = vst [vmem:[%s3648_s27 + $0x700] sm:$0xff] %v630_v32  ;;  %v634_v34 = vld [vmem:[%s3643_s26 + $0x1c40] sm:$0xff]  ;;  %v636_v35 = vld [vmem:[%s3643_s26 + $0x1c48] sm:$0xff]  ;;  %633 = vst [vmem:[%s3648_s27 + $0x708] sm:$0xff] %v632_v33 }
  0x81   : > { %635 = vst [vmem:[%s3648_s27 + $0x710] sm:$0xff] %v634_v34  ;;  %637 = vst [vmem:[%s3648_s27 + $0x718] sm:$0xff] %v636_v35  ;;  %v638_v36 = vld [vmem:[%s3643_s26 + $0x1c80] sm:$0xff]  ;;  %v640_v37 = vld [vmem:[%s3643_s26 + $0x1c88] sm:$0xff] }
  0x82   : > { %v642_v38 = vld [vmem:[%s3643_s26 + $0x1cc0] sm:$0xff]  ;;  %639 = vst [vmem:[%s3648_s27 + $0x720] sm:$0xff] %v638_v36  ;;  %641 = vst [vmem:[%s3648_s27 + $0x728] sm:$0xff] %v640_v37  ;;  %v644_v39 = vld [vmem:[%s3643_s26 + $0x1cc8] sm:$0xff] }
  0x83   : > { %643 = vst [vmem:[%s3648_s27 + $0x730] sm:$0xff] %v642_v38  ;;  %v646_v40 = vld [vmem:[%s3643_s26 + $0x1d00] sm:$0xff]  ;;  %v648_v41 = vld [vmem:[%s3643_s26 + $0x1d08] sm:$0xff]  ;;  %645 = vst [vmem:[%s3648_s27 + $0x738] sm:$0xff] %v644_v39 }
  0x84   : > { %647 = vst [vmem:[%s3648_s27 + $0x740] sm:$0xff] %v646_v40  ;;  %649 = vst [vmem:[%s3648_s27 + $0x748] sm:$0xff] %v648_v41  ;;  %v650_v42 = vld [vmem:[%s3643_s26 + $0x1d40] sm:$0xff]  ;;  %v652_v43 = vld [vmem:[%s3643_s26 + $0x1d48] sm:$0xff] }
  0x85   : > { %v654_v44 = vld [vmem:[%s3643_s26 + $0x1d80] sm:$0xff]  ;;  %651 = vst [vmem:[%s3648_s27 + $0x750] sm:$0xff] %v650_v42  ;;  %653 = vst [vmem:[%s3648_s27 + $0x758] sm:$0xff] %v652_v43  ;;  %v656_v45 = vld [vmem:[%s3643_s26 + $0x1d88] sm:$0xff] }
  0x86   : > { %655 = vst [vmem:[%s3648_s27 + $0x760] sm:$0xff] %v654_v44  ;;  %v658_v46 = vld [vmem:[%s3643_s26 + $0x1dc0] sm:$0xff]  ;;  %v660_v47 = vld [vmem:[%s3643_s26 + $0x1dc8] sm:$0xff]  ;;  %657 = vst [vmem:[%s3648_s27 + $0x768] sm:$0xff] %v656_v45 }
  0x87   : > { %659 = vst [vmem:[%s3648_s27 + $0x770] sm:$0xff] %v658_v46  ;;  %661 = vst [vmem:[%s3648_s27 + $0x778] sm:$0xff] %v660_v47  ;;  %v662_v48 = vld [vmem:[%s3643_s26 + $0x1e00] sm:$0xff]  ;;  %v664_v49 = vld [vmem:[%s3643_s26 + $0x1e08] sm:$0xff] }
  0x88   : > { %v666_v50 = vld [vmem:[%s3643_s26 + $0x1e40] sm:$0xff]  ;;  %663 = vst [vmem:[%s3648_s27 + $0x780] sm:$0xff] %v662_v48  ;;  %665 = vst [vmem:[%s3648_s27 + $0x788] sm:$0xff] %v664_v49  ;;  %v668_v51 = vld [vmem:[%s3643_s26 + $0x1e48] sm:$0xff] }
  0x89   : > { %667 = vst [vmem:[%s3648_s27 + $0x790] sm:$0xff] %v666_v50  ;;  %v670_v52 = vld [vmem:[%s3643_s26 + $0x1e80] sm:$0xff]  ;;  %v672_v53 = vld [vmem:[%s3643_s26 + $0x1e88] sm:$0xff]  ;;  %669 = vst [vmem:[%s3648_s27 + $0x798] sm:$0xff] %v668_v51 }
  0x8a   : > { %671 = vst [vmem:[%s3648_s27 + $0x7a0] sm:$0xff] %v670_v52  ;;  %673 = vst [vmem:[%s3648_s27 + $0x7a8] sm:$0xff] %v672_v53  ;;  %v674_v54 = vld [vmem:[%s3643_s26 + $0x1ec0] sm:$0xff]  ;;  %v676_v55 = vld [vmem:[%s3643_s26 + $0x1ec8] sm:$0xff] }
  0x8b   : > { %v678_v56 = vld [vmem:[%s3643_s26 + $0x1f00] sm:$0xff]  ;;  %675 = vst [vmem:[%s3648_s27 + $0x7b0] sm:$0xff] %v674_v54  ;;  %677 = vst [vmem:[%s3648_s27 + $0x7b8] sm:$0xff] %v676_v55  ;;  %v680_v57 = vld [vmem:[%s3643_s26 + $0x1f08] sm:$0xff] }
  0x8c   : > { %679 = vst [vmem:[%s3648_s27 + $0x7c0] sm:$0xff] %v678_v56  ;;  %v682_v58 = vld [vmem:[%s3643_s26 + $0x1f40] sm:$0xff]  ;;  %v684_v59 = vld [vmem:[%s3643_s26 + $0x1f48] sm:$0xff]  ;;  %681 = vst [vmem:[%s3648_s27 + $0x7c8] sm:$0xff] %v680_v57 }
  0x8d   : > { %683 = vst [vmem:[%s3648_s27 + $0x7d0] sm:$0xff] %v682_v58  ;;  %685 = vst [vmem:[%s3648_s27 + $0x7d8] sm:$0xff] %v684_v59  ;;  %v686_v60 = vld [vmem:[%s3643_s26 + $0x1f80] sm:$0xff]  ;;  %v688_v61 = vld [vmem:[%s3643_s26 + $0x1f88] sm:$0xff] }
  0x8e   : > { %v690_v62 = vld [vmem:[%s3643_s26 + $0x1fc0] sm:$0xff]  ;;  %687 = vst [vmem:[%s3648_s27 + $0x7e0] sm:$0xff] %v686_v60  ;;  %689 = vst [vmem:[%s3648_s27 + $0x7e8] sm:$0xff] %v688_v61  ;;  %v692_v63 = vld [vmem:[%s3643_s26 + $0x1fc8] sm:$0xff] }
  0x8f   : > { %691 = vst [vmem:[%s3648_s27 + $0x7f0] sm:$0xff] %v690_v62  ;;  %693 = vst [vmem:[%s3648_s27 + $0x7f8] sm:$0xff] %v692_v63 }
  0x90 PF: > { %p2836_p6 = scmp.ge.s32.totalorder %s3578_s16, 1  ;;  %p710_p7 = scmp.lt.s32.totalorder %s3578_s16, 5 }
  0x92   : > { %p711_p8 = pnand %p2836_p6, %p710_p7 }
  0x93   : > { %s717_s28 = sand.u32 (!%p711_p8), 1, %s3562_s12   ;;  %s2838_s12 = sshll.u32 (!%p711_p8), %s3570_s14, 2 }
  0x94   : > { %714 = sbr.rel (%p711_p8) target bundleno = 614 (0x266), region = 51  ;;  %s2837_s6 = sshll.u32 (!%p711_p8), %s717_s28, 11 }
  0x95   : > { %s4180_s7 = scalar_lea.vmem (!%p711_p8), [#allocation2], %s2837_s6  ;;  %p766_p9 = scmp.lt.s32.totalorder (!%p711_p8), %s2838_s12, 15 }
  0x99   : > { %v4165_v0 = vld [vmem:[%s4516_s0] sm:$0xff]  ;;  %v4170_v1 = vld [vmem:[%s4516_s0 + $0x8] sm:$0xff]  ;;  %s4527_s12 = smov (!%p766_p9, %s2838_s12), 15 }
  0x9a   : > { %v4174_v2 = vcombine.high %v4165_v0, %v4165_v0  ;;  %v4178_v3 = vcombine.high %v4170_v1, %v4170_v1  ;;  %v3148_v4 = vld [vmem:[%s4180_s7 + $0xe4] ss:$16 sps:$4 sm:$0xff]   ;;  %v3152_v6 = vld [vmem:[%s4180_s7 + $0xe0] ss:$16 sps:$4 sm:$0xff]   ;;  %s770_s21 = scalar_lea.vmem %s4518_s2, %s4527_s12  ;;  %s2840_s14 = sshll.u32 %s4527_s12, 3 }
  0x9b   : > { %v3150_v5 = vld [vmem:[%s4180_s7 + $0x2e4] ss:$16 sps:$4 sm:$0xff]   ;;  %2372 = vmatprep.subr.bf16.mxu0 %v3148_v4  ;;  %v3153_v7 = vld [vmem:[%s4180_s7 + $0x2e0] ss:$16 sps:$4 sm:$0xff]   ;;  %s4495_s24 = scalar_lea.vmem %s4519_s3, %s2840_s14 }
  0x9c   : > { %2404 = vmatprep.mubr.bf16.mxu0 %v4174_v2  ;;  %2445 = vmatprep.mubr.bf16.mxu1 %v4178_v3  ;;  %v3154_v8 = vld [vmem:[%s4180_s7 + $0xc4] ss:$16 sps:$4 sm:$0xff]   ;;  %v3158_v10 = vld [vmem:[%s4180_s7 + $0xc0] ss:$16 sps:$4 sm:$0xff]  }
  0x9d   : > { %2413 = vmatprep.subr.bf16.mxu1 %v3150_v5  ;;  %2373 = vmatpush1.bf16.msra.mxu0 %v3152_v6  ;;  %v3156_v9 = vld [vmem:[%s4180_s7 + $0x2c4] ss:$16 sps:$4 sm:$0xff]   ;;  %v3159_v11 = vld [vmem:[%s4180_s7 + $0x2c0] ss:$16 sps:$4 sm:$0xff]  }
  0x9e   : > { %2414 = vmatpush1.bf16.msra.mxu1 %v3153_v7  ;;  %2374 = vmatprep.subr.bf16.mxu0 %v3154_v8  ;;  %v3160_v12 = vld [vmem:[%s4180_s7 + $0xa4] ss:$16 sps:$4 sm:$0xff]   ;;  %v3164_v14 = vld [vmem:[%s4180_s7 + $0xa0] ss:$16 sps:$4 sm:$0xff]  }
  0x9f   : > { %2415 = vmatprep.subr.bf16.mxu1 %v3156_v9  ;;  %v3162_v13 = vld [vmem:[%s4180_s7 + $0x2a4] ss:$16 sps:$4 sm:$0xff]   ;;  %v3165_v15 = vld [vmem:[%s4180_s7 + $0x2a0] ss:$16 sps:$4 sm:$0xff]  }
  0xa0   : > { %v3166_v16 = vld [vmem:[%s4180_s7 + $0x84] ss:$16 sps:$4 sm:$0xff]   ;;  %v3170_v18 = vld [vmem:[%s4180_s7 + $0x80] ss:$16 sps:$4 sm:$0xff]  }
  0xa1   : > { %2375 = vmatpush1.bf16.msra.mxu0 %v3158_v10  ;;  %v3168_v17 = vld [vmem:[%s4180_s7 + $0x284] ss:$16 sps:$4 sm:$0xff]   ;;  %v3171_v19 = vld [vmem:[%s4180_s7 + $0x280] ss:$16 sps:$4 sm:$0xff]  }
  0xa2   : > { %2416 = vmatpush1.bf16.msra.mxu1 %v3159_v11  ;;  %2376 = vmatprep.subr.bf16.mxu0 %v3160_v12  ;;  %v3172_v20 = vld [vmem:[%s4180_s7 + $0x64] ss:$16 sps:$4 sm:$0xff]   ;;  %v3176_v22 = vld [vmem:[%s4180_s7 + $0x60] ss:$16 sps:$4 sm:$0xff]   ;;  %v4258_v11 = vld [vmem:[%s4516_s0 + $0x18] sm:$0xff]  ;;  %v4262_v12 = vcombine.low %v4165_v0, %v4165_v0 }
  0xa3   : > { %2417 = vmatprep.subr.bf16.mxu1 %v3162_v13  ;;  %v3174_v21 = vld [vmem:[%s4180_s7 + $0x264] ss:$16 sps:$4 sm:$0xff]   ;;  %v3177_v23 = vld [vmem:[%s4180_s7 + $0x260] ss:$16 sps:$4 sm:$0xff]   ;;  %v4266_v13 = vcombine.low %v4170_v1, %v4170_v1  ;;  %v4278_v1 = vcombine.high %v4258_v11, %v4258_v11 }
  0xa4   : > { %v3178_v24 = vld [vmem:[%s4180_s7 + $0x44] ss:$16 sps:$4 sm:$0xff]   ;;  %v3182_v26 = vld [vmem:[%s4180_s7 + $0x40] ss:$16 sps:$4 sm:$0xff]  }
  0xa5   : > { %2377 = vmatpush1.bf16.msra.mxu0 %v3164_v14  ;;  %v3180_v25 = vld [vmem:[%s4180_s7 + $0x244] ss:$16 sps:$4 sm:$0xff]   ;;  %v3183_v27 = vld [vmem:[%s4180_s7 + $0x240] ss:$16 sps:$4 sm:$0xff]  }
  0xa6   : > { %2418 = vmatpush1.bf16.msra.mxu1 %v3165_v15  ;;  %2378 = vmatprep.subr.bf16.mxu0 %v3166_v16  ;;  %v3184_v28 = vld [vmem:[%s4180_s7 + $0x24] ss:$16 sps:$4 sm:$0xff]   ;;  %v3188_v30 = vld [vmem:[%s4180_s7 + $0x20] ss:$16 sps:$4 sm:$0xff]  }
  0xa7   : > { %2419 = vmatprep.subr.bf16.mxu1 %v3168_v17  ;;  %v3186_v29 = vld [vmem:[%s4180_s7 + $0x224] ss:$16 sps:$4 sm:$0xff]   ;;  %v3189_v31 = vld [vmem:[%s4180_s7 + $0x220] ss:$16 sps:$4 sm:$0xff]  }
  0xa8   : > { %v3190_v32 = vld [vmem:[%s4180_s7 + $0x4] ss:$16 sps:$4 sm:$0xff]   ;;  %v3194_v34 = vld [vmem:[%s4180_s7] ss:$16 sps:$4 sm:$0xff]  }
  0xa9   : > { %2379 = vmatpush1.bf16.msra.mxu0 %v3170_v18  ;;  %v3192_v33 = vld [vmem:[%s4180_s7 + $0x204] ss:$16 sps:$4 sm:$0xff]   ;;  %v3195_v35 = vld [vmem:[%s4180_s7 + $0x200] ss:$16 sps:$4 sm:$0xff]  }
  0xaa   : > { %2420 = vmatpush1.bf16.msra.mxu1 %v3171_v19  ;;  %2380 = vmatprep.subr.bf16.mxu0 %v3172_v20  ;;  %v3196_v36 = vld [vmem:[%s4180_s7 + $0x1e4] ss:$16 sps:$4 sm:$0xff]   ;;  %v3200_v38 = vld [vmem:[%s4180_s7 + $0x1e0] ss:$16 sps:$4 sm:$0xff]  }
  0xab   : > { %2421 = vmatprep.subr.bf16.mxu1 %v3174_v21  ;;  %v3198_v37 = vld [vmem:[%s4180_s7 + $0x3e4] ss:$16 sps:$4 sm:$0xff]   ;;  %v3201_v39 = vld [vmem:[%s4180_s7 + $0x3e0] ss:$16 sps:$4 sm:$0xff]  }
  0xac   : > { %v3202_v40 = vld [vmem:[%s4180_s7 + $0x1c4] ss:$16 sps:$4 sm:$0xff]   ;;  %v3206_v42 = vld [vmem:[%s4180_s7 + $0x1c0] ss:$16 sps:$4 sm:$0xff]  }
  0xad   : > { %2381 = vmatpush1.bf16.msra.mxu0 %v3176_v22  ;;  %v3204_v41 = vld [vmem:[%s4180_s7 + $0x3c4] ss:$16 sps:$4 sm:$0xff]   ;;  %v3207_v43 = vld [vmem:[%s4180_s7 + $0x3c0] ss:$16 sps:$4 sm:$0xff]  }
  0xae   : > { %2422 = vmatpush1.bf16.msra.mxu1 %v3177_v23  ;;  %2382 = vmatprep.subr.bf16.mxu0 %v3178_v24  ;;  %v3208_v44 = vld [vmem:[%s4180_s7 + $0x1a4] ss:$16 sps:$4 sm:$0xff]   ;;  %v3212_v46 = vld [vmem:[%s4180_s7 + $0x1a0] ss:$16 sps:$4 sm:$0xff]  }
  0xaf   : > { %2423 = vmatprep.subr.bf16.mxu1 %v3180_v25  ;;  %v3210_v45 = vld [vmem:[%s4180_s7 + $0x3a4] ss:$16 sps:$4 sm:$0xff]   ;;  %v3213_v47 = vld [vmem:[%s4180_s7 + $0x3a0] ss:$16 sps:$4 sm:$0xff]  }
  0xb0   : > { %v3214_v48 = vld [vmem:[%s4180_s7 + $0x184] ss:$16 sps:$4 sm:$0xff]   ;;  %v3218_v50 = vld [vmem:[%s4180_s7 + $0x180] ss:$16 sps:$4 sm:$0xff]  }
  0xb1   : > { %2383 = vmatpush1.bf16.msra.mxu0 %v3182_v26  ;;  %v3216_v49 = vld [vmem:[%s4180_s7 + $0x384] ss:$16 sps:$4 sm:$0xff]   ;;  %v3219_v51 = vld [vmem:[%s4180_s7 + $0x380] ss:$16 sps:$4 sm:$0xff]  }
  0xb2   : > { %2424 = vmatpush1.bf16.msra.mxu1 %v3183_v27  ;;  %2384 = vmatprep.subr.bf16.mxu0 %v3184_v28  ;;  %v3220_v52 = vld [vmem:[%s4180_s7 + $0x164] ss:$16 sps:$4 sm:$0xff]   ;;  %v3224_v54 = vld [vmem:[%s4180_s7 + $0x160] ss:$16 sps:$4 sm:$0xff]  }
  0xb3   : > { %2425 = vmatprep.subr.bf16.mxu1 %v3186_v29  ;;  %v3222_v53 = vld [vmem:[%s4180_s7 + $0x364] ss:$16 sps:$4 sm:$0xff]   ;;  %v3225_v55 = vld [vmem:[%s4180_s7 + $0x360] ss:$16 sps:$4 sm:$0xff]  }
  0xb4   : > { %v3226_v56 = vld [vmem:[%s4180_s7 + $0x144] ss:$16 sps:$4 sm:$0xff]   ;;  %v3230_v58 = vld [vmem:[%s4180_s7 + $0x140] ss:$16 sps:$4 sm:$0xff]  }
  0xb5   : > { %2385 = vmatpush1.bf16.msra.mxu0 %v3188_v30  ;;  %v3228_v57 = vld [vmem:[%s4180_s7 + $0x344] ss:$16 sps:$4 sm:$0xff]   ;;  %v3231_v59 = vld [vmem:[%s4180_s7 + $0x340] ss:$16 sps:$4 sm:$0xff]  }
  0xb6   : > { %2426 = vmatpush1.bf16.msra.mxu1 %v3189_v31  ;;  %2386 = vmatprep.subr.bf16.mxu0 %v3190_v32  ;;  %v3232_v60 = vld [vmem:[%s4180_s7 + $0x124] ss:$16 sps:$4 sm:$0xff]   ;;  %v3236_v62 = vld [vmem:[%s4180_s7 + $0x120] ss:$16 sps:$4 sm:$0xff]  }
  0xb7   : > { %2427 = vmatprep.subr.bf16.mxu1 %v3192_v33  ;;  %v3234_v61 = vld [vmem:[%s4180_s7 + $0x324] ss:$16 sps:$4 sm:$0xff]   ;;  %v3237_v63 = vld [vmem:[%s4180_s7 + $0x320] ss:$16 sps:$4 sm:$0xff]  }
  0xb8   : > { %v3238_v4 = vld [vmem:[%s4180_s7 + $0x104] ss:$16 sps:$4 sm:$0xff]   ;;  %v3242_v6 = vld [vmem:[%s4180_s7 + $0x100] ss:$16 sps:$4 sm:$0xff]  }
  0xb9   : > { %2387 = vmatpush1.bf16.msra.mxu0 %v3194_v34  ;;  %v3240_v5 = vld [vmem:[%s4180_s7 + $0x304] ss:$16 sps:$4 sm:$0xff]   ;;  %v3243_v7 = vld [vmem:[%s4180_s7 + $0x300] ss:$16 sps:$4 sm:$0xff]  }
  0xba   : > { %2428 = vmatpush1.bf16.msra.mxu1 %v3195_v35  ;;  %2388 = vmatprep.subr.bf16.mxu0 %v3196_v36  ;;  %v3250_v8 = vld [vmem:[%s4180_s7 + $0x4e4] ss:$16 sps:$4 sm:$0xff]   ;;  %v3248_v14 = vld [vmem:[%s4180_s7 + $0x4e0] ss:$16 sps:$4 sm:$0xff]  }
  0xbb   : > { %2429 = vmatprep.subr.bf16.mxu1 %v3198_v37  ;;  %v3253_v9 = vld [vmem:[%s4180_s7 + $0x6e4] ss:$16 sps:$4 sm:$0xff]   ;;  %v3251_v15 = vld [vmem:[%s4180_s7 + $0x6e0] ss:$16 sps:$4 sm:$0xff]  }
  0xbc   : > { %v4253_v10 = vld [vmem:[%s4516_s0 + $0x10] sm:$0xff] }
  0xbd   : > { %2389 = vmatpush2.bf16.msra.mxu0 %v3200_v38  ;;  %v3256_v16 = vld [vmem:[%s4180_s7 + $0x4c4] ss:$16 sps:$4 sm:$0xff]   ;;  %v4274_v0 = vcombine.high %v4253_v10, %v4253_v10  ;;  %v3254_v18 = vld [vmem:[%s4180_s7 + $0x4c0] ss:$16 sps:$4 sm:$0xff]  }
  0xbe   : > { %2430 = vmatpush2.bf16.msra.mxu1 %v3201_v39  ;;  %2390 = vmatprep.subr.bf16.mxu0 %v3202_v40  ;;  %v3259_v17 = vld [vmem:[%s4180_s7 + $0x6c4] ss:$16 sps:$4 sm:$0xff]   ;;  %v3257_v19 = vld [vmem:[%s4180_s7 + $0x6c0] ss:$16 sps:$4 sm:$0xff]  }
  0xbf   : > { %2431 = vmatprep.subr.bf16.mxu1 %v3204_v41  ;;  %v3262_v20 = vld [vmem:[%s4180_s7 + $0x4a4] ss:$16 sps:$4 sm:$0xff]   ;;  %v3260_v22 = vld [vmem:[%s4180_s7 + $0x4a0] ss:$16 sps:$4 sm:$0xff]  }
  0xc0   : > { %v3265_v21 = vld [vmem:[%s4180_s7 + $0x6a4] ss:$16 sps:$4 sm:$0xff]   ;;  %v3263_v23 = vld [vmem:[%s4180_s7 + $0x6a0] ss:$16 sps:$4 sm:$0xff]  }
  0xc1   : > { %2391 = vmatpush2.bf16.msra.mxu0 %v3206_v42  ;;  %v3268_v24 = vld [vmem:[%s4180_s7 + $0x484] ss:$16 sps:$4 sm:$0xff]   ;;  %v3266_v26 = vld [vmem:[%s4180_s7 + $0x480] ss:$16 sps:$4 sm:$0xff]  }
  0xc2   : > { %2432 = vmatpush2.bf16.msra.mxu1 %v3207_v43  ;;  %2392 = vmatprep.subr.bf16.mxu0 %v3208_v44  ;;  %v3271_v25 = vld [vmem:[%s4180_s7 + $0x684] ss:$16 sps:$4 sm:$0xff]   ;;  %v3269_v27 = vld [vmem:[%s4180_s7 + $0x680] ss:$16 sps:$4 sm:$0xff]  }
  0xc3   : > { %2433 = vmatprep.subr.bf16.mxu1 %v3210_v45  ;;  %v3274_v28 = vld [vmem:[%s4180_s7 + $0x464] ss:$16 sps:$4 sm:$0xff]   ;;  %v3272_v30 = vld [vmem:[%s4180_s7 + $0x460] ss:$16 sps:$4 sm:$0xff]  }
  0xc4   : > { %v3277_v29 = vld [vmem:[%s4180_s7 + $0x664] ss:$16 sps:$4 sm:$0xff]   ;;  %v3275_v31 = vld [vmem:[%s4180_s7 + $0x660] ss:$16 sps:$4 sm:$0xff]  }
  0xc5   : > { %2393 = vmatpush2.bf16.msra.mxu0 %v3212_v46  ;;  %v3280_v32 = vld [vmem:[%s4180_s7 + $0x444] ss:$16 sps:$4 sm:$0xff]   ;;  %v3278_v34 = vld [vmem:[%s4180_s7 + $0x440] ss:$16 sps:$4 sm:$0xff]  }
  0xc6   : > { %2434 = vmatpush2.bf16.msra.mxu1 %v3213_v47  ;;  %2394 = vmatprep.subr.bf16.mxu0 %v3214_v48  ;;  %v3283_v33 = vld [vmem:[%s4180_s7 + $0x644] ss:$16 sps:$4 sm:$0xff]   ;;  %v3281_v35 = vld [vmem:[%s4180_s7 + $0x640] ss:$16 sps:$4 sm:$0xff]  }
  0xc7   : > { %2435 = vmatprep.subr.bf16.mxu1 %v3216_v49  ;;  %v3286_v36 = vld [vmem:[%s4180_s7 + $0x424] ss:$16 sps:$4 sm:$0xff]   ;;  %v3284_v38 = vld [vmem:[%s4180_s7 + $0x420] ss:$16 sps:$4 sm:$0xff]  }
  0xc8   : > { %v3289_v37 = vld [vmem:[%s4180_s7 + $0x624] ss:$16 sps:$4 sm:$0xff]   ;;  %v3287_v39 = vld [vmem:[%s4180_s7 + $0x620] ss:$16 sps:$4 sm:$0xff]  }
  0xc9   : > { %2395 = vmatpush2.bf16.msra.mxu0 %v3218_v50  ;;  %v3292_v40 = vld [vmem:[%s4180_s7 + $0x404] ss:$16 sps:$4 sm:$0xff]   ;;  %v3290_v42 = vld [vmem:[%s4180_s7 + $0x400] ss:$16 sps:$4 sm:$0xff]  }
  0xca   : > { %2436 = vmatpush2.bf16.msra.mxu1 %v3219_v51  ;;  %2396 = vmatprep.subr.bf16.mxu0 %v3220_v52  ;;  %v3295_v41 = vld [vmem:[%s4180_s7 + $0x604] ss:$16 sps:$4 sm:$0xff]   ;;  %v3293_v43 = vld [vmem:[%s4180_s7 + $0x600] ss:$16 sps:$4 sm:$0xff]  }
  0xcb   : > { %2437 = vmatprep.subr.bf16.mxu1 %v3222_v53  ;;  %v3298_v44 = vld [vmem:[%s4180_s7 + $0x5e4] ss:$16 sps:$4 sm:$0xff]   ;;  %v3296_v46 = vld [vmem:[%s4180_s7 + $0x5e0] ss:$16 sps:$4 sm:$0xff]  }
  0xcc   : > { %v3301_v45 = vld [vmem:[%s4180_s7 + $0x7e4] ss:$16 sps:$4 sm:$0xff]   ;;  %v3299_v47 = vld [vmem:[%s4180_s7 + $0x7e0] ss:$16 sps:$4 sm:$0xff]  }
  0xcd   : > { %2397 = vmatpush2.bf16.msra.mxu0 %v3224_v54  ;;  %v3304_v48 = vld [vmem:[%s4180_s7 + $0x5c4] ss:$16 sps:$4 sm:$0xff]   ;;  %v3302_v50 = vld [vmem:[%s4180_s7 + $0x5c0] ss:$16 sps:$4 sm:$0xff]  }
  0xce   : > { %2438 = vmatpush2.bf16.msra.mxu1 %v3225_v55  ;;  %2398 = vmatprep.subr.bf16.mxu0 %v3226_v56  ;;  %v3307_v49 = vld [vmem:[%s4180_s7 + $0x7c4] ss:$16 sps:$4 sm:$0xff]   ;;  %v3305_v51 = vld [vmem:[%s4180_s7 + $0x7c0] ss:$16 sps:$4 sm:$0xff]  }
  0xcf   : > { %2439 = vmatprep.subr.bf16.mxu1 %v3228_v57  ;;  %v3310_v52 = vld [vmem:[%s4180_s7 + $0x5a4] ss:$16 sps:$4 sm:$0xff]   ;;  %v3308_v54 = vld [vmem:[%s4180_s7 + $0x5a0] ss:$16 sps:$4 sm:$0xff]  }
  0xd0   : > { %v3313_v53 = vld [vmem:[%s4180_s7 + $0x7a4] ss:$16 sps:$4 sm:$0xff]   ;;  %v3311_v55 = vld [vmem:[%s4180_s7 + $0x7a0] ss:$16 sps:$4 sm:$0xff]  }
  0xd1   : > { %2399 = vmatpush2.bf16.msra.mxu0 %v3230_v58  ;;  %v3316_v56 = vld [vmem:[%s4180_s7 + $0x584] ss:$16 sps:$4 sm:$0xff]   ;;  %v3314_v58 = vld [vmem:[%s4180_s7 + $0x580] ss:$16 sps:$4 sm:$0xff]  }
  0xd2   : > { %2440 = vmatpush2.bf16.msra.mxu1 %v3231_v59  ;;  %2400 = vmatprep.subr.bf16.mxu0 %v3232_v60  ;;  %v3319_v57 = vld [vmem:[%s4180_s7 + $0x784] ss:$16 sps:$4 sm:$0xff]   ;;  %v3317_v59 = vld [vmem:[%s4180_s7 + $0x780] ss:$16 sps:$4 sm:$0xff]  }
  0xd3   : > { %2441 = vmatprep.subr.bf16.mxu1 %v3234_v61  ;;  %v3322_v60 = vld [vmem:[%s4180_s7 + $0x564] ss:$16 sps:$4 sm:$0xff]  }
  0xd4   : > { %v3325_v61 = vld [vmem:[%s4180_s7 + $0x764] ss:$16 sps:$4 sm:$0xff]  }
  0xd5   : > { %2401 = vmatpush2.bf16.msra.mxu0 %v3236_v62  ;;  %v3320_v62 = vld [vmem:[%s4180_s7 + $0x560] ss:$16 sps:$4 sm:$0xff]  }
  0xd6   : > { %2442 = vmatpush2.bf16.msra.mxu1 %v3237_v63  ;;  %2402 = vmatprep.subr.bf16.mxu0 %v3238_v4  ;;  %v3323_v63 = vld [vmem:[%s4180_s7 + $0x760] ss:$16 sps:$4 sm:$0xff]   ;;  %v3328_v4 = vld [vmem:[%s4180_s7 + $0x544] ss:$16 sps:$4 sm:$0xff]  }
  0xd7   : > { %2443 = vmatprep.subr.bf16.mxu1 %v3240_v5  ;;  %v3331_v5 = vld [vmem:[%s4180_s7 + $0x744] ss:$16 sps:$4 sm:$0xff]  }
  0xd9   : > { %2403 = vmatpush2.bf16.msra.mxu0 %v3242_v6  ;;  %v3326_v6 = vld [vmem:[%s4180_s7 + $0x540] ss:$16 sps:$4 sm:$0xff]  }
  0xda   : > { %2444 = vmatpush2.bf16.msra.mxu1 %v3243_v7  ;;  %2454 = vmatprep.subr.bf16.mxu0 %v3250_v8  ;;  %v3329_v7 = vld [vmem:[%s4180_s7 + $0x740] ss:$16 sps:$4 sm:$0xff]   ;;  %v3334_v8 = vld [vmem:[%s4180_s7 + $0x524] ss:$16 sps:$4 sm:$0xff]  }
  0xdb   : > { %2495 = vmatprep.subr.bf16.mxu1 %v3253_v9  ;;  %v3337_v9 = vld [vmem:[%s4180_s7 + $0x724] ss:$16 sps:$4 sm:$0xff]  }
  0xdc   : > { %2405 = vmatmul.mubr.bf16.vlgmr.msra.gmra.mxu0 %v4262_v12 }
  0xdd   : > { %2446 = vmatmul.mubr.bf16.vlgmr.msra.gmra.mxu1 %v4266_v13  ;;  %2455 = vmatpush1.bf16.msra.mxu0 %v3248_v14  ;;  %v3332_v14 = vld [vmem:[%s4180_s7 + $0x520] ss:$16 sps:$4 sm:$0xff]  }
  0xde   : > { %2496 = vmatpush1.bf16.msra.mxu1 %v3251_v15  ;;  %2456 = vmatprep.subr.bf16.mxu0 %v3256_v16  ;;  %v3335_v15 = vld [vmem:[%s4180_s7 + $0x720] ss:$16 sps:$4 sm:$0xff]   ;;  %v3340_v16 = vld [vmem:[%s4180_s7 + $0x504] ss:$16 sps:$4 sm:$0xff]  }
  0xdf   : > { %2497 = vmatprep.subr.bf16.mxu1 %v3259_v17  ;;  %2486 = vmatprep.mubr.bf16.mxu0 %v4274_v0  ;;  %v3343_v17 = vld [vmem:[%s4180_s7 + $0x704] ss:$16 sps:$4 sm:$0xff]  }
  0xe0   : > { %2527 = vmatprep.mubr.bf16.mxu1 %v4278_v1 }
  0xe1   : > { %2457 = vmatpush1.bf16.msra.mxu0 %v3254_v18  ;;  %v3338_v18 = vld [vmem:[%s4180_s7 + $0x500] ss:$16 sps:$4 sm:$0xff]  }
  0xe2   : > { %2498 = vmatpush1.bf16.msra.mxu1 %v3257_v19  ;;  %2458 = vmatprep.subr.bf16.mxu0 %v3262_v20  ;;  %v3341_v19 = vld [vmem:[%s4180_s7 + $0x700] ss:$16 sps:$4 sm:$0xff]   ;;  %v3350_v20 = vld [vmem:[%s4180_s7 + $0xec] ss:$16 sps:$4 sm:$0xff]  }
  0xe3   : > { %2499 = vmatprep.subr.bf16.mxu1 %v3265_v21  ;;  %v3353_v21 = vld [vmem:[%s4180_s7 + $0x2ec] ss:$16 sps:$4 sm:$0xff]  }
  0xe5   : > { %2459 = vmatpush1.bf16.msra.mxu0 %v3260_v22  ;;  %v4346_v22 = vcombine.low %v4253_v10, %v4253_v10  ;;  %v3354_v10 = vld [vmem:[%s4180_s7 + $0xc8] ss:$16 sps:$4 sm:$0xff]  }
  0xe6   : > { %2500 = vmatpush1.bf16.msra.mxu1 %v3263_v23  ;;  %2460 = vmatprep.subr.bf16.mxu0 %v3268_v24  ;;  %v4350_v23 = vcombine.low %v4258_v11, %v4258_v11  ;;  %v3348_v24 = vld [vmem:[%s4180_s7 + $0xe8] ss:$16 sps:$4 sm:$0xff]   ;;  %v3362_v11 = vld [vmem:[%s4180_s7 + $0xac] ss:$16 sps:$4 sm:$0xff]  }
  0xe7   : > { %2501 = vmatprep.subr.bf16.mxu1 %v3271_v25  ;;  %v3351_v25 = vld [vmem:[%s4180_s7 + $0x2e8] ss:$16 sps:$4 sm:$0xff]  }
  0xe9   : > { %2461 = vmatpush1.bf16.msra.mxu0 %v3266_v26  ;;  %v3356_v26 = vld [vmem:[%s4180_s7 + $0xcc] ss:$16 sps:$4 sm:$0xff]  }
  0xea   : > { %2502 = vmatpush1.bf16.msra.mxu1 %v3269_v27  ;;  %2462 = vmatprep.subr.bf16.mxu0 %v3274_v28  ;;  %v3359_v27 = vld [vmem:[%s4180_s7 + $0x2cc] ss:$16 sps:$4 sm:$0xff]   ;;  %v3357_v28 = vld [vmem:[%s4180_s7 + $0x2c8] ss:$16 sps:$4 sm:$0xff]  }
  0xeb   : > { %2503 = vmatprep.subr.bf16.mxu1 %v3277_v29  ;;  %v3365_v29 = vld [vmem:[%s4180_s7 + $0x2ac] ss:$16 sps:$4 sm:$0xff]  }
  0xed   : > { %2463 = vmatpush1.bf16.msra.mxu0 %v3272_v30  ;;  %v3360_v30 = vld [vmem:[%s4180_s7 + $0xa8] ss:$16 sps:$4 sm:$0xff]  }
  0xee   : > { %2504 = vmatpush1.bf16.msra.mxu1 %v3275_v31  ;;  %2464 = vmatprep.subr.bf16.mxu0 %v3280_v32  ;;  %v3363_v31 = vld [vmem:[%s4180_s7 + $0x2a8] ss:$16 sps:$4 sm:$0xff]   ;;  %v3368_v32 = vld [vmem:[%s4180_s7 + $0x8c] ss:$16 sps:$4 sm:$0xff]  }
  0xef   : > { %2505 = vmatprep.subr.bf16.mxu1 %v3283_v33  ;;  %v3371_v33 = vld [vmem:[%s4180_s7 + $0x28c] ss:$16 sps:$4 sm:$0xff]  }
  0xf1   : > { %2465 = vmatpush1.bf16.msra.mxu0 %v3278_v34  ;;  %v3366_v34 = vld [vmem:[%s4180_s7 + $0x88] ss:$16 sps:$4 sm:$0xff]  }
  0xf2   : > { %2506 = vmatpush1.bf16.msra.mxu1 %v3281_v35  ;;  %2466 = vmatprep.subr.bf16.mxu0 %v3286_v36  ;;  %v3369_v35 = vld [vmem:[%s4180_s7 + $0x288] ss:$16 sps:$4 sm:$0xff]  }
  0xf3   : > { %2507 = vmatprep.subr.bf16.mxu1 %v3289_v37  ;;  %v3372_v36 = vld [vmem:[%s4180_s7 + $0x68] ss:$16 sps:$4 sm:$0xff]  }
  0xf4   : > { %v3375_v37 = vld [vmem:[%s4180_s7 + $0x268] ss:$16 sps:$4 sm:$0xff]  }
  0xf5   : > { %2467 = vmatpush1.bf16.msra.mxu0 %v3284_v38  ;;  %v3380_v38 = vld [vmem:[%s4180_s7 + $0x4c] ss:$16 sps:$4 sm:$0xff]  }
  0xf6   : > { %2508 = vmatpush1.bf16.msra.mxu1 %v3287_v39  ;;  %2468 = vmatprep.subr.bf16.mxu0 %v3292_v40  ;;  %v3383_v39 = vld [vmem:[%s4180_s7 + $0x24c] ss:$16 sps:$4 sm:$0xff]   ;;  %v3378_v40 = vld [vmem:[%s4180_s7 + $0x48] ss:$16 sps:$4 sm:$0xff]  }
  0xf7   : > { %2509 = vmatprep.subr.bf16.mxu1 %v3295_v41  ;;  %v3381_v41 = vld [vmem:[%s4180_s7 + $0x248] ss:$16 sps:$4 sm:$0xff]  }
  0xf9   : > { %2469 = vmatpush1.bf16.msra.mxu0 %v3290_v42  ;;  %v3386_v42 = vld [vmem:[%s4180_s7 + $0x2c] ss:$16 sps:$4 sm:$0xff]  }
  0xfa   : > { %2510 = vmatpush1.bf16.msra.mxu1 %v3293_v43  ;;  %2470 = vmatprep.subr.bf16.mxu0 %v3298_v44  ;;  %v3389_v43 = vld [vmem:[%s4180_s7 + $0x22c] ss:$16 sps:$4 sm:$0xff]   ;;  %v3384_v44 = vld [vmem:[%s4180_s7 + $0x28] ss:$16 sps:$4 sm:$0xff]  }
  0xfb   : > { %2511 = vmatprep.subr.bf16.mxu1 %v3301_v45  ;;  %v3387_v45 = vld [vmem:[%s4180_s7 + $0x228] ss:$16 sps:$4 sm:$0xff]  }
  0xfd   : > { %2471 = vmatpush2.bf16.msra.mxu0 %v3296_v46  ;;  %v3392_v46 = vld [vmem:[%s4180_s7 + $0xc] ss:$16 sps:$4 sm:$0xff]  }
  0xfe   : > { %2512 = vmatpush2.bf16.msra.mxu1 %v3299_v47  ;;  %2472 = vmatprep.subr.bf16.mxu0 %v3304_v48  ;;  %v3395_v47 = vld [vmem:[%s4180_s7 + $0x20c] ss:$16 sps:$4 sm:$0xff]   ;;  %v3390_v48 = vld [vmem:[%s4180_s7 + $0x8] ss:$16 sps:$4 sm:$0xff]  }
  0xff   : > { %2513 = vmatprep.subr.bf16.mxu1 %v3307_v49  ;;  %v3393_v49 = vld [vmem:[%s4180_s7 + $0x208] ss:$16 sps:$4 sm:$0xff]  }
 0x101   : > { %2473 = vmatpush2.bf16.msra.mxu0 %v3302_v50  ;;  %v3398_v50 = vld [vmem:[%s4180_s7 + $0x1ec] ss:$16 sps:$4 sm:$0xff]  }
 0x102   : > { %2514 = vmatpush2.bf16.msra.mxu1 %v3305_v51  ;;  %2474 = vmatprep.subr.bf16.mxu0 %v3310_v52  ;;  %v3401_v51 = vld [vmem:[%s4180_s7 + $0x3ec] ss:$16 sps:$4 sm:$0xff]   ;;  %v3396_v52 = vld [vmem:[%s4180_s7 + $0x1e8] ss:$16 sps:$4 sm:$0xff]  }
 0x103   : > { %2515 = vmatprep.subr.bf16.mxu1 %v3313_v53  ;;  %v3399_v53 = vld [vmem:[%s4180_s7 + $0x3e8] ss:$16 sps:$4 sm:$0xff]  }
 0x105   : > { %2475 = vmatpush2.bf16.msra.mxu0 %v3308_v54  ;;  %v3404_v54 = vld [vmem:[%s4180_s7 + $0x1cc] ss:$16 sps:$4 sm:$0xff]  }
 0x106   : > { %2516 = vmatpush2.bf16.msra.mxu1 %v3311_v55  ;;  %2476 = vmatprep.subr.bf16.mxu0 %v3316_v56  ;;  %v3407_v55 = vld [vmem:[%s4180_s7 + $0x3cc] ss:$16 sps:$4 sm:$0xff]   ;;  %v3402_v56 = vld [vmem:[%s4180_s7 + $0x1c8] ss:$16 sps:$4 sm:$0xff]  }
 0x107   : > { %2517 = vmatprep.subr.bf16.mxu1 %v3319_v57  ;;  %v3405_v57 = vld [vmem:[%s4180_s7 + $0x3c8] ss:$16 sps:$4 sm:$0xff]  }
 0x109   : > { %2477 = vmatpush2.bf16.msra.mxu0 %v3314_v58  ;;  %v3410_v58 = vld [vmem:[%s4180_s7 + $0x1ac] ss:$16 sps:$4 sm:$0xff]  }
 0x10a   : > { %2518 = vmatpush2.bf16.msra.mxu1 %v3317_v59  ;;  %2478 = vmatprep.subr.bf16.mxu0 %v3322_v60  ;;  %v3413_v59 = vld [vmem:[%s4180_s7 + $0x3ac] ss:$16 sps:$4 sm:$0xff]   ;;  %v3408_v60 = vld [vmem:[%s4180_s7 + $0x1a8] ss:$16 sps:$4 sm:$0xff]  }
 0x10b   : > { %2519 = vmatprep.subr.bf16.mxu1 %v3325_v61  ;;  %v3411_v61 = vld [vmem:[%s4180_s7 + $0x3a8] ss:$16 sps:$4 sm:$0xff]  }
 0x10d   : > { %2479 = vmatpush2.bf16.msra.mxu0 %v3320_v62  ;;  %v3416_v62 = vld [vmem:[%s4180_s7 + $0x18c] ss:$16 sps:$4 sm:$0xff]  }
 0x10e   : > { %2520 = vmatpush2.bf16.msra.mxu1 %v3323_v63  ;;  %2480 = vmatprep.subr.bf16.mxu0 %v3328_v4  ;;  %v3419_v63 = vld [vmem:[%s4180_s7 + $0x38c] ss:$16 sps:$4 sm:$0xff]   ;;  %v3414_v4 = vld [vmem:[%s4180_s7 + $0x188] ss:$16 sps:$4 sm:$0xff]  }
 0x10f   : > { %2521 = vmatprep.subr.bf16.mxu1 %v3331_v5  ;;  %v3417_v5 = vld [vmem:[%s4180_s7 + $0x388] ss:$16 sps:$4 sm:$0xff]  }
 0x111   : > { %2481 = vmatpush2.bf16.msra.mxu0 %v3326_v6  ;;  %v3422_v6 = vld [vmem:[%s4180_s7 + $0x16c] ss:$16 sps:$4 sm:$0xff]  }
 0x112   : > { %2522 = vmatpush2.bf16.msra.mxu1 %v3329_v7  ;;  %2482 = vmatprep.subr.bf16.mxu0 %v3334_v8  ;;  %v3425_v7 = vld [vmem:[%s4180_s7 + $0x36c] ss:$16 sps:$4 sm:$0xff]   ;;  %v3420_v8 = vld [vmem:[%s4180_s7 + $0x168] ss:$16 sps:$4 sm:$0xff]  }
 0x113   : > { %2523 = vmatprep.subr.bf16.mxu1 %v3337_v9  ;;  %v3423_v9 = vld [vmem:[%s4180_s7 + $0x368] ss:$16 sps:$4 sm:$0xff]  }
 0x115   : > { %2483 = vmatpush2.bf16.msra.mxu0 %v3332_v14  ;;  %v3428_v14 = vld [vmem:[%s4180_s7 + $0x14c] ss:$16 sps:$4 sm:$0xff]  }
 0x116   : > { %2524 = vmatpush2.bf16.msra.mxu1 %v3335_v15  ;;  %2484 = vmatprep.subr.bf16.mxu0 %v3340_v16  ;;  %v3431_v15 = vld [vmem:[%s4180_s7 + $0x34c] ss:$16 sps:$4 sm:$0xff]   ;;  %v3426_v16 = vld [vmem:[%s4180_s7 + $0x148] ss:$16 sps:$4 sm:$0xff]  }
 0x117   : > { %2525 = vmatprep.subr.bf16.mxu1 %v3343_v17  ;;  %v3429_v17 = vld [vmem:[%s4180_s7 + $0x348] ss:$16 sps:$4 sm:$0xff]  }
 0x119   : > { %2485 = vmatpush2.bf16.msra.mxu0 %v3338_v18  ;;  %v3434_v18 = vld [vmem:[%s4180_s7 + $0x12c] ss:$16 sps:$4 sm:$0xff]  }
 0x11a   : > { %2526 = vmatpush2.bf16.msra.mxu1 %v3341_v19  ;;  %2536 = vmatprep.subr.bf16.mxu0 %v3350_v20  ;;  %v3437_v19 = vld [vmem:[%s4180_s7 + $0x32c] ss:$16 sps:$4 sm:$0xff]   ;;  %v3432_v20 = vld [vmem:[%s4180_s7 + $0x128] ss:$16 sps:$4 sm:$0xff]  }
 0x11b   : > { %2577 = vmatprep.subr.bf16.mxu1 %v3353_v21  ;;  %v3435_v21 = vld [vmem:[%s4180_s7 + $0x328] ss:$16 sps:$4 sm:$0xff]  }
 0x11c   : > { %2487 = vmatmul.mubr.bf16.vlgmr.msra.gmra.mxu0 %v4346_v22 }
 0x11d   : > { %2528 = vmatmul.mubr.bf16.vlgmr.msra.gmra.mxu1 %v4350_v23  ;;  %2537 = vmatpush1.bf16.msra.mxu0 %v3348_v24  ;;  %v3440_v24 = vld [vmem:[%s4180_s7 + $0x10c] ss:$16 sps:$4 sm:$0xff]  }
 0x11e   : > { %2578 = vmatpush1.bf16.msra.mxu1 %v3351_v25  ;;  %2538 = vmatprep.subr.bf16.mxu0 %v3356_v26  ;;  %v3443_v25 = vld [vmem:[%s4180_s7 + $0x30c] ss:$16 sps:$4 sm:$0xff]   ;;  %v3438_v26 = vld [vmem:[%s4180_s7 + $0x108] ss:$16 sps:$4 sm:$0xff]  }
 0x11f   : > { %2579 = vmatprep.subr.bf16.mxu1 %v3359_v27  ;;  %2568 = vmatprep.mubr.bf16.mxu0 %v4174_v2  ;;  %v3374_v2 = vld [vmem:[%s4180_s7 + $0x6c] ss:$16 sps:$4 sm:$0xff]   ;;  %v3441_v27 = vld [vmem:[%s4180_s7 + $0x308] ss:$16 sps:$4 sm:$0xff]  }
 0x120   : > { %2609 = vmatprep.mubr.bf16.mxu1 %v4178_v3  ;;  %v3377_v3 = vld [vmem:[%s4180_s7 + $0x26c] ss:$16 sps:$4 sm:$0xff]  }
 0x121   : > { %2539 = vmatpush1.bf16.msra.mxu0 %v3354_v10  ;;  %v3446_v10 = vld [vmem:[%s4180_s7 + $0x4ec] ss:$16 sps:$4 sm:$0xff]  }
 0x122   : > { %2580 = vmatpush1.bf16.msra.mxu1 %v3357_v28  ;;  %2540 = vmatprep.subr.bf16.mxu0 %v3362_v11  ;;  %v3449_v28 = vld [vmem:[%s4180_s7 + $0x6ec] ss:$16 sps:$4 sm:$0xff]   ;;  %v3444_v11 = vld [vmem:[%s4180_s7 + $0x4e8] ss:$16 sps:$4 sm:$0xff]  }
 0x123   : > { %2581 = vmatprep.subr.bf16.mxu1 %v3365_v29  ;;  %v3447_v29 = vld [vmem:[%s4180_s7 + $0x6e8] ss:$16 sps:$4 sm:$0xff]  }
 0x125   : > { %2541 = vmatpush1.bf16.msra.mxu0 %v3360_v30  ;;  %v3452_v30 = vld [vmem:[%s4180_s7 + $0x4cc] ss:$16 sps:$4 sm:$0xff]  }
 0x126   : > { %2582 = vmatpush1.bf16.msra.mxu1 %v3363_v31  ;;  %2542 = vmatprep.subr.bf16.mxu0 %v3368_v32  ;;  %v3455_v31 = vld [vmem:[%s4180_s7 + $0x6cc] ss:$16 sps:$4 sm:$0xff]   ;;  %v3450_v32 = vld [vmem:[%s4180_s7 + $0x4c8] ss:$16 sps:$4 sm:$0xff]  }
 0x127   : > { %2583 = vmatprep.subr.bf16.mxu1 %v3371_v33  ;;  %v3453_v33 = vld [vmem:[%s4180_s7 + $0x6c8] ss:$16 sps:$4 sm:$0xff]  }
 0x129   : > { %2543 = vmatpush1.bf16.msra.mxu0 %v3366_v34  ;;  %v3458_v34 = vld [vmem:[%s4180_s7 + $0x4ac] ss:$16 sps:$4 sm:$0xff]  }
 0x12a   : > { %2584 = vmatpush1.bf16.msra.mxu1 %v3369_v35  ;;  %2544 = vmatprep.subr.bf16.mxu0 %v3374_v2  ;;  %v3461_v35 = vld [vmem:[%s4180_s7 + $0x6ac] ss:$16 sps:$4 sm:$0xff]  }
 0x12b   : > { %2585 = vmatprep.subr.bf16.mxu1 %v3377_v3  ;;  %v3464_v2 = vld [vmem:[%s4180_s7 + $0x48c] ss:$16 sps:$4 sm:$0xff]  }
 0x12c   : > { %v3467_v3 = vld [vmem:[%s4180_s7 + $0x68c] ss:$16 sps:$4 sm:$0xff]  }
 0x12d   : > { %2545 = vmatpush1.bf16.msra.mxu0 %v3372_v36  ;;  %v3462_v36 = vld [vmem:[%s4180_s7 + $0x488] ss:$16 sps:$4 sm:$0xff]  }
 0x12e   : > { %2586 = vmatpush1.bf16.msra.mxu1 %v3375_v37  ;;  %2546 = vmatprep.subr.bf16.mxu0 %v3380_v38  ;;  %v3473_v37 = vld [vmem:[%s4180_s7 + $0x66c] ss:$16 sps:$4 sm:$0xff]   ;;  %v3468_v38 = vld [vmem:[%s4180_s7 + $0x468] ss:$16 sps:$4 sm:$0xff]  }
 0x12f   : > { %2587 = vmatprep.subr.bf16.mxu1 %v3383_v39  ;;  %v3471_v39 = vld [vmem:[%s4180_s7 + $0x668] ss:$16 sps:$4 sm:$0xff]  }
 0x131   : > { %2547 = vmatpush1.bf16.msra.mxu0 %v3378_v40  ;;  %v3476_v40 = vld [vmem:[%s4180_s7 + $0x44c] ss:$16 sps:$4 sm:$0xff]  }
 0x132   : > { %2588 = vmatpush1.bf16.msra.mxu1 %v3381_v41  ;;  %2548 = vmatprep.subr.bf16.mxu0 %v3386_v42  ;;  %v3479_v41 = vld [vmem:[%s4180_s7 + $0x64c] ss:$16 sps:$4 sm:$0xff]   ;;  %v3474_v42 = vld [vmem:[%s4180_s7 + $0x448] ss:$16 sps:$4 sm:$0xff]  }
 0x133   : > { %2589 = vmatprep.subr.bf16.mxu1 %v3389_v43  ;;  %v3477_v43 = vld [vmem:[%s4180_s7 + $0x648] ss:$16 sps:$4 sm:$0xff]  }
 0x135   : > { %2549 = vmatpush1.bf16.msra.mxu0 %v3384_v44  ;;  %v3482_v44 = vld [vmem:[%s4180_s7 + $0x42c] ss:$16 sps:$4 sm:$0xff]  }
 0x136   : > { %2590 = vmatpush1.bf16.msra.mxu1 %v3387_v45  ;;  %2550 = vmatprep.subr.bf16.mxu0 %v3392_v46  ;;  %v3485_v45 = vld [vmem:[%s4180_s7 + $0x62c] ss:$16 sps:$4 sm:$0xff]   ;;  %v3480_v46 = vld [vmem:[%s4180_s7 + $0x428] ss:$16 sps:$4 sm:$0xff]  }
 0x137   : > { %2591 = vmatprep.subr.bf16.mxu1 %v3395_v47  ;;  %v3483_v47 = vld [vmem:[%s4180_s7 + $0x628] ss:$16 sps:$4 sm:$0xff]  }
 0x139   : > { %2551 = vmatpush1.bf16.msra.mxu0 %v3390_v48  ;;  %v3488_v48 = vld [vmem:[%s4180_s7 + $0x40c] ss:$16 sps:$4 sm:$0xff]  }
 0x13a   : > { %2592 = vmatpush1.bf16.msra.mxu1 %v3393_v49  ;;  %2552 = vmatprep.subr.bf16.mxu0 %v3398_v50  ;;  %v3491_v49 = vld [vmem:[%s4180_s7 + $0x60c] ss:$16 sps:$4 sm:$0xff]   ;;  %v3486_v50 = vld [vmem:[%s4180_s7 + $0x408] ss:$16 sps:$4 sm:$0xff]  }
 0x13b   : > { %2593 = vmatprep.subr.bf16.mxu1 %v3401_v51  ;;  %v3489_v51 = vld [vmem:[%s4180_s7 + $0x608] ss:$16 sps:$4 sm:$0xff]  }
 0x13d   : > { %2553 = vmatpush2.bf16.msra.mxu0 %v3396_v52  ;;  %v3494_v52 = vld [vmem:[%s4180_s7 + $0x5ec] ss:$16 sps:$4 sm:$0xff]  }
 0x13e   : > { %2594 = vmatpush2.bf16.msra.mxu1 %v3399_v53  ;;  %2554 = vmatprep.subr.bf16.mxu0 %v3404_v54  ;;  %v3497_v53 = vld [vmem:[%s4180_s7 + $0x7ec] ss:$16 sps:$4 sm:$0xff]   ;;  %v3492_v54 = vld [vmem:[%s4180_s7 + $0x5e8] ss:$16 sps:$4 sm:$0xff]  }
 0x13f   : > { %2595 = vmatprep.subr.bf16.mxu1 %v3407_v55  ;;  %v3495_v55 = vld [vmem:[%s4180_s7 + $0x7e8] ss:$16 sps:$4 sm:$0xff]  }
 0x141   : > { %2555 = vmatpush2.bf16.msra.mxu0 %v3402_v56  ;;  %v3500_v56 = vld [vmem:[%s4180_s7 + $0x5cc] ss:$16 sps:$4 sm:$0xff]  }
 0x142   : > { %2596 = vmatpush2.bf16.msra.mxu1 %v3405_v57  ;;  %2556 = vmatprep.subr.bf16.mxu0 %v3410_v58  ;;  %v3503_v57 = vld [vmem:[%s4180_s7 + $0x7cc] ss:$16 sps:$4 sm:$0xff]   ;;  %v3498_v58 = vld [vmem:[%s4180_s7 + $0x5c8] ss:$16 sps:$4 sm:$0xff]  }
 0x143   : > { %2597 = vmatprep.subr.bf16.mxu1 %v3413_v59  ;;  %v3501_v59 = vld [vmem:[%s4180_s7 + $0x7c8] ss:$16 sps:$4 sm:$0xff]  }
 0x145   : > { %2557 = vmatpush2.bf16.msra.mxu0 %v3408_v60  ;;  %v3506_v60 = vld [vmem:[%s4180_s7 + $0x5ac] ss:$16 sps:$4 sm:$0xff]  }
 0x146   : > { %2598 = vmatpush2.bf16.msra.mxu1 %v3411_v61  ;;  %2558 = vmatprep.subr.bf16.mxu0 %v3416_v62  ;;  %v3509_v61 = vld [vmem:[%s4180_s7 + $0x7ac] ss:$16 sps:$4 sm:$0xff]   ;;  %v3504_v62 = vld [vmem:[%s4180_s7 + $0x5a8] ss:$16 sps:$4 sm:$0xff]  }
 0x147   : > { %2599 = vmatprep.subr.bf16.mxu1 %v3419_v63  ;;  %v3507_v63 = vld [vmem:[%s4180_s7 + $0x7a8] ss:$16 sps:$4 sm:$0xff]  }
 0x149   : > { %2559 = vmatpush2.bf16.msra.mxu0 %v3414_v4  ;;  %v3512_v4 = vld [vmem:[%s4180_s7 + $0x58c] ss:$16 sps:$4 sm:$0xff]  }
 0x14a   : > { %2600 = vmatpush2.bf16.msra.mxu1 %v3417_v5  ;;  %2560 = vmatprep.subr.bf16.mxu0 %v3422_v6  ;;  %v3515_v5 = vld [vmem:[%s4180_s7 + $0x78c] ss:$16 sps:$4 sm:$0xff]   ;;  %v3510_v6 = vld [vmem:[%s4180_s7 + $0x588] ss:$16 sps:$4 sm:$0xff]  }
 0x14b   : > { %2601 = vmatprep.subr.bf16.mxu1 %v3425_v7  ;;  %v3513_v7 = vld [vmem:[%s4180_s7 + $0x788] ss:$16 sps:$4 sm:$0xff]  }
 0x14d   : > { %2561 = vmatpush2.bf16.msra.mxu0 %v3420_v8  ;;  %v3518_v8 = vld [vmem:[%s4180_s7 + $0x56c] ss:$16 sps:$4 sm:$0xff]  }
 0x14e   : > { %2602 = vmatpush2.bf16.msra.mxu1 %v3423_v9  ;;  %2562 = vmatprep.subr.bf16.mxu0 %v3428_v14  ;;  %v3521_v9 = vld [vmem:[%s4180_s7 + $0x76c] ss:$16 sps:$4 sm:$0xff]   ;;  %v3516_v14 = vld [vmem:[%s4180_s7 + $0x568] ss:$16 sps:$4 sm:$0xff]  }
 0x14f   : > { %2603 = vmatprep.subr.bf16.mxu1 %v3431_v15  ;;  %v3519_v15 = vld [vmem:[%s4180_s7 + $0x768] ss:$16 sps:$4 sm:$0xff]  }
 0x151   : > { %2563 = vmatpush2.bf16.msra.mxu0 %v3426_v16  ;;  %v3524_v16 = vld [vmem:[%s4180_s7 + $0x54c] ss:$16 sps:$4 sm:$0xff]  }
 0x152   : > { %2604 = vmatpush2.bf16.msra.mxu1 %v3429_v17  ;;  %2564 = vmatprep.subr.bf16.mxu0 %v3434_v18  ;;  %v3527_v17 = vld [vmem:[%s4180_s7 + $0x74c] ss:$16 sps:$4 sm:$0xff]   ;;  %v3522_v18 = vld [vmem:[%s4180_s7 + $0x548] ss:$16 sps:$4 sm:$0xff]  }
 0x153   : > { %2605 = vmatprep.subr.bf16.mxu1 %v3437_v19  ;;  %v3525_v19 = vld [vmem:[%s4180_s7 + $0x748] ss:$16 sps:$4 sm:$0xff]  }
 0x155   : > { %2565 = vmatpush2.bf16.msra.mxu0 %v3432_v20  ;;  %v3530_v20 = vld [vmem:[%s4180_s7 + $0x52c] ss:$16 sps:$4 sm:$0xff]  }
 0x156   : > { %2606 = vmatpush2.bf16.msra.mxu1 %v3435_v21  ;;  %2566 = vmatprep.subr.bf16.mxu0 %v3440_v24  ;;  %v3533_v21 = vld [vmem:[%s4180_s7 + $0x72c] ss:$16 sps:$4 sm:$0xff]   ;;  %v3528_v24 = vld [vmem:[%s4180_s7 + $0x528] ss:$16 sps:$4 sm:$0xff]  }
 0x157   : > { %2607 = vmatprep.subr.bf16.mxu1 %v3443_v25  ;;  %v3531_v25 = vld [vmem:[%s4180_s7 + $0x728] ss:$16 sps:$4 sm:$0xff]  }
 0x159   : > { %2567 = vmatpush2.bf16.msra.mxu0 %v3438_v26  ;;  %v3536_v26 = vld [vmem:[%s4180_s7 + $0x50c] ss:$16 sps:$4 sm:$0xff]  }
 0x15a   : > { %2608 = vmatpush2.bf16.msra.mxu1 %v3441_v27  ;;  %2618 = vmatprep.subr.bf16.mxu0 %v3446_v10  ;;  %v3539_v27 = vld [vmem:[%s4180_s7 + $0x70c] ss:$16 sps:$4 sm:$0xff]   ;;  %v3534_v10 = vld [vmem:[%s4180_s7 + $0x508] ss:$16 sps:$4 sm:$0xff]  }
 0x15b   : > { %2659 = vmatprep.subr.bf16.mxu1 %v3449_v28  ;;  %v3537_v28 = vld [vmem:[%s4180_s7 + $0x708] ss:$16 sps:$4 sm:$0xff]  }
 0x15c   : > { %2569 = vmatmul.mubr.bf16.vlgmr.msra.gmra.mxu0 %v4262_v12  ;;  %v3456_v12 = vld [vmem:[%s4180_s7 + $0x4a8] ss:$16 sps:$4 sm:$0xff]  }
 0x15d   : > { %2610 = vmatmul.mubr.bf16.vlgmr.msra.gmra.mxu1 %v4266_v13  ;;  %2619 = vmatpush1.bf16.msra.mxu0 %v3444_v11  ;;  %v3459_v13 = vld [vmem:[%s4180_s7 + $0x6a8] ss:$16 sps:$4 sm:$0xff]  }
 0x15e   : > { %2660 = vmatpush1.bf16.msra.mxu1 %v3447_v29  ;;  %2620 = vmatprep.subr.bf16.mxu0 %v3452_v30 }
 0x15f   : > { %2661 = vmatprep.subr.bf16.mxu1 %v3455_v31  ;;  %2650 = vmatprep.mubr.bf16.mxu0 %v4274_v0  ;;  %v3465_v0 = vld [vmem:[%s4180_s7 + $0x688] ss:$16 sps:$4 sm:$0xff]  }
 0x160   : > { %2691 = vmatprep.mubr.bf16.mxu1 %v4278_v1  ;;  %v3470_v1 = vld [vmem:[%s4180_s7 + $0x46c] ss:$16 sps:$4 sm:$0xff]  }
 0x161   : > { %2621 = vmatpush1.bf16.msra.mxu0 %v3450_v32 }
 0x162   : > { %2662 = vmatpush1.bf16.msra.mxu1 %v3453_v33  ;;  %2622 = vmatprep.subr.bf16.mxu0 %v3458_v34 }
 0x163   : > { %2663 = vmatprep.subr.bf16.mxu1 %v3461_v35 }
 0x165   : > { %2623 = vmatpush1.bf16.msra.mxu0 %v3456_v12  ;;  %v1044_v12 = vlaneseq }
 0x166   : > { %2664 = vmatpush1.bf16.msra.mxu1 %v3459_v13  ;;  %2624 = vmatprep.subr.bf16.mxu0 %v3464_v2 }
 0x167   : > { %2665 = vmatprep.subr.bf16.mxu1 %v3467_v3  ;;  %v1045_v13 = vshrl.u32 %v1044_v12, 7  ;;  %v1042_v3 = vld [vmem:[%s770_s21] sm:$0xf] }
 0x169   : > { %2625 = vmatpush1.bf16.msra.mxu0 %v3462_v36  ;;  %v1046_v2 = vsub.s32 0, %v1045_v13 }
 0x16a   : > { %2666 = vmatpush1.bf16.msra.mxu1 %v3465_v0  ;;  %2626 = vmatprep.subr.bf16.mxu0 %v3470_v1 }
 0x16b   : > { %2667 = vmatprep.subr.bf16.mxu1 %v3473_v37  ;;  %v1047_v36 = vrot.slane %v1042_v3, %v1046_v2 }
 0x16d   : > { %2627 = vmatpush1.bf16.msra.mxu0 %v3468_v38 }
 0x16e   : > { %2668 = vmatpush1.bf16.msra.mxu1 %v3471_v39  ;;  %2628 = vmatprep.subr.bf16.mxu0 %v3476_v40 }
 0x16f   : > { %2669 = vmatprep.subr.bf16.mxu1 %v3479_v41 }
 0x171   : > { %2629 = vmatpush1.bf16.msra.mxu0 %v3474_v42 }
 0x172   : > { %2670 = vmatpush1.bf16.msra.mxu1 %v3477_v43  ;;  %2630 = vmatprep.subr.bf16.mxu0 %v3482_v44 }
 0x173   : > { %2671 = vmatprep.subr.bf16.mxu1 %v3485_v45 }
 0x175   : > { %2631 = vmatpush1.bf16.msra.mxu0 %v3480_v46 }
 0x176   : > { %2672 = vmatpush1.bf16.msra.mxu1 %v3483_v47  ;;  %2632 = vmatprep.subr.bf16.mxu0 %v3488_v48 }
 0x177   : > { %2673 = vmatprep.subr.bf16.mxu1 %v3491_v49 }
 0x179   : > { %2633 = vmatpush1.bf16.msra.mxu0 %v3486_v50 }
 0x17a   : > { %2674 = vmatpush1.bf16.msra.mxu1 %v3489_v51  ;;  %2634 = vmatprep.subr.bf16.mxu0 %v3494_v52 }
 0x17b   : > { %2675 = vmatprep.subr.bf16.mxu1 %v3497_v53 }
 0x17d   : > { %2635 = vmatpush2.bf16.msra.mxu0 %v3492_v54 }
 0x17e   : > { %2676 = vmatpush2.bf16.msra.mxu1 %v3495_v55  ;;  %2636 = vmatprep.subr.bf16.mxu0 %v3500_v56 }
 0x17f   : > { %2677 = vmatprep.subr.bf16.mxu1 %v3503_v57 }
 0x181   : > { %2637 = vmatpush2.bf16.msra.mxu0 %v3498_v58 }
 0x182   : > { %2678 = vmatpush2.bf16.msra.mxu1 %v3501_v59  ;;  %2638 = vmatprep.subr.bf16.mxu0 %v3506_v60 }
 0x183   : > { %2679 = vmatprep.subr.bf16.mxu1 %v3509_v61  ;;  %v1054_v61 = vsub.s32 2, %v1045_v13 }
 0x185   : > { %2639 = vmatpush2.bf16.msra.mxu0 %v3504_v62  ;;  %v1058_v62 = vsub.s32 3, %v1045_v13 }
 0x186   : > { %2680 = vmatpush2.bf16.msra.mxu1 %v3507_v63  ;;  %2640 = vmatprep.subr.bf16.mxu0 %v3512_v4  ;;  %v1055_v63 = vrot.slane %v1042_v3, %v1054_v61 }
 0x187   : > { %2681 = vmatprep.subr.bf16.mxu1 %v3515_v5  ;;  %v1059_v4 = vrot.slane %v1042_v3, %v1058_v62 }
 0x189   : > { %2641 = vmatpush2.bf16.msra.mxu0 %v3510_v6 }
 0x18a   : > { %2682 = vmatpush2.bf16.msra.mxu1 %v3513_v7  ;;  %2642 = vmatprep.subr.bf16.mxu0 %v3518_v8 }
 0x18b   : > { %2683 = vmatprep.subr.bf16.mxu1 %v3521_v9 }
 0x18d   : > { %2643 = vmatpush2.bf16.msra.mxu0 %v3516_v14 }
 0x18e   : > { %2684 = vmatpush2.bf16.msra.mxu1 %v3519_v15  ;;  %2644 = vmatprep.subr.bf16.mxu0 %v3524_v16 }
 0x18f   : > { %2685 = vmatprep.subr.bf16.mxu1 %v3527_v17 }
 0x191   : > { %2645 = vmatpush2.bf16.msra.mxu0 %v3522_v18 }
 0x192   : > { %2686 = vmatpush2.bf16.msra.mxu1 %v3525_v19  ;;  %2646 = vmatprep.subr.bf16.mxu0 %v3530_v20 }
 0x193   : > { %2687 = vmatprep.subr.bf16.mxu1 %v3533_v21 }
 0x195   : > { %2647 = vmatpush2.bf16.msra.mxu0 %v3528_v24 }
 0x196   : > { %2688 = vmatpush2.bf16.msra.mxu1 %v3531_v25  ;;  %2648 = vmatprep.subr.bf16.mxu0 %v3536_v26 }
 0x197   : > { %2689 = vmatprep.subr.bf16.mxu1 %v3539_v27 }
 0x199   : > { %2649 = vmatpush2.bf16.msra.mxu0 %v3534_v10 }
 0x19a   : > { %2690 = vmatpush2.bf16.msra.mxu1 %v3537_v28 }
 0x19c   : > { %v2406_v11 = vpop.f32.mrf.mxu0  ;;  %2651 = vmatmul.mubr.bf16.vlgmr.msra.gmra.mxu0 %v4346_v22  ;;  %v1050_v22 = vsub.s32 1, %v1045_v13 }
 0x19d   : > { %v2447_v29 = vpop.f32.mrf.mxu1  ;;  %2692 = vmatmul.mubr.bf16.vlgmr.msra.gmra.mxu1 %v4350_v23  ;;  %v2407_v0 = vadd.f32 %v2406_v11, %v1047_v36 }
 0x19e   : > { %v2408_v30 = vpop.f32.mrf.mxu0  ;;  %v1051_v23 = vrot.slane %v1042_v3, %v1050_v22 }
 0x19f   : > { %v2449_v31 = vpop.f32.mrf.mxu1  ;;  %v2448_v37 = vadd.f32 %v2447_v29, %v2407_v0 }
 0x1a0   : > { %v2410_v32 = vpop.f32.mrf.mxu0  ;;  %v2409_v1 = vadd.f32 %v2408_v30, %v1051_v23 }
 0x1a1   : > { %v2451_v33 = vpop.f32.mrf.mxu1 }
 0x1a2   : > { %v2411_v34 = vpop.f32.mrf.mxu0  ;;  %v2450_v40 = vadd.f32 %v2449_v31, %v2409_v1 }
 0x1a3   : > { %v2452_v35 = vpop.f32.mrf.mxu1 }
 0x1dc   : > { %v2488_v38 = vpop.f32.mrf.mxu0 }
 0x1dd   : > { %v2529_v39 = vpop.f32.mrf.mxu1  ;;  %v2489_v41 = vadd.f32 %v2488_v38, %v2448_v37 }
 0x1de   : > { %v2490_v42 = vpop.f32.mrf.mxu0 }
 0x1df   : > { %v2531_v43 = vpop.f32.mrf.mxu1  ;;  %v2530_v44 = vadd.f32 %v2529_v39, %v2489_v41  ;;  %v2491_v45 = vadd.f32 %v2490_v42, %v2450_v40 }
 0x1e0   : > { %v2492_v46 = vpop.f32.mrf.mxu0 }
 0x1e1   : > { %v2533_v47 = vpop.f32.mrf.mxu1  ;;  %v2700_v48 = vmax.f32 %v2530_v44, 0.0  ;;  %v2532_v49 = vadd.f32 %v2531_v43, %v2491_v45 }
 0x1e2   : > { %v2493_v50 = vpop.f32.mrf.mxu0 }
 0x1e3   : > { %v2534_v51 = vpop.f32.mrf.mxu1  ;;  %2704 = vst [vmem:[%s4495_s24] sm:$0xff] %v2700_v48  ;;  %v2701_v52 = vmax.f32 %v2532_v49, 0.0 }
 0x1e5   : > { %2705 = vst [vmem:[%s4495_s24 + $0x8] sm:$0xff] %v2701_v52 }
 0x21c   : > { %v2570_v53 = vpop.f32.mrf.mxu0 }
 0x21d   : > { %v2611_v54 = vpop.f32.mrf.mxu1  ;;  %v2571_v5 = vadd.f32 %v2570_v53, %v1055_v63 }
 0x21e   : > { %v2572_v55 = vpop.f32.mrf.mxu0 }
 0x21f   : > { %v2613_v56 = vpop.f32.mrf.mxu1  ;;  %v2573_v6 = vadd.f32 %v2572_v55, %v1059_v4  ;;  %v2612_v7 = vadd.f32 %v2611_v54, %v2571_v5 }
 0x220   : > { %v2574_v57 = vpop.f32.mrf.mxu0 }
 0x221   : > { %v2615_v58 = vpop.f32.mrf.mxu1  ;;  %v2614_v14 = vadd.f32 %v2613_v56, %v2573_v6 }
 0x222   : > { %v2575_v59 = vpop.f32.mrf.mxu0 }
 0x223   : > { %v2616_v60 = vpop.f32.mrf.mxu1 }
 0x25c   : > { %v2652_v8 = vpop.f32.mrf.mxu0 }
 0x25d   : > { %v2693_v9 = vpop.f32.mrf.mxu1  ;;  %v2653_v15 = vadd.f32 %v2652_v8, %v2612_v7 }
 0x25e   : > { %v2654_v16 = vpop.f32.mrf.mxu0 }
 0x25f   : > { %v2695_v17 = vpop.f32.mrf.mxu1  ;;  %v2694_v18 = vadd.f32 %v2693_v9, %v2653_v15  ;;  %v2655_v19 = vadd.f32 %v2654_v16, %v2614_v14 }
 0x260   : > { %v2656_v20 = vpop.f32.mrf.mxu0 }
 0x261   : > { %v2697_v21 = vpop.f32.mrf.mxu1  ;;  %v2702_v24 = vmax.f32 %v2694_v18, 0.0  ;;  %v2696_v25 = vadd.f32 %v2695_v17, %v2655_v19 }
 0x262   : > { %v2657_v26 = vpop.f32.mrf.mxu0 }
 0x263   : > { %v2698_v27 = vpop.f32.mrf.mxu1  ;;  %2706 = vst [vmem:[%s4495_s24 + $0x10] sm:$0xff] %v2702_v24  ;;  %v2703_v10 = vmax.f32 %v2696_v25, 0.0 }
 0x265   : > { %2707 = vst [vmem:[%s4495_s24 + $0x18] sm:$0xff] %v2703_v10 }
 0x266 PF: > { %s13_s16 = sadd.s32 1, %s3578_s16   ;;  %s4520_s12 = smov %s3566_s13 }
 0x267   : > { %p10_p10 = scmp.ge.s32.totalorder %s13_s16, 6   ;;  %s4521_s13 = smov %s3635_s20 }
 0x268   : > { %s4522_s14 = smov %s3574_s15  ;;  %s4523_s15 = smov %s4525_s17 }
 0x269   :  { %12 = sbr.rel (!%p10_p10) target bundleno = 3 (0x3), region = 96 }

// kernel: cvae_forward.17
= control target key start
LH: loop header
LB: loop body
LE: loop exit
PB: predicated region body
PF: predicated region fallthrough
CT: control target
= control target key end

     0   :  { %s997_s12 = smov 0   ;;  %s999_s13 = smov 0   ;;  %s1076_s0 = inlined_call_operand.vmem [shape: bf16[4,32,512], index: 0, kind: input, shape index: {}]   ;;  %s1077_s1 = inlined_call_operand.vmem [shape: bf16[4,512,128], index: 1, kind: input, shape index: {}]   ;;  %s1078_s2 = inlined_call_operand.vmem [shape: f32[4,1,128], index: 2, kind: input, shape index: {}]   ;;  %s1079_s3 = inlined_call_operand.vmem [shape: f32[4,32,128], index: 3, kind: output, shape index: {}]  }
   0x1   :  { %s1001_s14 = smov 0  }
   0x2 LB: > { %s25_s15 = sadd.s32 1, %s971_s13  ;;  %p776_p0 = scmp.ge.s32.totalorder %s975_s14, 1  ;;  %s975_s14 = sphi %s1001_s14, %s13_s14   ;;  %s971_s13 = sphi %s999_s13, %s1081_s13   ;;  %s967_s12 = sphi %s997_s12, %s1080_s12  }
   0x3   : > { %p27_p1 = scmp.ge.s32.totalorder %s25_s15, 4  ;;  %p179_p2 = scmp.lt.s32.totalorder %s975_s14, 5 }
   0x5   : > { %s1083_s15 = smov (%p27_p1, %s25_s15), 0  ;;  %p180_p3 = pnand %p776_p0, %p179_p2 }
   0x6   : > { %p220_p4 = scmp.lt.s32.totalorder (!%p180_p3), %s967_s12, 3 }
   0x7   : > { %183 = sbr.rel (%p180_p3) target bundleno = 265 (0x109), region = 32 }
   0xc   : > { %s1085_s12 = smov (!%p220_p4, %s967_s12), 3 }
   0xd   : > { %s827_s16 = sshll.u32 %s1085_s12, 8  ;;  %s826_s20 = sshll.u32 %s1085_s12, 6 }
   0xe   : > { %s1021_s19 = scalar_lea.vmem %s1077_s1, %s827_s16  ;;  %s224_s23 = scalar_lea.vmem %s1076_s0, %s826_s20 }
   0xf   : > { %v909_v0 = vld [vmem:[%s1021_s19 + $0x78] sm:$0xff]   ;;  %v913_v4 = vld [vmem:[%s1021_s19 + $0x70] sm:$0xff]   ;;  %v917_v8 = vld [vmem:[%s1021_s19 + $0x68] sm:$0xff]   ;;  %s238_s26 = scalar_lea.vmem %s1078_s2, %s1085_s12  ;;  %s828_s27 = sshll.u32 %s1085_s12, 5 }
  0x10   : > { %v910_v1 = vld [vmem:[%s1021_s19 + $0xf8] sm:$0xff]   ;;  %829 = vmatprep.subr.bf16.mxu0 %v909_v0  ;;  %v914_v5 = vld [vmem:[%s1021_s19 + $0xf0] sm:$0xff]   ;;  %v918_v9 = vld [vmem:[%s1021_s19 + $0xe8] sm:$0xff]   ;;  %s246_s30 = scalar_lea.vmem %s1079_s3, %s828_s27 }
  0x11   : > { %v911_v2 = vld [vmem:[%s1021_s19 + $0x38] sm:$0xff]   ;;  %857 = vmatprep.subr.bf16.mxu1 %v910_v1  ;;  %v915_v6 = vld [vmem:[%s1021_s19 + $0x30] sm:$0xff]   ;;  %v919_v10 = vld [vmem:[%s1021_s19 + $0x28] sm:$0xff]  }
  0x12   : > { %v912_v3 = vld [vmem:[%s1021_s19 + $0xb8] sm:$0xff]   ;;  %830 = vmatpush3.bf16.msra.mxu0 %v911_v2  ;;  %v916_v7 = vld [vmem:[%s1021_s19 + $0xb0] sm:$0xff]   ;;  %v920_v11 = vld [vmem:[%s1021_s19 + $0xa8] sm:$0xff]  }
  0x13   : > { %858 = vmatpush3.bf16.msra.mxu1 %v912_v3  ;;  %831 = vmatprep.subr.bf16.mxu0 %v913_v4  ;;  %v921_v12 = vld [vmem:[%s1021_s19 + $0x60] sm:$0xff]   ;;  %v925_v16 = vld [vmem:[%s1021_s19 + $0x58] sm:$0xff]   ;;  %v929_v20 = vld [vmem:[%s1021_s19 + $0x50] sm:$0xff]  }
  0x14   : > { %859 = vmatprep.subr.bf16.mxu1 %v914_v5  ;;  %v922_v13 = vld [vmem:[%s1021_s19 + $0xe0] sm:$0xff]   ;;  %v926_v17 = vld [vmem:[%s1021_s19 + $0xd8] sm:$0xff]   ;;  %v930_v21 = vld [vmem:[%s1021_s19 + $0xd0] sm:$0xff]  }
  0x15   : > { %v923_v14 = vld [vmem:[%s1021_s19 + $0x20] sm:$0xff]   ;;  %v927_v18 = vld [vmem:[%s1021_s19 + $0x18] sm:$0xff]   ;;  %v931_v22 = vld [vmem:[%s1021_s19 + $0x10] sm:$0xff]  }
  0x16   : > { %832 = vmatpush3.bf16.msra.mxu0 %v915_v6  ;;  %v924_v15 = vld [vmem:[%s1021_s19 + $0xa0] sm:$0xff]   ;;  %v928_v19 = vld [vmem:[%s1021_s19 + $0x98] sm:$0xff]   ;;  %v932_v23 = vld [vmem:[%s1021_s19 + $0x90] sm:$0xff]  }
  0x17   : > { %860 = vmatpush3.bf16.msra.mxu1 %v916_v7  ;;  %833 = vmatprep.subr.bf16.mxu0 %v917_v8  ;;  %v933_v24 = vld [vmem:[%s1021_s19 + $0x48] sm:$0xff]   ;;  %v937_v28 = vld [vmem:[%s1021_s19 + $0x40] sm:$0xff]  }
  0x18   : > { %861 = vmatprep.subr.bf16.mxu1 %v918_v9  ;;  %v934_v25 = vld [vmem:[%s1021_s19 + $0xc8] sm:$0xff]   ;;  %v938_v29 = vld [vmem:[%s1021_s19 + $0xc0] sm:$0xff]  }
  0x19   : > { %v935_v26 = vld [vmem:[%s1021_s19 + $0x8] sm:$0xff]   ;;  %v939_v30 = vld [vmem:[%s1021_s19] sm:$0xff]  }
  0x1a   : > { %834 = vmatpush3.bf16.msra.mxu0 %v919_v10  ;;  %v936_v27 = vld [vmem:[%s1021_s19 + $0x88] sm:$0xff]   ;;  %v940_v31 = vld [vmem:[%s1021_s19 + $0x80] sm:$0xff]  }
  0x1b   : > { %862 = vmatpush3.bf16.msra.mxu1 %v920_v11  ;;  %835 = vmatprep.subr.bf16.mxu0 %v921_v12  ;;  %v941_v32 = vld [vmem:[%s224_s23] ss:$16 sps:$4 sm:$0xff]   ;;  %v943_v33 = vld [vmem:[%s224_s23 + $0x4] ss:$16 sps:$4 sm:$0xff]   ;;  %v944_v34 = vld [vmem:[%s224_s23 + $0x8] ss:$16 sps:$4 sm:$0xff]  }
  0x1c   : > { %863 = vmatprep.subr.bf16.mxu1 %v922_v13  ;;  %v946_v35 = vld [vmem:[%s224_s23 + $0xc] ss:$16 sps:$4 sm:$0xff]   ;;  %591 = vmatprep.mubr.bf16.mxu0 %v943_v33  ;;  %v947_v36 = vld [vmem:[%s224_s23 + $0x24] ss:$16 sps:$4 sm:$0xff]   ;;  %v951_v38 = vld [vmem:[%s224_s23 + $0x20] ss:$16 sps:$4 sm:$0xff]  }
  0x1d   : > { %640 = vmatprep.mubr.bf16.mxu1 %v946_v35  ;;  %v949_v37 = vld [vmem:[%s224_s23 + $0x2c] ss:$16 sps:$4 sm:$0xff]   ;;  %v952_v39 = vld [vmem:[%s224_s23 + $0x28] ss:$16 sps:$4 sm:$0xff]   ;;  %v783_v42 = vld [vmem:[%s238_s26] ss:$0 sm:$0xff] }
  0x1e   : > { %836 = vmatpush3.bf16.msra.mxu0 %v923_v14 }
  0x1f   : > { %864 = vmatpush3.bf16.msra.mxu1 %v924_v15  ;;  %837 = vmatprep.subr.bf16.mxu0 %v925_v16 }
  0x20   : > { %865 = vmatprep.subr.bf16.mxu1 %v926_v17 }
  0x22   : > { %838 = vmatpush3.bf16.msra.mxu0 %v927_v18 }
  0x23   : > { %866 = vmatpush3.bf16.msra.mxu1 %v928_v19  ;;  %839 = vmatprep.subr.bf16.mxu0 %v929_v20 }
  0x24   : > { %867 = vmatprep.subr.bf16.mxu1 %v930_v21 }
  0x26   : > { %840 = vmatpush3.bf16.msra.mxu0 %v931_v22 }
  0x27   : > { %868 = vmatpush3.bf16.msra.mxu1 %v932_v23  ;;  %841 = vmatprep.subr.bf16.mxu0 %v933_v24 }
  0x28   : > { %869 = vmatprep.subr.bf16.mxu1 %v934_v25 }
  0x2a   : > { %842 = vmatpush3.bf16.msra.mxu0 %v935_v26 }
  0x2b   : > { %870 = vmatpush3.bf16.msra.mxu1 %v936_v27  ;;  %843 = vmatprep.subr.bf16.mxu0 %v937_v28 }
  0x2c   : > { %871 = vmatprep.subr.bf16.mxu1 %v938_v29 }
  0x2e   : > { %844 = vmatpush3.bf16.msra.mxu0 %v939_v30 }
  0x2f   : > { %872 = vmatpush3.bf16.msra.mxu1 %v940_v31 }
  0x31   : > { %592 = vmatmul.mubr.bf16.vlgmr.msra.gmra.mxu0 %v941_v32 }
  0x32   : > { %641 = vmatmul.mubr.bf16.vlgmr.msra.gmra.mxu1 %v944_v34  ;;  %599 = vmatprep.mubr.bf16.mxu0 %v947_v36 }
  0x33   : > { %648 = vmatprep.mubr.bf16.mxu1 %v949_v37 }
  0x39   : > { %600 = vmatmul.mubr.bf16.gmra.mxu0 %v951_v38 }
  0x3a   : > { %649 = vmatmul.mubr.bf16.gmra.mxu1 %v952_v39 }
  0xf1   : > { %v845_v40 = vpop.f32.mrf.mxu0 }
  0xf2   : > { %v873_v41 = vpop.f32.mrf.mxu1 }
  0xf3   : > { %v846_v43 = vpop.f32.mrf.mxu0 }
  0xf4   : > { %v847_v44 = vadd.f32 %v846_v43, %v845_v40  ;;  %v874_v45 = vpop.f32.mrf.mxu1 }
  0xf5   : > { %v848_v46 = vpop.f32.mrf.mxu0  ;;  %v875_v48 = vadd.f32 %v874_v45, %v873_v41 }
  0xf6   : > { %v594_v47 = vadd.f32 %v847_v44, %v783_v42  ;;  %v876_v49 = vpop.f32.mrf.mxu1 }
  0xf7   : > { %v849_v50 = vpop.f32.mrf.mxu0 }
  0xf8   : > { %v643_v51 = vadd.f32 %v875_v48, %v594_v47  ;;  %v850_v52 = vadd.f32 %v849_v50, %v848_v46  ;;  %v877_v53 = vpop.f32.mrf.mxu1 }
  0xf9   : > { %v851_v54 = vpop.f32.mrf.mxu0  ;;  %v878_v57 = vadd.f32 %v877_v53, %v876_v49 }
  0xfa   : > { %v657_v55 = vmax.f32 %v643_v51, 0.0  ;;  %v597_v56 = vadd.f32 %v850_v52, %v783_v42  ;;  %v879_v58 = vpop.f32.mrf.mxu1 }
  0xfb   : > { %v852_v59 = vpop.f32.mrf.mxu0 }
  0xfc   : > { %661 = vst [vmem:[%s246_s30] sm:$0xff] %v657_v55  ;;  %v646_v60 = vadd.f32 %v878_v57, %v597_v56  ;;  %v853_v61 = vadd.f32 %v852_v59, %v851_v54  ;;  %v880_v62 = vpop.f32.mrf.mxu1 }
  0xfd   : > { %v854_v63 = vpop.f32.mrf.mxu0  ;;  %v881_v2 = vadd.f32 %v880_v62, %v879_v58 }
  0xfe   : > { %v658_v0 = vmax.f32 %v646_v60, 0.0  ;;  %v602_v1 = vadd.f32 %v853_v61, %v783_v42  ;;  %v882_v3 = vpop.f32.mrf.mxu1 }
  0xff   : > { %v855_v4 = vpop.f32.mrf.mxu0 }
 0x100   : > { %662 = vst [vmem:[%s246_s30 + $0x8] sm:$0xff] %v658_v0  ;;  %v651_v5 = vadd.f32 %v881_v2, %v602_v1  ;;  %v856_v6 = vadd.f32 %v855_v4, %v854_v63  ;;  %v883_v7 = vpop.f32.mrf.mxu1 }
 0x101   : > { %v884_v10 = vadd.f32 %v883_v7, %v882_v3 }
 0x102   : > { %v659_v8 = vmax.f32 %v651_v5, 0.0  ;;  %v605_v9 = vadd.f32 %v856_v6, %v783_v42 }
 0x104   : > { %663 = vst [vmem:[%s246_s30 + $0x10] sm:$0xff] %v659_v8  ;;  %v654_v11 = vadd.f32 %v884_v10, %v605_v9 }
 0x106   : > { %v660_v12 = vmax.f32 %v654_v11, 0.0 }
 0x108   : > { %664 = vst [vmem:[%s246_s30 + $0x18] sm:$0xff] %v660_v12 }
 0x109 PF: > { %s13_s14 = sadd.s32 1, %s975_s14   ;;  %s1080_s12 = smov %s971_s13 }
 0x10a   : > { %p10_p5 = scmp.ge.s32.totalorder %s13_s14, 6   ;;  %s1081_s13 = smov %s1083_s15 }
 0x10c   :  { %12 = sbr.rel (!%p10_p5) target bundleno = 2 (0x2), region = 68 }

// kernel: cvae_forward.18
= control target key start
LH: loop header
LB: loop body
LE: loop exit
PB: predicated region body
PF: predicated region fallthrough
CT: control target
= control target key end

     0   :  { %s1711_s12 = smov 0   ;;  %s1713_s13 = smov 0   ;;  %s1972_s0 = inlined_call_operand.vmem [shape: bf16[4,128,640], index: 0, kind: input, shape index: {}]   ;;  %s1973_s1 = inlined_call_operand.vmem [shape: bf16[4,640,128], index: 1, kind: input, shape index: {}]   ;;  %s1974_s2 = inlined_call_operand.vmem [shape: f32[4,1,128], index: 2, kind: input, shape index: {}]   ;;  %s1975_s3 = inlined_call_operand.vmem [shape: f32[4,128,128], index: 3, kind: output, shape index: {}]  }
   0x1   :  { %s1715_s14 = smov 0  }
   0x2 LB: > { %s25_s15 = sadd.s32 1, %s1685_s13  ;;  %p1265_p0 = scmp.ge.s32.totalorder %s1689_s14, 1  ;;  %s1689_s14 = sphi %s1715_s14, %s13_s14   ;;  %s1685_s13 = sphi %s1713_s13, %s1981_s13   ;;  %s1681_s12 = sphi %s1711_s12, %s1980_s12  }
   0x3   : > { %p27_p1 = scmp.ge.s32.totalorder %s25_s15, 4  ;;  %p179_p2 = scmp.lt.s32.totalorder %s1689_s14, 5 }
   0x5   : > { %s1983_s15 = smov (%p27_p1, %s25_s15), 0  ;;  %p180_p3 = pnand %p1265_p0, %p179_p2 }
   0x7   : > { %183 = sbr.rel (%p180_p3) target bundleno = 329 (0x149), region = 32 }
   0xc   : > { %p220_p4 = scmp.lt.s32.totalorder %s1681_s12, 3 }
   0xe   : > { %s1985_s12 = smov (!%p220_p4, %s1681_s12), 3 }
   0xf   : > { %s1546_s16 = smul.u32 320, %s1985_s12  ;;  %s238_s25 = scalar_lea.vmem %s1974_s2, %s1985_s12 }
  0x10   : > { %s1353_s26 = sshll.u32 %s1985_s12, 7 }
  0x11   : > { %s1737_s19 = scalar_lea.vmem %s1973_s1, %s1546_s16  ;;  %s1774_s22 = scalar_lea.vmem %s1972_s0, %s1546_s16 }
  0x12   : > { %v1571_v0 = vld [vmem:[%s1737_s19 + $0x78] sm:$0xff]   ;;  %v1575_v4 = vld [vmem:[%s1737_s19 + $0x70] sm:$0xff]   ;;  %v1579_v8 = vld [vmem:[%s1737_s19 + $0x68] sm:$0xff]   ;;  %s1924_s29 = scalar_lea.vmem %s1975_s3, %s1353_s26 }
  0x13   : > { %v1572_v1 = vld [vmem:[%s1737_s19 + $0xf8] sm:$0xff]   ;;  %1354 = vmatprep.subr.bf16.mxu0 %v1571_v0  ;;  %v1576_v5 = vld [vmem:[%s1737_s19 + $0xf0] sm:$0xff]   ;;  %v1580_v9 = vld [vmem:[%s1737_s19 + $0xe8] sm:$0xff]  }
  0x14   : > { %v1573_v2 = vld [vmem:[%s1737_s19 + $0x38] sm:$0xff]   ;;  %1418 = vmatprep.subr.bf16.mxu1 %v1572_v1  ;;  %v1577_v6 = vld [vmem:[%s1737_s19 + $0x30] sm:$0xff]   ;;  %v1581_v10 = vld [vmem:[%s1737_s19 + $0x28] sm:$0xff]  }
  0x15   : > { %v1574_v3 = vld [vmem:[%s1737_s19 + $0xb8] sm:$0xff]   ;;  %1355 = vmatpush3.bf16.msra.mxu0 %v1573_v2  ;;  %v1578_v7 = vld [vmem:[%s1737_s19 + $0xb0] sm:$0xff]   ;;  %v1582_v11 = vld [vmem:[%s1737_s19 + $0xa8] sm:$0xff]  }
  0x16   : > { %1419 = vmatpush3.bf16.msra.mxu1 %v1574_v3  ;;  %1356 = vmatprep.subr.bf16.mxu0 %v1575_v4  ;;  %v1583_v12 = vld [vmem:[%s1737_s19 + $0x60] sm:$0xff]   ;;  %v1587_v16 = vld [vmem:[%s1737_s19 + $0x58] sm:$0xff]   ;;  %v1591_v20 = vld [vmem:[%s1737_s19 + $0x50] sm:$0xff]  }
  0x17   : > { %1420 = vmatprep.subr.bf16.mxu1 %v1576_v5  ;;  %v1584_v13 = vld [vmem:[%s1737_s19 + $0xe0] sm:$0xff]   ;;  %v1588_v17 = vld [vmem:[%s1737_s19 + $0xd8] sm:$0xff]   ;;  %v1592_v21 = vld [vmem:[%s1737_s19 + $0xd0] sm:$0xff]  }
  0x18   : > { %v1585_v14 = vld [vmem:[%s1737_s19 + $0x20] sm:$0xff]   ;;  %v1589_v18 = vld [vmem:[%s1737_s19 + $0x18] sm:$0xff]   ;;  %v1593_v22 = vld [vmem:[%s1737_s19 + $0x10] sm:$0xff]  }
  0x19   : > { %1357 = vmatpush3.bf16.msra.mxu0 %v1577_v6  ;;  %v1586_v15 = vld [vmem:[%s1737_s19 + $0xa0] sm:$0xff]   ;;  %v1590_v19 = vld [vmem:[%s1737_s19 + $0x98] sm:$0xff]   ;;  %v1594_v23 = vld [vmem:[%s1737_s19 + $0x90] sm:$0xff]  }
  0x1a   : > { %1421 = vmatpush3.bf16.msra.mxu1 %v1578_v7  ;;  %1358 = vmatprep.subr.bf16.mxu0 %v1579_v8  ;;  %v1595_v24 = vld [vmem:[%s1737_s19 + $0x48] sm:$0xff]   ;;  %v1599_v28 = vld [vmem:[%s1737_s19 + $0x40] sm:$0xff]   ;;  %v1609_v36 = vld [vmem:[%s1737_s19 + $0x138] sm:$0xff]  }
  0x1b   : > { %1422 = vmatprep.subr.bf16.mxu1 %v1580_v9  ;;  %v1596_v25 = vld [vmem:[%s1737_s19 + $0xc8] sm:$0xff]   ;;  %v1600_v29 = vld [vmem:[%s1737_s19 + $0xc0] sm:$0xff]   ;;  %v1616_v39 = vld [vmem:[%s1737_s19 + $0x130] sm:$0xff]  }
  0x1c   : > { %v1597_v26 = vld [vmem:[%s1737_s19 + $0x8] sm:$0xff]   ;;  %v1601_v30 = vld [vmem:[%s1737_s19] sm:$0xff]   ;;  %v1619_v43 = vld [vmem:[%s1774_s22 + $0x5c] ss:$20 sps:$4 sm:$0xff]  }
  0x1d   : > { %1359 = vmatpush3.bf16.msra.mxu0 %v1581_v10  ;;  %v1598_v27 = vld [vmem:[%s1737_s19 + $0x88] sm:$0xff]   ;;  %v1602_v31 = vld [vmem:[%s1737_s19 + $0x80] sm:$0xff]   ;;  %v1624_v48 = vld [vmem:[%s1774_s22 + $0x7c] ss:$20 sps:$4 sm:$0xff]  }
  0x1e   : > { %1423 = vmatpush3.bf16.msra.mxu1 %v1582_v11  ;;  %1360 = vmatprep.subr.bf16.mxu0 %v1583_v12  ;;  %v1603_v32 = vld [vmem:[%s1774_s22] ss:$20 sps:$4 sm:$0xff]   ;;  %v1605_v33 = vld [vmem:[%s1774_s22 + $0x4] ss:$20 sps:$4 sm:$0xff]   ;;  %v1606_v34 = vld [vmem:[%s1774_s22 + $0x8] ss:$20 sps:$4 sm:$0xff]  }
  0x1f   : > { %1424 = vmatprep.subr.bf16.mxu1 %v1584_v13  ;;  %v1608_v35 = vld [vmem:[%s1774_s22 + $0xc] ss:$20 sps:$4 sm:$0xff]   ;;  %863 = vmatprep.mubr.bf16.mxu0 %v1605_v33  ;;  %v1612_v38 = vld [vmem:[%s1774_s22 + $0x34] ss:$20 sps:$4 sm:$0xff]   ;;  %v1615_v41 = vld [vmem:[%s1774_s22 + $0x30] ss:$20 sps:$4 sm:$0xff]  }
  0x20   : > { %960 = vmatprep.mubr.bf16.mxu1 %v1608_v35  ;;  %v1610_v37 = vld [vmem:[%s1774_s22 + $0x2c] ss:$20 sps:$4 sm:$0xff]   ;;  %v1614_v40 = vld [vmem:[%s1774_s22 + $0x28] ss:$20 sps:$4 sm:$0xff]   ;;  %v1621_v46 = vld [vmem:[%s1774_s22 + $0x50] ss:$20 sps:$4 sm:$0xff]  }
  0x21   : > { %1361 = vmatpush3.bf16.msra.mxu0 %v1585_v14  ;;  %v1617_v42 = vld [vmem:[%s1774_s22 + $0x54] ss:$20 sps:$4 sm:$0xff]   ;;  %v1630_v45 = vld [vmem:[%s1737_s19 + $0x120] sm:$0xff]   ;;  %v1622_v47 = vld [vmem:[%s1774_s22 + $0x58] ss:$20 sps:$4 sm:$0xff]  }
  0x22   : > { %1425 = vmatpush3.bf16.msra.mxu1 %v1586_v15  ;;  %1362 = vmatprep.subr.bf16.mxu0 %v1587_v16  ;;  %v1623_v44 = vld [vmem:[%s1737_s19 + $0x128] sm:$0xff]   ;;  %v1626_v49 = vld [vmem:[%s1774_s22 + $0x84] ss:$20 sps:$4 sm:$0xff]   ;;  %v1644_v51 = vld [vmem:[%s1737_s19 + $0x110] sm:$0xff]  }
  0x23   : > { %1426 = vmatprep.subr.bf16.mxu1 %v1588_v17  ;;  %v1637_v50 = vld [vmem:[%s1737_s19 + $0x118] sm:$0xff]   ;;  %v1629_v53 = vld [vmem:[%s1774_s22 + $0x80] ss:$20 sps:$4 sm:$0xff]   ;;  %v1651_v55 = vld [vmem:[%s1737_s19 + $0x108] sm:$0xff]  }
  0x24   : > { %v1628_v52 = vld [vmem:[%s1774_s22 + $0x78] ss:$20 sps:$4 sm:$0xff]   ;;  %v1658_v57 = vld [vmem:[%s1737_s19 + $0x100] sm:$0xff]   ;;  %v1636_v59 = vld [vmem:[%s1774_s22 + $0xa8] ss:$20 sps:$4 sm:$0xff]  }
  0x25   : > { %1363 = vmatpush3.bf16.msra.mxu0 %v1589_v18  ;;  %v1631_v54 = vld [vmem:[%s1774_s22 + $0xa4] ss:$20 sps:$4 sm:$0xff]   ;;  %v1633_v56 = vld [vmem:[%s1774_s22 + $0xac] ss:$20 sps:$4 sm:$0xff]   ;;  %v1640_v61 = vld [vmem:[%s1774_s22 + $0xd4] ss:$20 sps:$4 sm:$0xff]  }
  0x26   : > { %1427 = vmatpush3.bf16.msra.mxu1 %v1590_v19  ;;  %1364 = vmatprep.subr.bf16.mxu0 %v1591_v20  ;;  %v1635_v58 = vld [vmem:[%s1774_s22 + $0xa0] ss:$20 sps:$4 sm:$0xff]   ;;  %v1642_v62 = vld [vmem:[%s1774_s22 + $0xc8] ss:$20 sps:$4 sm:$0xff]   ;;  %v1643_v63 = vld [vmem:[%s1774_s22 + $0xd0] ss:$20 sps:$4 sm:$0xff]  }
  0x27   : > { %1428 = vmatprep.subr.bf16.mxu1 %v1592_v21  ;;  %v1638_v60 = vld [vmem:[%s1774_s22 + $0xcc] ss:$20 sps:$4 sm:$0xff]   ;;  %v1645_v0 = vld [vmem:[%s1774_s22 + $0xf4] ss:$20 sps:$4 sm:$0xff]   ;;  %v1647_v1 = vld [vmem:[%s1774_s22 + $0xfc] ss:$20 sps:$4 sm:$0xff]  }
  0x28   : > { %v1649_v2 = vld [vmem:[%s1774_s22 + $0xf0] ss:$20 sps:$4 sm:$0xff]   ;;  %v1650_v3 = vld [vmem:[%s1774_s22 + $0xf8] ss:$20 sps:$4 sm:$0xff]   ;;  %v1657_v7 = vld [vmem:[%s1774_s22 + $0x120] ss:$20 sps:$4 sm:$0xff]  }
  0x29   : > { %1365 = vmatpush3.bf16.msra.mxu0 %v1593_v22  ;;  %v1652_v4 = vld [vmem:[%s1774_s22 + $0x11c] ss:$20 sps:$4 sm:$0xff]   ;;  %v1654_v5 = vld [vmem:[%s1774_s22 + $0x124] ss:$20 sps:$4 sm:$0xff]   ;;  %v1663_v12 = vld [vmem:[%s1774_s22 + $0x60] ss:$20 sps:$4 sm:$0xff]  }
  0x2a   : > { %1429 = vmatpush3.bf16.msra.mxu1 %v1594_v23  ;;  %1366 = vmatprep.subr.bf16.mxu0 %v1595_v24  ;;  %v1656_v6 = vld [vmem:[%s1774_s22 + $0x118] ss:$20 sps:$4 sm:$0xff]   ;;  %v1659_v8 = vld [vmem:[%s1774_s22 + $0x10] ss:$20 sps:$4 sm:$0xff]   ;;  %v1664_v13 = vld [vmem:[%s1774_s22 + $0x100] ss:$20 sps:$4 sm:$0xff]  }
  0x2b   : > { %1430 = vmatprep.subr.bf16.mxu1 %v1596_v25  ;;  %v1660_v9 = vld [vmem:[%s1774_s22 + $0xb0] ss:$20 sps:$4 sm:$0xff]   ;;  %v1661_v10 = vld [vmem:[%s1774_s22 + $0x38] ss:$20 sps:$4 sm:$0xff]   ;;  %v1665_v14 = vld [vmem:[%s1774_s22 + $0x88] ss:$20 sps:$4 sm:$0xff]  }
  0x2c   : > { %v1662_v11 = vld [vmem:[%s1774_s22 + $0xd8] ss:$20 sps:$4 sm:$0xff]   ;;  %v1666_v15 = vld [vmem:[%s1774_s22 + $0x128] ss:$20 sps:$4 sm:$0xff]  }
  0x2d   : > { %1367 = vmatpush3.bf16.msra.mxu0 %v1597_v26 }
  0x2e   : > { %1431 = vmatpush3.bf16.msra.mxu1 %v1598_v27  ;;  %1368 = vmatprep.subr.bf16.mxu0 %v1599_v28 }
  0x2f   : > { %1432 = vmatprep.subr.bf16.mxu1 %v1600_v29 }
  0x31   : > { %1369 = vmatpush3.bf16.msra.mxu0 %v1601_v30 }
  0x32   : > { %1433 = vmatpush3.bf16.msra.mxu1 %v1602_v31  ;;  %1498 = vmatprep.subr.bf16.mxu0 %v1609_v36 }
  0x33   : > { %1530 = vmatprep.subr.bf16.mxu1 %v1609_v36 }
  0x34   : > { %864 = vmatmul.mubr.bf16.vlgmr.msra.gmra.mxu0 %v1603_v32 }
  0x35   : > { %961 = vmatmul.mubr.bf16.vlgmr.msra.gmra.mxu1 %v1606_v34  ;;  %1499 = vmatpush3.bf16.msra.mxu0 %v1609_v36 }
  0x36   : > { %1538 = vmatpush3.bf16.msra.mxu1 %v1609_v36  ;;  %871 = vmatprep.mubr.bf16.mxu0 %v1610_v37 }
  0x37   : > { %968 = vmatprep.mubr.bf16.mxu1 %v1612_v38  ;;  %1500 = vmatprep.subr.bf16.mxu0 %v1616_v39 }
  0x38   : > { %1531 = vmatprep.subr.bf16.mxu1 %v1616_v39 }
  0x39   : > { %1501 = vmatpush3.bf16.msra.mxu0 %v1616_v39 }
  0x3a   : > { %1539 = vmatpush3.bf16.msra.mxu1 %v1616_v39  ;;  %1502 = vmatprep.subr.bf16.mxu0 %v1623_v44 }
  0x3b   : > { %1532 = vmatprep.subr.bf16.mxu1 %v1623_v44 }
  0x3c   : > { %872 = vmatmul.mubr.bf16.gmra.mxu0 %v1614_v40 }
  0x3d   : > { %969 = vmatmul.mubr.bf16.gmra.mxu1 %v1615_v41  ;;  %879 = vmatprep.mubr.bf16.mxu0 %v1617_v42 }
  0x3e   : > { %976 = vmatprep.mubr.bf16.mxu1 %v1619_v43  ;;  %1503 = vmatpush3.bf16.msra.mxu0 %v1623_v44 }
  0x3f   : > { %1540 = vmatpush3.bf16.msra.mxu1 %v1623_v44  ;;  %1504 = vmatprep.subr.bf16.mxu0 %v1630_v45 }
  0x40   : > { %1533 = vmatprep.subr.bf16.mxu1 %v1630_v45 }
  0x42   : > { %1505 = vmatpush3.bf16.msra.mxu0 %v1630_v45 }
  0x43   : > { %1541 = vmatpush3.bf16.msra.mxu1 %v1630_v45  ;;  %1506 = vmatprep.subr.bf16.mxu0 %v1637_v50 }
  0x44   : > { %880 = vmatmul.mubr.bf16.gmra.mxu0 %v1621_v46  ;;  %1534 = vmatprep.subr.bf16.mxu1 %v1637_v50 }
  0x45   : > { %977 = vmatmul.mubr.bf16.gmra.mxu1 %v1622_v47  ;;  %887 = vmatprep.mubr.bf16.mxu0 %v1624_v48 }
  0x46   : > { %984 = vmatprep.mubr.bf16.mxu1 %v1626_v49  ;;  %1507 = vmatpush3.bf16.msra.mxu0 %v1637_v50 }
  0x47   : > { %1542 = vmatpush3.bf16.msra.mxu1 %v1637_v50  ;;  %1508 = vmatprep.subr.bf16.mxu0 %v1644_v51 }
  0x48   : > { %1535 = vmatprep.subr.bf16.mxu1 %v1644_v51 }
  0x4a   : > { %1509 = vmatpush3.bf16.msra.mxu0 %v1644_v51 }
  0x4b   : > { %1543 = vmatpush3.bf16.msra.mxu1 %v1644_v51  ;;  %1510 = vmatprep.subr.bf16.mxu0 %v1651_v55 }
  0x4c   : > { %888 = vmatmul.mubr.bf16.gmra.mxu0 %v1628_v52  ;;  %1536 = vmatprep.subr.bf16.mxu1 %v1651_v55 }
  0x4d   : > { %985 = vmatmul.mubr.bf16.gmra.mxu1 %v1629_v53  ;;  %895 = vmatprep.mubr.bf16.mxu0 %v1631_v54 }
  0x4e   : > { %992 = vmatprep.mubr.bf16.mxu1 %v1633_v56  ;;  %1511 = vmatpush3.bf16.msra.mxu0 %v1651_v55 }
  0x4f   : > { %1544 = vmatpush3.bf16.msra.mxu1 %v1651_v55  ;;  %1512 = vmatprep.subr.bf16.mxu0 %v1658_v57 }
  0x50   : > { %1537 = vmatprep.subr.bf16.mxu1 %v1658_v57 }
  0x52   : > { %1513 = vmatpush3.bf16.msra.mxu0 %v1658_v57 }
  0x53   : > { %1545 = vmatpush3.bf16.msra.mxu1 %v1658_v57 }
  0x54   : > { %896 = vmatmul.mubr.bf16.gmra.mxu0 %v1635_v58 }
  0x55   : > { %993 = vmatmul.mubr.bf16.gmra.mxu1 %v1636_v59  ;;  %903 = vmatprep.mubr.bf16.mxu0 %v1638_v60 }
  0x56   : > { %1000 = vmatprep.mubr.bf16.mxu1 %v1640_v61 }
  0x5c   : > { %904 = vmatmul.mubr.bf16.gmra.mxu0 %v1642_v62 }
  0x5d   : > { %1001 = vmatmul.mubr.bf16.gmra.mxu1 %v1643_v63  ;;  %911 = vmatprep.mubr.bf16.mxu0 %v1645_v0 }
  0x5e   : > { %1008 = vmatprep.mubr.bf16.mxu1 %v1647_v1 }
  0x64   : > { %912 = vmatmul.mubr.bf16.gmra.mxu0 %v1649_v2 }
  0x65   : > { %1009 = vmatmul.mubr.bf16.gmra.mxu1 %v1650_v3  ;;  %919 = vmatprep.mubr.bf16.mxu0 %v1652_v4 }
  0x66   : > { %1016 = vmatprep.mubr.bf16.mxu1 %v1654_v5 }
  0x6c   : > { %920 = vmatmul.mubr.bf16.gmra.mxu0 %v1656_v6  ;;  %v1878_v6 = vld [vmem:[%s238_s25] ss:$0 sm:$0xff] }
  0x6d   : > { %1017 = vmatmul.mubr.bf16.gmra.mxu1 %v1657_v7  ;;  %1514 = vmatprep.mubr.bf16.mxu0 %v1659_v8 }
  0x6e   : > { %1522 = vmatprep.mubr.bf16.mxu1 %v1660_v9 }
  0x74   : > { %1515 = vmatmul.mubr.bf16.vlgmr.msra.gmra.mxu0 %v1661_v10 }
  0x75   : > { %1523 = vmatmul.mubr.bf16.vlgmr.msra.gmra.mxu1 %v1662_v11  ;;  %1518 = vmatprep.mubr.bf16.mxu0 %v1663_v12 }
  0x76   : > { %1526 = vmatprep.mubr.bf16.mxu1 %v1664_v13 }
  0x7c   : > { %1519 = vmatmul.mubr.bf16.gmra.mxu0 %v1665_v14 }
  0x7d   : > { %1527 = vmatmul.mubr.bf16.gmra.mxu1 %v1666_v15 }
  0xf4   : > { %v1370_v16 = vpop.f32.mrf.mxu0 }
  0xf5   : > { %v1826_v17 = vpop.f32.mrf.mxu1 }
  0xf6   : > { %v1371_v18 = vpop.f32.mrf.mxu0 }
  0xf7   : > { %v1828_v19 = vpop.f32.mrf.mxu1  ;;  %v1372_v4 = vadd.f32 %v1371_v18, %v1370_v16 }
  0xf8   : > { %v1373_v20 = vpop.f32.mrf.mxu0  ;;  %v1436_v16 = vadd.f32 %v1828_v19, %v1826_v17 }
  0xf9   : > { %v1830_v21 = vpop.f32.mrf.mxu1  ;;  %v866_v14 = vadd.f32 %v1372_v4, %v1878_v6 }
  0xfa   : > { %v1374_v22 = vpop.f32.mrf.mxu0 }
  0xfb   : > { %v1438_v23 = vpop.f32.mrf.mxu1  ;;  %v1375_v7 = vadd.f32 %v1374_v22, %v1373_v20 }
  0xfc   : > { %v1376_v24 = vpop.f32.mrf.mxu0  ;;  %v1439_v20 = vadd.f32 %v1438_v23, %v1830_v21  ;;  %v963_v21 = vadd.f32 %v1436_v16, %v866_v14 }
  0xfd   : > { %v1832_v25 = vpop.f32.mrf.mxu1  ;;  %v869_v18 = vadd.f32 %v1375_v7, %v1878_v6 }
  0xfe   : > { %v1377_v26 = vpop.f32.mrf.mxu0 }
  0xff   : > { %v1834_v27 = vpop.f32.mrf.mxu1  ;;  %v1378_v9 = vadd.f32 %v1377_v26, %v1376_v24 }
 0x100   : > { %v1379_v28 = vpop.f32.mrf.mxu0  ;;  %v1442_v17 = vadd.f32 %v1834_v27, %v1832_v25 }
 0x101   : > { %v1836_v29 = vpop.f32.mrf.mxu1  ;;  %v874_v22 = vadd.f32 %v1378_v9, %v1878_v6 }
 0x102   : > { %v1380_v30 = vpop.f32.mrf.mxu0 }
 0x103   : > { %v1838_v31 = vpop.f32.mrf.mxu1  ;;  %v1381_v11 = vadd.f32 %v1380_v30, %v1379_v28 }
 0x104   : > { %v1382_v32 = vpop.f32.mrf.mxu0  ;;  %v1445_v23 = vadd.f32 %v1838_v31, %v1836_v29 }
 0x105   : > { %v1840_v33 = vpop.f32.mrf.mxu1  ;;  %v877_v30 = vadd.f32 %v1381_v11, %v1878_v6 }
 0x106   : > { %v1383_v34 = vpop.f32.mrf.mxu0 }
 0x107   : > { %v1842_v35 = vpop.f32.mrf.mxu1  ;;  %v1384_v12 = vadd.f32 %v1383_v34, %v1382_v32  ;;  %v974_v31 = vadd.f32 %v1445_v23, %v877_v30 }
 0x108   : > { %v1385_v36 = vpop.f32.mrf.mxu0 }
 0x109   : > { %v1844_v37 = vpop.f32.mrf.mxu1  ;;  %v882_v32 = vadd.f32 %v1384_v12, %v1878_v6 }
 0x10a   : > { %1976 = vst [vmem:[#allocation2_spill] sm:$0xff] %v1844_v37  ;;  %v1386_v38 = vpop.f32.mrf.mxu0 }
 0x10b   : > { %v1846_v39 = vpop.f32.mrf.mxu1  ;;  %v1387_v34 = vadd.f32 %v1386_v38, %v1385_v36  ;;  %v966_v36 = vadd.f32 %v1439_v20, %v869_v18 }
 0x10c   : > { %1977 = vst [vmem:[#allocation3_spill] sm:$0xff] %v1846_v39  ;;  %v1388_v40 = vpop.f32.mrf.mxu0 }
 0x10d   : > { %v1848_v41 = vpop.f32.mrf.mxu1 }
 0x10e   : > { %v1389_v42 = vpop.f32.mrf.mxu0 }
 0x10f   : > { %v1850_v43 = vpop.f32.mrf.mxu1  ;;  %v1390_v24 = vadd.f32 %v1389_v42, %v1388_v40  ;;  %v1448_v40 = vadd.f32 %v1842_v35, %v1840_v33 }
 0x110   : > { %v1852_v44 = vpop.f32.mrf.mxu0  ;;  %v1454_v35 = vadd.f32 %v1850_v43, %v1848_v41 }
 0x111   : > { %v1854_v45 = vpop.f32.mrf.mxu1  ;;  %v890_v38 = vadd.f32 %v1390_v24, %v1878_v6  ;;  %v1912_v33 = vadd.f32 %v1448_v40, %v882_v32 }
 0x112   : > { %v1856_v46 = vpop.f32.mrf.mxu0 }
 0x113   : > { %v1858_v47 = vpop.f32.mrf.mxu1  ;;  %v1393_v16 = vadd.f32 %v1856_v46, %v1852_v44 }
 0x114   : > { %v1394_v48 = vpop.f32.mrf.mxu0 }
 0x115   : > { %v1860_v49 = vpop.f32.mrf.mxu1 }
 0x116   : > { %v1395_v50 = vpop.f32.mrf.mxu0 }
 0x117   : > { %v1862_v51 = vpop.f32.mrf.mxu1  ;;  %v1396_v26 = vadd.f32 %v1395_v50, %v1394_v48 }
 0x118   : > { %v1397_v52 = vpop.f32.mrf.mxu0 }
 0x119   : > { %v1864_v53 = vpop.f32.mrf.mxu1  ;;  %v898_v50 = vadd.f32 %v1396_v26, %v1878_v6 }
 0x11a   : > { %v1398_v54 = vpop.f32.mrf.mxu0 }
 0x11b   : > { %v1866_v55 = vpop.f32.mrf.mxu1  ;;  %v1399_v42 = vadd.f32 %v1398_v54, %v1397_v52  ;;  %v1460_v52 = vadd.f32 %v1862_v51, %v1860_v49  ;;  %v987_v49 = vadd.f32 %v1454_v35, %v890_v38  ;;  %v1457_v38 = vadd.f32 %v1858_v47, %v1854_v45  ;;  %v1978_v35 = vld [vmem:[#allocation2_spill] sm:$0xff] }
 0x11c   : > { %v1400_v56 = vpop.f32.mrf.mxu0  ;;  %v1463_v51 = vadd.f32 %v1866_v55, %v1864_v53 }
 0x11d   : > { %v1464_v57 = vpop.f32.mrf.mxu1  ;;  %v901_v9 = vadd.f32 %v1399_v42, %v1878_v6 }
 0x11e   : > { %v1401_v58 = vpop.f32.mrf.mxu0 }
 0x11f   : > { %v1465_v59 = vpop.f32.mrf.mxu1  ;;  %v1402_v15 = vadd.f32 %v1401_v58, %v1400_v56  ;;  %v998_v53 = vadd.f32 %v1463_v51, %v901_v9 }
 0x120   : > { %v1403_v60 = vpop.f32.mrf.mxu0  ;;  %v1466_v25 = vadd.f32 %v1465_v59, %v1464_v57 }
 0x121   : > { %v1467_v61 = vpop.f32.mrf.mxu1  ;;  %v906_v19 = vadd.f32 %v1402_v15, %v1878_v6 }
 0x122   : > { %v1404_v62 = vpop.f32.mrf.mxu0 }
 0x123   : > { %v1468_v63 = vpop.f32.mrf.mxu1  ;;  %v1405_v56 = vadd.f32 %v1404_v62, %v1403_v60  ;;  %v971_v60 = vadd.f32 %v1442_v17, %v874_v22  ;;  %v1908_v62 = vadd.f32 %v1387_v34, %v1878_v6  ;;  %v1003_v59 = vadd.f32 %v1466_v25, %v906_v19 }
 0x124   : > { %v1406_v0 = vpop.f32.mrf.mxu0  ;;  %v1469_v11 = vadd.f32 %v1468_v63, %v1467_v61  ;;  %v893_v19 = vadd.f32 %v1393_v16, %v1878_v6 }
 0x125   : > { %v1868_v1 = vpop.f32.mrf.mxu1  ;;  %v909_v7 = vadd.f32 %v1405_v56, %v1878_v6 }
 0x126   : > { %v1407_v2 = vpop.f32.mrf.mxu0 }
 0x127   : > { %v1874_v3 = vpop.f32.mrf.mxu1  ;;  %v1408_v12 = vadd.f32 %v1407_v2, %v1406_v0  ;;  %v1006_v2 = vadd.f32 %v1469_v11, %v909_v7 }
 0x128   : > { %v1876_v5 = vpop.f32.mrf.mxu0 }
 0x129   : > { %v1880_v8 = vpop.f32.mrf.mxu1  ;;  %v914_v24 = vadd.f32 %v1408_v12, %v1878_v6 }
 0x12a   : > { %v1882_v10 = vpop.f32.mrf.mxu0 }
 0x12b   : > { %v1884_v13 = vpop.f32.mrf.mxu1  ;;  %v1411_v55 = vadd.f32 %v1882_v10, %v1876_v5 }
 0x12c   : > { %v1412_v39 = vpop.f32.mrf.mxu0 }
 0x12d   : > { %v1890_v37 = vpop.f32.mrf.mxu1 }
 0x12e   : > { %v1413_v28 = vpop.f32.mrf.mxu0 }
 0x12f   : > { %v1477_v58 = vpop.f32.mrf.mxu1  ;;  %v1414_v54 = vadd.f32 %v1413_v28, %v1412_v39  ;;  %v995_v39 = vadd.f32 %v1460_v52, %v898_v50  ;;  %v1979_v52 = vld [vmem:[#allocation3_spill] sm:$0xff] }
 0x130   : > { %v1415_v4 = vpop.f32.mrf.mxu0  ;;  %v1478_v32 = vadd.f32 %v1477_v58, %v1890_v37 }
 0x131   : > { %v1903_v48 = vpop.f32.mrf.mxu1  ;;  %v922_v44 = vadd.f32 %v1414_v54, %v1878_v6  ;;  %v1451_v54 = vadd.f32 %v1979_v52, %v1978_v35 }
 0x132   : > { %v1416_v27 = vpop.f32.mrf.mxu0 }
 0x133   : > { %v1480_v29 = vpop.f32.mrf.mxu1  ;;  %v1417_v46 = vadd.f32 %v1416_v27, %v1415_v4  ;;  %v1472_v4 = vadd.f32 %v1874_v3, %v1868_v1  ;;  %v1019_v58 = vadd.f32 %v1478_v32, %v922_v44 }
 0x134   : > { %v1516_v57 = vpop.f32.mrf.mxu0  ;;  %v1481_v27 = vadd.f32 %v1480_v29, %v1903_v48 }
 0x135   : > { %v1068_v14 = vadd.f32 %v1516_v57, %v971_v60  ;;  %v1524_v15 = vpop.f32.mrf.mxu1  ;;  %v925_v42 = vadd.f32 %v1417_v46, %v1878_v6  ;;  %v1011_v3 = vadd.f32 %v1472_v4, %v914_v24 }
 0x136   : > { %v1100_v41 = vadd.f32 %v1524_v15, %v1003_v59  ;;  %v1059_v43 = vpop.f32.mrf.mxu0  ;;  %v990_v59 = vadd.f32 %v1457_v38, %v893_v19 }
 0x137   : > { %v1124_v61 = vmax.f32 %v1068_v14, 0.0  ;;  %v1060_v63 = vadd.f32 %v1059_v43, %v963_v21  ;;  %v1091_v0 = vpop.f32.mrf.mxu1  ;;  %v1022_v11 = vadd.f32 %v1481_v27, %v925_v42 }
 0x138   : > { %v1132_v18 = vmax.f32 %v1100_v41, 0.0  ;;  %v1092_v20 = vadd.f32 %v1091_v0, %v995_v39  ;;  %v1517_v22 = vpop.f32.mrf.mxu0 }
 0x139   : > { %1140 = vst [vmem:[%s1924_s29 + $0x10] sm:$0xff] %v1124_v61  ;;  %v1122_v26 = vmax.f32 %v1060_v63, 0.0  ;;  %v1071_v28 = vadd.f32 %v1517_v22, %v974_v31  ;;  %v1525_v30 = vpop.f32.mrf.mxu1 }
 0x13a   : > { %1148 = vst [vmem:[%s1924_s29 + $0x50] sm:$0xff] %v1132_v18  ;;  %v1130_v34 = vmax.f32 %v1092_v20, 0.0  ;;  %v1103_v56 = vadd.f32 %v1525_v30, %v1006_v2  ;;  %v1062_v17 = vpop.f32.mrf.mxu0 }
 0x13b   : > { %1138 = vst [vmem:[%s1924_s29] sm:$0xff] %v1122_v26  ;;  %v1125_v21 = vmax.f32 %v1071_v28, 0.0  ;;  %v1063_v23 = vadd.f32 %v1062_v17, %v966_v36  ;;  %v1094_v40 = vpop.f32.mrf.mxu1  ;;  %v917_v36 = vadd.f32 %v1411_v55, %v1878_v6  ;;  %v1475_v6 = vadd.f32 %v1884_v13, %v1880_v8 }
 0x13c   : > { %1146 = vst [vmem:[%s1924_s29 + $0x40] sm:$0xff] %v1130_v34  ;;  %v1133_v5 = vmax.f32 %v1103_v56, 0.0  ;;  %v1095_v37 = vadd.f32 %v1094_v40, %v998_v53  ;;  %v1520_v10 = vpop.f32.mrf.mxu0 }
 0x13d   : > { %1141 = vst [vmem:[%s1924_s29 + $0x18] sm:$0xff] %v1125_v21  ;;  %v1123_v50 = vmax.f32 %v1063_v23, 0.0  ;;  %v1084_v25 = vadd.f32 %v1520_v10, %v987_v49  ;;  %v1528_v1 = vpop.f32.mrf.mxu1  ;;  %v1014_v41 = vadd.f32 %v1475_v6, %v917_v36 }
 0x13e   : > { %1149 = vst [vmem:[%s1924_s29 + $0x58] sm:$0xff] %v1133_v5  ;;  %v1131_v60 = vmax.f32 %v1095_v37, 0.0  ;;  %v1116_v7 = vadd.f32 %v1528_v1, %v1019_v58  ;;  %v1075_v31 = vpop.f32.mrf.mxu0 }
 0x13f   : > { %1139 = vst [vmem:[%s1924_s29 + $0x8] sm:$0xff] %v1123_v50  ;;  %v1128_v45 = vmax.f32 %v1084_v25, 0.0  ;;  %v1076_v47 = vadd.f32 %v1075_v31, %v1912_v33  ;;  %v1107_v57 = vpop.f32.mrf.mxu1  ;;  %v982_v33 = vadd.f32 %v1451_v54, %v1908_v62 }
 0x140   : > { %1147 = vst [vmem:[%s1924_s29 + $0x48] sm:$0xff] %v1131_v60  ;;  %v1136_v48 = vmax.f32 %v1116_v7, 0.0  ;;  %v1108_v29 = vadd.f32 %v1107_v57, %v1011_v3  ;;  %v1521_v9 = vpop.f32.mrf.mxu0 }
 0x141   : > { %1144 = vst [vmem:[%s1924_s29 + $0x30] sm:$0xff] %v1128_v45  ;;  %v1126_v12 = vmax.f32 %v1076_v47, 0.0  ;;  %v1087_v14 = vadd.f32 %v1521_v9, %v990_v59  ;;  %v1529_v15 = vpop.f32.mrf.mxu1 }
 0x142   : > { %1152 = vst [vmem:[%s1924_s29 + $0x70] sm:$0xff] %v1136_v48  ;;  %v1134_v16 = vmax.f32 %v1108_v29, 0.0  ;;  %v1119_v8 = vadd.f32 %v1529_v15, %v1022_v11  ;;  %v1078_v13 = vpop.f32.mrf.mxu0 }
 0x143   : > { %1142 = vst [vmem:[%s1924_s29 + $0x20] sm:$0xff] %v1126_v12  ;;  %v1129_v43 = vmax.f32 %v1087_v14, 0.0  ;;  %v1079_v39 = vadd.f32 %v1078_v13, %v982_v33  ;;  %v1110_v49 = vpop.f32.mrf.mxu1 }
 0x144   : > { %1150 = vst [vmem:[%s1924_s29 + $0x60] sm:$0xff] %v1134_v16  ;;  %v1137_v51 = vmax.f32 %v1119_v8, 0.0  ;;  %v1111_v61 = vadd.f32 %v1110_v49, %v1014_v41 }
 0x145   : > { %1145 = vst [vmem:[%s1924_s29 + $0x38] sm:$0xff] %v1129_v43  ;;  %v1127_v63 = vmax.f32 %v1079_v39, 0.0 }
 0x146   : > { %1153 = vst [vmem:[%s1924_s29 + $0x78] sm:$0xff] %v1137_v51  ;;  %v1135_v0 = vmax.f32 %v1111_v61, 0.0 }
 0x147   : > { %1143 = vst [vmem:[%s1924_s29 + $0x28] sm:$0xff] %v1127_v63 }
 0x148   : > { %1151 = vst [vmem:[%s1924_s29 + $0x68] sm:$0xff] %v1135_v0 }
 0x149 PF: > { %s13_s14 = sadd.s32 1, %s1689_s14   ;;  %s1980_s12 = smov %s1685_s13 }
 0x14a   : > { %p10_p5 = scmp.ge.s32.totalorder %s13_s14, 6   ;;  %s1981_s13 = smov %s1983_s15 }
 0x14c   :  { %12 = sbr.rel (!%p10_p5) target bundleno = 2 (0x2), region = 68 }

// kernel: cvae_forward.19
= control target key start
LH: loop header
LB: loop body
LE: loop exit
PB: predicated region body
PF: predicated region fallthrough
CT: control target
= control target key end

     0   :  { %s2986_s12 = smov 0   ;;  %s2988_s13 = smov 0   ;;  %s3475_s0 = inlined_call_operand.vmem [shape: bf16[4,512,384], index: 0, kind: input, shape index: {}]   ;;  %s3476_s1 = inlined_call_operand.vmem [shape: bf16[4,384,128], index: 1, kind: input, shape index: {}]   ;;  %s3477_s2 = inlined_call_operand.vmem [shape: f32[4,1,128], index: 2, kind: input, shape index: {}]   ;;  %s3478_s3 = inlined_call_operand.vmem [shape: f32[4,512,128], index: 3, kind: output, shape index: {}]  }
   0x1   :  { %s2990_s14 = smov 0  }
   0x2 LB: > { %s25_s15 = sadd.s32 1, %s2959_s13  ;;  %p2224_p0 = scmp.ge.s32.totalorder %s2963_s14, 1  ;;  %s2963_s14 = sphi %s2990_s14, %s13_s14   ;;  %s2959_s13 = sphi %s2988_s13, %s3480_s13   ;;  %s2955_s12 = sphi %s2986_s12, %s3479_s12  }
   0x3   : > { %p27_p1 = scmp.ge.s32.totalorder %s25_s15, 4  ;;  %p179_p2 = scmp.lt.s32.totalorder %s2963_s14, 5 }
   0x5   : > { %s3482_s15 = smov (%p27_p1, %s25_s15), 0  ;;  %p180_p3 = pnand %p2224_p0, %p179_p2 }
   0x6   : > { %p220_p4 = scmp.lt.s32.totalorder (!%p180_p3), %s2955_s12, 3 }
   0x7   : > { %183 = sbr.rel (%p180_p3) target bundleno = 513 (0x201), region = 32 }
   0xc   : > { %v2965_v0 = vmov 0   ;;  %s3484_s12 = smov (!%p220_p4, %s2955_s12), 3 }
   0xd   : > { %1087 = vmatprep.subr.bf16.mxu0 %v2965_v0  ;;  %2473 = vmatprep.subr.bf16.mxu1 %v2965_v0  ;;  %s2506_s16 = smul.u32 192, %s3484_s12  ;;  %s3230_s26 = scalar_lea.vmem %s3477_s2, %s3484_s12 }
   0xe   : > { %s2505_s20 = smul.u32 768, %s3484_s12  ;;  %s2352_s27 = sshll.u32 %s3484_s12, 9 }
   0xf   : > { %s3012_s19 = scalar_lea.vmem %s3476_s1, %s2506_s16  ;;  %s3295_s30 = scalar_lea.vmem %s3478_s3, %s2352_s27 }
  0x10   : > { %v2532_v1 = vld [vmem:[%s3012_s19 + $0x38] sm:$0xff]   ;;  %v2533_v2 = vld [vmem:[%s3012_s19 + $0x30] sm:$0xff]   ;;  %v2534_v3 = vld [vmem:[%s3012_s19 + $0x28] sm:$0xff]   ;;  %s3029_s23 = scalar_lea.vmem %s3475_s0, %s2505_s20 }
  0x11   : > { %1088 = vmatpush1.bf16.msra.mxu0 %v2532_v1  ;;  %2489 = vmatpush1.bf16.msra.mxu1 %v2532_v1  ;;  %v2535_v4 = vld [vmem:[%s3012_s19 + $0x20] sm:$0xff]   ;;  %v2536_v5 = vld [vmem:[%s3012_s19 + $0x18] sm:$0xff]   ;;  %v2537_v7 = vld [vmem:[%s3012_s19 + $0x10] sm:$0xff]  }
  0x12   : > { %1089 = vmatprep.subr.bf16.mxu0 %v2965_v0  ;;  %2474 = vmatprep.subr.bf16.mxu1 %v2965_v0  ;;  %v2550_v6 = vld [vmem:[%s3029_s23 + $0x4] ss:$12 sps:$4 sm:$0xff]   ;;  %v2538_v9 = vld [vmem:[%s3012_s19 + $0x8] sm:$0xff]   ;;  %v2540_v11 = vld [vmem:[%s3012_s19 + $0x78] sm:$0xff]  }
  0x13   : > { %v2553_v8 = vld [vmem:[%s3029_s23 + $0x244] ss:$12 sps:$4 sm:$0xff]   ;;  %1119 = vmatprep.mubr.bf16.mxu0 %v2550_v6  ;;  %v2542_v13 = vld [vmem:[%s3012_s19 + $0x68] sm:$0xff]   ;;  %v2544_v15 = vld [vmem:[%s3012_s19 + $0x58] sm:$0xff]  }
  0x14   : > { %1311 = vmatprep.mubr.bf16.mxu1 %v2553_v8  ;;  %v2539_v10 = vld [vmem:[%s3012_s19] sm:$0xff]   ;;  %v2541_v12 = vld [vmem:[%s3012_s19 + $0x70] sm:$0xff]   ;;  %v2546_v17 = vld [vmem:[%s3012_s19 + $0x48] sm:$0xff]  }
  0x15   : > { %1090 = vmatpush1.bf16.msra.mxu0 %v2533_v2  ;;  %2490 = vmatpush1.bf16.msra.mxu1 %v2533_v2  ;;  %v2543_v14 = vld [vmem:[%s3012_s19 + $0x60] sm:$0xff]   ;;  %v2545_v16 = vld [vmem:[%s3012_s19 + $0x50] sm:$0xff]   ;;  %v2554_v19 = vld [vmem:[%s3012_s19 + $0xb8] sm:$0xff]  }
  0x16   : > { %1091 = vmatprep.subr.bf16.mxu0 %v2965_v0  ;;  %2475 = vmatprep.subr.bf16.mxu1 %v2965_v0  ;;  %v2547_v18 = vld [vmem:[%s3012_s19 + $0x40] sm:$0xff]   ;;  %v2555_v22 = vld [vmem:[%s3029_s23 + $0x1c] ss:$12 sps:$4 sm:$0xff]   ;;  %v2561_v24 = vld [vmem:[%s3012_s19 + $0xb0] sm:$0xff]  }
  0x17   : > { %v2548_v20 = vld [vmem:[%s3029_s23] ss:$12 sps:$4 sm:$0xff]   ;;  %v2557_v23 = vld [vmem:[%s3029_s23 + $0x25c] ss:$12 sps:$4 sm:$0xff]   ;;  %v2559_v26 = vld [vmem:[%s3029_s23 + $0x18] ss:$12 sps:$4 sm:$0xff]  }
  0x18   : > { %v2551_v21 = vld [vmem:[%s3029_s23 + $0x240] ss:$12 sps:$4 sm:$0xff]   ;;  %v2560_v27 = vld [vmem:[%s3029_s23 + $0x258] ss:$12 sps:$4 sm:$0xff]   ;;  %v2566_v31 = vld [vmem:[%s3029_s23 + $0x30] ss:$12 sps:$4 sm:$0xff]  }
  0x19   : > { %1092 = vmatpush1.bf16.msra.mxu0 %v2534_v3  ;;  %2491 = vmatpush1.bf16.msra.mxu1 %v2534_v3  ;;  %v2568_v25 = vld [vmem:[%s3012_s19 + $0xa8] sm:$0xff]   ;;  %v2562_v28 = vld [vmem:[%s3029_s23 + $0x34] ss:$12 sps:$4 sm:$0xff]   ;;  %v2582_v32 = vld [vmem:[%s3012_s19 + $0x98] sm:$0xff]  }
  0x1a   : > { %1093 = vmatprep.subr.bf16.mxu0 %v2965_v0  ;;  %2476 = vmatprep.subr.bf16.mxu1 %v2965_v0  ;;  %v2564_v29 = vld [vmem:[%s3029_s23 + $0x274] ss:$12 sps:$4 sm:$0xff]   ;;  %v2567_v33 = vld [vmem:[%s3029_s23 + $0x270] ss:$12 sps:$4 sm:$0xff]   ;;  %v2569_v34 = vld [vmem:[%s3029_s23 + $0x4c] ss:$12 sps:$4 sm:$0xff]  }
  0x1b   : > { %v2575_v30 = vld [vmem:[%s3012_s19 + $0xa0] sm:$0xff]   ;;  %v2571_v35 = vld [vmem:[%s3029_s23 + $0x28c] ss:$12 sps:$4 sm:$0xff]   ;;  %v2589_v36 = vld [vmem:[%s3012_s19 + $0x90] sm:$0xff]  }
  0x1c   : > { %v2573_v37 = vld [vmem:[%s3029_s23 + $0x48] ss:$12 sps:$4 sm:$0xff]   ;;  %v2576_v39 = vld [vmem:[%s3029_s23 + $0x64] ss:$12 sps:$4 sm:$0xff]   ;;  %v2580_v43 = vld [vmem:[%s3029_s23 + $0x60] ss:$12 sps:$4 sm:$0xff]  }
  0x1d   : > { %1094 = vmatpush1.bf16.msra.mxu0 %v2535_v4  ;;  %2492 = vmatpush1.bf16.msra.mxu1 %v2535_v4  ;;  %v2574_v38 = vld [vmem:[%s3029_s23 + $0x288] ss:$12 sps:$4 sm:$0xff]   ;;  %v2578_v40 = vld [vmem:[%s3029_s23 + $0x2a4] ss:$12 sps:$4 sm:$0xff]   ;;  %v2581_v44 = vld [vmem:[%s3029_s23 + $0x2a0] ss:$12 sps:$4 sm:$0xff]  }
  0x1e   : > { %1095 = vmatprep.subr.bf16.mxu0 %v2965_v0  ;;  %2477 = vmatprep.subr.bf16.mxu1 %v2965_v0  ;;  %v2596_v41 = vld [vmem:[%s3012_s19 + $0x88] sm:$0xff]   ;;  %v2603_v42 = vld [vmem:[%s3012_s19 + $0x80] sm:$0xff]   ;;  %v2594_v51 = vld [vmem:[%s3029_s23 + $0x90] ss:$12 sps:$4 sm:$0xff]  }
  0x1f   : > { %v2583_v45 = vld [vmem:[%s3029_s23 + $0x7c] ss:$12 sps:$4 sm:$0xff]   ;;  %v2587_v47 = vld [vmem:[%s3029_s23 + $0x78] ss:$12 sps:$4 sm:$0xff]   ;;  %v2590_v49 = vld [vmem:[%s3029_s23 + $0x94] ss:$12 sps:$4 sm:$0xff]  }
  0x20   : > { %v2585_v46 = vld [vmem:[%s3029_s23 + $0x2bc] ss:$12 sps:$4 sm:$0xff]   ;;  %v2588_v48 = vld [vmem:[%s3029_s23 + $0x2b8] ss:$12 sps:$4 sm:$0xff]   ;;  %v2592_v50 = vld [vmem:[%s3029_s23 + $0x2d4] ss:$12 sps:$4 sm:$0xff]  }
  0x21   : > { %1096 = vmatpush1.bf16.msra.mxu0 %v2536_v5  ;;  %2493 = vmatpush1.bf16.msra.mxu1 %v2536_v5  ;;  %v2595_v52 = vld [vmem:[%s3029_s23 + $0x2d0] ss:$12 sps:$4 sm:$0xff]   ;;  %v2597_v53 = vld [vmem:[%s3029_s23 + $0xac] ss:$12 sps:$4 sm:$0xff]   ;;  %v2601_v55 = vld [vmem:[%s3029_s23 + $0xa8] ss:$12 sps:$4 sm:$0xff]  }
  0x22   : > { %1097 = vmatprep.subr.bf16.mxu0 %v2965_v0  ;;  %2478 = vmatprep.subr.bf16.mxu1 %v2965_v0  ;;  %v2599_v54 = vld [vmem:[%s3029_s23 + $0x2ec] ss:$12 sps:$4 sm:$0xff]   ;;  %v2602_v56 = vld [vmem:[%s3029_s23 + $0x2e8] ss:$12 sps:$4 sm:$0xff]   ;;  %v2604_v57 = vld [vmem:[%s3029_s23 + $0xc4] ss:$12 sps:$4 sm:$0xff]  }
  0x23   : > { %v2606_v58 = vld [vmem:[%s3029_s23 + $0x8] ss:$12 sps:$4 sm:$0xff]   ;;  %v2607_v59 = vld [vmem:[%s3029_s23 + $0xc0] ss:$12 sps:$4 sm:$0xff]   ;;  %v2611_v62 = vld [vmem:[%s3029_s23 + $0x38] ss:$12 sps:$4 sm:$0xff]  }
  0x24   : > { %v2608_v60 = vld [vmem:[%s3029_s23 + $0x20] ss:$12 sps:$4 sm:$0xff]   ;;  %v2609_v61 = vld [vmem:[%s3029_s23 + $0xdc] ss:$12 sps:$4 sm:$0xff]   ;;  %v2612_v63 = vld [vmem:[%s3029_s23 + $0xd8] ss:$12 sps:$4 sm:$0xff]  }
  0x25   : > { %1098 = vmatpush1.bf16.msra.mxu0 %v2537_v7  ;;  %2494 = vmatpush1.bf16.msra.mxu1 %v2537_v7  ;;  %v2614_v1 = vld [vmem:[%s3029_s23 + $0xf4] ss:$12 sps:$4 sm:$0xff]   ;;  %v2617_v3 = vld [vmem:[%s3029_s23 + $0xf0] ss:$12 sps:$4 sm:$0xff]   ;;  %v2619_v5 = vld [vmem:[%s3029_s23 + $0x10c] ss:$12 sps:$4 sm:$0xff]  }
  0x26   : > { %1099 = vmatprep.subr.bf16.mxu0 %v2965_v0  ;;  %2479 = vmatprep.subr.bf16.mxu1 %v2965_v0  ;;  %v2616_v2 = vld [vmem:[%s3029_s23 + $0x68] ss:$12 sps:$4 sm:$0xff]   ;;  %v2618_v4 = vld [vmem:[%s3029_s23 + $0x80] ss:$12 sps:$4 sm:$0xff]   ;;  %v2621_v6 = vld [vmem:[%s3029_s23 + $0x98] ss:$12 sps:$4 sm:$0xff]  }
  0x27   : > { %v2622_v7 = vld [vmem:[%s3029_s23 + $0x108] ss:$12 sps:$4 sm:$0xff]   ;;  %v2623_v8 = vld [vmem:[%s3029_s23 + $0xb0] ss:$12 sps:$4 sm:$0xff]  }
  0x29   : > { %1100 = vmatpush1.bf16.msra.mxu0 %v2538_v9  ;;  %2495 = vmatpush1.bf16.msra.mxu1 %v2538_v9  ;;  %v2624_v9 = vld [vmem:[%s3029_s23 + $0x124] ss:$12 sps:$4 sm:$0xff]  }
  0x2a   : > { %1101 = vmatprep.subr.bf16.mxu0 %v2965_v0  ;;  %2480 = vmatprep.subr.bf16.mxu1 %v2965_v0 }
  0x2d   : > { %1102 = vmatpush1.bf16.msra.mxu0 %v2539_v10  ;;  %2496 = vmatpush1.bf16.msra.mxu1 %v2539_v10  ;;  %v2626_v10 = vld [vmem:[%s3029_s23 + $0xc8] ss:$12 sps:$4 sm:$0xff]  }
  0x2e   : > { %1103 = vmatprep.subr.bf16.mxu0 %v2965_v0  ;;  %2481 = vmatprep.subr.bf16.mxu1 %v2965_v0 }
  0x31   : > { %1104 = vmatpush2.bf16.msra.mxu0 %v2540_v11  ;;  %2497 = vmatpush2.bf16.msra.mxu1 %v2540_v11  ;;  %v2627_v11 = vld [vmem:[%s3029_s23 + $0x120] ss:$12 sps:$4 sm:$0xff]  }
  0x32   : > { %1105 = vmatprep.subr.bf16.mxu0 %v2965_v0  ;;  %2482 = vmatprep.subr.bf16.mxu1 %v2965_v0 }
  0x35   : > { %1106 = vmatpush2.bf16.msra.mxu0 %v2541_v12  ;;  %2498 = vmatpush2.bf16.msra.mxu1 %v2541_v12  ;;  %v2628_v12 = vld [vmem:[%s3029_s23 + $0xe0] ss:$12 sps:$4 sm:$0xff]  }
  0x36   : > { %1107 = vmatprep.subr.bf16.mxu0 %v2965_v0  ;;  %2483 = vmatprep.subr.bf16.mxu1 %v2965_v0 }
  0x39   : > { %1108 = vmatpush2.bf16.msra.mxu0 %v2542_v13  ;;  %2499 = vmatpush2.bf16.msra.mxu1 %v2542_v13  ;;  %v2629_v13 = vld [vmem:[%s3029_s23 + $0x13c] ss:$12 sps:$4 sm:$0xff]  }
  0x3a   : > { %1109 = vmatprep.subr.bf16.mxu0 %v2965_v0  ;;  %2484 = vmatprep.subr.bf16.mxu1 %v2965_v0 }
  0x3d   : > { %1110 = vmatpush2.bf16.msra.mxu0 %v2543_v14  ;;  %2500 = vmatpush2.bf16.msra.mxu1 %v2543_v14  ;;  %v2631_v14 = vld [vmem:[%s3029_s23 + $0xf8] ss:$12 sps:$4 sm:$0xff]  }
  0x3e   : > { %1111 = vmatprep.subr.bf16.mxu0 %v2965_v0  ;;  %2485 = vmatprep.subr.bf16.mxu1 %v2965_v0 }
  0x41   : > { %1112 = vmatpush2.bf16.msra.mxu0 %v2544_v15  ;;  %2501 = vmatpush2.bf16.msra.mxu1 %v2544_v15  ;;  %v2632_v15 = vld [vmem:[%s3029_s23 + $0x138] ss:$12 sps:$4 sm:$0xff]  }
  0x42   : > { %1113 = vmatprep.subr.bf16.mxu0 %v2965_v0  ;;  %2486 = vmatprep.subr.bf16.mxu1 %v2965_v0 }
  0x45   : > { %1114 = vmatpush2.bf16.msra.mxu0 %v2545_v16  ;;  %2502 = vmatpush2.bf16.msra.mxu1 %v2545_v16  ;;  %v2633_v16 = vld [vmem:[%s3029_s23 + $0x110] ss:$12 sps:$4 sm:$0xff]  }
  0x46   : > { %1115 = vmatprep.subr.bf16.mxu0 %v2965_v0  ;;  %2487 = vmatprep.subr.bf16.mxu1 %v2965_v0 }
  0x49   : > { %1116 = vmatpush2.bf16.msra.mxu0 %v2546_v17  ;;  %2503 = vmatpush2.bf16.msra.mxu1 %v2546_v17  ;;  %v2634_v17 = vld [vmem:[%s3029_s23 + $0x154] ss:$12 sps:$4 sm:$0xff]  }
  0x4a   : > { %1117 = vmatprep.subr.bf16.mxu0 %v2965_v0  ;;  %2488 = vmatprep.subr.bf16.mxu1 %v2965_v0  ;;  %v2613_v0 = vld [vmem:[%s3029_s23 + $0x50] ss:$12 sps:$4 sm:$0xff]  }
  0x4d   : > { %1118 = vmatpush2.bf16.msra.mxu0 %v2547_v18  ;;  %2504 = vmatpush2.bf16.msra.mxu1 %v2547_v18  ;;  %v2636_v18 = vld [vmem:[%s3029_s23 + $0x128] ss:$12 sps:$4 sm:$0xff]  }
  0x4e   : > { %2393 = vmatprep.subr.bf16.mxu1 %v2554_v19 }
  0x50   : > { %1120 = vmatmul.mubr.bf16.vlgmr.msra.gmra.mxu0 %v2548_v20  ;;  %1312 = vmatmul.mubr.bf16.vlgmr.msra.gmra.mxu1 %v2551_v21  ;;  %v2638_v20 = vld [vmem:[%s3029_s23 + $0x140] ss:$12 sps:$4 sm:$0xff]  }
  0x51   : > { %2394 = vmatpush3.bf16.msra.mxu1 %v2554_v19  ;;  %1127 = vmatprep.mubr.bf16.mxu0 %v2555_v22  ;;  %v2637_v19 = vld [vmem:[%s3029_s23 + $0x150] ss:$12 sps:$4 sm:$0xff]   ;;  %v2639_v21 = vld [vmem:[%s3029_s23 + $0x16c] ss:$12 sps:$4 sm:$0xff]  }
  0x52   : > { %1319 = vmatprep.mubr.bf16.mxu1 %v2557_v23  ;;  %2395 = vmatprep.subr.bf16.mxu1 %v2561_v24  ;;  %v2641_v22 = vld [vmem:[%s3029_s23 + $0x158] ss:$12 sps:$4 sm:$0xff]   ;;  %v2642_v23 = vld [vmem:[%s3029_s23 + $0x168] ss:$12 sps:$4 sm:$0xff]  }
  0x55   : > { %2396 = vmatpush3.bf16.msra.mxu1 %v2561_v24  ;;  %v2643_v24 = vld [vmem:[%s3029_s23 + $0x170] ss:$12 sps:$4 sm:$0xff]  }
  0x56   : > { %2397 = vmatprep.subr.bf16.mxu1 %v2568_v25 }
  0x58   : > { %1128 = vmatmul.mubr.bf16.gmra.mxu0 %v2559_v26  ;;  %1320 = vmatmul.mubr.bf16.gmra.mxu1 %v2560_v27  ;;  %v2646_v26 = vld [vmem:[%s3029_s23 + $0x188] ss:$12 sps:$4 sm:$0xff]   ;;  %v2647_v27 = vld [vmem:[%s3029_s23 + $0x180] ss:$12 sps:$4 sm:$0xff]  }
  0x59   : > { %1135 = vmatprep.mubr.bf16.mxu0 %v2562_v28  ;;  %1327 = vmatprep.mubr.bf16.mxu1 %v2564_v29  ;;  %v2648_v28 = vld [vmem:[%s3029_s23 + $0x1a0] ss:$12 sps:$4 sm:$0xff]   ;;  %v2649_v29 = vld [vmem:[%s3029_s23 + $0x19c] ss:$12 sps:$4 sm:$0xff]  }
  0x5a   : > { %2398 = vmatpush3.bf16.msra.mxu1 %v2568_v25  ;;  %v2644_v25 = vld [vmem:[%s3029_s23 + $0x184] ss:$12 sps:$4 sm:$0xff]  }
  0x5b   : > { %2399 = vmatprep.subr.bf16.mxu1 %v2575_v30 }
  0x5e   : > { %2400 = vmatpush3.bf16.msra.mxu1 %v2575_v30  ;;  %v2651_v30 = vld [vmem:[%s3029_s23 + $0x1b8] ss:$12 sps:$4 sm:$0xff]  }
  0x5f   : > { %2401 = vmatprep.subr.bf16.mxu1 %v2582_v32 }
  0x60   : > { %1136 = vmatmul.mubr.bf16.gmra.mxu0 %v2566_v31  ;;  %1328 = vmatmul.mubr.bf16.gmra.mxu1 %v2567_v33  ;;  %v2652_v31 = vld [vmem:[%s3029_s23 + $0x198] ss:$12 sps:$4 sm:$0xff]   ;;  %v2654_v33 = vld [vmem:[%s3029_s23 + $0x1b4] ss:$12 sps:$4 sm:$0xff]  }
  0x61   : > { %1143 = vmatprep.mubr.bf16.mxu0 %v2569_v34  ;;  %1335 = vmatprep.mubr.bf16.mxu1 %v2571_v35  ;;  %v2656_v34 = vld [vmem:[%s3029_s23 + $0x1e8] ss:$12 sps:$4 sm:$0xff]   ;;  %v2657_v35 = vld [vmem:[%s3029_s23 + $0x1b0] ss:$12 sps:$4 sm:$0xff]  }
  0x62   : > { %2402 = vmatpush3.bf16.msra.mxu1 %v2582_v32  ;;  %v2653_v32 = vld [vmem:[%s3029_s23 + $0x1d0] ss:$12 sps:$4 sm:$0xff]  }
  0x63   : > { %2403 = vmatprep.subr.bf16.mxu1 %v2589_v36 }
  0x66   : > { %2404 = vmatpush3.bf16.msra.mxu1 %v2589_v36  ;;  %v2658_v36 = vld [vmem:[%s3029_s23 + $0x200] ss:$12 sps:$4 sm:$0xff]  }
  0x67   : > { %2405 = vmatprep.subr.bf16.mxu1 %v2596_v41 }
  0x68   : > { %1144 = vmatmul.mubr.bf16.gmra.mxu0 %v2573_v37  ;;  %1336 = vmatmul.mubr.bf16.gmra.mxu1 %v2574_v38  ;;  %v2659_v37 = vld [vmem:[%s3029_s23 + $0x1cc] ss:$12 sps:$4 sm:$0xff]  }
  0x69   : > { %1151 = vmatprep.mubr.bf16.mxu0 %v2576_v39  ;;  %1343 = vmatprep.mubr.bf16.mxu1 %v2578_v40  ;;  %v2661_v38 = vld [vmem:[%s3029_s23 + $0x218] ss:$12 sps:$4 sm:$0xff]   ;;  %v2662_v39 = vld [vmem:[%s3029_s23 + $0x1c8] ss:$12 sps:$4 sm:$0xff]   ;;  %v2663_v40 = vld [vmem:[%s3029_s23 + $0x230] ss:$12 sps:$4 sm:$0xff]  }
  0x6a   : > { %2406 = vmatpush3.bf16.msra.mxu1 %v2596_v41  ;;  %v2664_v41 = vld [vmem:[%s3029_s23 + $0x1e4] ss:$12 sps:$4 sm:$0xff]  }
  0x6b   : > { %2407 = vmatprep.subr.bf16.mxu1 %v2603_v42 }
  0x6e   : > { %2408 = vmatpush3.bf16.msra.mxu1 %v2603_v42  ;;  %v2666_v42 = vld [vmem:[%s3029_s23 + $0x248] ss:$12 sps:$4 sm:$0xff]  }
  0x70   : > { %1152 = vmatmul.mubr.bf16.gmra.mxu0 %v2580_v43  ;;  %1344 = vmatmul.mubr.bf16.gmra.mxu1 %v2581_v44  ;;  %v2667_v43 = vld [vmem:[%s3029_s23 + $0x1e0] ss:$12 sps:$4 sm:$0xff]  }
  0x71   : > { %1159 = vmatprep.mubr.bf16.mxu0 %v2583_v45  ;;  %1351 = vmatprep.mubr.bf16.mxu1 %v2585_v46  ;;  %v2668_v44 = vld [vmem:[%s3029_s23 + $0x260] ss:$12 sps:$4 sm:$0xff]   ;;  %v2669_v45 = vld [vmem:[%s3029_s23 + $0x1fc] ss:$12 sps:$4 sm:$0xff]   ;;  %v2671_v46 = vld [vmem:[%s3029_s23 + $0x278] ss:$12 sps:$4 sm:$0xff]  }
  0x78   : > { %1160 = vmatmul.mubr.bf16.gmra.mxu0 %v2587_v47  ;;  %1352 = vmatmul.mubr.bf16.gmra.mxu1 %v2588_v48  ;;  %v2672_v47 = vld [vmem:[%s3029_s23 + $0x1f8] ss:$12 sps:$4 sm:$0xff]   ;;  %v2673_v48 = vld [vmem:[%s3029_s23 + $0x290] ss:$12 sps:$4 sm:$0xff]  }
  0x79   : > { %1167 = vmatprep.mubr.bf16.mxu0 %v2590_v49  ;;  %1359 = vmatprep.mubr.bf16.mxu1 %v2592_v50  ;;  %v2674_v49 = vld [vmem:[%s3029_s23 + $0x214] ss:$12 sps:$4 sm:$0xff]  }
  0x7a   : > { %v2676_v50 = vld [vmem:[%s3029_s23 + $0x2a8] ss:$12 sps:$4 sm:$0xff]  }
  0x80   : > { %1168 = vmatmul.mubr.bf16.gmra.mxu0 %v2594_v51  ;;  %1360 = vmatmul.mubr.bf16.gmra.mxu1 %v2595_v52  ;;  %v2677_v51 = vld [vmem:[%s3029_s23 + $0x210] ss:$12 sps:$4 sm:$0xff]   ;;  %v2678_v52 = vld [vmem:[%s3029_s23 + $0x2c0] ss:$12 sps:$4 sm:$0xff]  }
  0x81   : > { %1175 = vmatprep.mubr.bf16.mxu0 %v2597_v53  ;;  %1367 = vmatprep.mubr.bf16.mxu1 %v2599_v54  ;;  %v2679_v53 = vld [vmem:[%s3029_s23 + $0x22c] ss:$12 sps:$4 sm:$0xff]  }
  0x82   : > { %v2681_v54 = vld [vmem:[%s3029_s23 + $0x2d8] ss:$12 sps:$4 sm:$0xff]  }
  0x88   : > { %1176 = vmatmul.mubr.bf16.gmra.mxu0 %v2601_v55  ;;  %1368 = vmatmul.mubr.bf16.gmra.mxu1 %v2602_v56  ;;  %v2682_v55 = vld [vmem:[%s3029_s23 + $0x228] ss:$12 sps:$4 sm:$0xff]   ;;  %v2683_v56 = vld [vmem:[%s3029_s23 + $0x2f0] ss:$12 sps:$4 sm:$0xff]  }
  0x89   : > { %1183 = vmatprep.mubr.bf16.mxu0 %v2604_v57  ;;  %2409 = vmatprep.mubr.bf16.mxu1 %v2606_v58 }
  0x90   : > { %1184 = vmatmul.mubr.bf16.gmra.mxu0 %v2607_v59  ;;  %2410 = vmatmul.mubr.bf16.vlgmr.msra.gmra.mxu1 %v2608_v60 }
  0x91   : > { %1191 = vmatprep.mubr.bf16.mxu0 %v2609_v61  ;;  %2413 = vmatprep.mubr.bf16.mxu1 %v2611_v62 }
  0x98   : > { %1192 = vmatmul.mubr.bf16.gmra.mxu0 %v2612_v63  ;;  %2414 = vmatmul.mubr.bf16.gmra.mxu1 %v2613_v0 }
  0x99   : > { %1199 = vmatprep.mubr.bf16.mxu0 %v2614_v1  ;;  %2417 = vmatprep.mubr.bf16.mxu1 %v2616_v2 }
  0xa0   : > { %1200 = vmatmul.mubr.bf16.gmra.mxu0 %v2617_v3  ;;  %2418 = vmatmul.mubr.bf16.gmra.mxu1 %v2618_v4 }
  0xa1   : > { %1207 = vmatprep.mubr.bf16.mxu0 %v2619_v5  ;;  %2421 = vmatprep.mubr.bf16.mxu1 %v2621_v6 }
  0xa8   : > { %1208 = vmatmul.mubr.bf16.gmra.mxu0 %v2622_v7  ;;  %2422 = vmatmul.mubr.bf16.gmra.mxu1 %v2623_v8 }
  0xa9   : > { %1215 = vmatprep.mubr.bf16.mxu0 %v2624_v9  ;;  %2425 = vmatprep.mubr.bf16.mxu1 %v2626_v10 }
  0xb0   : > { %1216 = vmatmul.mubr.bf16.gmra.mxu0 %v2627_v11  ;;  %2426 = vmatmul.mubr.bf16.gmra.mxu1 %v2628_v12 }
  0xb1   : > { %1223 = vmatprep.mubr.bf16.mxu0 %v2629_v13  ;;  %2429 = vmatprep.mubr.bf16.mxu1 %v2631_v14 }
  0xb8   : > { %1224 = vmatmul.mubr.bf16.gmra.mxu0 %v2632_v15  ;;  %2430 = vmatmul.mubr.bf16.gmra.mxu1 %v2633_v16 }
  0xb9   : > { %1231 = vmatprep.mubr.bf16.mxu0 %v2634_v17  ;;  %2433 = vmatprep.mubr.bf16.mxu1 %v2636_v18 }
  0xc0   : > { %1232 = vmatmul.mubr.bf16.gmra.mxu0 %v2637_v19  ;;  %2434 = vmatmul.mubr.bf16.gmra.mxu1 %v2638_v20 }
  0xc1   : > { %1239 = vmatprep.mubr.bf16.mxu0 %v2639_v21  ;;  %2437 = vmatprep.mubr.bf16.mxu1 %v2641_v22 }
  0xc8   : > { %1240 = vmatmul.mubr.bf16.gmra.mxu0 %v2642_v23  ;;  %2438 = vmatmul.mubr.bf16.gmra.mxu1 %v2643_v24 }
  0xc9   : > { %1247 = vmatprep.mubr.bf16.mxu0 %v2644_v25  ;;  %2441 = vmatprep.mubr.bf16.mxu1 %v2646_v26 }
  0xd0   : > { %1248 = vmatmul.mubr.bf16.gmra.mxu0 %v2647_v27  ;;  %2442 = vmatmul.mubr.bf16.gmra.mxu1 %v2648_v28 }
  0xd1   : > { %1255 = vmatprep.mubr.bf16.mxu0 %v2649_v29  ;;  %2445 = vmatprep.mubr.bf16.mxu1 %v2651_v30 }
  0xd8   : > { %1256 = vmatmul.mubr.bf16.gmra.mxu0 %v2652_v31  ;;  %2446 = vmatmul.mubr.bf16.gmra.mxu1 %v2653_v32 }
  0xd9   : > { %1263 = vmatprep.mubr.bf16.mxu0 %v2654_v33  ;;  %2449 = vmatprep.mubr.bf16.mxu1 %v2656_v34 }
  0xe0   : > { %1264 = vmatmul.mubr.bf16.gmra.mxu0 %v2657_v35  ;;  %2450 = vmatmul.mubr.bf16.gmra.mxu1 %v2658_v36 }
  0xe1   : > { %1271 = vmatprep.mubr.bf16.mxu0 %v2659_v37  ;;  %2453 = vmatprep.mubr.bf16.mxu1 %v2661_v38 }
  0xe8   : > { %1272 = vmatmul.mubr.bf16.gmra.mxu0 %v2662_v39  ;;  %2454 = vmatmul.mubr.bf16.gmra.mxu1 %v2663_v40 }
  0xe9   : > { %1279 = vmatprep.mubr.bf16.mxu0 %v2664_v41  ;;  %2457 = vmatprep.mubr.bf16.mxu1 %v2666_v42 }
  0xf0   : > { %1280 = vmatmul.mubr.bf16.gmra.mxu0 %v2667_v43  ;;  %2458 = vmatmul.mubr.bf16.gmra.mxu1 %v2668_v44 }
  0xf1   : > { %1287 = vmatprep.mubr.bf16.mxu0 %v2669_v45  ;;  %2461 = vmatprep.mubr.bf16.mxu1 %v2671_v46 }
  0xf8   : > { %1288 = vmatmul.mubr.bf16.gmra.mxu0 %v2672_v47  ;;  %2462 = vmatmul.mubr.bf16.gmra.mxu1 %v2673_v48 }
  0xf9   : > { %1295 = vmatprep.mubr.bf16.mxu0 %v2674_v49  ;;  %2465 = vmatprep.mubr.bf16.mxu1 %v2676_v50 }
 0x100   : > { %1296 = vmatmul.mubr.bf16.gmra.mxu0 %v2677_v51  ;;  %2466 = vmatmul.mubr.bf16.gmra.mxu1 %v2678_v52 }
 0x101   : > { %1303 = vmatprep.mubr.bf16.mxu0 %v2679_v53  ;;  %2469 = vmatprep.mubr.bf16.mxu1 %v2681_v54 }
 0x108   : > { %1304 = vmatmul.mubr.bf16.gmra.mxu0 %v2682_v55  ;;  %2470 = vmatmul.mubr.bf16.gmra.mxu1 %v2683_v56  ;;  %v3237_v55 = vld [vmem:[%s3230_s26] ss:$0 sm:$0xff] }
 0x110   : > { %v3170_v57 = vpop.f32.mrf.mxu0  ;;  %v3172_v58 = vpop.f32.mrf.mxu1 }
 0x112   : > { %v1123_v59 = vpop.f32.mrf.mxu0  ;;  %v1315_v60 = vpop.f32.mrf.mxu1 }
 0x114   : > { %v3174_v61 = vpop.f32.mrf.mxu0  ;;  %v3176_v62 = vpop.f32.mrf.mxu1 }
 0x116   : > { %v1126_v63 = vpop.f32.mrf.mxu0  ;;  %v1318_v0 = vpop.f32.mrf.mxu1 }
 0x118   : > { %v1129_v1 = vpop.f32.mrf.mxu0  ;;  %v3178_v2 = vpop.f32.mrf.mxu1 }
 0x119   : > { %v1130_v60 = vadd.f32 %v3237_v55, %v1129_v1 }
 0x11a   : > { %v1131_v3 = vpop.f32.mrf.mxu0  ;;  %v1323_v4 = vpop.f32.mrf.mxu1 }
 0x11b   : > { %v1122_v3 = vadd.f32 %v3237_v55, %v3170_v57 }
 0x11c   : > { %v1132_v5 = vpop.f32.mrf.mxu0  ;;  %v3180_v6 = vpop.f32.mrf.mxu1 }
 0x11e   : > { %v1134_v7 = vpop.f32.mrf.mxu0  ;;  %v1326_v8 = vpop.f32.mrf.mxu1 }
 0x120   : > { %v3182_v9 = vpop.f32.mrf.mxu0  ;;  %v3184_v10 = vpop.f32.mrf.mxu1 }
 0x122   : > { %v1139_v11 = vpop.f32.mrf.mxu0  ;;  %v1331_v12 = vpop.f32.mrf.mxu1 }
 0x123   : > { %v1133_v11 = vadd.f32 %v3237_v55, %v1132_v5 }
 0x124   : > { %v3186_v13 = vpop.f32.mrf.mxu0  ;;  %v3188_v14 = vpop.f32.mrf.mxu1 }
 0x126   : > { %v1142_v15 = vpop.f32.mrf.mxu0  ;;  %v1334_v16 = vpop.f32.mrf.mxu1 }
 0x128   : > { %v3190_v17 = vpop.f32.mrf.mxu0  ;;  %v3192_v18 = vpop.f32.mrf.mxu1 }
 0x129   : > { %v1146_v5 = vadd.f32 %v3237_v55, %v3190_v17 }
 0x12a   : > { %v1147_v19 = vpop.f32.mrf.mxu0  ;;  %v1339_v20 = vpop.f32.mrf.mxu1 }
 0x12b   : > { %v1125_v20 = vadd.f32 %v3237_v55, %v3174_v61 }
 0x12c   : > { %v3194_v21 = vpop.f32.mrf.mxu0  ;;  %v3196_v22 = vpop.f32.mrf.mxu1 }
 0x12e   : > { %v1150_v23 = vpop.f32.mrf.mxu0  ;;  %v1342_v24 = vpop.f32.mrf.mxu1 }
 0x130   : > { %v3198_v25 = vpop.f32.mrf.mxu0  ;;  %v3200_v26 = vpop.f32.mrf.mxu1 }
 0x132   : > { %v1155_v27 = vpop.f32.mrf.mxu0  ;;  %v1347_v28 = vpop.f32.mrf.mxu1 }
 0x134   : > { %v3202_v29 = vpop.f32.mrf.mxu0  ;;  %v3204_v30 = vpop.f32.mrf.mxu1 }
 0x136   : > { %v1158_v31 = vpop.f32.mrf.mxu0  ;;  %v1350_v32 = vpop.f32.mrf.mxu1 }
 0x138   : > { %v3206_v33 = vpop.f32.mrf.mxu0  ;;  %v3208_v34 = vpop.f32.mrf.mxu1 }
 0x13a   : > { %v1163_v35 = vpop.f32.mrf.mxu0  ;;  %v1355_v36 = vpop.f32.mrf.mxu1 }
 0x13c   : > { %v3210_v37 = vpop.f32.mrf.mxu0  ;;  %v3212_v38 = vpop.f32.mrf.mxu1 }
 0x13e   : > { %v1166_v39 = vpop.f32.mrf.mxu0  ;;  %v1358_v40 = vpop.f32.mrf.mxu1 }
 0x13f   : > { %v1138_v39 = vadd.f32 %v3237_v55, %v3182_v9 }
 0x140   : > { %v3214_v41 = vpop.f32.mrf.mxu0  ;;  %v3216_v42 = vpop.f32.mrf.mxu1 }
 0x142   : > { %v1171_v43 = vpop.f32.mrf.mxu0  ;;  %v1363_v44 = vpop.f32.mrf.mxu1 }
 0x144   : > { %v3218_v45 = vpop.f32.mrf.mxu0  ;;  %v3220_v46 = vpop.f32.mrf.mxu1 }
 0x146   : > { %v1174_v47 = vpop.f32.mrf.mxu0  ;;  %v1366_v48 = vpop.f32.mrf.mxu1 }
 0x147   : > { %v1149_v48 = vadd.f32 %v3237_v55, %v3194_v21  ;;  %v1162_v21 = vadd.f32 %v3237_v55, %v3206_v33  ;;  %v1165_v33 = vadd.f32 %v3237_v55, %v3210_v37 }
 0x148   : > { %v3222_v49 = vpop.f32.mrf.mxu0  ;;  %v3224_v50 = vpop.f32.mrf.mxu1 }
 0x14a   : > { %v1179_v51 = vpop.f32.mrf.mxu0  ;;  %v1371_v52 = vpop.f32.mrf.mxu1 }
 0x14c   : > { %v3232_v53 = vpop.f32.mrf.mxu0  ;;  %v3234_v54 = vpop.f32.mrf.mxu1 }
 0x14e   : > { %v1182_v56 = vpop.f32.mrf.mxu0  ;;  %v1374_v59 = vpop.f32.mrf.mxu1 }
 0x150   : > { %v3240_v63 = vpop.f32.mrf.mxu0  ;;  %v2411_v0 = vpop.f32.mrf.mxu1 }
 0x151   : > { %v1419_v4 = vadd.f32 %v2411_v0, %v1130_v60  ;;  %v1141_v60 = vadd.f32 %v3237_v55, %v3186_v13 }
 0x152   : > { %v1187_v7 = vpop.f32.mrf.mxu0  ;;  %v1410_v8 = vpop.f32.mrf.mxu1 }
 0x153   : > { %v1667_v12 = vsub.f32 0.0, %v1419_v4  ;;  %v1411_v15 = vadd.f32 %v1410_v8, %v1122_v3 }
 0x154   : > { %v3245_v16 = vpop.f32.mrf.mxu0  ;;  %v2412_v19 = vpop.f32.mrf.mxu1 }
 0x155   : > { %v1733_v1 = vmul.f32 1.442695, %v1667_v12  ;;  %v1665_v23 = vsub.f32 0.0, %v1411_v15  ;;  %v1422_v24 = vadd.f32 %v2412_v19, %v1133_v11 }
 0x156   : > { %v1190_v27 = vpop.f32.mrf.mxu0  ;;  %v1413_v28 = vpop.f32.mrf.mxu1 }
 0x157   : > { %2684 = vpow2.f32 %v1733_v1  ;;  %v1729_v57 = vmul.f32 1.442695, %v1665_v23  ;;  %v1668_v31 = vsub.f32 0.0, %v1422_v24  ;;  %v1414_v32 = vadd.f32 %v1413_v28, %v1125_v20 }
 0x158   : > { %v3251_v35 = vpop.f32.mrf.mxu0  ;;  %v2415_v36 = vpop.f32.mrf.mxu1  ;;  %v1154_v20 = vadd.f32 %v3237_v55, %v3198_v25  ;;  %v1157_v25 = vadd.f32 %v3237_v55, %v3202_v29 }
 0x159   : > { %2686 = vpow2.f32 %v1729_v57  ;;  %v1735_v61 = vmul.f32 1.442695, %v1668_v31  ;;  %v1666_v40 = vsub.f32 0.0, %v1414_v32  ;;  %v1435_v43 = vadd.f32 %v2415_v36, %v1146_v5 }
 0x15a   : > { %v1195_v44 = vpop.f32.mrf.mxu0  ;;  %v1426_v47 = vpop.f32.mrf.mxu1 }
 0x15b   : > { %2688 = vpow2.f32 %v1735_v61  ;;  %v1731_v51 = vmul.f32 1.442695, %v1666_v40  ;;  %v1427_v52 = vadd.f32 %v1426_v47, %v1138_v39  ;;  %v1671_v56 = vsub.f32 0.0, %v1435_v43 }
 0x15c   : > { %v3257_v17 = vpop.f32.mrf.mxu0  ;;  %v2416_v59 = vpop.f32.mrf.mxu1 }
 0x15d   : > { %2690 = vpow2.f32 %v1731_v51  ;;  %v1669_v9 = vsub.f32 0.0, %v1427_v52  ;;  %v1438_v0 = vadd.f32 %v2416_v59, %v1149_v48  ;;  %v1741_v3 = vmul.f32 1.442695, %v1671_v56 }
 0x15e   : > { %v1198_v4 = vpop.f32.mrf.mxu0  ;;  %v1429_v7 = vpop.f32.mrf.mxu1  ;;  %v1178_v59 = vadd.f32 %v3237_v55, %v3222_v49 }
 0x15f   : > { %v1737_v8 = vmul.f32 1.442695, %v1669_v9  ;;  %v1672_v11 = vsub.f32 0.0, %v1438_v0  ;;  %v1430_v12 = vadd.f32 %v1429_v7, %v1141_v60  ;;  %2692 = vpow2.f32 %v1741_v3 }
 0x160   : > { %v3263_v15 = vpop.f32.mrf.mxu0  ;;  %v2419_v19 = vpop.f32.mrf.mxu1  ;;  %v1170_v0 = vadd.f32 %v3237_v55, %v3214_v41 }
 0x161   : > { %2694 = vpow2.f32 %v1737_v8  ;;  %v1743_v13 = vmul.f32 1.442695, %v1672_v11  ;;  %v1670_v1 = vsub.f32 0.0, %v1430_v12  ;;  %v1451_v23 = vadd.f32 %v2419_v19, %v1162_v21 }
 0x162   : > { %v1203_v24 = vpop.f32.mrf.mxu0  ;;  %v1442_v27 = vpop.f32.mrf.mxu1  ;;  %v1181_v8 = vadd.f32 %v3237_v55, %v3232_v53 }
 0x163   : > { %2696 = vpow2.f32 %v1743_v13  ;;  %v1739_v28 = vmul.f32 1.442695, %v1670_v1  ;;  %v1443_v57 = vadd.f32 %v1442_v27, %v1154_v20  ;;  %v1675_v32 = vsub.f32 0.0, %v1451_v23 }
 0x164   : > { %v2685_v31 = vpop.eup %2684  ;;  %v3269_v5 = vpop.f32.mrf.mxu0  ;;  %v1173_v27 = vadd.f32 %v3237_v55, %v3218_v45 }
 0x165   : > { %v2420_v36 = vpop.f32.mrf.mxu1  ;;  %v1859_v39 = vadd.f32 1.0, %v2685_v31  ;;  %2698 = vpow2.f32 %v1739_v28  ;;  %v1673_v61 = vsub.f32 0.0, %v1443_v57  ;;  %v1749_v43 = vmul.f32 1.442695, %v1675_v32 }
 0x166   : > { %v2687_v40 = vpop.eup %2686  ;;  %v1454_v44 = vadd.f32 %v2420_v36, %v1165_v33  ;;  %v1206_v47 = vpop.f32.mrf.mxu0 }
 0x167   : > { %v1445_v48 = vpop.f32.mrf.mxu1  ;;  %2700 = vrcp.f32 %v1859_v39  ;;  %v1857_v51 = vadd.f32 1.0, %v2687_v40  ;;  %v1745_v52 = vmul.f32 1.442695, %v1673_v61 }
 0x168   : > { %v1446_v56 = vadd.f32 %v1445_v48, %v1157_v25  ;;  %v2689_v37 = vpop.eup %2688  ;;  %2702 = vpow2.f32 %v1749_v43  ;;  %v1676_v60 = vsub.f32 0.0, %v1454_v44  ;;  %v3275_v9 = vpop.f32.mrf.mxu0  ;;  %v1194_v43 = vadd.f32 %v3237_v55, %v3251_v35 }
 0x169   : > { %v2423_v29 = vpop.f32.mrf.mxu1  ;;  %2704 = vrcp.f32 %v1857_v51  ;;  %v1860_v3 = vadd.f32 1.0, %v2689_v37  ;;  %v1186_v48 = vadd.f32 %v3237_v55, %v3240_v63  ;;  %v1197_v35 = vadd.f32 %v3237_v55, %v3257_v17 }
 0x16a   : > { %v1674_v4 = vsub.f32 0.0, %v1446_v56  ;;  %v2691_v7 = vpop.eup %2690  ;;  %2706 = vpow2.f32 %v1745_v52  ;;  %v1751_v11 = vmul.f32 1.442695, %v1676_v60  ;;  %v1467_v12 = vadd.f32 %v2423_v29, %v1178_v59  ;;  %v1211_v21 = vpop.f32.mrf.mxu0 }
 0x16b   : > { %v1458_v49 = vpop.f32.mrf.mxu1  ;;  %2708 = vrcp.f32 %v1860_v3  ;;  %v1858_v19 = vadd.f32 1.0, %v2691_v7  ;;  %v1189_v17 = vadd.f32 %v3237_v55, %v3245_v16  ;;  %v1210_v16 = vadd.f32 %v3237_v55, %v3275_v9 }
 0x16c   : > { %v1747_v20 = vmul.f32 1.442695, %v1674_v4  ;;  %v1459_v13 = vadd.f32 %v1458_v49, %v1170_v0  ;;  %2710 = vpow2.f32 %v1751_v11  ;;  %v1679_v1 = vsub.f32 0.0, %v1467_v12  ;;  %v3281_v41 = vpop.f32.mrf.mxu0  ;;  %v2693_v24 = vpop.eup %2692 }
 0x16d   : > { %v2424_v23 = vpop.f32.mrf.mxu1  ;;  %2712 = vrcp.f32 %v1858_v19  ;;  %v1863_v31 = vadd.f32 1.0, %v2693_v24  ;;  %v1213_v9 = vadd.f32 %v3237_v55, %v3281_v41 }
 0x16e   : > { %v1677_v53 = vsub.f32 0.0, %v1459_v13  ;;  %v1470_v28 = vadd.f32 %v2424_v23, %v1181_v8  ;;  %v2695_v57 = vpop.eup %2694  ;;  %2714 = vpow2.f32 %v1747_v20  ;;  %v1757_v33 = vmul.f32 1.442695, %v1679_v1  ;;  %v1214_v32 = vpop.f32.mrf.mxu0 }
 0x16f   : > { %v1461_v36 = vpop.f32.mrf.mxu1  ;;  %v1861_v25 = vadd.f32 1.0, %v2695_v57  ;;  %2716 = vrcp.f32 %v1863_v31 }
 0x170   : > { %v1680_v39 = vsub.f32 0.0, %v1470_v28  ;;  %v1462_v61 = vadd.f32 %v1461_v36, %v1173_v27  ;;  %v2697_v40 = vpop.eup %2696  ;;  %v1753_v44 = vmul.f32 1.442695, %v1677_v53  ;;  %v3288_v45 = vpop.f32.mrf.mxu0 }
 0x171   : > { %v2427_v47 = vpop.f32.mrf.mxu1  ;;  %2718 = vrcp.f32 %v1861_v25  ;;  %v1864_v51 = vadd.f32 1.0, %v2697_v40  ;;  %v1202_v25 = vadd.f32 %v3237_v55, %v3263_v15 }
 0x172   : > { %v1678_v52 = vsub.f32 0.0, %v1462_v61  ;;  %v2699_v56 = vpop.eup %2698  ;;  %2720 = vpow2.f32 %v1757_v33  ;;  %v1759_v37 = vmul.f32 1.442695, %v1680_v39  ;;  %v1483_v59 = vadd.f32 %v2427_v47, %v1194_v43  ;;  %v1219_v60 = vpop.f32.mrf.mxu0 }
 0x173   : > { %v1474_v29 = vpop.f32.mrf.mxu1  ;;  %2722 = vrcp.f32 %v1864_v51  ;;  %v1862_v63 = vadd.f32 1.0, %v2699_v56 }
 0x174   : > { %v1755_v0 = vmul.f32 1.442695, %v1678_v52  ;;  %v1475_v3 = vadd.f32 %v1474_v29, %v1186_v48  ;;  %v2701_v4 = vpop.eup %2700  ;;  %2724 = vpow2.f32 %v1753_v44  ;;  %v1683_v7 = vsub.f32 0.0, %v1483_v59  ;;  %v3299_v8 = vpop.f32.mrf.mxu0 }
 0x175   : > { %v2428_v11 = vpop.f32.mrf.mxu1  ;;  %v2703_v12 = vpop.eup %2702  ;;  %2051 = vst [vmem:[%s3295_s30 + $0x10] sm:$0xff] %v2701_v4  ;;  %2726 = vrcp.f32 %v1862_v63  ;;  %v1205_v29 = vadd.f32 %v3237_v55, %v3269_v5 }
 0x176   : > { %v1681_v21 = vsub.f32 0.0, %v1475_v3  ;;  %v1486_v49 = vadd.f32 %v2428_v11, %v1197_v35  ;;  %v2705_v19 = vpop.eup %2704  ;;  %v1867_v20 = vadd.f32 1.0, %v2703_v12  ;;  %2728 = vpow2.f32 %v1759_v37  ;;  %v1222_v1 = vpop.f32.mrf.mxu0 }
 0x177   : > { %v1765_v13 = vmul.f32 1.442695, %v1683_v7  ;;  %v1477_v23 = vpop.f32.mrf.mxu1  ;;  %v2707_v24 = vpop.eup %2706  ;;  %2049 = vst [vmem:[%s3295_s30] sm:$0xff] %v2705_v19  ;;  %2730 = vpow2.f32 %v1755_v0 }
 0x178   : > { %v1761_v27 = vmul.f32 1.442695, %v1681_v21  ;;  %v1684_v53 = vsub.f32 0.0, %v1486_v49  ;;  %v1478_v28 = vadd.f32 %v1477_v23, %v1189_v17  ;;  %v2709_v57 = vpop.eup %2708  ;;  %2732 = vrcp.f32 %v1867_v20  ;;  %v1225_v33 = vpop.f32.mrf.mxu0 }
 0x179   : > { %v1865_v31 = vadd.f32 1.0, %v2707_v24  ;;  %v2431_v32 = vpop.f32.mrf.mxu1  ;;  %v2711_v36 = vpop.eup %2710  ;;  %2052 = vst [vmem:[%s3295_s30 + $0x18] sm:$0xff] %v2709_v57  ;;  %2734 = vpow2.f32 %v1765_v13  ;;  %v1226_v5 = vadd.f32 %v3237_v55, %v1225_v33  ;;  %v1218_v23 = vadd.f32 %v3237_v55, %v3288_v45 }
 0x17a   : > { %v1767_v39 = vmul.f32 1.442695, %v1684_v53  ;;  %v1682_v61 = vsub.f32 0.0, %v1478_v28  ;;  %v2713_v40 = vpop.eup %2712  ;;  %v1868_v43 = vadd.f32 1.0, %v2711_v36  ;;  %v1499_v44 = vadd.f32 %v2431_v32, %v1210_v16  ;;  %v1227_v47 = vpop.f32.mrf.mxu0 }
 0x17b   : > { %2736 = vrcp.f32 %v1865_v31  ;;  %v1490_v48 = vpop.f32.mrf.mxu1  ;;  %v2715_v51 = vpop.eup %2714  ;;  %2050 = vst [vmem:[%s3295_s30 + $0x8] sm:$0xff] %v2713_v40 }
 0x17c   : > { %2738 = vpow2.f32 %v1761_v27  ;;  %v1763_v52 = vmul.f32 1.442695, %v1682_v61  ;;  %v1491_v56 = vadd.f32 %v1490_v48, %v1202_v25  ;;  %v1866_v15 = vadd.f32 1.0, %v2715_v51  ;;  %v1228_v37 = vpop.f32.mrf.mxu0  ;;  %v2717_v60 = vpop.eup %2716 }
 0x17d   : > { %2740 = vrcp.f32 %v1868_v43  ;;  %v1687_v35 = vsub.f32 0.0, %v1499_v44  ;;  %v2432_v59 = vpop.f32.mrf.mxu1  ;;  %2055 = vst [vmem:[%s3295_s30 + $0x30] sm:$0xff] %v2717_v60  ;;  %v1229_v45 = vadd.f32 %v3237_v55, %v1228_v37  ;;  %v1221_v48 = vadd.f32 %v3237_v55, %v3299_v8 }
 0x17e   : > { %2742 = vpow2.f32 %v1767_v39  ;;  %v1685_v63 = vsub.f32 0.0, %v1491_v56  ;;  %v1502_v0 = vadd.f32 %v2432_v59, %v1213_v9  ;;  %v2719_v3 = vpop.eup %2718  ;;  %v1230_v4 = vpop.f32.mrf.mxu0 }
 0x17f   : > { %2744 = vrcp.f32 %v1866_v15  ;;  %v1773_v41 = vmul.f32 1.442695, %v1687_v35  ;;  %v1493_v7 = vpop.f32.mrf.mxu1  ;;  %v2721_v11 = vpop.eup %2720  ;;  %2053 = vst [vmem:[%s3295_s30 + $0x20] sm:$0xff] %v2719_v3 }
 0x180   : > { %2746 = vpow2.f32 %v1763_v52  ;;  %v1769_v12 = vmul.f32 1.442695, %v1685_v63  ;;  %v1688_v17 = vsub.f32 0.0, %v1502_v0  ;;  %v1494_v21 = vadd.f32 %v1493_v7, %v1205_v29  ;;  %v2723_v49 = vpop.eup %2722  ;;  %v1233_v20 = vpop.f32.mrf.mxu0 }
 0x181   : > { %v1871_v19 = vadd.f32 1.0, %v2721_v11  ;;  %2748 = vpow2.f32 %v1773_v41  ;;  %v2435_v13 = vpop.f32.mrf.mxu1  ;;  %v2725_v1 = vpop.eup %2724  ;;  %2056 = vst [vmem:[%s3295_s30 + $0x38] sm:$0xff] %v2723_v49 }
 0x182   : > { %2750 = vpow2.f32 %v1769_v12  ;;  %v1775_v24 = vmul.f32 1.442695, %v1688_v17  ;;  %v1686_v27 = vsub.f32 0.0, %v1494_v21  ;;  %v2727_v53 = vpop.eup %2726  ;;  %v1869_v28 = vadd.f32 1.0, %v2725_v1  ;;  %v1235_v31 = vpop.f32.mrf.mxu0 }
 0x183   : > { %2752 = vrcp.f32 %v1871_v19  ;;  %v1515_v57 = vadd.f32 %v2435_v13, %v1226_v5  ;;  %v1506_v16 = vpop.f32.mrf.mxu1  ;;  %v2729_v32 = vpop.eup %2728  ;;  %2054 = vst [vmem:[%s3295_s30 + $0x28] sm:$0xff] %v2727_v53  ;;  %v1234_v17 = vadd.f32 %v3237_v55, %v1233_v20 }
 0x184   : > { %2754 = vpow2.f32 %v1775_v24  ;;  %v1771_v33 = vmul.f32 1.442695, %v1686_v27  ;;  %v1507_v36 = vadd.f32 %v1506_v16, %v1218_v23  ;;  %v2731_v25 = vpop.eup %2730  ;;  %v1872_v39 = vadd.f32 1.0, %v2729_v32  ;;  %v1236_v40 = vpop.f32.mrf.mxu0 }
 0x185   : > { %2756 = vrcp.f32 %v1869_v28  ;;  %v1691_v61 = vsub.f32 0.0, %v1515_v57  ;;  %v2436_v43 = vpop.f32.mrf.mxu1  ;;  %v2733_v44 = vpop.eup %2732  ;;  %v1870_v47 = vadd.f32 1.0, %v2731_v25 }
 0x186   : > { %2758 = vpow2.f32 %v1771_v33  ;;  %v1689_v51 = vsub.f32 0.0, %v1507_v36  ;;  %v2735_v9 = vpop.eup %2734  ;;  %2059 = vst [vmem:[%s3295_s30 + $0x50] sm:$0xff] %v2733_v44  ;;  %v1518_v56 = vadd.f32 %v2436_v43, %v1229_v45  ;;  %v1238_v15 = vpop.f32.mrf.mxu0  ;;  %v1237_v36 = vadd.f32 %v3237_v55, %v1236_v40 }
 0x187   : > { %2760 = vrcp.f32 %v1872_v39  ;;  %v1781_v52 = vmul.f32 1.442695, %v1691_v61  ;;  %v1509_v35 = vpop.f32.mrf.mxu1  ;;  %v1875_v37 = vadd.f32 1.0, %v2735_v9 }
 0x188   : > { %v2737_v59 = vpop.eup %2736  ;;  %2762 = vrcp.f32 %v1870_v47  ;;  %v1777_v60 = vmul.f32 1.442695, %v1689_v51  ;;  %v1510_v29 = vadd.f32 %v1509_v35, %v1221_v48  ;;  %v1692_v8 = vsub.f32 0.0, %v1518_v56  ;;  %v1241_v0 = vpop.f32.mrf.mxu0 }
 0x189   : > { %v2739_v63 = vpop.eup %2738  ;;  %2057 = vst [vmem:[%s3295_s30 + $0x40] sm:$0xff] %v2737_v59  ;;  %2764 = vpow2.f32 %v1781_v52  ;;  %v2439_v3 = vpop.f32.mrf.mxu1  ;;  %v1242_v11 = vadd.f32 %v3237_v55, %v1241_v0 }
 0x18a   : > { %v2741_v41 = vpop.eup %2740  ;;  %2766 = vrcp.f32 %v1875_v37  ;;  %v1873_v4 = vadd.f32 1.0, %v2739_v63  ;;  %v1690_v7 = vsub.f32 0.0, %v1510_v29  ;;  %v1783_v21 = vmul.f32 1.442695, %v1692_v8  ;;  %v1243_v49 = vpop.f32.mrf.mxu0 }
 0x18b   : > { %v2743_v12 = vpop.eup %2742  ;;  %2060 = vst [vmem:[%s3295_s30 + $0x58] sm:$0xff] %v2741_v41  ;;  %2768 = vpow2.f32 %v1777_v60  ;;  %v1522_v19 = vpop.f32.mrf.mxu1  ;;  %v1531_v23 = vadd.f32 %v2439_v3, %v1242_v11 }
 0x18c   : > { %v2745_v5 = vpop.eup %2744  ;;  %2770 = vrcp.f32 %v1873_v4  ;;  %v1876_v13 = vadd.f32 1.0, %v2743_v12  ;;  %v1779_v1 = vmul.f32 1.442695, %v1690_v7  ;;  %v1523_v27 = vadd.f32 %v1522_v19, %v1234_v17  ;;  %v1244_v53 = vpop.f32.mrf.mxu0 }
 0x18d   : > { %v2747_v24 = vpop.eup %2746  ;;  %2058 = vst [vmem:[%s3295_s30 + $0x48] sm:$0xff] %v2745_v5  ;;  %2772 = vpow2.f32 %v1783_v21  ;;  %v2440_v28 = vpop.f32.mrf.mxu1  ;;  %v1695_v20 = vsub.f32 0.0, %v1531_v23  ;;  %v1245_v16 = vadd.f32 %v3237_v55, %v1244_v53 }
 0x18e   : > { %v2749_v57 = vpop.eup %2748  ;;  %2774 = vrcp.f32 %v1876_v13  ;;  %v1874_v31 = vadd.f32 1.0, %v2747_v24  ;;  %v1693_v25 = vsub.f32 0.0, %v1523_v27  ;;  %v1246_v39 = vpop.f32.mrf.mxu0 }
 0x18f   : > { %v2751_v32 = vpop.eup %2750  ;;  %v1879_v33 = vadd.f32 1.0, %v2749_v57  ;;  %2776 = vpow2.f32 %v1779_v1  ;;  %v1525_v45 = vpop.f32.mrf.mxu1  ;;  %v1789_v44 = vmul.f32 1.442695, %v1695_v20  ;;  %v1534_v47 = vadd.f32 %v2440_v28, %v1245_v16 }
 0x190   : > { %v2753_v61 = vpop.eup %2752  ;;  %2778 = vrcp.f32 %v1874_v31  ;;  %v1877_v43 = vadd.f32 1.0, %v2751_v32  ;;  %v1785_v51 = vmul.f32 1.442695, %v1693_v25  ;;  %v1526_v9 = vadd.f32 %v1525_v45, %v1237_v36  ;;  %v1249_v52 = vpop.f32.mrf.mxu0 }
 0x191   : > { %v2755_v48 = vpop.eup %2754  ;;  %2063 = vst [vmem:[%s3295_s30 + $0x70] sm:$0xff] %v2753_v61  ;;  %2780 = vrcp.f32 %v1879_v33  ;;  %v2443_v56 = vpop.f32.mrf.mxu1  ;;  %v1696_v35 = vsub.f32 0.0, %v1534_v47  ;;  %v1250_v59 = vadd.f32 %v3237_v55, %v1249_v52 }
 0x192   : > { %v2757_v15 = vpop.eup %2756  ;;  %2782 = vrcp.f32 %v1877_v43  ;;  %v1880_v40 = vadd.f32 1.0, %v2755_v48  ;;  %v1694_v60 = vsub.f32 0.0, %v1526_v9  ;;  %v1251_v29 = vpop.f32.mrf.mxu0 }
 0x193   : > { %v2759_v37 = vpop.eup %2758  ;;  %2061 = vst [vmem:[%s3295_s30 + $0x60] sm:$0xff] %v2757_v15  ;;  %2784 = vpow2.f32 %v1789_v44  ;;  %v1538_v63 = vpop.f32.mrf.mxu1  ;;  %v1791_v3 = vmul.f32 1.442695, %v1696_v35 }
 0x194   : > { %v2761_v8 = vpop.eup %2760  ;;  %2786 = vrcp.f32 %v1880_v40  ;;  %v1878_v0 = vadd.f32 1.0, %v2759_v37  ;;  %v1539_v41 = vadd.f32 %v1538_v63, %v1250_v59  ;;  %v1787_v7 = vmul.f32 1.442695, %v1694_v60  ;;  %v1252_v11 = vpop.f32.mrf.mxu0 }
 0x195   : > { %v2763_v4 = vpop.eup %2762  ;;  %2064 = vst [vmem:[%s3295_s30 + $0x78] sm:$0xff] %v2761_v8  ;;  %2788 = vpow2.f32 %v1785_v51  ;;  %v2444_v12 = vpop.f32.mrf.mxu1  ;;  %v1253_v49 = vadd.f32 %v3237_v55, %v1252_v11 }
 0x196   : > { %v2765_v17 = vpop.eup %2764  ;;  %2062 = vst [vmem:[%s3295_s30 + $0x68] sm:$0xff] %v2763_v4  ;;  %2790 = vrcp.f32 %v1878_v0  ;;  %v1697_v21 = vsub.f32 0.0, %v1539_v41  ;;  %v1254_v13 = vpop.f32.mrf.mxu0 }
 0x197   : > { %v2767_v19 = vpop.eup %2766  ;;  %v1883_v5 = vadd.f32 1.0, %v2765_v17  ;;  %2792 = vpow2.f32 %v1791_v3  ;;  %v1541_v1 = vpop.f32.mrf.mxu1 }
 0x198   : > { %v2769_v23 = vpop.eup %2768  ;;  %2067 = vst [vmem:[%s3295_s30 + $0x90] sm:$0xff] %v2767_v19  ;;  %2794 = vpow2.f32 %v1787_v7  ;;  %v1793_v24 = vmul.f32 1.442695, %v1697_v21  ;;  %v1542_v27 = vadd.f32 %v1541_v1, %v1253_v49  ;;  %v1257_v57 = vpop.f32.mrf.mxu0 }
 0x199   : > { %v2771_v53 = vpop.eup %2770  ;;  %2796 = vrcp.f32 %v1883_v5  ;;  %v1881_v28 = vadd.f32 1.0, %v2769_v23  ;;  %v3340_v31 = vpop.f32.mrf.mxu1  ;;  %v1258_v32 = vadd.f32 %v3237_v55, %v1257_v57 }
 0x19a   : > { %v2773_v20 = vpop.eup %2772  ;;  %2065 = vst [vmem:[%s3295_s30 + $0x80] sm:$0xff] %v2771_v53  ;;  %2798 = vpow2.f32 %v1793_v24  ;;  %v1698_v16 = vsub.f32 0.0, %v1542_v27  ;;  %v1259_v25 = vpop.f32.mrf.mxu0 }
 0x19b   : > { %v2775_v33 = vpop.eup %2774  ;;  %2800 = vrcp.f32 %v1881_v28  ;;  %v1884_v36 = vadd.f32 1.0, %v2773_v20  ;;  %v1554_v39 = vpop.f32.mrf.mxu1  ;;  %v1547_v43 = vadd.f32 %v2443_v56, %v1258_v32 }
 0x19c   : > { %v2777_v45 = vpop.eup %2776  ;;  %2068 = vst [vmem:[%s3295_s30 + $0x98] sm:$0xff] %v2775_v33  ;;  %v1795_v61 = vmul.f32 1.442695, %v1698_v16  ;;  %v1260_v48 = vpop.f32.mrf.mxu0 }
 0x19d   : > { %v2779_v44 = vpop.eup %2778  ;;  %2802 = vrcp.f32 %v1884_v36  ;;  %v1882_v47 = vadd.f32 1.0, %v2777_v45  ;;  %v3345_v51 = vpop.f32.mrf.mxu1  ;;  %v1699_v52 = vsub.f32 0.0, %v1547_v43  ;;  %v1261_v15 = vadd.f32 %v3237_v55, %v1260_v48 }
 0x19e   : > { %v2781_v9 = vpop.eup %2780  ;;  %2066 = vst [vmem:[%s3295_s30 + $0x88] sm:$0xff] %v2779_v44  ;;  %2804 = vpow2.f32 %v1795_v61  ;;  %v1262_v35 = vpop.f32.mrf.mxu0 }
 0x19f   : > { %v2783_v40 = vpop.eup %2782  ;;  %2071 = vst [vmem:[%s3295_s30 + $0xb0] sm:$0xff] %v2781_v9  ;;  %2806 = vrcp.f32 %v1882_v47  ;;  %v1557_v59 = vpop.f32.mrf.mxu1  ;;  %v1797_v37 = vmul.f32 1.442695, %v1699_v52  ;;  %v1550_v60 = vadd.f32 %v2444_v12, %v1261_v15 }
 0x1a0   : > { %v2785_v56 = vpop.eup %2784  ;;  %2069 = vst [vmem:[%s3295_s30 + $0xa0] sm:$0xff] %v2783_v40  ;;  %v1265_v8 = vpop.f32.mrf.mxu0 }
 0x1a1   : > { %v2787_v29 = vpop.eup %2786  ;;  %v1887_v63 = vadd.f32 1.0, %v2785_v56  ;;  %v3351_v0 = vpop.f32.mrf.mxu1  ;;  %2808 = vpow2.f32 %v1797_v37  ;;  %v1700_v41 = vsub.f32 0.0, %v1550_v60  ;;  %v1266_v4 = vadd.f32 %v3237_v55, %v1265_v8 }
 0x1a2   : > { %v2789_v3 = vpop.eup %2788  ;;  %2072 = vst [vmem:[%s3295_s30 + $0xb8] sm:$0xff] %v2787_v29  ;;  %v1267_v17 = vpop.f32.mrf.mxu0 }
 0x1a3   : > { %v2791_v7 = vpop.eup %2790  ;;  %2810 = vrcp.f32 %v1887_v63  ;;  %v1885_v11 = vadd.f32 1.0, %v2789_v3  ;;  %v3355_v21 = vpop.f32.mrf.mxu1  ;;  %v1799_v49 = vmul.f32 1.442695, %v1700_v41  ;;  %v1555_v19 = vadd.f32 %v1554_v39, %v1266_v4 }
 0x1a4   : > { %v2793_v12 = vpop.eup %2792  ;;  %2070 = vst [vmem:[%s3295_s30 + $0xa8] sm:$0xff] %v2791_v7  ;;  %v1268_v1 = vpop.f32.mrf.mxu0  ;;  %v1322_v41 = vadd.f32 %v3237_v55, %v3178_v2 }
 0x1a5   : > { %v2795_v5 = vpop.eup %2794  ;;  %2812 = vrcp.f32 %v1885_v11  ;;  %v1888_v13 = vadd.f32 1.0, %v2793_v12  ;;  %v3358_v23 = vpop.f32.mrf.mxu1  ;;  %v1701_v53 = vsub.f32 0.0, %v1555_v19  ;;  %v1269_v28 = vadd.f32 %v3237_v55, %v1268_v1 }
 0x1a6   : > { %v2797_v24 = vpop.eup %2796  ;;  %v1886_v27 = vadd.f32 1.0, %v2795_v5  ;;  %2814 = vpow2.f32 %v1799_v49  ;;  %v1270_v20 = vpop.f32.mrf.mxu0  ;;  %v1314_v1 = vadd.f32 %v3237_v55, %v3172_v58  ;;  %v1330_v58 = vadd.f32 %v3237_v55, %v3184_v10 }
 0x1a7   : > { %v2799_v57 = vpop.eup %2798  ;;  %2075 = vst [vmem:[%s3295_s30 + $0xd0] sm:$0xff] %v2797_v24  ;;  %2816 = vrcp.f32 %v1888_v13  ;;  %v3362_v16 = vpop.f32.mrf.mxu1  ;;  %v1801_v36 = vmul.f32 1.442695, %v1701_v53  ;;  %v1558_v25 = vadd.f32 %v1557_v59, %v1269_v28 }
 0x1a8   : > { %v2801_v32 = vpop.eup %2800  ;;  %2818 = vrcp.f32 %v1886_v27  ;;  %v1889_v33 = vadd.f32 1.0, %v2799_v57  ;;  %v1273_v39 = vpop.f32.mrf.mxu0 }
 0x1a9   : > { %2073 = vst [vmem:[%s3295_s30 + $0xc0] sm:$0xff] %v2801_v32  ;;  %v3365_v45 = vpop.f32.mrf.mxu1  ;;  %v1702_v43 = vsub.f32 0.0, %v1558_v25  ;;  %v1274_v44 = vadd.f32 %v3237_v55, %v1273_v39  ;;  %v1317_v32 = vadd.f32 %v3237_v55, %v3176_v62  ;;  %v1333_v62 = vadd.f32 %v3237_v55, %v3188_v14 }
 0x1aa   : > { %v2803_v61 = vpop.eup %2802  ;;  %2820 = vrcp.f32 %v1889_v33  ;;  %v1275_v48 = vpop.f32.mrf.mxu0  ;;  %v1325_v33 = vadd.f32 %v3237_v55, %v3180_v6 }
 0x1ab   : > { %v2805_v47 = vpop.eup %2804  ;;  %2076 = vst [vmem:[%s3295_s30 + $0xd8] sm:$0xff] %v2803_v61  ;;  %2822 = vpow2.f32 %v1801_v36  ;;  %v3369_v9 = vpop.f32.mrf.mxu1  ;;  %v1803_v40 = vmul.f32 1.442695, %v1702_v43  ;;  %v1563_v35 = vadd.f32 %v3340_v31, %v1274_v44 }
 0x1ac   : > { %v2807_v52 = vpop.eup %2806  ;;  %v1890_v15 = vadd.f32 1.0, %v2805_v47  ;;  %v1276_v59 = vpop.f32.mrf.mxu0 }
 0x1ad   : > { %2074 = vst [vmem:[%s3295_s30 + $0xc8] sm:$0xff] %v2807_v52  ;;  %v3373_v56 = vpop.f32.mrf.mxu1  ;;  %v1703_v37 = vsub.f32 0.0, %v1563_v35  ;;  %v1277_v60 = vadd.f32 %v3237_v55, %v1276_v59  ;;  %v1338_v59 = vadd.f32 %v3237_v55, %v3192_v18 }
 0x1ae   : > { %2824 = vrcp.f32 %v1890_v15  ;;  %v2809_v29 = vpop.eup %2808  ;;  %v1278_v63 = vpop.f32.mrf.mxu0 }
 0x1af   : > { %2826 = vpow2.f32 %v1803_v40  ;;  %v3376_v8 = vpop.f32.mrf.mxu1  ;;  %v1891_v31 = vadd.f32 1.0, %v2809_v29  ;;  %v1805_v4 = vmul.f32 1.442695, %v1703_v37  ;;  %v1566_v7 = vadd.f32 %v3345_v51, %v1277_v60 }
 0x1b0   : > { %v2811_v3 = vpop.eup %2810  ;;  %v1281_v11 = vpop.f32.mrf.mxu0 }
 0x1b1   : > { %2079 = vst [vmem:[%s3295_s30 + $0xf0] sm:$0xff] %v2811_v3  ;;  %v2459_v17 = vpop.f32.mrf.mxu1  ;;  %2828 = vrcp.f32 %v1891_v31  ;;  %v1704_v49 = vsub.f32 0.0, %v1566_v7  ;;  %v1282_v19 = vadd.f32 %v3237_v55, %v1281_v11  ;;  %v3403_v31 = vld [vmem:[%s3230_s26] ss:$0 sm:$0xff] }
 0x1b2   : > { %v2813_v12 = vpop.eup %2812  ;;  %v1611_v5 = vadd.f32 %v2459_v17, %v1322_v41  ;;  %2830 = vpow2.f32 %v1805_v4  ;;  %v1283_v2 = vpop.f32.mrf.mxu0 }
 0x1b3   : > { %v2815_v13 = vpop.eup %2814  ;;  %2077 = vst [vmem:[%s3295_s30 + $0xe0] sm:$0xff] %v2813_v12  ;;  %v1602_v24 = vpop.f32.mrf.mxu1  ;;  %v1807_v53 = vmul.f32 1.442695, %v1704_v49  ;;  %v1571_v28 = vadd.f32 %v3355_v21, %v1282_v19 }
 0x1b4   : > { %v2817_v51 = vpop.eup %2816  ;;  %v1892_v27 = vadd.f32 1.0, %v2815_v13  ;;  %v1715_v57 = vsub.f32 0.0, %v1611_v5  ;;  %v1603_v36 = vadd.f32 %v1602_v24, %v1314_v1  ;;  %v1284_v25 = vpop.f32.mrf.mxu0 }
 0x1b5   : > { %v2819_v20 = vpop.eup %2818  ;;  %2080 = vst [vmem:[%s3295_s30 + $0xf8] sm:$0xff] %v2817_v51  ;;  %v2460_v39 = vpop.f32.mrf.mxu1  ;;  %v1705_v61 = vsub.f32 0.0, %v1571_v28  ;;  %v1285_v43 = vadd.f32 %v3237_v55, %v1284_v25 }
 0x1b6   : > { %2078 = vst [vmem:[%s3295_s30 + $0xe8] sm:$0xff] %v2819_v20  ;;  %2832 = vrcp.f32 %v1892_v27  ;;  %v1829_v21 = vmul.f32 1.442695, %v1715_v57  ;;  %v1713_v6 = vsub.f32 0.0, %v1603_v36  ;;  %v1614_v47 = vadd.f32 %v2460_v39, %v1325_v33  ;;  %v1286_v48 = vpop.f32.mrf.mxu0 }
 0x1b7   : > { %v2821_v44 = vpop.eup %2820  ;;  %2834 = vpow2.f32 %v1807_v53  ;;  %v1605_v10 = vpop.f32.mrf.mxu1  ;;  %v1809_v15 = vmul.f32 1.442695, %v1705_v61  ;;  %v1574_v40 = vadd.f32 %v3362_v16, %v1285_v43  ;;  %v1341_v16 = vadd.f32 %v3403_v31, %v3196_v22 }
 0x1b8   : > { %v2823_v52 = vpop.eup %2822  ;;  %2081 = vst [vmem:[%s3295_s30 + $0x100] sm:$0xff] %v2821_v44  ;;  %2836 = vpow2.f32 %v1829_v21  ;;  %v1606_v35 = vadd.f32 %v1605_v10, %v1317_v32  ;;  %v1825_v60 = vmul.f32 1.442695, %v1713_v6  ;;  %v1716_v29 = vsub.f32 0.0, %v1614_v47  ;;  %v1289_v14 = vpop.f32.mrf.mxu0 }
 0x1b9   : > { %v1893_v37 = vadd.f32 1.0, %v2823_v52  ;;  %v2463_v63 = vpop.f32.mrf.mxu1  ;;  %2838 = vpow2.f32 %v1809_v15  ;;  %v1706_v3 = vsub.f32 0.0, %v1574_v40  ;;  %v1290_v4 = vadd.f32 %v3403_v31, %v1289_v14 }
 0x1ba   : > { %v1714_v41 = vsub.f32 0.0, %v1606_v35  ;;  %v1831_v11 = vmul.f32 1.442695, %v1716_v29  ;;  %v1627_v18 = vadd.f32 %v2463_v63, %v1338_v59  ;;  %v1291_v55 = vpop.f32.mrf.mxu0  ;;  %v1354_v57 = vadd.f32 %v3403_v31, %v3208_v34 }
 0x1bb   : > { %v2825_v7 = vpop.eup %2824  ;;  %2840 = vrcp.f32 %v1893_v37  ;;  %v1618_v17 = vpop.f32.mrf.mxu1  ;;  %v1811_v49 = vmul.f32 1.442695, %v1706_v3  ;;  %v1579_v5 = vadd.f32 %v3351_v0, %v1290_v4  ;;  %v1346_v52 = vadd.f32 %v3403_v31, %v3200_v26 }
 0x1bc   : > { %v2827_v12 = vpop.eup %2826  ;;  %2082 = vst [vmem:[%s3295_s30 + $0x108] sm:$0xff] %v2825_v7  ;;  %2842 = vpow2.f32 %v1825_v60  ;;  %v1827_v19 = vmul.f32 1.442695, %v1714_v41  ;;  %v1719_v1 = vsub.f32 0.0, %v1627_v18  ;;  %v1619_v2 = vadd.f32 %v1618_v17, %v1330_v58  ;;  %v1292_v24 = vpop.f32.mrf.mxu0 }
 0x1bd   : > { %v1894_v13 = vadd.f32 1.0, %v2827_v12  ;;  %2844 = vpow2.f32 %v1831_v11  ;;  %v2464_v51 = vpop.f32.mrf.mxu1  ;;  %v1707_v22 = vsub.f32 0.0, %v1579_v5  ;;  %v1293_v27 = vadd.f32 %v3403_v31, %v1292_v24 }
 0x1be   : > { %2846 = vpow2.f32 %v1811_v49  ;;  %v1630_v53 = vadd.f32 %v2464_v51, %v1341_v16  ;;  %v2829_v28 = vpop.eup %2828  ;;  %v1837_v20 = vmul.f32 1.442695, %v1719_v1  ;;  %v1717_v32 = vsub.f32 0.0, %v1619_v2  ;;  %v1294_v0 = vpop.f32.mrf.mxu0 }
 0x1bf   : > { %2848 = vrcp.f32 %v1894_v13  ;;  %v1621_v33 = vpop.f32.mrf.mxu1  ;;  %v2831_v36 = vpop.eup %2830  ;;  %2083 = vst [vmem:[%s3295_s30 + $0x110] sm:$0xff] %v2829_v28  ;;  %v1813_v58 = vmul.f32 1.442695, %v1707_v22  ;;  %v1582_v25 = vadd.f32 %v3358_v23, %v1293_v27 }
 0x1c0   : > { %2850 = vpow2.f32 %v1827_v19  ;;  %v1720_v39 = vsub.f32 0.0, %v1630_v53  ;;  %v1895_v61 = vadd.f32 1.0, %v2831_v36  ;;  %v1833_v21 = vmul.f32 1.442695, %v1717_v32  ;;  %v1297_v44 = vpop.f32.mrf.mxu0 }
 0x1c1   : > { %2852 = vpow2.f32 %v1837_v20  ;;  %v1622_v43 = vadd.f32 %v1621_v33, %v1333_v62  ;;  %v2467_v6 = vpop.f32.mrf.mxu1  ;;  %v1708_v34 = vsub.f32 0.0, %v1582_v25  ;;  %v1298_v48 = vadd.f32 %v3403_v31, %v1297_v44 }
 0x1c2   : > { %2854 = vpow2.f32 %v1813_v58  ;;  %v1839_v47 = vmul.f32 1.442695, %v1720_v39  ;;  %v1643_v23 = vadd.f32 %v2467_v6, %v1354_v57  ;;  %v1299_v40 = vpop.f32.mrf.mxu0  ;;  %v1357_v19 = vadd.f32 %v3403_v31, %v3212_v38 }
 0x1c3   : > { %v2833_v10 = vpop.eup %2832  ;;  %2856 = vrcp.f32 %v1895_v61  ;;  %v1718_v15 = vsub.f32 0.0, %v1622_v43  ;;  %v1634_v35 = vpop.f32.mrf.mxu1  ;;  %v1815_v62 = vmul.f32 1.442695, %v1708_v34  ;;  %v1587_v37 = vadd.f32 %v3369_v9, %v1298_v48 }
 0x1c4   : > { %v2835_v59 = vpop.eup %2834  ;;  %2084 = vst [vmem:[%s3295_s30 + $0x118] sm:$0xff] %v2833_v10  ;;  %2858 = vpow2.f32 %v1833_v21  ;;  %v1635_v63 = vadd.f32 %v1634_v35, %v1346_v52  ;;  %v1300_v3 = vpop.f32.mrf.mxu0  ;;  %v1723_v7 = vsub.f32 0.0, %v1643_v23  ;;  %v1349_v38 = vadd.f32 %v3403_v31, %v3204_v30 }
 0x1c5   : > { %v2837_v60 = vpop.eup %2836  ;;  %v1896_v29 = vadd.f32 1.0, %v2835_v59  ;;  %2860 = vpow2.f32 %v1839_v47  ;;  %v1835_v14 = vmul.f32 1.442695, %v1718_v15  ;;  %v2468_v41 = vpop.f32.mrf.mxu1  ;;  %v1709_v4 = vsub.f32 0.0, %v1587_v37 }
 0x1c6   : > { %v1907_v26 = vadd.f32 1.0, %v2837_v60  ;;  %2862 = vpow2.f32 %v1815_v62  ;;  %v2839_v16 = vpop.eup %2838  ;;  %v1301_v11 = vadd.f32 %v3403_v31, %v1300_v3  ;;  %v1302_v18 = vpop.f32.mrf.mxu0  ;;  %v1845_v24 = vmul.f32 1.442695, %v1723_v7 }
 0x1c7   : > { %2864 = vrcp.f32 %v1896_v29  ;;  %v1637_v55 = vpop.f32.mrf.mxu1  ;;  %v1897_v9 = vadd.f32 1.0, %v2839_v16  ;;  %v1817_v12 = vmul.f32 1.442695, %v1709_v4  ;;  %v1721_v51 = vsub.f32 0.0, %v1635_v63 }
 0x1c8   : > { %v2841_v17 = vpop.eup %2840  ;;  %2866 = vrcp.f32 %v1907_v26  ;;  %v1305_v5 = vpop.f32.mrf.mxu0  ;;  %v1590_v53 = vadd.f32 %v3376_v8, %v1301_v11  ;;  %v1646_v28 = vadd.f32 %v2468_v41, %v1357_v19  ;;  %v1362_v58 = vadd.f32 %v3403_v31, %v3216_v42 }
 0x1c9   : > { %v2843_v49 = vpop.eup %2842  ;;  %2085 = vst [vmem:[%s3295_s30 + $0x120] sm:$0xff] %v2841_v17  ;;  %2868 = vpow2.f32 %v1835_v14  ;;  %v2471_v13 = vpop.f32.mrf.mxu1  ;;  %v1306_v33 = vadd.f32 %v3403_v31, %v1305_v5  ;;  %v1370_v25 = vadd.f32 %v3403_v31, %v3224_v50  ;;  %v1841_v21 = vmul.f32 1.442695, %v1721_v51 }
 0x1ca   : > { %v2845_v1 = vpop.eup %2844  ;;  %2870 = vrcp.f32 %v1897_v9  ;;  %v1905_v2 = vadd.f32 1.0, %v2843_v49  ;;  %v1307_v57 = vpop.f32.mrf.mxu0  ;;  %v1638_v43 = vadd.f32 %v1637_v55, %v1349_v38  ;;  %v1710_v6 = vsub.f32 0.0, %v1590_v53 }
 0x1cb   : > { %v2847_v22 = vpop.eup %2846  ;;  %v1908_v27 = vadd.f32 1.0, %v2845_v1  ;;  %2872 = vpow2.f32 %v1817_v12  ;;  %v1650_v20 = vpop.f32.mrf.mxu1  ;;  %v1724_v34 = vsub.f32 0.0, %v1646_v28  ;;  %v1595_v50 = vadd.f32 %v3365_v45, %v1306_v33 }
 0x1cc   : > { %v2849_v32 = vpop.eup %2848  ;;  %2874 = vrcp.f32 %v1905_v2  ;;  %v1898_v0 = vadd.f32 1.0, %v2847_v22  ;;  %v1308_v8 = vpop.f32.mrf.mxu0  ;;  %v1365_v23 = vadd.f32 %v3403_v31, %v3220_v46  ;;  %v1373_v40 = vadd.f32 %v3403_v31, %v3234_v54 }
 0x1cd   : > { %v2851_v36 = vpop.eup %2850  ;;  %2086 = vst [vmem:[%s3295_s30 + $0x128] sm:$0xff] %v2849_v32  ;;  %2876 = vrcp.f32 %v1908_v27  ;;  %v2472_v47 = vpop.f32.mrf.mxu1  ;;  %v1309_v52 = vadd.f32 %v3403_v31, %v1308_v8  ;;  %v1659_v35 = vadd.f32 %v2471_v13, %v1370_v25  ;;  %v1722_v37 = vsub.f32 0.0, %v1638_v43 }
 0x1ce   : > { %v2853_v39 = vpop.eup %2852  ;;  %2878 = vrcp.f32 %v1898_v0  ;;  %v1906_v61 = vadd.f32 1.0, %v2851_v36  ;;  %v1310_v48 = vpop.f32.mrf.mxu0  ;;  %v1651_v60 = vadd.f32 %v1650_v20, %v1362_v58  ;;  %v1819_v14 = vmul.f32 1.442695, %v1710_v6 }
 0x1cf   : > { %v2855_v30 = vpop.eup %2854  ;;  %v1911_v44 = vadd.f32 1.0, %v2853_v39  ;;  %2880 = vpow2.f32 %v1845_v24  ;;  %v1847_v63 = vmul.f32 1.442695, %v1724_v34  ;;  %v1653_v3 = vpop.f32.mrf.mxu1  ;;  %v1711_v54 = vsub.f32 0.0, %v1595_v50 }
 0x1d0   : > { %v2857_v42 = vpop.eup %2856  ;;  %2882 = vrcp.f32 %v1906_v61  ;;  %v1899_v10 = vadd.f32 1.0, %v2855_v30  ;;  %v1598_v31 = vadd.f32 %v3373_v56, %v1309_v52  ;;  %v1727_v4 = vsub.f32 0.0, %v1659_v35 }
 0x1d1   : > { %v2859_v15 = vpop.eup %2858  ;;  %2087 = vst [vmem:[%s3295_s30 + $0x130] sm:$0xff] %v2857_v42  ;;  %2884 = vrcp.f32 %v1911_v44  ;;  %v1662_v7 = vadd.f32 %v2472_v47, %v1373_v40  ;;  %v1843_v11 = vmul.f32 1.442695, %v1722_v37  ;;  %v1725_v18 = vsub.f32 0.0, %v1651_v60 }
 0x1d2   : > { %v2861_v59 = vpop.eup %2860  ;;  %2886 = vrcp.f32 %v1899_v10  ;;  %v1909_v62 = vadd.f32 1.0, %v2859_v15  ;;  %v1654_v55 = vadd.f32 %v1653_v3, %v1365_v23  ;;  %v1821_v56 = vmul.f32 1.442695, %v1711_v54 }
 0x1d3   : > { %v2863_v29 = vpop.eup %2862  ;;  %v1912_v45 = vadd.f32 1.0, %v2861_v59  ;;  %2888 = vpow2.f32 %v1841_v21  ;;  %v1712_v49 = vsub.f32 0.0, %v1598_v31  ;;  %v1853_v13 = vmul.f32 1.442695, %v1727_v4 }
 0x1d4   : > { %v2865_v46 = vpop.eup %2864  ;;  %2890 = vrcp.f32 %v1909_v62  ;;  %v1900_v41 = vadd.f32 1.0, %v2863_v29  ;;  %v1728_v1 = vsub.f32 0.0, %v1662_v7  ;;  %v1849_v24 = vmul.f32 1.442695, %v1725_v18 }
 0x1d5   : > { %v2867_v26 = vpop.eup %2866  ;;  %2088 = vst [vmem:[%s3295_s30 + $0x138] sm:$0xff] %v2865_v46  ;;  %2892 = vrcp.f32 %v1912_v45  ;;  %v1726_v51 = vsub.f32 0.0, %v1654_v55  ;;  %v1823_v53 = vmul.f32 1.442695, %v1712_v49 }
 0x1d6   : > { %v2869_v16 = vpop.eup %2868  ;;  %2099 = vst [vmem:[%s3295_s30 + $0x190] sm:$0xff] %v2867_v26  ;;  %2894 = vrcp.f32 %v1900_v41  ;;  %v1855_v20 = vmul.f32 1.442695, %v1728_v1 }
 0x1d7   : > { %v2871_v17 = vpop.eup %2870  ;;  %v1910_v9 = vadd.f32 1.0, %v2869_v16  ;;  %2896 = vpow2.f32 %v1819_v14  ;;  %v1851_v38 = vmul.f32 1.442695, %v1726_v51 }
 0x1d8   : > { %v2873_v12 = vpop.eup %2872  ;;  %2089 = vst [vmem:[%s3295_s30 + $0x140] sm:$0xff] %v2871_v17  ;;  %2898 = vpow2.f32 %v1847_v63 }
 0x1d9   : > { %v2875_v19 = vpop.eup %2874  ;;  %2900 = vrcp.f32 %v1910_v9  ;;  %v1901_v5 = vadd.f32 1.0, %v2873_v12 }
 0x1da   : > { %v2877_v2 = vpop.eup %2876  ;;  %2097 = vst [vmem:[%s3295_s30 + $0x180] sm:$0xff] %v2875_v19  ;;  %2902 = vpow2.f32 %v1843_v11 }
 0x1db   : > { %v2879_v22 = vpop.eup %2878  ;;  %2100 = vst [vmem:[%s3295_s30 + $0x198] sm:$0xff] %v2877_v2  ;;  %2904 = vrcp.f32 %v1901_v5 }
 0x1dc   : > { %v2881_v27 = vpop.eup %2880  ;;  %2090 = vst [vmem:[%s3295_s30 + $0x148] sm:$0xff] %v2879_v22  ;;  %2906 = vpow2.f32 %v1821_v56 }
 0x1dd   : > { %v2883_v28 = vpop.eup %2882  ;;  %v1915_v57 = vadd.f32 1.0, %v2881_v27  ;;  %2908 = vpow2.f32 %v1853_v13 }
 0x1de   : > { %v2885_v32 = vpop.eup %2884  ;;  %2098 = vst [vmem:[%s3295_s30 + $0x188] sm:$0xff] %v2883_v28  ;;  %2910 = vpow2.f32 %v1849_v24 }
 0x1df   : > { %v2887_v0 = vpop.eup %2886  ;;  %2103 = vst [vmem:[%s3295_s30 + $0x1b0] sm:$0xff] %v2885_v32  ;;  %2912 = vrcp.f32 %v1915_v57 }
 0x1e0   : > { %v2889_v33 = vpop.eup %2888  ;;  %2091 = vst [vmem:[%s3295_s30 + $0x150] sm:$0xff] %v2887_v0  ;;  %2914 = vpow2.f32 %v1823_v53 }
 0x1e1   : > { %v2891_v36 = vpop.eup %2890  ;;  %v1913_v58 = vadd.f32 1.0, %v2889_v33  ;;  %2916 = vpow2.f32 %v1855_v20 }
 0x1e2   : > { %v2893_v25 = vpop.eup %2892  ;;  %2101 = vst [vmem:[%s3295_s30 + $0x1a0] sm:$0xff] %v2891_v36  ;;  %2918 = vpow2.f32 %v1851_v38 }
 0x1e3   : > { %v2895_v8 = vpop.eup %2894  ;;  %2104 = vst [vmem:[%s3295_s30 + $0x1b8] sm:$0xff] %v2893_v25  ;;  %2920 = vrcp.f32 %v1913_v58 }
 0x1e4   : > { %v2897_v39 = vpop.eup %2896  ;;  %2092 = vst [vmem:[%s3295_s30 + $0x158] sm:$0xff] %v2895_v8 }
 0x1e5   : > { %v2899_v61 = vpop.eup %2898  ;;  %v1902_v21 = vadd.f32 1.0, %v2897_v39 }
 0x1e6   : > { %v2901_v43 = vpop.eup %2900  ;;  %v1916_v30 = vadd.f32 1.0, %v2899_v61 }
 0x1e7   : > { %v2903_v44 = vpop.eup %2902  ;;  %2102 = vst [vmem:[%s3295_s30 + $0x1a8] sm:$0xff] %v2901_v43  ;;  %2922 = vrcp.f32 %v1902_v21 }
 0x1e8   : > { %v2905_v6 = vpop.eup %2904  ;;  %2924 = vrcp.f32 %v1916_v30  ;;  %v1914_v34 = vadd.f32 1.0, %v2903_v44 }
 0x1e9   : > { %v2907_v47 = vpop.eup %2906  ;;  %2093 = vst [vmem:[%s3295_s30 + $0x160] sm:$0xff] %v2905_v6 }
 0x1ea   : > { %v2909_v48 = vpop.eup %2908  ;;  %2926 = vrcp.f32 %v1914_v34  ;;  %v1903_v42 = vadd.f32 1.0, %v2907_v47 }
 0x1eb   : > { %v2911_v10 = vpop.eup %2910  ;;  %v1919_v50 = vadd.f32 1.0, %v2909_v48 }
 0x1ec   : > { %v2913_v52 = vpop.eup %2912  ;;  %2928 = vrcp.f32 %v1903_v42  ;;  %v1917_v15 = vadd.f32 1.0, %v2911_v10 }
 0x1ed   : > { %v2915_v23 = vpop.eup %2914  ;;  %2107 = vst [vmem:[%s3295_s30 + $0x1d0] sm:$0xff] %v2913_v52  ;;  %2930 = vrcp.f32 %v1919_v50 }
 0x1ee   : > { %v2917_v40 = vpop.eup %2916  ;;  %2932 = vrcp.f32 %v1917_v15  ;;  %v1904_v35 = vadd.f32 1.0, %v2915_v23 }
 0x1ef   : > { %v2919_v59 = vpop.eup %2918  ;;  %v1920_v62 = vadd.f32 1.0, %v2917_v40 }
 0x1f0   : > { %v2921_v37 = vpop.eup %2920  ;;  %2934 = vrcp.f32 %v1904_v35  ;;  %v1918_v60 = vadd.f32 1.0, %v2919_v59 }
 0x1f1   : > { %2105 = vst [vmem:[%s3295_s30 + $0x1c0] sm:$0xff] %v2921_v37  ;;  %2936 = vrcp.f32 %v1920_v62 }
 0x1f2   : > { %2938 = vrcp.f32 %v1918_v60 }
 0x1f4   : > { %v2923_v29 = vpop.eup %2922 }
 0x1f5   : > { %v2925_v45 = vpop.eup %2924  ;;  %2094 = vst [vmem:[%s3295_s30 + $0x168] sm:$0xff] %v2923_v29 }
 0x1f6   : > { %2108 = vst [vmem:[%s3295_s30 + $0x1d8] sm:$0xff] %v2925_v45 }
 0x1f7   : > { %v2927_v14 = vpop.eup %2926 }
 0x1f8   : > { %2106 = vst [vmem:[%s3295_s30 + $0x1c8] sm:$0xff] %v2927_v14 }
 0x1f9   : > { %v2929_v63 = vpop.eup %2928 }
 0x1fa   : > { %v2931_v3 = vpop.eup %2930  ;;  %2095 = vst [vmem:[%s3295_s30 + $0x170] sm:$0xff] %v2929_v63 }
 0x1fb   : > { %v2933_v46 = vpop.eup %2932  ;;  %2111 = vst [vmem:[%s3295_s30 + $0x1f0] sm:$0xff] %v2931_v3 }
 0x1fc   : > { %2109 = vst [vmem:[%s3295_s30 + $0x1e0] sm:$0xff] %v2933_v46 }
 0x1fd   : > { %v2935_v41 = vpop.eup %2934 }
 0x1fe   : > { %v2937_v54 = vpop.eup %2936  ;;  %2096 = vst [vmem:[%s3295_s30 + $0x178] sm:$0xff] %v2935_v41 }
 0x1ff   : > { %v2939_v31 = vpop.eup %2938  ;;  %2112 = vst [vmem:[%s3295_s30 + $0x1f8] sm:$0xff] %v2937_v54 }
 0x200   : > { %2110 = vst [vmem:[%s3295_s30 + $0x1e8] sm:$0xff] %v2939_v31 }
 0x201 PF: > { %s13_s14 = sadd.s32 1, %s2963_s14   ;;  %s3479_s12 = smov %s2959_s13 }
 0x202   : > { %p10_p5 = scmp.ge.s32.totalorder %s13_s14, 6   ;;  %s3480_s13 = smov %s3482_s15 }
 0x204   :  { %12 = sbr.rel (!%p10_p5) target bundleno = 2 (0x2), region = 68 }

</bundles_post_ra>
